<compile_context>
chip_gen: v6e
topology: v6e:2x2x1
jax: 0.10.0
libtpu: 0.0.40
codegen_flags: <defaults>
</compile_context>

<pallas_src>
import jax
import jax.numpy as jnp
import numpy as np
from jax.experimental import pallas as pl
from jax.experimental.pallas import tpu as pltpu

# ---------------------------------------------------------------------------
# Configuration (small shapes consistent with the module defaults).
# ---------------------------------------------------------------------------
B = 2
DIM = 32                 # channels C
NUM_HEADS = 4
HEAD_DIM = DIM // NUM_HEADS
WINDOW = 16
N = WINDOW * WINDOW      # 256 tokens (window_size**2)
SCALE = HEAD_DIM ** (-0.5)


# ---------------------------------------------------------------------------
# Pallas kernel: fused multi-head attention for one batch element.
# ---------------------------------------------------------------------------
def attention_kernel(x_ref, a_ref, m_ref, bproj_ref, bias_ref, o_ref):
    x = x_ref[0]                                   # (N, C) f32
    xb = x.astype(jnp.bfloat16)                    # bf16 MXU operand
    xt = x.T.astype(jnp.bfloat16)                  # (C, N): hoisted transpose

    # Batched lane-dense head projections: 2 MXU calls with 128-wide outputs
    # instead of 8 calls with 32-wide outputs.
    xa_all = jnp.dot(xb, a_ref[...],
                     preferred_element_type=jnp.float32).astype(jnp.bfloat16)   # (N, H*C)
    xm_all = jnp.dot(xb, m_ref[...],
                     preferred_element_type=jnp.float32).astype(jnp.bfloat16)   # (N, H*C)

    acc = jnp.zeros((N, DIM), jnp.float32)
    for h in range(NUM_HEADS):                     # static, unrolled
        lo = h * DIM
        # Scores: (x @ A_h) @ x^T ; softmax scale already folded into A_h.
        s = jnp.dot(xa_all[:, lo:lo + DIM], xt,
                    preferred_element_type=jnp.float32)               # (N, N) f32
        s = s + bias_ref[h].astype(jnp.float32)    # bf16 bias upcast, f32 add

        # Numerically stable softmax; elementwise math stays f32 (v5e has no
        # bf16 VPU/EUP).  Normalization is deferred past the PV matmul.
        s = s - jnp.max(s, axis=-1, keepdims=True)
        p = jnp.exp(s)                                                # (N, N)
        denom = jnp.sum(p, axis=-1, keepdims=True)                    # (N, 1)

        # Value path on the unnormalized probabilities (bf16 MXU operands).
        out_h = jnp.dot(p.astype(jnp.bfloat16), xm_all[:, lo:lo + DIM],
                        preferred_element_type=jnp.float32)           # (N, C)

        # Deferred normalization on the narrow (N, C) result, exact reciprocal
        # of an (N, 1) vector (negligible cost, no approx-rcp accuracy risk).
        acc = acc + out_h * pl.reciprocal(denom, approx=False)

    o_ref[0] = acc + bproj_ref[...]                # proj bias added once


# ---------------------------------------------------------------------------
# Wrapper: weight folding + pallas_call.
# ---------------------------------------------------------------------------
def fold_weights(wqkv, wproj):
    """Fold Q/K into A_h = scale*Wq_h@Wk_h^T and V/proj into M_h, then
    concatenate heads along the output dim into lane-dense (C, H*C) blocks."""
    wq = wqkv[:, 0 * DIM:1 * DIM]
    wk = wqkv[:, 1 * DIM:2 * DIM]
    wv = wqkv[:, 2 * DIM:3 * DIM]
    a_cols, m_cols = [], []
    for h in range(NUM_HEADS):
        sl = slice(h * HEAD_DIM, (h + 1) * HEAD_DIM)
        a_cols.append(SCALE * (wq[:, sl] @ wk[:, sl].T))           # (C, C)
        m_cols.append(wv[:, sl] @ wproj[sl, :])                    # (C, C)
    a_cat = jnp.concatenate(a_cols, axis=1).astype(jnp.bfloat16)   # (C, H*C)
    m_cat = jnp.concatenate(m_cols, axis=1).astype(jnp.bfloat16)   # (C, H*C)
    return a_cat, m_cat


def attention_forward(x, wqkv, wproj, bproj, bias_f32):
    a_cat, m_cat = fold_weights(wqkv, wproj)
    bias = bias_f32.astype(jnp.bfloat16)        # halve the dominant HBM transfer

    # Full-array blocks with constant index maps: weights/bias fetched once,
    # VMEM resident across the batch grid.
    const = lambda arr: pl.BlockSpec(arr.shape, lambda i: (0,) * arr.ndim)

    return pl.pallas_call(
        attention_kernel,
        out_shape=jax.ShapeDtypeStruct(x.shape, x.dtype),
        grid_spec=pltpu.PrefetchScalarGridSpec(
            num_scalar_prefetch=0,
            grid=(B,),
            in_specs=[
                pl.BlockSpec((1, N, DIM), lambda i: (i, 0, 0)),    # x
                const(a_cat),                                      # (C, H*C) bf16
                const(m_cat),                                      # (C, H*C) bf16
                const(bproj),                                      # (1, C)   f32
                const(bias),                                       # (H, N, N) bf16
            ],
            out_specs=pl.BlockSpec((1, N, DIM), lambda i: (i, 0, 0)),
        ),
        compiler_params=pltpu.CompilerParams(
            dimension_semantics=("parallel",)),                    # v7x: 2 TCs
    )(x, a_cat, m_cat, bproj, bias)


# ---------------------------------------------------------------------------
# Relative-position index (identical construction to the PyTorch module).
# ---------------------------------------------------------------------------
def make_relative_position_index(window_size):
    coords_h = np.arange(window_size)
    coords_w = np.arange(window_size)
    coords = np.stack(np.meshgrid(coords_h, coords_w, indexing="ij"))  # (2, ws, ws)
    coords_flatten = coords.reshape(2, -1)                             # (2, ws*ws)
    rel = coords_flatten[:, :, None] - coords_flatten[:, None, :]      # (2, N, N)
    rel = rel.transpose(1, 2, 0).copy()
    rel[:, :, 0] += window_size - 1
    rel[:, :, 1] += window_size - 1
    rel[:, :, 0] *= 2 * window_size - 1
    return rel.sum(-1)                                                 # (N, N)


# ---------------------------------------------------------------------------
# Pure-JAX reference (mirrors the PyTorch forward exactly) for validation.
# ---------------------------------------------------------------------------
def reference(x, wqkv, wproj, bproj, bias):
    qkv = x @ wqkv                                                 # (B, N, 3C)
    qkv = qkv.reshape(B, N, 3, NUM_HEADS, HEAD_DIM).transpose(2, 0, 3, 1, 4)
    q, k, v = qkv[0], qkv[1], qkv[2]                               # (B, H, N, hd)
    attn = jnp.einsum("bhnd,bhmd->bhnm", q, k) * SCALE + bias[None]
    attn = jax.nn.softmax(attn, axis=-1)
    out = jnp.einsum("bhnm,bhmd->bhnd", attn, v)
    out = out.transpose(0, 2, 1, 3).reshape(B, N, DIM)
    return out @ wproj + bproj[0]


# ---------------------------------------------------------------------------
# Main: deterministic synthetic params, run kernel, validate, report.
# ---------------------------------------------------------------------------
if __name__ == "__main__":
    key = jax.random.PRNGKey(0)
    kx, kq, kp, kb, kt = jax.random.split(key, 5)

    x = jax.random.normal(kx, (B, N, DIM), jnp.float32)
    wqkv = jax.random.normal(kq, (DIM, 3 * DIM), jnp.float32) * 0.05   # no qkv bias
    wproj = jax.random.normal(kp, (DIM, DIM), jnp.float32) * 0.05
    bproj = jax.random.normal(kb, (1, DIM), jnp.float32) * 0.02

    # relative_position_bias_table ~ trunc_normal(std=0.02) (synthetic init).
    # TODO(synk): exact erfinv-based trunc_normal_ init is host-side only; a
    # clipped normal stand-in is used (forward semantics are unaffected).
    table = jnp.clip(
        jax.random.normal(kt, ((2 * WINDOW - 1) ** 2, NUM_HEADS),
                          jnp.float32) * 0.02, -0.04, 0.04)
    rel_index = jnp.asarray(make_relative_position_index(WINDOW))       # (N, N)
    bias = table[rel_index.reshape(-1)].reshape(N, N, NUM_HEADS)
    bias = jnp.transpose(bias, (2, 0, 1)).astype(jnp.float32)           # (H, N, N)

    out = attention_forward(x, wqkv, wproj, bproj, bias)
    jax.block_until_ready(out)

    ref = reference(x, wqkv, wproj, bproj, bias)
    # Tolerance loosened vs the all-f32 version: bf16 MXU operands and the
    # bf16-shipped bias introduce ~1e-3-class relative differences (per review).
    np.testing.assert_allclose(np.asarray(out), np.asarray(ref),
                               rtol=2e-3, atol=2e-3)
    print("KERNEL_OK")
</pallas_src>

<mosaic_0001>
module attributes {stable_mosaic.version = 11 : i64} {
  func.func @attention_kernel(%arg0: i32, %arg1: memref<1x256x32xf32, #tpu.memory_space<vmem>>, %arg2: memref<32x128xbf16, #tpu.memory_space<vmem>>, %arg3: memref<32x128xbf16, #tpu.memory_space<vmem>>, %arg4: memref<1x32xf32, #tpu.memory_space<vmem>>, %arg5: memref<4x256x256xbf16, #tpu.memory_space<vmem>>, %arg6: memref<1x256x32xf32, #tpu.memory_space<vmem>>) attributes {dimension_semantics = [#tpu.dimension_semantics<parallel>], iteration_bounds = array<i64: 2>, scalar_prefetch = 0 : i64, scratch_operands = 0 : i64, tpu.core_type = #tpu.core_type<tc>, window_params = [{transform_indices = @transform_0, window_bounds = array<i64: 1, 256, 32>}, {pipeline_mode = #tpu.pipeline_mode<synchronous>, transform_indices = @transform_1, window_bounds = array<i64: 32, 128>}, {pipeline_mode = #tpu.pipeline_mode<synchronous>, transform_indices = @transform_2, window_bounds = array<i64: 32, 128>}, {pipeline_mode = #tpu.pipeline_mode<synchronous>, transform_indices = @transform_3, window_bounds = array<i64: 1, 32>}, {pipeline_mode = #tpu.pipeline_mode<synchronous>, transform_indices = @transform_4, window_bounds = array<i64: 4, 256, 256>}, {transform_indices = @transform_5, window_bounds = array<i64: 1, 256, 32>}]} {
    %c0 = arith.constant 0 : index
    %c0_0 = arith.constant 0 : index
    %c0_1 = arith.constant 0 : index
    %0 = vector.load %arg1[%c0, %c0_0, %c0_1] : memref<1x256x32xf32, #tpu.memory_space<vmem>>, vector<1x256x32xf32>
    %1 = vector.shape_cast %0 : vector<1x256x32xf32> to vector<256x32xf32>
    %2 = arith.truncf %1 : vector<256x32xf32> to vector<256x32xbf16>
    %3 = tpu.transpose %1, [1, 0] : vector<256x32xf32> -> vector<32x256xf32>
    %4 = arith.truncf %3 : vector<32x256xf32> to vector<32x256xbf16>
    %c0_2 = arith.constant 0 : index
    %c0_3 = arith.constant 0 : index
    %5 = vector.load %arg2[%c0_2, %c0_3] : memref<32x128xbf16, #tpu.memory_space<vmem>>, vector<32x128xbf16>
    %cst = arith.constant dense<0.000000e+00> : vector<256x128xf32>
    %6 = tpu.matmul %2, %5, %cst {dimension_numbers = #tpu.dot_dimension_numbers<[1], [0], [0], [1], [0, 0, 1, 1], [], []>} : vector<256x32xbf16>, vector<32x128xbf16>, vector<256x128xf32> -> vector<256x128xf32>
    %7 = arith.truncf %6 : vector<256x128xf32> to vector<256x128xbf16>
    %c0_4 = arith.constant 0 : index
    %c0_5 = arith.constant 0 : index
    %8 = vector.load %arg3[%c0_4, %c0_5] : memref<32x128xbf16, #tpu.memory_space<vmem>>, vector<32x128xbf16>
    %cst_6 = arith.constant dense<0.000000e+00> : vector<256x128xf32>
    %9 = tpu.matmul %2, %8, %cst_6 {dimension_numbers = #tpu.dot_dimension_numbers<[1], [0], [0], [1], [0, 0, 1, 1], [], []>} : vector<256x32xbf16>, vector<32x128xbf16>, vector<256x128xf32> -> vector<256x128xf32>
    %10 = arith.truncf %9 : vector<256x128xf32> to vector<256x128xbf16>
    %cst_7 = arith.constant 0.000000e+00 : f32
    %11 = vector.broadcast %cst_7 : f32 to vector<256x32xf32>
    %12 = vector.extract_strided_slice %7 {offsets = [0, 0], sizes = [256, 32], strides = [1, 1]} : vector<256x128xbf16> to vector<256x32xbf16>
    %cst_8 = arith.constant dense<0.000000e+00> : vector<256x256xf32>
    %13 = tpu.matmul %12, %4, %cst_8 {dimension_numbers = #tpu.dot_dimension_numbers<[1], [0], [0], [1], [0, 0, 1, 1], [], []>} : vector<256x32xbf16>, vector<32x256xbf16>, vector<256x256xf32> -> vector<256x256xf32>
    %c0_9 = arith.constant 0 : index
    %c0_10 = arith.constant 0 : index
    %c0_11 = arith.constant 0 : index
    %14 = vector.load %arg5[%c0_9, %c0_10, %c0_11] : memref<4x256x256xbf16, #tpu.memory_space<vmem>>, vector<1x256x256xbf16>
    %15 = vector.shape_cast %14 : vector<1x256x256xbf16> to vector<256x256xbf16>
    %16 = arith.extf %15 : vector<256x256xbf16> to vector<256x256xf32>
    %17 = arith.addf %13, %16 : vector<256x256xf32>
    %cst_12 = arith.constant dense<0xFF800000> : vector<256xf32>
    %18 = vector.multi_reduction <maximumf>, %17, %cst_12 [1] : vector<256x256xf32> to vector<256xf32>
    %19 = vector.shape_cast %18 : vector<256xf32> to vector<256x1xf32>
    %20 = vector.broadcast %19 : vector<256x1xf32> to vector<256x256xf32>
    %21 = arith.subf %17, %20 : vector<256x256xf32>
    %22 = math.exp %21 : vector<256x256xf32>
    %cst_13 = arith.constant dense<0.000000e+00> : vector<256xf32>
    %23 = vector.multi_reduction <add>, %22, %cst_13 [1] : vector<256x256xf32> to vector<256xf32>
    %24 = vector.shape_cast %23 : vector<256xf32> to vector<256x1xf32>
    %25 = arith.truncf %22 : vector<256x256xf32> to vector<256x256xbf16>
    %26 = vector.extract_strided_slice %10 {offsets = [0, 0], sizes = [256, 32], strides = [1, 1]} : vector<256x128xbf16> to vector<256x32xbf16>
    %cst_14 = arith.constant dense<0.000000e+00> : vector<256x32xf32>
    %27 = tpu.matmul %25, %26, %cst_14 {dimension_numbers = #tpu.dot_dimension_numbers<[1], [0], [0], [1], [0, 0, 1, 1], [], []>} : vector<256x256xbf16>, vector<256x32xbf16>, vector<256x32xf32> -> vector<256x32xf32>
    %28 = tpu.reciprocal %24 : vector<256x1xf32> -> vector<256x1xf32>
    %29 = vector.broadcast %28 : vector<256x1xf32> to vector<256x32xf32>
    %30 = arith.mulf %27, %29 : vector<256x32xf32>
    %31 = arith.addf %11, %30 : vector<256x32xf32>
    %32 = vector.extract_strided_slice %7 {offsets = [0, 32], sizes = [256, 32], strides = [1, 1]} : vector<256x128xbf16> to vector<256x32xbf16>
    %cst_15 = arith.constant dense<0.000000e+00> : vector<256x256xf32>
    %33 = tpu.matmul %32, %4, %cst_15 {dimension_numbers = #tpu.dot_dimension_numbers<[1], [0], [0], [1], [0, 0, 1, 1], [], []>} : vector<256x32xbf16>, vector<32x256xbf16>, vector<256x256xf32> -> vector<256x256xf32>
    %c1 = arith.constant 1 : index
    %c0_16 = arith.constant 0 : index
    %c0_17 = arith.constant 0 : index
    %34 = vector.load %arg5[%c1, %c0_16, %c0_17] : memref<4x256x256xbf16, #tpu.memory_space<vmem>>, vector<1x256x256xbf16>
    %35 = vector.shape_cast %34 : vector<1x256x256xbf16> to vector<256x256xbf16>
    %36 = arith.extf %35 : vector<256x256xbf16> to vector<256x256xf32>
    %37 = arith.addf %33, %36 : vector<256x256xf32>
    %cst_18 = arith.constant dense<0xFF800000> : vector<256xf32>
    %38 = vector.multi_reduction <maximumf>, %37, %cst_18 [1] : vector<256x256xf32> to vector<256xf32>
    %39 = vector.shape_cast %38 : vector<256xf32> to vector<256x1xf32>
    %40 = vector.broadcast %39 : vector<256x1xf32> to vector<256x256xf32>
    %41 = arith.subf %37, %40 : vector<256x256xf32>
    %42 = math.exp %41 : vector<256x256xf32>
    %cst_19 = arith.constant dense<0.000000e+00> : vector<256xf32>
    %43 = vector.multi_reduction <add>, %42, %cst_19 [1] : vector<256x256xf32> to vector<256xf32>
    %44 = vector.shape_cast %43 : vector<256xf32> to vector<256x1xf32>
    %45 = arith.truncf %42 : vector<256x256xf32> to vector<256x256xbf16>
    %46 = vector.extract_strided_slice %10 {offsets = [0, 32], sizes = [256, 32], strides = [1, 1]} : vector<256x128xbf16> to vector<256x32xbf16>
    %cst_20 = arith.constant dense<0.000000e+00> : vector<256x32xf32>
    %47 = tpu.matmul %45, %46, %cst_20 {dimension_numbers = #tpu.dot_dimension_numbers<[1], [0], [0], [1], [0, 0, 1, 1], [], []>} : vector<256x256xbf16>, vector<256x32xbf16>, vector<256x32xf32> -> vector<256x32xf32>
    %48 = tpu.reciprocal %44 : vector<256x1xf32> -> vector<256x1xf32>
    %49 = vector.broadcast %48 : vector<256x1xf32> to vector<256x32xf32>
    %50 = arith.mulf %47, %49 : vector<256x32xf32>
    %51 = arith.addf %31, %50 : vector<256x32xf32>
    %52 = vector.extract_strided_slice %7 {offsets = [0, 64], sizes = [256, 32], strides = [1, 1]} : vector<256x128xbf16> to vector<256x32xbf16>
    %cst_21 = arith.constant dense<0.000000e+00> : vector<256x256xf32>
    %53 = tpu.matmul %52, %4, %cst_21 {dimension_numbers = #tpu.dot_dimension_numbers<[1], [0], [0], [1], [0, 0, 1, 1], [], []>} : vector<256x32xbf16>, vector<32x256xbf16>, vector<256x256xf32> -> vector<256x256xf32>
    %c2 = arith.constant 2 : index
    %c0_22 = arith.constant 0 : index
    %c0_23 = arith.constant 0 : index
    %54 = vector.load %arg5[%c2, %c0_22, %c0_23] : memref<4x256x256xbf16, #tpu.memory_space<vmem>>, vector<1x256x256xbf16>
    %55 = vector.shape_cast %54 : vector<1x256x256xbf16> to vector<256x256xbf16>
    %56 = arith.extf %55 : vector<256x256xbf16> to vector<256x256xf32>
    %57 = arith.addf %53, %56 : vector<256x256xf32>
    %cst_24 = arith.constant dense<0xFF800000> : vector<256xf32>
    %58 = vector.multi_reduction <maximumf>, %57, %cst_24 [1] : vector<256x256xf32> to vector<256xf32>
    %59 = vector.shape_cast %58 : vector<256xf32> to vector<256x1xf32>
    %60 = vector.broadcast %59 : vector<256x1xf32> to vector<256x256xf32>
    %61 = arith.subf %57, %60 : vector<256x256xf32>
    %62 = math.exp %61 : vector<256x256xf32>
    %cst_25 = arith.constant dense<0.000000e+00> : vector<256xf32>
    %63 = vector.multi_reduction <add>, %62, %cst_25 [1] : vector<256x256xf32> to vector<256xf32>
    %64 = vector.shape_cast %63 : vector<256xf32> to vector<256x1xf32>
    %65 = arith.truncf %62 : vector<256x256xf32> to vector<256x256xbf16>
    %66 = vector.extract_strided_slice %10 {offsets = [0, 64], sizes = [256, 32], strides = [1, 1]} : vector<256x128xbf16> to vector<256x32xbf16>
    %cst_26 = arith.constant dense<0.000000e+00> : vector<256x32xf32>
    %67 = tpu.matmul %65, %66, %cst_26 {dimension_numbers = #tpu.dot_dimension_numbers<[1], [0], [0], [1], [0, 0, 1, 1], [], []>} : vector<256x256xbf16>, vector<256x32xbf16>, vector<256x32xf32> -> vector<256x32xf32>
    %68 = tpu.reciprocal %64 : vector<256x1xf32> -> vector<256x1xf32>
    %69 = vector.broadcast %68 : vector<256x1xf32> to vector<256x32xf32>
    %70 = arith.mulf %67, %69 : vector<256x32xf32>
    %71 = arith.addf %51, %70 : vector<256x32xf32>
    %72 = vector.extract_strided_slice %7 {offsets = [0, 96], sizes = [256, 32], strides = [1, 1]} : vector<256x128xbf16> to vector<256x32xbf16>
    %cst_27 = arith.constant dense<0.000000e+00> : vector<256x256xf32>
    %73 = tpu.matmul %72, %4, %cst_27 {dimension_numbers = #tpu.dot_dimension_numbers<[1], [0], [0], [1], [0, 0, 1, 1], [], []>} : vector<256x32xbf16>, vector<32x256xbf16>, vector<256x256xf32> -> vector<256x256xf32>
    %c3 = arith.constant 3 : index
    %c0_28 = arith.constant 0 : index
    %c0_29 = arith.constant 0 : index
    %74 = vector.load %arg5[%c3, %c0_28, %c0_29] : memref<4x256x256xbf16, #tpu.memory_space<vmem>>, vector<1x256x256xbf16>
    %75 = vector.shape_cast %74 : vector<1x256x256xbf16> to vector<256x256xbf16>
    %76 = arith.extf %75 : vector<256x256xbf16> to vector<256x256xf32>
    %77 = arith.addf %73, %76 : vector<256x256xf32>
    %cst_30 = arith.constant dense<0xFF800000> : vector<256xf32>
    %78 = vector.multi_reduction <maximumf>, %77, %cst_30 [1] : vector<256x256xf32> to vector<256xf32>
    %79 = vector.shape_cast %78 : vector<256xf32> to vector<256x1xf32>
    %80 = vector.broadcast %79 : vector<256x1xf32> to vector<256x256xf32>
    %81 = arith.subf %77, %80 : vector<256x256xf32>
    %82 = math.exp %81 : vector<256x256xf32>
    %cst_31 = arith.constant dense<0.000000e+00> : vector<256xf32>
    %83 = vector.multi_reduction <add>, %82, %cst_31 [1] : vector<256x256xf32> to vector<256xf32>
    %84 = vector.shape_cast %83 : vector<256xf32> to vector<256x1xf32>
    %85 = arith.truncf %82 : vector<256x256xf32> to vector<256x256xbf16>
    %86 = vector.extract_strided_slice %10 {offsets = [0, 96], sizes = [256, 32], strides = [1, 1]} : vector<256x128xbf16> to vector<256x32xbf16>
    %cst_32 = arith.constant dense<0.000000e+00> : vector<256x32xf32>
    %87 = tpu.matmul %85, %86, %cst_32 {dimension_numbers = #tpu.dot_dimension_numbers<[1], [0], [0], [1], [0, 0, 1, 1], [], []>} : vector<256x256xbf16>, vector<256x32xbf16>, vector<256x32xf32> -> vector<256x32xf32>
    %88 = tpu.reciprocal %84 : vector<256x1xf32> -> vector<256x1xf32>
    %89 = vector.broadcast %88 : vector<256x1xf32> to vector<256x32xf32>
    %90 = arith.mulf %87, %89 : vector<256x32xf32>
    %91 = arith.addf %71, %90 : vector<256x32xf32>
    %c0_33 = arith.constant 0 : index
    %c0_34 = arith.constant 0 : index
    %92 = vector.load %arg4[%c0_33, %c0_34] : memref<1x32xf32, #tpu.memory_space<vmem>>, vector<1x32xf32>
    %93 = vector.broadcast %92 : vector<1x32xf32> to vector<256x32xf32>
    %94 = arith.addf %91, %93 : vector<256x32xf32>
    %c0_35 = arith.constant 0 : index
    %c0_36 = arith.constant 0 : index
    %c0_37 = arith.constant 0 : index
    %95 = vector.load %arg6[%c0_35, %c0_36, %c0_37] : memref<1x256x32xf32, #tpu.memory_space<vmem>>, vector<1x256x32xf32>
    %96 = vector.shape_cast %95 : vector<1x256x32xf32> to vector<256x32xf32>
    %97 = vector.shape_cast %94 : vector<256x32xf32> to vector<1x256x32xf32>
    tpu.vector_store %arg6[%c0_35, %c0_36, %c0_37], %97 {strides = array<i32>} : memref<1x256x32xf32, #tpu.memory_space<vmem>>, vector<1x256x32xf32>,
    return
  }
  func.func @transform_0(%arg0: i32) -> (i32, i32, i32) {
    %c0_i32 = arith.constant 0 : i32
    %c0_i32_0 = arith.constant 0 : i32
    %c0_i32_1 = arith.constant 0 : i32
    return %arg0, %c0_i32, %c0_i32_0 : i32, i32, i32
  }
  func.func @transform_1(%arg0: i32) -> (i32, i32) {
    %c0_i32 = arith.constant 0 : i32
    %c0_i32_0 = arith.constant 0 : i32
    %c0_i32_1 = arith.constant 0 : i32
    return %c0_i32, %c0_i32_0 : i32, i32
  }
  func.func @transform_2(%arg0: i32) -> (i32, i32) {
    %c0_i32 = arith.constant 0 : i32
    %c0_i32_0 = arith.constant 0 : i32
    %c0_i32_1 = arith.constant 0 : i32
    return %c0_i32, %c0_i32_0 : i32, i32
  }
  func.func @transform_3(%arg0: i32) -> (i32, i32) {
    %c0_i32 = arith.constant 0 : i32
    %c0_i32_0 = arith.constant 0 : i32
    %c0_i32_1 = arith.constant 0 : i32
    return %c0_i32, %c0_i32_0 : i32, i32
  }
  func.func @transform_4(%arg0: i32) -> (i32, i32, i32) {
    %c0_i32 = arith.constant 0 : i32
    %c0_i32_0 = arith.constant 0 : i32
    %c0_i32_1 = arith.constant 0 : i32
    %c0_i32_2 = arith.constant 0 : i32
    return %c0_i32, %c0_i32_0, %c0_i32_1 : i32, i32, i32
  }
  func.func @transform_5(%arg0: i32) -> (i32, i32, i32) {
    %c0_i32 = arith.constant 0 : i32
    %c0_i32_0 = arith.constant 0 : i32
    %c0_i32_1 = arith.constant 0 : i32
    return %arg0, %c0_i32, %c0_i32_0 : i32, i32, i32
  }
}

</mosaic_0001>

<bundles_post_ra>
// kernel: tpu_custom_call.1
= control target key start
LH: loop header
LB: loop body
LE: loop exit
PB: predicated region body
PF: predicated region fallthrough
CT: control target
= control target key end

     0   :  { %10 = vsyncpa [#allocation3], 0  ;;  %s6841_s18 = smov 0   ;;  %s10717_s0 = inlined_call_operand.vmem [shape: f32[2,256,32], index: 0, kind: input, shape index: {}]   ;;  %s10718_s1 = inlined_call_operand.vmem [shape: bf16[32,128], index: 1, kind: input, shape index: {}]   ;;  %s10719_s2 = inlined_call_operand.vmem [shape: bf16[32,128], index: 2, kind: input, shape index: {}]   ;;  %s10720_s3 = inlined_call_operand.vmem [shape: f32[1,32], index: 3, kind: input, shape index: {}]   ;;  %s10721_s4 = inlined_call_operand.hbm [shape: bf16[4,256,256], index: 4, kind: input, shape index: {}]   ;;  %s10722_s5 = inlined_call_operand.vmem [shape: f32[2,256,32], index: 5, kind: output, shape index: {}]  }
   0x1 LB: > { %s5245_s19 = sadd.s32 4294967295, %s6802_s18   ;;  %p5247_p0 = scmp.ge.s32.totalorder %s6802_s18, 1  ;;  %s6802_s18 = sphi %s6841_s18, %s16_s18  }
   0x2   : > { %p157_p1 = scmp.lt.s32.totalorder %s6802_s18, 3  ;;  %s6804_s20 = smov [#allocation2]  }
   0x3   : > { %s178_s21 = sshll.u32 %s6804_s20, 4  ;;  %p5925_p3 = scmp.eq.s32.totalorder %s5245_s19, 0  ;;  %s179_s21 = int_to_ptr.vmem [resolvable:$true] %s178_s21 }
   0x4   : > { %p6849_p2 = pnand %p5247_p0, %p157_p1  ;;  %s6777_s23 = scalar_lea.vmem %s179_s21, 16384 }
   0x5   : > { %p6778_p7 = scmp.ne.s32.totalorder %s179_s21, %s6777_s23  ;;  %p6785_p10 = scmp.lt.s32.totalorder %s179_s21, %s179_s21 }
   0x6   : > { %p5921_p4 = pneg %p6849_p2  ;;  %p6786_p11 = scmp.lt.s32.totalorder %s6777_s23, %s6777_s23 }
   0x8   : > { %p5922_p5 = pnand %p5925_p3, %p5921_p4  ;;  %p6787_p12 = por %p6786_p11, %p6785_p10 }
   0xa   : > { %p6768_p6 = pneg %p5922_p5 }
   0xc   : > { %p6780_p8 = pnand %p6778_p7, %p6768_p6 }
   0xe   : > { %p6781_p9 = pneg %p6780_p8 }
  0x10   : > { %p6788_p13 = pnand %p6787_p12, %p6781_p9 }
  0x12   : > { %6791 = shalt.err (!%p6788_p13)
}
  0x13   : > { %s6805_s24 = smov 128   ;;  %s6806_s25 = smov 8  }
  0x14   : > { %5924 = dma.hbm_to_vmem [thread:$0]  (!%p5922_p5), %s10721_s4, 16384, %s179_s21, [#allocation3], %s6805_s24, %s6805_s24, %s6806_s25  }
  0x15   : > { %202 = sbr.rel (%p6849_p2) target bundleno = 2116 (0x844), region = 40 }
  0x1a   : > { %6797 = dma.done.wait (%p5925_p3), [#allocation3], 16384  }
  0x1b   : > { %6799 = vsyncadd (%p5925_p3), [#allocation3], 4294950912  ;;  %p230_p0 = scmp.lt.s32.totalorder %s5245_s19, 1  ;;  %v5994_v0 = vld [vmem:[%s10718_s1 + $0x8] sm:$0xff]   ;;  %v5995_v5 = vld [vmem:[%s10718_s1] sm:$0xff]   ;;  %vm373_vm0 = vcmask 261120  }
  0x1c   : > { %5845 = vmatprep.subr.bf16.mxu0 %v5994_v0  ;;  %s6808_s15 = smov 96   ;;  %s6809_s16 = smov 64  }
  0x1d   : > { %s11583_s19 = smov (!%p230_p0, %s5245_s19), 1  ;;  %5846 = vmatpush3.bf16.msra.mxu0 %v5994_v0  ;;  %s6810_s17 = smov 32  }
  0x1e   : > { %s5359_s28 = sshll.u32 %s11583_s19, 8  ;;  %5847 = vmatprep.subr.bf16.mxu0 %v5995_v5 }
  0x1f   : > { %s6871_s6 = scalar_lea.vmem %s10717_s0, %s5359_s28  ;;  %s10504_s24 = scalar_lea.vmem %s10722_s5, %s5359_s28 }
  0x20   : > { %v241_v1 = vld [vmem:[%s6871_s6] sm:$0xff]  ;;  %v258_v3 = vld [vmem:[%s6871_s6 + $0x88] sm:$0xff]  ;;  %v243_v7 = vld [vmem:[%s6871_s6 + $0x10] sm:$0xff] }
  0x21   : > { %v257_v2 = vld [vmem:[%s6871_s6 + $0x80] sm:$0xff]  ;;  %v242_v6 = vld [vmem:[%s6871_s6 + $0x8] sm:$0xff]  ;;  %v244_v8 = vld [vmem:[%s6871_s6 + $0x18] sm:$0xff]  ;;  %5848 = vmatpush3.bf16.msra.mxu0 %v5995_v5 }
  0x22   : > { %v5942_v4 = vpack.i.bf16 %v241_v1, %v257_v2  ;;  %v5944_v9 = vpack.i.bf16 %v242_v6, %v258_v3  ;;  %v273_v10 = vpack.c.bf16 %v242_v6, %v241_v1  ;;  %v245_v11 = vld [vmem:[%s6871_s6 + $0x20] sm:$0xff]  ;;  %v259_v12 = vld [vmem:[%s6871_s6 + $0x90] sm:$0xff]  ;;  %v246_v13 = vld [vmem:[%s6871_s6 + $0x28] sm:$0xff]  ;;  %v6889_v14 = vpack.c.bf16 %v244_v8, %v243_v7 }
  0x23   : > { %v6892_v15 = vpack.c.bf16 %v246_v13, %v245_v11  ;;  %v5946_v16 = vpack.i.bf16 %v243_v7, %v259_v12  ;;  %v260_v17 = vld [vmem:[%s6871_s6 + $0x98] sm:$0xff]  ;;  %v261_v18 = vld [vmem:[%s6871_s6 + $0xa0] sm:$0xff]  ;;  %v247_v19 = vld [vmem:[%s6871_s6 + $0x30] sm:$0xff]  ;;  %v281_v43 = vpack.c.bf16 %v258_v3, %v257_v2  ;;  %v10723_v2 = vmov 0  }
  0x24   : > { %5943 = vxpose.xlu0.b32.start [1/16] (narrow) %v5942_v4, 32  ;;  %5849 = vmatprep.mubr.msk.bf16.mxu0 %vm373_vm0, %v273_v10  ;;  %v248_v20 = vld [vmem:[%s6871_s6 + $0x38] sm:$0xff]  ;;  %v5948_v21 = vpack.i.bf16 %v244_v8, %v260_v17  ;;  %v249_v22 = vld [vmem:[%s6871_s6 + $0x40] sm:$0xff]  ;;  %v250_v23 = vld [vmem:[%s6871_s6 + $0x48] sm:$0xff]  ;;  %v5950_v26 = vpack.i.bf16 %v245_v11, %v261_v18  ;;  %v282_v48 = vpack.c.bf16 %v260_v17, %v259_v12 }
  0x25   : > { %5885 = vmatprep.mubr.msk.bf16.mxu1 %vm373_vm0, %v273_v10  ;;  %5850 = vmatmul.mubr.msk.bf16.vlgmr.msra.gmra.mxu0 %vm373_vm0, %v6889_v14  ;;  %v6904_v24 = vpack.c.bf16 %v248_v20, %v247_v19  ;;  %v6906_v25 = vpack.c.bf16 %v250_v23, %v249_v22  ;;  %v262_v27 = vld [vmem:[%s6871_s6 + $0xa8] sm:$0xff]  ;;  %v251_v28 = vld [vmem:[%s6871_s6 + $0x50] sm:$0xff]  ;;  %v252_v29 = vld [vmem:[%s6871_s6 + $0x58] sm:$0xff] }
  0x26   : > { %5853 = vmatprep.mubr.msk.bf16.mxu0 %vm373_vm0, %v6892_v15  ;;  %v5952_v30 = vpack.i.bf16 %v246_v13, %v262_v27  ;;  %v253_v31 = vld [vmem:[%s6871_s6 + $0x60] sm:$0xff]  ;;  %v254_v32 = vld [vmem:[%s6871_s6 + $0x68] sm:$0xff]  ;;  %v263_v33 = vld [vmem:[%s6871_s6 + $0xb0] sm:$0xff]  ;;  %v6918_v34 = vpack.c.bf16 %v252_v29, %v251_v28  ;;  %v283_v49 = vpack.c.bf16 %v262_v27, %v261_v18 }
  0x27   : > { %v6920_v35 = vpack.c.bf16 %v254_v32, %v253_v31  ;;  %v5954_v36 = vpack.i.bf16 %v247_v19, %v263_v33  ;;  %v264_v37 = vld [vmem:[%s6871_s6 + $0xb8] sm:$0xff]  ;;  %v255_v38 = vld [vmem:[%s6871_s6 + $0x70] sm:$0xff]  ;;  %v265_v41 = vld [vmem:[%s6871_s6 + $0xc0] sm:$0xff] }
  0x28   : > { %5945 = vxpose.xlu0.b32.cont [2/16] (narrow) %v5944_v9, 32  ;;  %v256_v39 = vld [vmem:[%s6871_s6 + $0x78] sm:$0xff]  ;;  %v5956_v40 = vpack.i.bf16 %v248_v20, %v264_v37  ;;  %v5958_v44 = vpack.i.bf16 %v249_v22, %v265_v41  ;;  %v266_v45 = vld [vmem:[%s6871_s6 + $0xc8] sm:$0xff]  ;;  %v267_v47 = vld [vmem:[%s6871_s6 + $0xd0] sm:$0xff]  ;;  %v284_v54 = vpack.c.bf16 %v264_v37, %v263_v33 }
  0x29   : > { %v280_v42 = vpack.c.bf16 %v256_v39, %v255_v38  ;;  %v5960_v46 = vpack.i.bf16 %v250_v23, %v266_v45  ;;  %v5962_v50 = vpack.i.bf16 %v251_v28, %v267_v47  ;;  %v268_v51 = vld [vmem:[%s6871_s6 + $0xd8] sm:$0xff]  ;;  %v269_v53 = vld [vmem:[%s6871_s6 + $0xe0] sm:$0xff]  ;;  %v285_v55 = vpack.c.bf16 %v266_v45, %v265_v41  ;;  %v270_v57 = vld [vmem:[%s6871_s6 + $0xe8] sm:$0xff] }
  0x2a   : > { %v5964_v52 = vpack.i.bf16 %v252_v29, %v268_v51  ;;  %v5966_v56 = vpack.i.bf16 %v253_v31, %v269_v53  ;;  %v5968_v58 = vpack.i.bf16 %v254_v32, %v270_v57  ;;  %v271_v59 = vld [vmem:[%s6871_s6 + $0xf0] sm:$0xff]  ;;  %v286_v60 = vpack.c.bf16 %v268_v51, %v267_v47  ;;  %v272_v63 = vld [vmem:[%s6871_s6 + $0xf8] sm:$0xff]  ;;  %v5996_v3 = vld [vmem:[%s10719_s2 + $0x8] sm:$0xff]  }
  0x2b   : > { %v287_v61 = vpack.c.bf16 %v270_v57, %v269_v53  ;;  %v5970_v62 = vpack.i.bf16 %v255_v38, %v271_v59  ;;  %v5972_v0 = vpack.i.bf16 %v256_v39, %v272_v63  ;;  %v288_v1 = vpack.c.bf16 %v272_v63, %v271_v59  ;;  %5881 = vmatprep.subr.bf16.mxu1 %v5996_v3  ;;  %v5997_v4 = vld [vmem:[%s10719_s2] sm:$0xff]  }
  0x2c   : > { %5947 = vxpose.xlu0.b32.cont [3/16] (narrow) %v5946_v16, 32  ;;  %5882 = vmatpush3.bf16.msra.mxu1 %v5996_v3 }
  0x2d   : > { %5854 = vmatmul.mubr.msk.bf16.gmra.mxu0 %vm373_vm0, %v6904_v24  ;;  %5883 = vmatprep.subr.bf16.mxu1 %v5997_v4 }
  0x2e   : > { %5857 = vmatprep.mubr.msk.bf16.mxu0 %vm373_vm0, %v6906_v25 }
  0x30   : > { %5949 = vxpose.xlu0.b32.cont [4/16] (narrow) %v5948_v21, 32  ;;  %5884 = vmatpush3.bf16.msra.mxu1 %v5997_v4 }
  0x33   : > { %5886 = vmatmul.mubr.msk.bf16.vlgmr.msra.gmra.mxu1 %vm373_vm0, %v6889_v14 }
  0x34   : > { %5951 = vxpose.xlu0.b32.cont [5/16] (narrow) %v5950_v26, 32  ;;  %5889 = vmatprep.mubr.msk.bf16.mxu1 %vm373_vm0, %v6892_v15 }
  0x35   : > { %5858 = vmatmul.mubr.msk.bf16.gmra.mxu0 %vm373_vm0, %v6918_v34 }
  0x36   : > { %5861 = vmatprep.mubr.msk.bf16.mxu0 %vm373_vm0, %v6920_v35 }
  0x38   : > { %5953 = vxpose.xlu0.b32.cont [6/16] (narrow) %v5952_v30, 32 }
  0x3b   : > { %5890 = vmatmul.mubr.msk.bf16.gmra.mxu1 %vm373_vm0, %v6904_v24 }
  0x3c   : > { %5955 = vxpose.xlu0.b32.cont [7/16] (narrow) %v5954_v36, 32  ;;  %5893 = vmatprep.mubr.msk.bf16.mxu1 %vm373_vm0, %v6906_v25 }
  0x3d   : > { %5862 = vmatmul.mubr.msk.bf16.gmra.mxu0 %vm373_vm0, %v280_v42 }
  0x3e   : > { %5865 = vmatprep.mubr.msk.bf16.mxu0 %vm373_vm0, %v281_v43 }
  0x40   : > { %5957 = vxpose.xlu0.b32.cont [8/16] (narrow) %v5956_v40, 32 }
  0x43   : > { %5894 = vmatmul.mubr.msk.bf16.gmra.mxu1 %vm373_vm0, %v6918_v34 }
  0x44   : > { %5959 = vxpose.xlu0.b32.cont [9/16] (narrow) %v5958_v44, 32  ;;  %5897 = vmatprep.mubr.msk.bf16.mxu1 %vm373_vm0, %v6920_v35 }
  0x45   : > { %5866 = vmatmul.mubr.msk.bf16.gmra.mxu0 %vm373_vm0, %v282_v48 }
  0x46   : > { %5869 = vmatprep.mubr.msk.bf16.mxu0 %vm373_vm0, %v283_v49 }
  0x48   : > { %5961 = vxpose.xlu0.b32.cont [10/16] (narrow) %v5960_v46, 32 }
  0x4b   : > { %5898 = vmatmul.mubr.msk.bf16.gmra.mxu1 %vm373_vm0, %v280_v42 }
  0x4c   : > { %5963 = vxpose.xlu0.b32.cont [11/16] (narrow) %v5962_v50, 32  ;;  %5901 = vmatprep.mubr.msk.bf16.mxu1 %vm373_vm0, %v281_v43 }
  0x4d   : > { %5870 = vmatmul.mubr.msk.bf16.gmra.mxu0 %vm373_vm0, %v284_v54 }
  0x4e   : > { %5873 = vmatprep.mubr.msk.bf16.mxu0 %vm373_vm0, %v285_v55 }
  0x50   : > { %5965 = vxpose.xlu0.b32.cont [12/16] (narrow) %v5964_v52, 32 }
  0x53   : > { %5902 = vmatmul.mubr.msk.bf16.gmra.mxu1 %vm373_vm0, %v282_v48 }
  0x54   : > { %5967 = vxpose.xlu0.b32.cont [13/16] (narrow) %v5966_v56, 32  ;;  %5905 = vmatprep.mubr.msk.bf16.mxu1 %vm373_vm0, %v283_v49 }
  0x55   : > { %5874 = vmatmul.mubr.msk.bf16.gmra.mxu0 %vm373_vm0, %v286_v60 }
  0x56   : > { %5877 = vmatprep.mubr.msk.bf16.mxu0 %vm373_vm0, %v287_v61 }
  0x58   : > { %5969 = vxpose.xlu0.b32.cont [14/16] (narrow) %v5968_v58, 32 }
  0x5b   : > { %5906 = vmatmul.mubr.msk.bf16.gmra.mxu1 %vm373_vm0, %v284_v54 }
  0x5c   : > { %5971 = vxpose.xlu0.b32.cont [15/16] (narrow) %v5970_v62, 32  ;;  %5909 = vmatprep.mubr.msk.bf16.mxu1 %vm373_vm0, %v285_v55 }
  0x5d   : > { %5878 = vmatmul.mubr.msk.bf16.gmra.mxu0 %vm373_vm0, %v288_v1 }
  0x5e   : > { %968 = vmatprep.mubr.bf16.mxu0 %v10723_v2 }
  0x60   : > { %5973 = vxpose.xlu0.b32.end [16/16] (narrow) %v5972_v0, 32 }
  0x63   : > { %5910 = vmatmul.mubr.msk.bf16.gmra.mxu1 %vm373_vm0, %v286_v60 }
  0x64   : > { %5913 = vmatprep.mubr.msk.bf16.mxu1 %vm373_vm0, %v287_v61 }
  0x6b   : > { %5914 = vmatmul.mubr.msk.bf16.gmra.mxu1 %vm373_vm0, %v288_v1 }
  0xa0   : > { %v5974_v5 = vpop.trf.xlu0 }
  0xa1   : > { %v5975_v8 = vunpack.i.l.bf16 %v5974_v5  ;;  %v5978_v15 = vunpack.i.h.bf16 %v5974_v5 }
  0xa4   : > { %v5979_v6 = vpop.trf.xlu0 }
  0xa5   : > { %v5980_v9 = vunpack.i.l.bf16 %v5979_v6  ;;  %v5983_v16 = vunpack.i.h.bf16 %v5979_v6 }
  0xa7   : > { %v6975_v19 = vpack.c.bf16 %v5980_v9, %v5975_v8  ;;  %v6979_v20 = vpack.c.bf16 %v5983_v16, %v5978_v15 }
  0xa8   : > { %v5984_v7 = vpop.trf.xlu0 }
  0xa9   : > { %v5988_v10 = vunpack.i.h.bf16 %v5984_v7  ;;  %v5985_v11 = vunpack.i.l.bf16 %v5984_v7 }
  0xac   : > { %v5989_v12 = vpop.trf.xlu0 }
  0xad   : > { %v5993_v13 = vunpack.i.h.bf16 %v5989_v12  ;;  %v5990_v14 = vunpack.i.l.bf16 %v5989_v12 }
  0xaf   : > { %v6971_v17 = vpack.c.bf16 %v5990_v14, %v5985_v11  ;;  %v6973_v18 = vpack.c.bf16 %v5993_v13, %v5988_v10 }
  0xb1   : > { %948 = vmatprep.subr.bf16.mxu0 %v6971_v17 }
  0xb2   : > { %949 = vmatpush1.bf16.msra.mxu0 %v6973_v18 }
  0xb3   : > { %950 = vmatprep.subr.bf16.mxu0 %v6975_v19 }
  0xb6   : > { %951 = vmatpush1.bf16.msra.mxu0 %v6979_v20 }
  0xb7   : > { %2007 = vmatprep.subr.bf16.mxu0 %v6971_v17 }
  0xe5   : > { %v5851_v21 = vpop.f32.mrf.mxu0 }
  0xe7   : > { %v456_v22 = vpop.f32.mrf.mxu0 }
  0xe9   : > { %v5852_v23 = vpop.f32.mrf.mxu0 }
  0xea   : > { %v6987_v24 = vpack.c.bf16 %v5852_v23, %v5851_v21 }
  0xeb   : > { %v459_v25 = vpop.f32.mrf.mxu0 }
  0xec   : > { %v6989_v26 = vpack.c.bf16 %v459_v25, %v456_v22  ;;  %1917 = vrot.lane.b32.xlu1 %v6987_v24, %s6808_s15 }
  0xed   : > { %v5855_v27 = vpop.f32.mrf.mxu0 }
  0xee   : > { %3022 = vrot.lane.b32.xlu0 %v6989_v26, %s6809_s16  ;;  %5292 = vmatmul.mubr.msk.bf16.vlgmr.msra.gmra.mxu0 %vm373_vm0, %v6989_v26 }
  0xef   : > { %2008 = vmatpush1.bf16.msra.mxu0 %v6973_v18  ;;  %v472_v28 = vpop.f32.mrf.mxu0  ;;  %978 = vmatprep.mubr.bf16.mxu0 %v10723_v2 }
  0xf0   : > { %2009 = vmatprep.subr.bf16.mxu0 %v6975_v19  ;;  %3024 = vrot.lane.b32.xlu1 %v6987_v24, %s6809_s16 }
  0xf1   : > { %v5856_v29 = vpop.f32.mrf.mxu0 }
  0xf2   : > { %v7003_v31 = vpack.c.bf16 %v5856_v29, %v5855_v27 }
  0xf3   : > { %2010 = vmatpush1.bf16.msra.mxu0 %v6979_v20  ;;  %v475_v30 = vpop.f32.mrf.mxu0  ;;  %v5887_v6 = vpop.f32.mrf.mxu1 }
  0xf4   : > { %10856 = vst [vmem:[#allocation5_spill] sm:$0xff] %v7003_v31  ;;  %3114 = vmatprep.subr.bf16.mxu0 %v6971_v17  ;;  %1915 = vrot.lane.b32.xlu1 %v6989_v26, %s6808_s15  ;;  %v7008_v32 = vpack.c.bf16 %v475_v30, %v472_v28 }
  0xf5   : > { %v5859_v33 = vpop.f32.mrf.mxu0  ;;  %v7116_v7 = vpop.f32.mrf.mxu1 }
  0xf6   : > { %10857 = vst [vmem:[#allocation6_spill] sm:$0xff] %v7008_v32  ;;  %5293 = vmatmul.mubr.msk.bf16.gmra.mxu0 %vm373_vm0, %v6987_v24  ;;  %3026 = vrot.lane.b32.xlu0 %v7008_v32, %s6809_s16 }
  0xf7   : > { %988 = vmatprep.mubr.bf16.mxu0 %v10723_v2  ;;  %v488_v34 = vpop.f32.mrf.mxu0  ;;  %v5888_v8 = vpop.f32.mrf.mxu1 }
  0xf8   : > { %1921 = vrot.lane.b32.xlu1 %v7003_v31, %s6808_s15  ;;  %v7120_v9 = vpack.c.bf16 %v5888_v8, %v5887_v6 }
  0xf9   : > { %v5860_v35 = vpop.f32.mrf.mxu0  ;;  %v7124_v10 = vpop.f32.mrf.mxu1 }
  0xfa   : > { %v7028_v40 = vpack.c.bf16 %v5860_v35, %v5859_v33  ;;  %10870 = vst [vmem:[#allocation19_spill] sm:$0xff] %v7120_v9 }
  0xfb   : > { %v491_v36 = vpop.f32.mrf.mxu0  ;;  %v5891_v11 = vpop.f32.mrf.mxu1 }
  0xfc   : > { %3028 = vrot.lane.b32.xlu1 %v7003_v31, %s6809_s16  ;;  %v7019_v37 = vpack.c.bf16 %v491_v36, %v488_v34  ;;  %10859 = vst [vmem:[#allocation8_spill] sm:$0xff] %v7028_v40 }
  0xfd   : > { %v5863_v38 = vpop.f32.mrf.mxu0  ;;  %v7129_v12 = vpop.f32.mrf.mxu1 }
  0xfe   : > { %10858 = vst [vmem:[#allocation7_spill] sm:$0xff] %v7019_v37  ;;  %5294 = vmatmul.mubr.msk.bf16.gmra.mxu0 %vm373_vm0, %v7008_v32  ;;  %3030 = vrot.lane.b32.xlu0 %v7019_v37, %s6809_s16 }
  0xff   : > { %998 = vmatprep.mubr.bf16.mxu0 %v10723_v2  ;;  %v504_v39 = vpop.f32.mrf.mxu0  ;;  %v5892_v13 = vpop.f32.mrf.mxu1 }
 0x100   : > { %1919 = vrot.lane.b32.xlu1 %v7008_v32, %s6808_s15  ;;  %v7131_v14 = vpack.c.bf16 %v5892_v13, %v5891_v11 }
 0x101   : > { %v5864_v41 = vpop.f32.mrf.mxu0  ;;  %v7135_v15 = vpop.f32.mrf.mxu1 }
 0x102   : > { %v7043_v48 = vpack.c.bf16 %v5864_v41, %v5863_v38  ;;  %10871 = vst [vmem:[#allocation20_spill] sm:$0xff] %v7131_v14 }
 0x103   : > { %v507_v42 = vpop.f32.mrf.mxu0  ;;  %v5895_v16 = vpop.f32.mrf.mxu1 }
 0x104   : > { %1925 = vrot.lane.b32.xlu1 %v7028_v40, %s6808_s15  ;;  %v7032_v43 = vpack.c.bf16 %v507_v42, %v504_v39  ;;  %10861 = vst [vmem:[#allocation10_spill] sm:$0xff] %v7043_v48 }
 0x105   : > { %v5867_v44 = vpop.f32.mrf.mxu0  ;;  %v681_v21 = vpop.f32.mrf.mxu1 }
 0x106   : > { %10860 = vst [vmem:[#allocation9_spill] sm:$0xff] %v7032_v43  ;;  %5295 = vmatmul.mubr.msk.bf16.gmra.mxu0 %vm373_vm0, %v7003_v31  ;;  %3034 = vrot.lane.b32.xlu0 %v7032_v43, %s6809_s16 }
 0x107   : > { %1008 = vmatprep.mubr.bf16.mxu0 %v10723_v2  ;;  %v520_v45 = vpop.f32.mrf.mxu0  ;;  %v5896_v22 = vpop.f32.mrf.mxu1 }
 0x108   : > { %3032 = vrot.lane.b32.xlu1 %v7028_v40, %s6809_s16  ;;  %v7176_v11 = vpack.c.bf16 %v5896_v22, %v5895_v16 }
 0x109   : > { %v5868_v46 = vpop.f32.mrf.mxu0  ;;  %v684_v23 = vpop.f32.mrf.mxu1 }
 0x10a   : > { %v7065_v57 = vpack.c.bf16 %v5868_v46, %v5867_v44  ;;  %10877 = vst [vmem:[#allocation26_spill] sm:$0xff] %v7176_v11 }
 0x10b   : > { %v523_v47 = vpop.f32.mrf.mxu0  ;;  %v5899_v25 = vpop.f32.mrf.mxu1 }
 0x10c   : > { %1923 = vrot.lane.b32.xlu1 %v7019_v37, %s6808_s15  ;;  %v7045_v49 = vpack.c.bf16 %v523_v47, %v520_v45  ;;  %10864 = vst [vmem:[#allocation13_spill] sm:$0xff] %v7065_v57 }
 0x10d   : > { %v5871_v50 = vpop.f32.mrf.mxu0  ;;  %v697_v27 = vpop.f32.mrf.mxu1 }
 0x10e   : > { %10862 = vst [vmem:[#allocation11_spill] sm:$0xff] %v7045_v49  ;;  %5296 = vmatmul.mubr.msk.bf16.gmra.mxu0 %vm373_vm0, %v7019_v37  ;;  %3038 = vrot.lane.b32.xlu0 %v7045_v49, %s6809_s16 }
 0x10f   : > { %1018 = vmatprep.mubr.bf16.mxu0 %v10723_v2  ;;  %v536_v51 = vpop.f32.mrf.mxu0  ;;  %v5900_v28 = vpop.f32.mrf.mxu1 }
 0x110   : > { %1929 = vrot.lane.b32.xlu1 %v7043_v48, %s6808_s15 }
 0x111   : > { %v5872_v52 = vpop.f32.mrf.mxu0  ;;  %v700_v30 = vpop.f32.mrf.mxu1 }
 0x112   : > { %v7080_v1 = vpack.c.bf16 %v5872_v52, %v5871_v50 }
 0x113   : > { %v539_v53 = vpop.f32.mrf.mxu0  ;;  %v5903_v33 = vpop.f32.mrf.mxu1 }
 0x114   : > { %3036 = vrot.lane.b32.xlu1 %v7043_v48, %s6809_s16  ;;  %v7056_v54 = vpack.c.bf16 %v539_v53, %v536_v51  ;;  %10866 = vst [vmem:[#allocation15_spill] sm:$0xff] %v7080_v1 }
 0x115   : > { %v5875_v55 = vpop.f32.mrf.mxu0  ;;  %v7146_v35 = vpop.f32.mrf.mxu1 }
 0x116   : > { %10863 = vst [vmem:[#allocation12_spill] sm:$0xff] %v7056_v54  ;;  %5297 = vmatmul.mubr.msk.bf16.gmra.mxu0 %vm373_vm0, %v7028_v40  ;;  %3042 = vrot.lane.b32.xlu0 %v7056_v54, %s6809_s16 }
 0x117   : > { %1028 = vmatprep.mubr.bf16.mxu0 %v10723_v2  ;;  %v552_v56 = vpop.f32.mrf.mxu0  ;;  %v5904_v36 = vpop.f32.mrf.mxu1 }
 0x118   : > { %1927 = vrot.lane.b32.xlu1 %v7032_v43, %s6808_s15 }
 0x119   : > { %v5876_v58 = vpop.f32.mrf.mxu0  ;;  %v716_v38 = vpop.f32.mrf.mxu1 }
 0x11a   : > { %v7098_v4 = vpack.c.bf16 %v5876_v58, %v5875_v55 }
 0x11b   : > { %v555_v59 = vpop.f32.mrf.mxu0  ;;  %v5907_v41 = vpop.f32.mrf.mxu1 }
 0x11c   : > { %1933 = vrot.lane.b32.xlu1 %v7065_v57, %s6808_s15  ;;  %v7069_v60 = vpack.c.bf16 %v555_v59, %v552_v56  ;;  %10868 = vst [vmem:[#allocation17_spill] sm:$0xff] %v7098_v4  ;;  %v7161_v59 = vpack.c.bf16 %v5900_v28, %v5899_v25 }
 0x11d   : > { %v5879_v61 = vpop.f32.mrf.mxu0  ;;  %v729_v42 = vpop.f32.mrf.mxu1 }
 0x11e   : > { %10865 = vst [vmem:[#allocation14_spill] sm:$0xff] %v7069_v60  ;;  %5298 = vmatmul.mubr.msk.bf16.gmra.mxu0 %vm373_vm0, %v7032_v43  ;;  %3046 = vrot.lane.b32.xlu0 %v7069_v60, %s6809_s16  ;;  %10872 = vst [vmem:[#allocation21_spill] sm:$0xff] %v7161_v59 }
 0x11f   : > { %1038 = vmatprep.mubr.bf16.mxu0 %v10723_v2  ;;  %v568_v62 = vpop.f32.mrf.mxu0  ;;  %v5908_v44 = vpop.f32.mrf.mxu1 }
 0x120   : > { %3040 = vrot.lane.b32.xlu1 %v7065_v57, %s6809_s16  ;;  %v7189_v28 = vpack.c.bf16 %v5908_v44, %v5907_v41 }
 0x121   : > { %v5880_v63 = vpop.f32.mrf.mxu0  ;;  %v732_v46 = vpop.f32.mrf.mxu1 }
 0x122   : > { %v7109_v5 = vpack.c.bf16 %v5880_v63, %v5879_v61  ;;  %10880 = vst [vmem:[#allocation29_spill] sm:$0xff] %v7189_v28  ;;  %v7193_v22 = vpack.c.bf16 %v732_v46, %v729_v42  ;;  %v793_v42 = vld [vmem:[#allocation2 + $0x8] sm:$0xff] }
 0x123   : > { %v571_v0 = vpop.f32.mrf.mxu0  ;;  %v5911_v47 = vpop.f32.mrf.mxu1 }
 0x124   : > { %1931 = vrot.lane.b32.xlu1 %v7045_v49, %s6808_s15  ;;  %v7082_v3 = vpack.c.bf16 %v571_v0, %v568_v62  ;;  %10869 = vst [vmem:[#allocation18_spill] sm:$0xff] %v7109_v5  ;;  %v7168_v0 = vpack.c.bf16 %v700_v30, %v697_v27  ;;  %v7186_v27 = vpack.c.bf16 %v684_v23, %v681_v21  ;;  %10881 = vst [vmem:[#allocation30_spill] sm:$0xff] %v7193_v22 }
 0x125   : > { %v745_v50 = vpop.f32.mrf.mxu1  ;;  %v7200_v21 = vpack.c.bf16 %v7135_v15, %v7129_v12  ;;  %v7208_v30 = vpack.c.bf16 %v716_v38, %v7146_v35  ;;  %v7217_v12 = vpack.c.bf16 %v7124_v10, %v7116_v7  ;;  %v792_v7 = vld [vmem:[#allocation2] sm:$0xff] }
 0x126   : > { %10867 = vst [vmem:[#allocation16_spill] sm:$0xff] %v7082_v3  ;;  %5299 = vmatmul.mubr.msk.bf16.gmra.mxu0 %vm373_vm0, %v7043_v48  ;;  %3050 = vrot.lane.b32.xlu0 %v7082_v3, %s6809_s16  ;;  %10874 = vst [vmem:[#allocation23_spill] sm:$0xff] %v7168_v0  ;;  %v825_v38 = vunpack.c.h.bf16 %v792_v7 }
 0x127   : > { %1048 = vmatprep.mubr.bf16.mxu0 %v10723_v2  ;;  %v5912_v52 = vpop.f32.mrf.mxu1  ;;  %10879 = vst [vmem:[#allocation28_spill] sm:$0xff] %v7186_v27  ;;  %10882 = vst [vmem:[#allocation31_spill] sm:$0xff] %v7200_v21 }
 0x128   : > { %1937 = vrot.lane.b32.xlu1 %v7080_v1, %s6808_s15  ;;  %v7173_v8 = vpack.c.bf16 %v5912_v52, %v5911_v47  ;;  %10884 = vst [vmem:[#allocation33_spill] sm:$0xff] %v7208_v30  ;;  %10885 = vst [vmem:[#allocation34_spill] sm:$0xff] %v7217_v12  ;;  %v827_v52 = vunpack.c.h.bf16 %v793_v42 }
 0x129   : > { %v748_v53 = vpop.f32.mrf.mxu1 }
 0x12a   : > { %10876 = vst [vmem:[#allocation25_spill] sm:$0xff] %v7173_v8  ;;  %v7181_v25 = vpack.c.bf16 %v748_v53, %v745_v50  ;;  %v826_v50 = vunpack.c.l.bf16 %v793_v42 }
 0x12b   : > { %v5915_v55 = vpop.f32.mrf.mxu1 }
 0x12c   : > { %3044 = vrot.lane.b32.xlu1 %v7080_v1, %s6809_s16  ;;  %10878 = vst [vmem:[#allocation27_spill] sm:$0xff] %v7181_v25 }
 0x12d   : > { %v761_v58 = vpop.f32.mrf.mxu1 }
 0x12e   : > { %5300 = vmatmul.mubr.msk.bf16.gmra.mxu0 %vm373_vm0, %v7045_v49 }
 0x12f   : > { %1058 = vmatprep.mubr.bf16.mxu0 %v10723_v2  ;;  %v5916_v61 = vpop.f32.mrf.mxu1 }
 0x130   : > { %1935 = vrot.lane.b32.xlu1 %v7056_v54, %s6808_s15  ;;  %v7163_v62 = vpack.c.bf16 %v5916_v61, %v5915_v55  ;;  %v794_v55 = vld [vmem:[#allocation2 + $0x10] sm:$0xff] }
 0x132   : > { %10873 = vst [vmem:[#allocation22_spill] sm:$0xff] %v7163_v62  ;;  %5397 = vmatprep.subr.bf16.mxu1 %v7163_v62 }
 0x133   : > { %5398 = vmatpush3.bf16.msra.mxu1 %v7161_v59 }
 0x134   : > { %1941 = vrot.lane.b32.xlu1 %v7098_v4, %s6808_s15 }
 0x136   : > { %5301 = vmatmul.mubr.msk.bf16.gmra.mxu0 %vm373_vm0, %v7065_v57 }
 0x137   : > { %1068 = vmatprep.mubr.bf16.mxu0 %v10723_v2 }
 0x138   : > { %3048 = vrot.lane.b32.xlu1 %v7098_v4, %s6809_s16 }
 0x13c   : > { %1939 = vrot.lane.b32.xlu1 %v7069_v60, %s6808_s15 }
 0x13e   : > { %5302 = vmatmul.mubr.msk.bf16.gmra.mxu0 %vm373_vm0, %v7056_v54 }
 0x13f   : > { %1078 = vmatprep.mubr.bf16.mxu0 %v10723_v2 }
 0x140   : > { %1945 = vrot.lane.b32.xlu1 %v7109_v5, %s6808_s15 }
 0x144   : > { %3052 = vrot.lane.b32.xlu1 %v7109_v5, %s6809_s16 }
 0x146   : > { %5303 = vmatmul.mubr.msk.bf16.gmra.mxu0 %vm373_vm0, %v7080_v1 }
 0x147   : > { %1088 = vmatprep.mubr.bf16.mxu0 %v10723_v2 }
 0x148   : > { %1943 = vrot.lane.b32.xlu1 %v7082_v3, %s6808_s15 }
 0x14e   : > { %5304 = vmatmul.mubr.msk.bf16.gmra.mxu0 %vm373_vm0, %v7069_v60 }
 0x14f   : > { %1098 = vmatprep.mubr.bf16.mxu0 %v10723_v2 }
 0x156   : > { %5305 = vmatmul.mubr.msk.bf16.gmra.mxu0 %vm373_vm0, %v7098_v4 }
 0x157   : > { %1108 = vmatprep.mubr.bf16.mxu0 %v10723_v2 }
 0x15e   : > { %v1918_v29 = vpop.permute.xlu1 %1917  ;;  %5306 = vmatmul.mubr.msk.bf16.gmra.mxu0 %vm373_vm0, %v7082_v3 }
 0x15f   : > { %1118 = vmatprep.mubr.bf16.mxu0 %v10723_v2 }
 0x162   : > { %v7144_v34 = vpop.permute.xlu1 %3024 }
 0x166   : > { %5307 = vmatmul.mubr.msk.bf16.gmra.mxu0 %vm373_vm0, %v7109_v5  ;;  %v1916_v39 = vpop.permute.xlu1 %1915 }
 0x167   : > { %2027 = vmatprep.mubr.bf16.mxu0 %v10723_v2 }
 0x16a   : > { %v1922_v45 = vpop.permute.xlu1 %1921 }
 0x16e   : > { %5308 = vmatmul.mubr.msk.bf16.vlgmr.msra.gmra.mxu0 %vm373_vm0, %v1916_v39  ;;  %v7155_v51 = vpop.permute.xlu1 %3028 }
 0x16f   : > { %3115 = vmatpush1.bf16.msra.mxu0 %v6973_v18  ;;  %2037 = vmatprep.mubr.bf16.mxu0 %v10723_v2 }
 0x170   : > { %3116 = vmatprep.subr.bf16.mxu0 %v6975_v19 }
 0x172   : > { %v1920_v56 = vpop.permute.xlu1 %1919 }
 0x173   : > { %3117 = vmatpush1.bf16.msra.mxu0 %v6979_v20 }
 0x174   : > { %4205 = vmatprep.subr.bf16.mxu0 %v6971_v17  ;;  %v764_v17 = vpop.f32.mrf.mxu1 }
 0x175   : > { %v7170_v6 = vpack.c.bf16 %v764_v17, %v761_v58  ;;  %v828_v17 = vunpack.c.l.bf16 %v794_v55 }
 0x176   : > { %5309 = vmatmul.mubr.msk.bf16.gmra.mxu0 %vm373_vm0, %v1918_v29  ;;  %v1926_v63 = vpop.permute.xlu1 %1925  ;;  %v7203_v29 = vpack.c.bf16 %v5904_v36, %v5903_v33  ;;  %v824_v36 = vunpack.c.l.bf16 %v792_v7 }
 0x177   : > { %2047 = vmatprep.mubr.bf16.mxu0 %v10723_v2  ;;  %10875 = vst [vmem:[#allocation24_spill] sm:$0xff] %v7170_v6  ;;  %5399 = vmatprep.subr.bf16.mxu1 %v7170_v6 }
 0x178   : > { %5400 = vmatpush3.bf16.msra.mxu1 %v7168_v0  ;;  %10883 = vst [vmem:[#allocation32_spill] sm:$0xff] %v7203_v29 }
 0x179   : > { %5401 = vmatprep.subr.bf16.mxu1 %v7173_v8 }
 0x17a   : > { %v7179_v13 = vpop.permute.xlu1 %3032 }
 0x17c   : > { %5402 = vmatpush3.bf16.msra.mxu1 %v7176_v11 }
 0x17d   : > { %5403 = vmatprep.subr.bf16.mxu1 %v7181_v25 }
 0x17e   : > { %5310 = vmatmul.mubr.msk.bf16.gmra.mxu0 %vm373_vm0, %v1920_v56  ;;  %v1924_v16 = vpop.permute.xlu1 %1923 }
 0x17f   : > { %2057 = vmatprep.mubr.bf16.mxu0 %v10723_v2 }
 0x180   : > { %5404 = vmatpush3.bf16.msra.mxu1 %v7186_v27 }
 0x181   : > { %5405 = vmatprep.subr.bf16.mxu1 %v7189_v28 }
 0x182   : > { %v1930_v23 = vpop.permute.xlu1 %1929 }
 0x184   : > { %5406 = vmatpush3.bf16.msra.mxu1 %v7131_v14 }
 0x185   : > { %5407 = vmatprep.subr.bf16.mxu1 %v7193_v22 }
 0x186   : > { %5311 = vmatmul.mubr.msk.bf16.gmra.mxu0 %vm373_vm0, %v1922_v45  ;;  %v7212_v39 = vpop.permute.xlu1 %3036 }
 0x187   : > { %2067 = vmatprep.mubr.bf16.mxu0 %v10723_v2 }
 0x188   : > { %5408 = vmatpush3.bf16.msra.mxu1 %v7200_v21 }
 0x189   : > { %5409 = vmatprep.subr.bf16.mxu1 %v7203_v29 }
 0x18a   : > { %v1928_v15 = vpop.permute.xlu1 %1927 }
 0x18c   : > { %5410 = vmatpush3.bf16.msra.mxu1 %v7120_v9 }
 0x18d   : > { %5411 = vmatprep.subr.bf16.mxu1 %v7208_v30 }
 0x18e   : > { %5312 = vmatmul.mubr.msk.bf16.gmra.mxu0 %vm373_vm0, %v1924_v16  ;;  %v1934_v33 = vpop.permute.xlu1 %1933  ;;  %v829_v16 = vunpack.c.h.bf16 %v794_v55 }
 0x18f   : > { %2077 = vmatprep.mubr.bf16.mxu0 %v10723_v2 }
 0x190   : > { %5412 = vmatpush3.bf16.msra.mxu1 %v7217_v12 }
 0x192   : > { %v7225_v35 = vpop.permute.xlu1 %3040 }
 0x196   : > { %5313 = vmatmul.mubr.msk.bf16.gmra.mxu0 %vm373_vm0, %v1926_v63  ;;  %v1932_v10 = vpop.permute.xlu1 %1931 }
 0x197   : > { %2087 = vmatprep.mubr.bf16.mxu0 %v10723_v2 }
 0x19a   : > { %v1938_v45 = vpop.permute.xlu1 %1937 }
 0x19e   : > { %5314 = vmatmul.mubr.msk.bf16.gmra.mxu0 %vm373_vm0, %v1928_v15  ;;  %v795_v15 = vld [vmem:[#allocation2 + $0x18] sm:$0xff]  ;;  %v7241_v7 = vpop.permute.xlu1 %3044 }
 0x19f   : > { %2097 = vmatprep.mubr.bf16.mxu0 %v10723_v2  ;;  %v830_v42 = vunpack.c.l.bf16 %v795_v15 }
 0x1a2   : > { %v1936_v55 = vpop.permute.xlu1 %1935 }
 0x1a6   : > { %5315 = vmatmul.mubr.msk.bf16.gmra.mxu0 %vm373_vm0, %v1930_v23  ;;  %v1942_v5 = vpop.permute.xlu1 %1941 }
 0x1a7   : > { %2107 = vmatprep.mubr.bf16.mxu0 %v10723_v2 }
 0x1ae   : > { %v970_v41 = vpop.f32.mrf.mxu0  ;;  %5316 = vmatmul.mubr.msk.bf16.gmra.mxu0 %vm373_vm0, %v1932_v10 }
 0x1af   : > { %2117 = vmatprep.mubr.bf16.mxu0 %v10723_v2  ;;  %v7230_v46 = vadd.f32 %v970_v41, %v824_v36 }
 0x1b0   : > { %v972_v44 = vpop.f32.mrf.mxu0 }
 0x1b1   : > { %v7232_v47 = vadd.f32 %v972_v44, %v825_v38  ;;  %v831_v44 = vunpack.c.h.bf16 %v795_v15 }
 0x1b2   : > { %v974_v53 = vpop.f32.mrf.mxu0 }
 0x1b3   : > { %v1129_v56 = vmax.f32 %v7230_v46, %v7232_v47  ;;  %v7236_v61 = vadd.f32 %v974_v53, %v826_v50 }
 0x1b4   : > { %v976_v58 = vpop.f32.mrf.mxu0 }
 0x1b5   : > { %v7238_v63 = vadd.f32 %v976_v58, %v827_v52  ;;  %1130 = vmax.xlane.f32.xlu1 %v1129_v56  ;;  %v796_v52 = vld [vmem:[#allocation2 + $0x20] sm:$0xff] }
 0x1b6   : > { %v980_v23 = vpop.f32.mrf.mxu0  ;;  %5317 = vmatmul.mubr.msk.bf16.gmra.mxu0 %vm373_vm0, %v1934_v33 }
 0x1b7   : > { %v1132_v10 = vmax.f32 %v7236_v61, %v7238_v63  ;;  %2127 = vmatprep.mubr.bf16.mxu0 %v10723_v2  ;;  %v7246_v38 = vadd.f32 %v980_v23, %v828_v17  ;;  %v832_v2 = vunpack.c.l.bf16 %v796_v52  ;;  %v833_v17 = vunpack.c.h.bf16 %v796_v52  ;;  %v798_v52 = vld [vmem:[#allocation2 + $0x30] sm:$0xff] }
 0x1b8   : > { %v982_v36 = vpop.f32.mrf.mxu0  ;;  %v836_v60 = vunpack.c.l.bf16 %v798_v52  ;;  %v837_v57 = vunpack.c.h.bf16 %v798_v52 }
 0x1b9   : > { %v7248_v41 = vadd.f32 %v982_v36, %v829_v16  ;;  %1133 = vmax.xlane.f32.xlu1 %v1132_v10  ;;  %v797_v16 = vld [vmem:[#allocation2 + $0x28] sm:$0xff]  ;;  %v10886_v10 = vmov 0  }
 0x1ba   : > { %v984_v50 = vpop.f32.mrf.mxu0 }
 0x1bb   : > { %v1135_v33 = vmax.f32 %v7246_v38, %v7248_v41  ;;  %v7252_v56 = vadd.f32 %v984_v50, %v830_v42  ;;  %v835_v50 = vunpack.c.h.bf16 %v797_v16 }
 0x1bc   : > { %v986_v53 = vpop.f32.mrf.mxu0 }
 0x1bd   : > { %v7254_v58 = vadd.f32 %v986_v53, %v831_v44  ;;  %1136 = vmax.xlane.f32.xlu0 %v1135_v33  ;;  %v834_v44 = vunpack.c.l.bf16 %v797_v16 }
 0x1be   : > { %v990_v23 = vpop.f32.mrf.mxu0  ;;  %5318 = vmatmul.mubr.msk.bf16.gmra.mxu0 %vm373_vm0, %v1936_v55 }
 0x1bf   : > { %v1138_v15 = vmax.f32 %v7252_v56, %v7254_v58  ;;  %2137 = vmatprep.mubr.bf16.mxu0 %v10886_v10  ;;  %v7260_v4 = vadd.f32 %v990_v23, %v832_v2  ;;  %v7271_v23 = vpop.permute.xlu1 %3048 }
 0x1c0   : > { %v992_v36 = vpop.f32.mrf.mxu0 }
 0x1c1   : > { %v7262_v42 = vadd.f32 %v992_v36, %v833_v17  ;;  %1139 = vmax.xlane.f32.xlu1 %v1138_v15  ;;  %v799_v17 = vld [vmem:[#allocation2 + $0x38] sm:$0xff] }
 0x1c2   : > { %v994_v33 = vpop.f32.mrf.mxu0 }
 0x1c3   : > { %v1141_v53 = vmax.f32 %v7260_v4, %v7262_v42  ;;  %v7266_v3 = vadd.f32 %v994_v33, %v834_v44  ;;  %v839_v33 = vunpack.c.h.bf16 %v799_v17  ;;  %v1940_v54 = vpop.permute.xlu1 %1939 }
 0x1c4   : > { %v996_v55 = vpop.f32.mrf.mxu0 }
 0x1c5   : > { %v7268_v1 = vadd.f32 %v996_v55, %v835_v50  ;;  %1142 = vmax.xlane.f32.xlu1 %v1141_v53  ;;  %v838_v50 = vunpack.c.l.bf16 %v799_v17  ;;  %v800_v53 = vld [vmem:[#allocation2 + $0x40] sm:$0xff] }
 0x1c6   : > { %v1000_v2 = vpop.f32.mrf.mxu0  ;;  %5319 = vmatmul.mubr.msk.bf16.gmra.mxu0 %vm373_vm0, %v1938_v45  ;;  %v840_v40 = vunpack.c.l.bf16 %v800_v53 }
 0x1c7   : > { %v1144_v16 = vmax.f32 %v7266_v3, %v7268_v1  ;;  %2147 = vmatprep.mubr.bf16.mxu0 %v10886_v10  ;;  %v7276_v36 = vadd.f32 %v1000_v2, %v836_v60  ;;  %v841_v60 = vunpack.c.h.bf16 %v800_v53  ;;  %v802_v53 = vld [vmem:[#allocation2 + $0x50] sm:$0xff] }
 0x1c8   : > { %v1002_v15 = vpop.f32.mrf.mxu0  ;;  %v844_v29 = vunpack.c.l.bf16 %v802_v53  ;;  %v845_v30 = vunpack.c.h.bf16 %v802_v53 }
 0x1c9   : > { %v7278_v44 = vadd.f32 %v1002_v15, %v837_v57  ;;  %1145 = vmax.xlane.f32.xlu0 %v1144_v16  ;;  %v801_v57 = vld [vmem:[#allocation2 + $0x48] sm:$0xff]  ;;  %v1946_v15 = vpop.permute.xlu1 %1945 }
 0x1ca   : > { %v1004_v52 = vpop.f32.mrf.mxu0 }
 0x1cb   : > { %v1147_v45 = vmax.f32 %v7276_v36, %v7278_v44  ;;  %v7282_v48 = vadd.f32 %v1004_v52, %v838_v50  ;;  %v843_v52 = vunpack.c.h.bf16 %v801_v57 }
 0x1cc   : > { %v1006_v55 = vpop.f32.mrf.mxu0 }
 0x1cd   : > { %v7284_v49 = vadd.f32 %v1006_v55, %v839_v33  ;;  %1148 = vmax.xlane.f32.xlu1 %v1147_v45  ;;  %v842_v33 = vunpack.c.l.bf16 %v801_v57 }
 0x1ce   : > { %v1010_v2 = vpop.f32.mrf.mxu0  ;;  %5320 = vmatmul.mubr.msk.bf16.gmra.mxu0 %vm373_vm0, %v1940_v54 }
 0x1cf   : > { %v1150_v17 = vmax.f32 %v7282_v48, %v7284_v49  ;;  %2157 = vmatprep.mubr.bf16.mxu0 %v10886_v10  ;;  %v7290_v43 = vadd.f32 %v1010_v2, %v840_v40  ;;  %v7301_v2 = vpop.permute.xlu1 %3052 }
 0x1d0   : > { %v1012_v16 = vpop.f32.mrf.mxu0 }
 0x1d1   : > { %v7292_v50 = vadd.f32 %v1012_v16, %v841_v60  ;;  %1151 = vmax.xlane.f32.xlu0 %v1150_v17  ;;  %v803_v60 = vld [vmem:[#allocation2 + $0x58] sm:$0xff] }
 0x1d2   : > { %v1014_v45 = vpop.f32.mrf.mxu0 }
 0x1d3   : > { %v1153_v54 = vmax.f32 %v7290_v43, %v7292_v50  ;;  %v7296_v12 = vadd.f32 %v1014_v45, %v842_v33  ;;  %v847_v45 = vunpack.c.h.bf16 %v803_v60  ;;  %v1944_v9 = vpop.permute.xlu1 %1943 }
 0x1d4   : > { %v1016_v55 = vpop.f32.mrf.mxu0 }
 0x1d5   : > { %v7298_v37 = vadd.f32 %v1016_v55, %v843_v52  ;;  %1154 = vmax.xlane.f32.xlu1 %v1153_v54  ;;  %v846_v52 = vunpack.c.l.bf16 %v803_v60  ;;  %v804_v54 = vld [vmem:[#allocation2 + $0x60] sm:$0xff] }
 0x1d6   : > { %v1020_v40 = vpop.f32.mrf.mxu0  ;;  %5321 = vmatmul.mubr.msk.bf16.gmra.mxu0 %vm373_vm0, %v1942_v5  ;;  %v848_v22 = vunpack.c.l.bf16 %v804_v54 }
 0x1d7   : > { %v1156_v57 = vmax.f32 %v7296_v12, %v7298_v37  ;;  %2167 = vmatprep.mubr.bf16.mxu0 %v10886_v10  ;;  %v7306_v16 = vadd.f32 %v1020_v40, %v844_v29  ;;  %v849_v29 = vunpack.c.h.bf16 %v804_v54 }
 0x1d8   : > { %v1022_v17 = vpop.f32.mrf.mxu0 }
 0x1d9   : > { %v7308_v33 = vadd.f32 %v1022_v17, %v845_v30  ;;  %1157 = vmax.xlane.f32.xlu0 %v1156_v57  ;;  %v805_v30 = vld [vmem:[#allocation2 + $0x68] sm:$0xff] }
 0x1da   : > { %v1024_v53 = vpop.f32.mrf.mxu0 }
 0x1db   : > { %v1159_v5 = vmax.f32 %v7306_v16, %v7308_v33  ;;  %v7312_v14 = vadd.f32 %v1024_v53, %v846_v52  ;;  %v850_v52 = vunpack.c.l.bf16 %v805_v30 }
 0x1dc   : > { %v1026_v55 = vpop.f32.mrf.mxu0 }
 0x1dd   : > { %v7314_v21 = vadd.f32 %v1026_v55, %v847_v45  ;;  %1160 = vmax.xlane.f32.xlu1 %v1159_v5  ;;  %v851_v45 = vunpack.c.h.bf16 %v805_v30  ;;  %v806_v5 = vld [vmem:[#allocation2 + $0x70] sm:$0xff] }
 0x1de   : > { %v1030_v40 = vpop.f32.mrf.mxu0  ;;  %5322 = vmatmul.mubr.msk.bf16.gmra.mxu0 %vm373_vm0, %v1944_v9  ;;  %v852_v11 = vunpack.c.l.bf16 %v806_v5  ;;  %v853_v27 = vunpack.c.h.bf16 %v806_v5 }
 0x1df   : > { %v1162_v60 = vmax.f32 %v7312_v14, %v7314_v21  ;;  %2177 = vmatprep.mubr.bf16.mxu0 %v10886_v10  ;;  %v7320_v17 = vadd.f32 %v1030_v40, %v848_v22 }
 0x1e0   : > { %v1032_v57 = vpop.f32.mrf.mxu0 }
 0x1e1   : > { %v7322_v31 = vadd.f32 %v1032_v57, %v849_v29  ;;  %1163 = vmax.xlane.f32.xlu0 %v1162_v60  ;;  %v807_v29 = vld [vmem:[#allocation2 + $0x78] sm:$0xff] }
 0x1e2   : > { %v1034_v53 = vpop.f32.mrf.mxu0 }
 0x1e3   : > { %v1165_v54 = vmax.f32 %v7320_v17, %v7322_v31  ;;  %v7326_v55 = vadd.f32 %v1034_v53, %v850_v52  ;;  %v854_v52 = vunpack.c.l.bf16 %v807_v29 }
 0x1e4   : > { %v1036_v9 = vpop.f32.mrf.mxu0 }
 0x1e5   : > { %v7328_v28 = vadd.f32 %v1036_v9, %v851_v45  ;;  %1166 = vmax.xlane.f32.xlu1 %v1165_v54  ;;  %v855_v45 = vunpack.c.h.bf16 %v807_v29  ;;  %v808_v54 = vld [vmem:[#allocation2 + $0x80] sm:$0xff]  ;;  %v3023_v9 = vpop.permute.xlu0 %3022 }
 0x1e6   : > { %v1040_v22 = vpop.f32.mrf.mxu0  ;;  %5323 = vmatmul.mubr.msk.bf16.gmra.mxu0 %vm373_vm0, %v1946_v15  ;;  %v856_v8 = vunpack.c.l.bf16 %v808_v54 }
 0x1e7   : > { %v1168_v40 = vmax.f32 %v7326_v55, %v7328_v28  ;;  %3134 = vmatprep.mubr.bf16.mxu0 %v10886_v10  ;;  %v7334_v60 = vadd.f32 %v1040_v22, %v852_v11  ;;  %v857_v11 = vunpack.c.h.bf16 %v808_v54 }
 0x1e8   : > { %v1042_v30 = vpop.f32.mrf.mxu0 }
 0x1e9   : > { %v7336_v57 = vadd.f32 %v1042_v30, %v853_v27  ;;  %1169 = vmax.xlane.f32.xlu0 %v1168_v40  ;;  %v809_v27 = vld [vmem:[#allocation2 + $0x88] sm:$0xff] }
 0x1ea   : > { %v1044_v53 = vpop.f32.mrf.mxu0 }
 0x1eb   : > { %v1171_v5 = vmax.f32 %v7334_v60, %v7336_v57  ;;  %v7340_v25 = vadd.f32 %v1044_v53, %v854_v52  ;;  %v859_v53 = vunpack.c.h.bf16 %v809_v27 }
 0x1ec   : > { %v1046_v15 = vpop.f32.mrf.mxu0 }
 0x1ed   : > { %v7342_v32 = vadd.f32 %v1046_v15, %v855_v45  ;;  %1172 = vmax.xlane.f32.xlu1 %v1171_v5  ;;  %v858_v45 = vunpack.c.l.bf16 %v809_v27  ;;  %v810_v5 = vld [vmem:[#allocation2 + $0x90] sm:$0xff] }
 0x1ee   : > { %v1050_v22 = vpop.f32.mrf.mxu0  ;;  %5324 = vmatmul.mubr.msk.bf16.vlgmr.msra.gmra.mxu0 %vm373_vm0, %v3023_v9 }
 0x1ef   : > { %4206 = vmatpush1.bf16.msra.mxu0 %v6973_v18  ;;  %v1174_v29 = vmax.f32 %v7340_v25, %v7342_v32  ;;  %3144 = vmatprep.mubr.bf16.mxu0 %v10886_v10  ;;  %v7350_v30 = vadd.f32 %v1050_v22, %v856_v8  ;;  %v861_v8 = vunpack.c.h.bf16 %v810_v5  ;;  %v811_v22 = vld [vmem:[#allocation2 + $0x98] sm:$0xff] }
 0x1f0   : > { %4207 = vmatprep.subr.bf16.mxu0 %v6975_v19  ;;  %v1052_v40 = vpop.f32.mrf.mxu0  ;;  %v860_v19 = vunpack.c.l.bf16 %v810_v5  ;;  %v812_v5 = vld [vmem:[#allocation2 + $0xa0] sm:$0xff] }
 0x1f1   : > { %v7352_v52 = vadd.f32 %v1052_v40, %v857_v11  ;;  %1175 = vmax.xlane.f32.xlu0 %v1174_v29 }
 0x1f2   : > { %v1054_v54 = vpop.f32.mrf.mxu0 }
 0x1f3   : > { %10887 = vst [vmem:[#allocation35_spill] sm:$0xff] %v7352_v52  ;;  %4208 = vmatpush1.bf16.msra.mxu0 %v6979_v20  ;;  %v1177_v18 = vmax.f32 %v7350_v30, %v7352_v52  ;;  %v7357_v9 = vadd.f32 %v1054_v54, %v858_v45  ;;  %v862_v45 = vunpack.c.l.bf16 %v811_v22 }
 0x1f4   : > { %v1056_v15 = vpop.f32.mrf.mxu0 }
 0x1f5   : > { %10888 = vst [vmem:[#allocation36_spill] sm:$0xff] %v7357_v9  ;;  %v7359_v0 = vadd.f32 %v1056_v15, %v859_v53  ;;  %1178 = vmax.xlane.f32.xlu1 %v1177_v18  ;;  %v863_v53 = vunpack.c.h.bf16 %v811_v22  ;;  %v3027_v15 = vpop.permute.xlu0 %3026 }
 0x1f6   : > { %v1060_v11 = vpop.f32.mrf.mxu0  ;;  %5325 = vmatmul.mubr.msk.bf16.gmra.mxu0 %vm373_vm0, %v7144_v34 }
 0x1f7   : > { %10889 = vst [vmem:[#allocation37_spill] sm:$0xff] %v7359_v0  ;;  %v1180_v27 = vmax.f32 %v7357_v9, %v7359_v0  ;;  %3154 = vmatprep.mubr.bf16.mxu0 %v10886_v10  ;;  %v7366_v29 = vadd.f32 %v1060_v11, %v860_v19  ;;  %v864_v9 = vunpack.c.l.bf16 %v812_v5  ;;  %v865_v19 = vunpack.c.h.bf16 %v812_v5 }
 0x1f8   : > { %v1062_v20 = vpop.f32.mrf.mxu0 }
 0x1f9   : > { %10890 = vst [vmem:[#allocation38_spill] sm:$0xff] %v7366_v29  ;;  %v7368_v40 = vadd.f32 %v1062_v20, %v861_v8  ;;  %1181 = vmax.xlane.f32.xlu0 %v1180_v27  ;;  %v813_v8 = vld [vmem:[#allocation2 + $0xa8] sm:$0xff] }
 0x1fa   : > { %v1064_v54 = vpop.f32.mrf.mxu0 }
 0x1fb   : > { %10891 = vst [vmem:[#allocation39_spill] sm:$0xff] %v7368_v40  ;;  %v1183_v18 = vmax.f32 %v7366_v29, %v7368_v40  ;;  %v7372_v52 = vadd.f32 %v1064_v54, %v862_v45  ;;  %v866_v45 = vunpack.c.l.bf16 %v813_v8 }
 0x1fc   : > { %v1066_v34 = vpop.f32.mrf.mxu0 }
 0x1fd   : > { %10892 = vst [vmem:[#allocation40_spill] sm:$0xff] %v7372_v52  ;;  %v7374_v0 = vadd.f32 %v1066_v34, %v863_v53  ;;  %1184 = vmax.xlane.f32.xlu1 %v1183_v18  ;;  %v867_v53 = vunpack.c.h.bf16 %v813_v8  ;;  %v814_v18 = vld [vmem:[#allocation2 + $0xb0] sm:$0xff] }
 0x1fe   : > { %v1070_v11 = vpop.f32.mrf.mxu0  ;;  %5326 = vmatmul.mubr.msk.bf16.gmra.mxu0 %vm373_vm0, %v3027_v15 }
 0x1ff   : > { %10893 = vst [vmem:[#allocation41_spill] sm:$0xff] %v7374_v0  ;;  %v1186_v22 = vmax.f32 %v7372_v52, %v7374_v0  ;;  %3164 = vmatprep.mubr.bf16.mxu0 %v10886_v10  ;;  %v7380_v20 = vadd.f32 %v1070_v11, %v864_v9  ;;  %v868_v0 = vunpack.c.l.bf16 %v814_v18  ;;  %v869_v52 = vunpack.c.h.bf16 %v814_v18  ;;  %v816_v18 = vld [vmem:[#allocation2 + $0xc0] sm:$0xff] }
 0x200   : > { %v1072_v27 = vpop.f32.mrf.mxu0 }
 0x201   : > { %v7382_v40 = vadd.f32 %v1072_v27, %v865_v19  ;;  %1187 = vmax.xlane.f32.xlu0 %v1186_v22  ;;  %v815_v19 = vld [vmem:[#allocation2 + $0xb8] sm:$0xff] }
 0x202   : > { %v1074_v54 = vpop.f32.mrf.mxu0 }
 0x203   : > { %10894 = vst [vmem:[#allocation42_spill] sm:$0xff] %v7382_v40  ;;  %v1189_v5 = vmax.f32 %v7380_v20, %v7382_v40  ;;  %v7386_v15 = vadd.f32 %v1074_v54, %v866_v45  ;;  %v870_v45 = vunpack.c.l.bf16 %v815_v19 }
 0x204   : > { %v1076_v34 = vpop.f32.mrf.mxu0 }
 0x205   : > { %10895 = vst [vmem:[#allocation43_spill] sm:$0xff] %v7386_v15  ;;  %v7388_v29 = vadd.f32 %v1076_v34, %v867_v53  ;;  %1190 = vmax.xlane.f32.xlu1 %v1189_v5  ;;  %v871_v53 = vunpack.c.h.bf16 %v815_v19  ;;  %v3031_v34 = vpop.permute.xlu0 %3030 }
 0x206   : > { %v1080_v9 = vpop.f32.mrf.mxu0  ;;  %5327 = vmatmul.mubr.msk.bf16.gmra.mxu0 %vm373_vm0, %v7155_v51 }
 0x207   : > { %10896 = vst [vmem:[#allocation44_spill] sm:$0xff] %v7388_v29  ;;  %v1192_v11 = vmax.f32 %v7386_v15, %v7388_v29  ;;  %3174 = vmatprep.mubr.bf16.mxu0 %v10886_v10  ;;  %v7395_v22 = vadd.f32 %v1080_v9, %v868_v0  ;;  %v872_v15 = vunpack.c.l.bf16 %v816_v18  ;;  %v873_v0 = vunpack.c.h.bf16 %v816_v18 }
 0x208   : > { %v1082_v8 = vpop.f32.mrf.mxu0 }
 0x209   : > { %10897 = vst [vmem:[#allocation45_spill] sm:$0xff] %v7395_v22  ;;  %v7397_v27 = vadd.f32 %v1082_v8, %v869_v52  ;;  %1193 = vmax.xlane.f32.xlu0 %v1192_v11  ;;  %v817_v52 = vld [vmem:[#allocation2 + $0xc8] sm:$0xff] }
 0x20a   : > { %v1084_v54 = vpop.f32.mrf.mxu0 }
 0x20b   : > { %10898 = vst [vmem:[#allocation46_spill] sm:$0xff] %v7397_v27  ;;  %v1195_v5 = vmax.f32 %v7395_v22, %v7397_v27  ;;  %v7401_v40 = vadd.f32 %v1084_v54, %v870_v45  ;;  %v874_v45 = vunpack.c.l.bf16 %v817_v52 }
 0x20c   : > { %v1086_v51 = vpop.f32.mrf.mxu0 }
 0x20d   : > { %10899 = vst [vmem:[#allocation47_spill] sm:$0xff] %v7401_v40  ;;  %v7403_v29 = vadd.f32 %v1086_v51, %v871_v53  ;;  %1196 = vmax.xlane.f32.xlu1 %v1195_v5  ;;  %v875_v53 = vunpack.c.h.bf16 %v817_v52  ;;  %v818_v5 = vld [vmem:[#allocation2 + $0xd0] sm:$0xff] }
 0x20e   : > { %v1090_v9 = vpop.f32.mrf.mxu0  ;;  %5328 = vmatmul.mubr.msk.bf16.gmra.mxu0 %vm373_vm0, %v3031_v34 }
 0x20f   : > { %10900 = vst [vmem:[#allocation48_spill] sm:$0xff] %v7403_v29  ;;  %v1198_v19 = vmax.f32 %v7401_v40, %v7403_v29  ;;  %3184 = vmatprep.mubr.bf16.mxu0 %v10886_v10  ;;  %v7409_v8 = vadd.f32 %v1090_v9, %v872_v15  ;;  %v876_v29 = vunpack.c.l.bf16 %v818_v5  ;;  %v877_v40 = vunpack.c.h.bf16 %v818_v5  ;;  %v820_v5 = vld [vmem:[#allocation2 + $0xe0] sm:$0xff] }
 0x210   : > { %v1092_v11 = vpop.f32.mrf.mxu0 }
 0x211   : > { %v7411_v27 = vadd.f32 %v1092_v11, %v873_v0  ;;  %1199 = vmax.xlane.f32.xlu0 %v1198_v19  ;;  %v819_v0 = vld [vmem:[#allocation2 + $0xd8] sm:$0xff] }
 0x212   : > { %v1094_v54 = vpop.f32.mrf.mxu0 }
 0x213   : > { %10901 = vst [vmem:[#allocation49_spill] sm:$0xff] %v7411_v27  ;;  %v1201_v18 = vmax.f32 %v7409_v8, %v7411_v27  ;;  %v7415_v34 = vadd.f32 %v1094_v54, %v874_v45  ;;  %v878_v45 = vunpack.c.l.bf16 %v819_v0 }
 0x214   : > { %v1096_v51 = vpop.f32.mrf.mxu0 }
 0x215   : > { %10902 = vst [vmem:[#allocation50_spill] sm:$0xff] %v7415_v34  ;;  %v7417_v22 = vadd.f32 %v1096_v51, %v875_v53  ;;  %1202 = vmax.xlane.f32.xlu1 %v1201_v18  ;;  %v879_v53 = vunpack.c.h.bf16 %v819_v0  ;;  %v3035_v51 = vpop.permute.xlu0 %3034 }
 0x216   : > { %v1100_v15 = vpop.f32.mrf.mxu0  ;;  %5329 = vmatmul.mubr.msk.bf16.gmra.mxu0 %vm373_vm0, %v7179_v13 }
 0x217   : > { %10903 = vst [vmem:[#allocation51_spill] sm:$0xff] %v7417_v22  ;;  %v1204_v9 = vmax.f32 %v7415_v34, %v7417_v22  ;;  %3194 = vmatprep.mubr.bf16.mxu0 %v10886_v10  ;;  %v7424_v19 = vadd.f32 %v1100_v15, %v876_v29  ;;  %v880_v34 = vunpack.c.l.bf16 %v820_v5  ;;  %v881_v29 = vunpack.c.h.bf16 %v820_v5 }
 0x218   : > { %v1102_v52 = vpop.f32.mrf.mxu0 }
 0x219   : > { %10904 = vst [vmem:[#allocation52_spill] sm:$0xff] %v7424_v19  ;;  %v7426_v11 = vadd.f32 %v1102_v52, %v877_v40  ;;  %1205 = vmax.xlane.f32.xlu0 %v1204_v9  ;;  %v821_v40 = vld [vmem:[#allocation2 + $0xe8] sm:$0xff] }
 0x21a   : > { %v1104_v54 = vpop.f32.mrf.mxu0 }
 0x21b   : > { %10905 = vst [vmem:[#allocation53_spill] sm:$0xff] %v7426_v11  ;;  %v1207_v18 = vmax.f32 %v7424_v19, %v7426_v11  ;;  %v7430_v27 = vadd.f32 %v1104_v54, %v878_v45  ;;  %v882_v45 = vunpack.c.l.bf16 %v821_v40 }
 0x21c   : > { %v1106_v13 = vpop.f32.mrf.mxu0 }
 0x21d   : > { %10906 = vst [vmem:[#allocation54_spill] sm:$0xff] %v7430_v27  ;;  %v7432_v22 = vadd.f32 %v1106_v13, %v879_v53  ;;  %1208 = vmax.xlane.f32.xlu1 %v1207_v18  ;;  %v883_v53 = vunpack.c.h.bf16 %v821_v40  ;;  %v822_v18 = vld [vmem:[#allocation2 + $0xf0] sm:$0xff] }
 0x21e   : > { %v1110_v15 = vpop.f32.mrf.mxu0  ;;  %5330 = vmatmul.mubr.msk.bf16.gmra.mxu0 %vm373_vm0, %v3035_v51 }
 0x21f   : > { %10907 = vst [vmem:[#allocation55_spill] sm:$0xff] %v7432_v22  ;;  %v1210_v0 = vmax.f32 %v7430_v27, %v7432_v22  ;;  %3204 = vmatprep.mubr.bf16.mxu0 %v10886_v10  ;;  %v7438_v52 = vadd.f32 %v1110_v15, %v880_v34  ;;  %v884_v22 = vunpack.c.l.bf16 %v822_v18  ;;  %v885_v27 = vunpack.c.h.bf16 %v822_v18  ;;  %v1803_v18 = vld [vmem:[#allocation2 + $0x100] sm:$0xff] }
 0x220   : > { %v1112_v9 = vpop.f32.mrf.mxu0 }
 0x221   : > { %v7440_v11 = vadd.f32 %v1112_v9, %v881_v29  ;;  %1211 = vmax.xlane.f32.xlu0 %v1210_v0  ;;  %v823_v29 = vld [vmem:[#allocation2 + $0xf8] sm:$0xff] }
 0x222   : > { %v1114_v54 = vpop.f32.mrf.mxu0 }
 0x223   : > { %10908 = vst [vmem:[#allocation56_spill] sm:$0xff] %v7440_v11  ;;  %v1213_v5 = vmax.f32 %v7438_v52, %v7440_v11  ;;  %v7444_v51 = vadd.f32 %v1114_v54, %v882_v45  ;;  %v886_v45 = vunpack.c.l.bf16 %v823_v29 }
 0x224   : > { %v1116_v13 = vpop.f32.mrf.mxu0 }
 0x225   : > { %10909 = vst [vmem:[#allocation57_spill] sm:$0xff] %v7444_v51  ;;  %v7446_v19 = vadd.f32 %v1116_v13, %v883_v53  ;;  %1214 = vmax.xlane.f32.xlu1 %v1213_v5  ;;  %v887_v53 = vunpack.c.h.bf16 %v823_v29  ;;  %v3039_v13 = vpop.permute.xlu0 %3038 }
 0x226   : > { %v1120_v34 = vpop.f32.mrf.mxu0  ;;  %5331 = vmatmul.mubr.msk.bf16.gmra.mxu0 %vm373_vm0, %v7212_v39 }
 0x227   : > { %10910 = vst [vmem:[#allocation58_spill] sm:$0xff] %v7446_v19  ;;  %v1216_v15 = vmax.f32 %v7444_v51, %v7446_v19  ;;  %3214 = vmatprep.mubr.bf16.mxu0 %v10886_v10  ;;  %v7453_v0 = vadd.f32 %v1120_v34, %v884_v22  ;;  %v1835_v51 = vunpack.c.l.bf16 %v1803_v18  ;;  %v1836_v22 = vunpack.c.h.bf16 %v1803_v18 }
 0x228   : > { %v1122_v40 = vpop.f32.mrf.mxu0 }
 0x229   : > { %v7455_v9 = vadd.f32 %v1122_v40, %v885_v27  ;;  %1217 = vmax.xlane.f32.xlu0 %v1216_v15  ;;  %v3043_v18 = vpop.permute.xlu0 %3042 }
 0x22a   : > { %v1124_v54 = vpop.f32.mrf.mxu0 }
 0x22b   : > { %v1219_v5 = vmax.f32 %v7453_v0, %v7455_v9  ;;  %v7459_v11 = vadd.f32 %v1124_v54, %v886_v45 }
 0x22c   : > { %v1126_v39 = vpop.f32.mrf.mxu0 }
 0x22d   : > { %10911 = vst [vmem:[#allocation59_spill] sm:$0xff] %v7459_v11  ;;  %v7461_v19 = vadd.f32 %v1126_v39, %v887_v53  ;;  %1220 = vmax.xlane.f32.xlu1 %v1219_v5 }
 0x22e   : > { %v2029_v34 = vpop.f32.mrf.mxu0  ;;  %5332 = vmatmul.mubr.msk.bf16.gmra.mxu0 %vm373_vm0, %v3039_v13 }
 0x22f   : > { %10912 = vst [vmem:[#allocation60_spill] sm:$0xff] %v7461_v19  ;;  %v1222_v27 = vmax.f32 %v7459_v11, %v7461_v19  ;;  %3224 = vmatprep.mubr.bf16.mxu0 %v10886_v10  ;;  %v7467_v15 = vadd.f32 %v2029_v34, %v1835_v51  ;;  %v3047_v51 = vpop.permute.xlu0 %3046 }
 0x230   : > { %v2031_v29 = vpop.f32.mrf.mxu0 }
 0x231   : > { %10913 = vst [vmem:[#allocation61_spill] sm:$0xff] %v7467_v15  ;;  %v7469_v40 = vadd.f32 %v2031_v29, %v1836_v22  ;;  %1223 = vmax.xlane.f32.xlu0 %v1222_v27 }
 0x232   : > { %v7471_v45 = vpop.f32.mrf.mxu0 }
 0x233   : > { %10914 = vst [vmem:[#allocation62_spill] sm:$0xff] %v7469_v40  ;;  %v2188_v53 = vmax.f32 %v7467_v15, %v7469_v40  ;;  %v7488_v27 = vpop.permute.xlu0 %3050 }
 0x234   : > { %v7475_v54 = vpop.f32.mrf.mxu0 }
 0x235   : > { %2189 = vmax.xlane.f32.xlu1 %v2188_v53 }
 0x236   : > { %5333 = vmatmul.mubr.msk.bf16.gmra.mxu0 %vm373_vm0, %v7225_v35  ;;  %v7480_v5 = vpop.f32.mrf.mxu0 }
 0x237   : > { %3234 = vmatprep.mubr.bf16.mxu0 %v10886_v10 }
 0x238   : > { %v7482_v39 = vpop.f32.mrf.mxu0 }
 0x23a   : > { %v7490_v53 = vpop.f32.mrf.mxu0 }
 0x23e   : > { %v1131_v13 = vpop.xlane.xlu1 %1130  ;;  %5334 = vmatmul.mubr.msk.bf16.gmra.mxu0 %vm373_vm0, %v3043_v18 }
 0x23f   : > { %v1225_v22 = vsub.f32 %v7230_v46, %v1131_v13  ;;  %v1226_v34 = vsub.f32 %v7232_v47, %v1131_v13  ;;  %3244 = vmatprep.mubr.bf16.mxu0 %v10886_v10  ;;  %v7494_v46 = vpop.f32.mrf.mxu0 }
 0x241   : > { %v1289_v35 = vmul.f32 1.442695, %v1225_v22  ;;  %v1291_v29 = vmul.f32 1.442695, %v1226_v34 }
 0x242   : > { %v1134_v40 = vpop.xlane.xlu1 %1133 }
 0x243   : > { %5998 = vpow2.f32 %v1289_v35  ;;  %v1227_v15 = vsub.f32 %v7236_v61, %v1134_v40  ;;  %v1228_v19 = vsub.f32 %v7238_v63, %v1134_v40 }
 0x244   : > { %6000 = vpow2.f32 %v1291_v29 }
 0x245   : > { %v1293_v18 = vmul.f32 1.442695, %v1227_v15  ;;  %v1295_v11 = vmul.f32 1.442695, %v1228_v19  ;;  %v7505_v19 = vpop.f32.mrf.mxu0 }
 0x246   : > { %v1137_v47 = vpop.xlane.xlu0 %1136  ;;  %5335 = vmatmul.mubr.msk.bf16.gmra.mxu0 %vm373_vm0, %v7241_v7  ;;  %2650 = vrot.lane.b32.xlu1 %v7163_v62, %s6808_s15 }
 0x247   : > { %6002 = vpow2.f32 %v1293_v18  ;;  %v1229_v13 = vsub.f32 %v7246_v38, %v1137_v47  ;;  %v1230_v22 = vsub.f32 %v7248_v41, %v1137_v47  ;;  %4113 = vrot.lane.b32.xlu0 %v6989_v26, %s6810_s17  ;;  %3254 = vmatprep.mubr.bf16.mxu0 %v10886_v10  ;;  %v7511_v26 = vpop.f32.mrf.mxu0 }
 0x248   : > { %6004 = vpow2.f32 %v1295_v11 }
 0x249   : > { %v1297_v61 = vmul.f32 1.442695, %v1229_v13  ;;  %v1299_v63 = vmul.f32 1.442695, %v1230_v22  ;;  %v7519_v47 = vpop.f32.mrf.mxu0 }
 0x24a   : > { %v1140_v7 = vpop.xlane.xlu1 %1139  ;;  %2634 = vrot.lane.b32.xlu1 %v7161_v59, %s6808_s15 }
 0x24b   : > { %6006 = vpow2.f32 %v1297_v61  ;;  %v1231_v38 = vsub.f32 %v7252_v56, %v1140_v7  ;;  %v1232_v41 = vsub.f32 %v7254_v58, %v1140_v7 }
 0x24c   : > { %6008 = vpow2.f32 %v1299_v63 }
 0x24d   : > { %v1301_v15 = vmul.f32 1.442695, %v1231_v38  ;;  %v1303_v40 = vmul.f32 1.442695, %v1232_v41  ;;  %v7527_v38 = vpop.f32.mrf.mxu0 }
 0x24e   : > { %v1143_v34 = vpop.xlane.xlu1 %1142  ;;  %5336 = vmatmul.mubr.msk.bf16.gmra.mxu0 %vm373_vm0, %v3047_v51  ;;  %4115 = vrot.lane.b32.xlu1 %v6987_v24, %s6810_s17 }
 0x24f   : > { %6010 = vpow2.f32 %v1301_v15  ;;  %v1233_v11 = vsub.f32 %v7260_v4, %v1143_v34  ;;  %v1234_v35 = vsub.f32 %v7262_v42, %v1143_v34  ;;  %3264 = vmatprep.mubr.bf16.mxu0 %v10886_v10 }
 0x250   : > { %v5999_v56 = vpop.eup %5998  ;;  %6012 = vpow2.f32 %v1303_v40 }
 0x251   : > { %v6001_v58 = vpop.eup %6000  ;;  %v1305_v29 = vmul.f32 1.442695, %v1233_v11  ;;  %v1307_v18 = vmul.f32 1.442695, %v1234_v35 }
 0x252   : > { %v1146_v13 = vpop.xlane.xlu0 %1145  ;;  %2648 = vrot.lane.b32.xlu1 %v7170_v6, %s6808_s15  ;;  %v7523_v51 = vadd.f32 %v6001_v58, %v5999_v56 }
 0x253   : > { %6014 = vpow2.f32 %v1305_v29  ;;  %v1235_v24 = vsub.f32 %v7266_v3, %v1146_v13  ;;  %v1236_v4 = vsub.f32 %v7268_v1, %v1146_v13  ;;  %v7536_v29 = vpop.f32.mrf.mxu0 }
 0x254   : > { %10915 = vst [vmem:[#allocation63_spill] sm:$0xff] %v7523_v51  ;;  %v6003_v42 = vpop.eup %6002  ;;  %6016 = vpow2.f32 %v1307_v18  ;;  %v1804_v18 = vld [vmem:[#allocation2 + $0x108] sm:$0xff] }
 0x255   : > { %v6005_v22 = vpop.eup %6004  ;;  %v1309_v61 = vmul.f32 1.442695, %v1235_v24  ;;  %v1311_v63 = vmul.f32 1.442695, %v1236_v4  ;;  %v1513_v7 = vpack.c.bf16 %v6003_v42, %v5999_v56  ;;  %v1838_v24 = vunpack.c.h.bf16 %v1804_v18 }
 0x256   : > { %v1149_v41 = vpop.xlane.xlu1 %1148  ;;  %5337 = vmatmul.mubr.msk.bf16.gmra.mxu0 %vm373_vm0, %v7271_v23  ;;  %v1514_v15 = vpack.c.bf16 %v6005_v22, %v6001_v58  ;;  %v7531_v40 = vadd.f32 %v6005_v22, %v6003_v42 }
 0x257   : > { %6018 = vpow2.f32 %v1309_v61  ;;  %v1237_v3 = vsub.f32 %v7276_v36, %v1149_v41  ;;  %v1238_v1 = vsub.f32 %v7278_v44, %v1149_v41  ;;  %3274 = vmatprep.mubr.bf16.mxu0 %v10886_v10 }
 0x258   : > { %10916 = vst [vmem:[#allocation64_spill] sm:$0xff] %v7531_v40  ;;  %v6007_v34 = vpop.eup %6006  ;;  %6020 = vpow2.f32 %v1311_v63  ;;  %1577 = vmatprep.mubr.bf16.mxu1 %v1514_v15  ;;  %v1837_v63 = vunpack.c.l.bf16 %v1804_v18 }
 0x259   : > { %v6009_v11 = vpop.eup %6008  ;;  %v1313_v35 = vmul.f32 1.442695, %v1237_v3  ;;  %v1315_v56 = vmul.f32 1.442695, %v1238_v1  ;;  %1578 = vmatmul.mubr.bf16.vlgmr.msra.gmra.mxu1 %v1513_v7  ;;  %v7542_v7 = vpop.f32.mrf.mxu0 }
 0x25a   : > { %v1152_v23 = vpop.xlane.xlu0 %1151  ;;  %v7538_v58 = vadd.f32 %v6009_v11, %v6007_v34 }
 0x25b   : > { %6022 = vpow2.f32 %v1313_v35  ;;  %v1239_v36 = vsub.f32 %v7282_v48, %v1152_v23  ;;  %v1240_v44 = vsub.f32 %v7284_v49, %v1152_v23 }
 0x25c   : > { %10917 = vst [vmem:[#allocation65_spill] sm:$0xff] %v7538_v58  ;;  %v6011_v13 = vpop.eup %6010  ;;  %6024 = vpow2.f32 %v1315_v56 }
 0x25d   : > { %v6013_v4 = vpop.eup %6012  ;;  %v1317_v42 = vmul.f32 1.442695, %v1239_v36  ;;  %v1319_v22 = vmul.f32 1.442695, %v1240_v44  ;;  %v1515_v61 = vpack.c.bf16 %v6011_v13, %v6007_v34  ;;  %v7552_v34 = vadd.f32 %v7475_v54, %v1838_v24 }
 0x25e   : > { %v1155_v41 = vpop.xlane.xlu1 %1154  ;;  %5338 = vmatmul.mubr.msk.bf16.gmra.mxu0 %vm373_vm0, %v7488_v27  ;;  %v1516_v15 = vpack.c.bf16 %v6013_v4, %v6009_v11  ;;  %v7546_v3 = vadd.f32 %v6013_v4, %v6011_v13  ;;  %v7555_v27 = vadd.f32 %v7471_v45, %v1837_v63  ;;  %v7557_v11 = vpop.f32.mrf.mxu0 }
 0x25f   : > { %6026 = vpow2.f32 %v1317_v42  ;;  %v1241_v48 = vsub.f32 %v7290_v43, %v1155_v41  ;;  %v1242_v49 = vsub.f32 %v7292_v50, %v1155_v41  ;;  %3284 = vmatprep.mubr.bf16.mxu0 %v10886_v10 }
 0x260   : > { %10918 = vst [vmem:[#allocation66_spill] sm:$0xff] %v7546_v3  ;;  %v6015_v1 = vpop.eup %6014  ;;  %6028 = vpow2.f32 %v1319_v22  ;;  %1585 = vmatprep.mubr.bf16.mxu1 %v1516_v15  ;;  %v2191_v44 = vmax.f32 %v7555_v27, %v7552_v34  ;;  %v7565_v42 = vpop.f32.mrf.mxu0 }
 0x261   : > { %v6017_v35 = vpop.eup %6016  ;;  %v1321_v56 = vmul.f32 1.442695, %v1241_v48  ;;  %v1323_v23 = vmul.f32 1.442695, %v1242_v49  ;;  %1586 = vmatmul.mubr.bf16.gmra.mxu1 %v1515_v61 }
 0x262   : > { %v1158_v43 = vpop.xlane.xlu0 %1157  ;;  %v7559_v18 = vadd.f32 %v6017_v35, %v6015_v1 }
 0x263   : > { %6030 = vpow2.f32 %v1321_v56  ;;  %v1243_v50 = vsub.f32 %v7296_v12, %v1158_v43  ;;  %v1244_v54 = vsub.f32 %v7298_v37, %v1158_v43 }
 0x264   : > { %10919 = vst [vmem:[#allocation67_spill] sm:$0xff] %v7559_v18  ;;  %v6019_v36 = vpop.eup %6018  ;;  %6032 = vpow2.f32 %v1323_v23 }
 0x265   : > { %v6021_v13 = vpop.eup %6020  ;;  %v1325_v24 = vmul.f32 1.442695, %v1243_v50  ;;  %v1327_v4 = vmul.f32 1.442695, %v1244_v54  ;;  %v1517_v45 = vpack.c.bf16 %v6019_v36, %v6015_v1 }
 0x266   : > { %v1161_v22 = vpop.xlane.xlu1 %1160  ;;  %5339 = vmatmul.mubr.msk.bf16.gmra.mxu0 %vm373_vm0, %v7301_v2  ;;  %2192 = vmax.xlane.f32.xlu0 %v2191_v44  ;;  %v1518_v61 = vpack.c.bf16 %v6021_v13, %v6017_v35  ;;  %v7569_v12 = vadd.f32 %v6021_v13, %v6019_v36  ;;  %v1805_v35 = vld [vmem:[#allocation2 + $0x110] sm:$0xff] }
 0x267   : > { %6034 = vpow2.f32 %v1325_v24  ;;  %v1245_v37 = vsub.f32 %v7306_v16, %v1161_v22  ;;  %v1246_v63 = vsub.f32 %v7308_v33, %v1161_v22  ;;  %4225 = vmatprep.mubr.bf16.mxu0 %v10886_v10  ;;  %v1840_v33 = vunpack.c.h.bf16 %v1805_v35 }
 0x268   : > { %10920 = vst [vmem:[#allocation68_spill] sm:$0xff] %v7569_v12  ;;  %v6023_v41 = vpop.eup %6022  ;;  %6036 = vpow2.f32 %v1327_v4  ;;  %1593 = vmatprep.mubr.bf16.mxu1 %v1518_v61  ;;  %v1839_v44 = vunpack.c.l.bf16 %v1805_v35 }
 0x269   : > { %v6025_v15 = vpop.eup %6024  ;;  %v1329_v48 = vmul.f32 1.442695, %v1245_v37  ;;  %v1331_v49 = vmul.f32 1.442695, %v1246_v63  ;;  %1594 = vmatmul.mubr.bf16.gmra.mxu1 %v1517_v45 }
 0x26a   : > { %v1164_v1 = vpop.xlane.xlu0 %1163  ;;  %v7574_v2 = vadd.f32 %v6025_v15, %v6023_v41 }
 0x26b   : > { %6038 = vpow2.f32 %v1329_v48  ;;  %v1247_v56 = vsub.f32 %v7312_v14, %v1164_v1  ;;  %v1248_v16 = vsub.f32 %v7314_v21, %v1164_v1  ;;  %v7583_v21 = vadd.f32 %v7482_v39, %v1840_v33 }
 0x26c   : > { %10921 = vst [vmem:[#allocation69_spill] sm:$0xff] %v7574_v2  ;;  %v6027_v23 = vpop.eup %6026  ;;  %6040 = vpow2.f32 %v1331_v49 }
 0x26d   : > { %v6029_v43 = vpop.eup %6028  ;;  %v1333_v50 = vmul.f32 1.442695, %v1247_v56  ;;  %v1335_v54 = vmul.f32 1.442695, %v1248_v16  ;;  %v1519_v36 = vpack.c.bf16 %v6027_v23, %v6023_v41  ;;  %v7586_v41 = vadd.f32 %v7480_v5, %v1839_v44 }
 0x26e   : > { %v1167_v13 = vpop.xlane.xlu1 %1166  ;;  %v1520_v24 = vpack.c.bf16 %v6029_v43, %v6025_v15  ;;  %v7578_v4 = vadd.f32 %v6029_v43, %v6027_v23 }
 0x26f   : > { %6042 = vpow2.f32 %v1333_v50  ;;  %v1249_v45 = vsub.f32 %v7320_v17, %v1167_v13  ;;  %v1250_v22 = vsub.f32 %v7322_v31, %v1167_v13  ;;  %v2194_v39 = vmax.f32 %v7586_v41, %v7583_v21 }
 0x270   : > { %10922 = vst [vmem:[#allocation70_spill] sm:$0xff] %v7578_v4  ;;  %v6031_v14 = vpop.eup %6030  ;;  %6044 = vpow2.f32 %v1335_v54  ;;  %1601 = vmatprep.mubr.bf16.mxu1 %v1520_v24 }
 0x271   : > { %v6033_v61 = vpop.eup %6032  ;;  %v1337_v37 = vmul.f32 1.442695, %v1249_v45  ;;  %v1339_v63 = vmul.f32 1.442695, %v1250_v22  ;;  %1602 = vmatmul.mubr.bf16.gmra.mxu1 %v1519_v36 }
 0x272   : > { %v1170_v15 = vpop.xlane.xlu0 %1169  ;;  %v7588_v48 = vadd.f32 %v6033_v61, %v6031_v14 }
 0x273   : > { %6046 = vpow2.f32 %v1337_v37  ;;  %v1251_v17 = vsub.f32 %v7326_v55, %v1170_v15  ;;  %v1252_v31 = vsub.f32 %v7328_v28, %v1170_v15 }
 0x274   : > { %10923 = vst [vmem:[#allocation71_spill] sm:$0xff] %v7588_v48  ;;  %v6035_v49 = vpop.eup %6034  ;;  %6048 = vpow2.f32 %v1339_v63 }
 0x275   : > { %v6037_v1 = vpop.eup %6036  ;;  %v1341_v35 = vmul.f32 1.442695, %v1251_v17  ;;  %v1343_v56 = vmul.f32 1.442695, %v1252_v31  ;;  %v1521_v16 = vpack.c.bf16 %v6035_v49, %v6031_v14 }
 0x276   : > { %v1173_v23 = vpop.xlane.xlu1 %1172  ;;  %2195 = vmax.xlane.f32.xlu1 %v2194_v39  ;;  %v1522_v5 = vpack.c.bf16 %v6037_v1, %v6033_v61  ;;  %v7594_v33 = vadd.f32 %v6037_v1, %v6035_v49  ;;  %v10928_v49 = vld [vmem:[#allocation35_spill] sm:$0xff] }
 0x277   : > { %6050 = vpow2.f32 %v1341_v35  ;;  %v1253_v43 = vsub.f32 %v7334_v60, %v1173_v23  ;;  %v1254_v55 = vsub.f32 %v7336_v57, %v1173_v23  ;;  %v10926_v60 = vld [vmem:[#allocation23_spill] sm:$0xff]  ;;  %v10930_v23 = vld [vmem:[#allocation36_spill] sm:$0xff] }
 0x278   : > { %10924 = vst [vmem:[#allocation72_spill] sm:$0xff] %v7594_v33  ;;  %v6039_v28 = vpop.eup %6038  ;;  %6052 = vpow2.f32 %v1343_v56  ;;  %1609 = vmatprep.mubr.bf16.mxu1 %v1522_v5 }
 0x279   : > { %v6041_v50 = vpop.eup %6040  ;;  %v1345_v54 = vmul.f32 1.442695, %v1253_v43  ;;  %v1347_v36 = vmul.f32 1.442695, %v1254_v55  ;;  %1610 = vmatmul.mubr.bf16.gmra.mxu1 %v1521_v16  ;;  %v10931_v43 = vld [vmem:[#allocation37_spill] sm:$0xff] }
 0x27a   : > { %v1176_v44 = vpop.xlane.xlu0 %1175  ;;  %v7598_v13 = vadd.f32 %v6041_v50, %v6039_v28 }
 0x27b   : > { %6054 = vpow2.f32 %v1345_v54  ;;  %v1255_v24 = vsub.f32 %v7340_v25, %v1176_v44  ;;  %v1256_v45 = vsub.f32 %v7342_v32, %v1176_v44 }
 0x27c   : > { %10925 = vst [vmem:[#allocation73_spill] sm:$0xff] %v7598_v13  ;;  %v6043_v22 = vpop.eup %6042  ;;  %6056 = vpow2.f32 %v1347_v36  ;;  %2632 = vrot.lane.b32.xlu0 %v10926_v60, %s6808_s15 }
 0x27d   : > { %v6045_v57 = vpop.eup %6044  ;;  %v1349_v14 = vmul.f32 1.442695, %v1255_v24  ;;  %v1351_v61 = vmul.f32 1.442695, %v1256_v45  ;;  %v1523_v37 = vpack.c.bf16 %v6043_v22, %v6039_v28 }
 0x27e   : > { %v1179_v63 = vpop.xlane.xlu1 %1178  ;;  %v1524_v15 = vpack.c.bf16 %v6045_v57, %v6041_v50  ;;  %v7604_v17 = vadd.f32 %v6045_v57, %v6043_v22  ;;  %v10933_v22 = vld [vmem:[#allocation38_spill] sm:$0xff] }
 0x27f   : > { %6058 = vpow2.f32 %v1349_v14  ;;  %v1257_v31 = vsub.f32 %v7350_v30, %v1179_v63  ;;  %v1258_v25 = vsub.f32 %v10928_v49, %v1179_v63  ;;  %v10934_v14 = vld [vmem:[#allocation39_spill] sm:$0xff] }
 0x280   : > { %10927 = vst [vmem:[#allocation74_spill] sm:$0xff] %v7604_v17  ;;  %v6047_v39 = vpop.eup %6046  ;;  %6060 = vpow2.f32 %v1351_v61  ;;  %1617 = vmatprep.mubr.bf16.mxu1 %v1524_v15 }
 0x281   : > { %v6049_v32 = vpop.eup %6048  ;;  %v1353_v1 = vmul.f32 1.442695, %v1257_v31  ;;  %v1355_v35 = vmul.f32 1.442695, %v1258_v25  ;;  %1618 = vmatmul.mubr.bf16.gmra.mxu1 %v1523_v37  ;;  %v10935_v37 = vld [vmem:[#allocation25_spill] sm:$0xff] }
 0x282   : > { %v1182_v56 = vpop.xlane.xlu0 %1181  ;;  %v7608_v16 = vadd.f32 %v6049_v32, %v6047_v39 }
 0x283   : > { %6062 = vpow2.f32 %v1353_v1  ;;  %v1259_v5 = vsub.f32 %v10930_v23, %v1182_v56  ;;  %v1260_v55 = vsub.f32 %v10931_v43, %v1182_v56  ;;  %v10939_v23 = vld [vmem:[#allocation6_spill] sm:$0xff] }
 0x284   : > { %10929 = vst [vmem:[#allocation35_spill] sm:$0xff] %v7608_v16  ;;  %v6051_v28 = vpop.eup %6050  ;;  %6064 = vpow2.f32 %v1355_v35  ;;  %v10938_v35 = vld [vmem:[#allocation41_spill] sm:$0xff]  ;;  %v10976_v16 = vld [vmem:[#allocation62_spill] sm:$0xff] }
 0x285   : > { %v6053_v30 = vpop.eup %6052  ;;  %v1357_v50 = vmul.f32 1.442695, %v1259_v5  ;;  %v1359_v54 = vmul.f32 1.442695, %v1260_v55  ;;  %v1525_v36 = vpack.c.bf16 %v6051_v28, %v6047_v39 }
 0x286   : > { %v1185_v44 = vpop.xlane.xlu1 %1184  ;;  %v1526_v24 = vpack.c.bf16 %v6053_v30, %v6049_v32  ;;  %v7612_v45 = vadd.f32 %v6053_v30, %v6051_v28  ;;  %v10937_v32 = vld [vmem:[#allocation40_spill] sm:$0xff] }
 0x287   : > { %6066 = vpow2.f32 %v1357_v50  ;;  %v1261_v57 = vsub.f32 %v10933_v22, %v1185_v44  ;;  %v1262_v61 = vsub.f32 %v10934_v14, %v1185_v44  ;;  %2646 = vrot.lane.b32.xlu1 %v10935_v37, %s6808_s15 }
 0x288   : > { %10932 = vst [vmem:[#allocation36_spill] sm:$0xff] %v7612_v45  ;;  %v6055_v63 = vpop.eup %6054  ;;  %6068 = vpow2.f32 %v1359_v54  ;;  %1625 = vmatprep.mubr.bf16.mxu1 %v1526_v24  ;;  %v10941_v24 = vld [vmem:[#allocation42_spill] sm:$0xff] }
 0x289   : > { %v6057_v15 = vpop.eup %6056  ;;  %v1361_v31 = vmul.f32 1.442695, %v1261_v57  ;;  %v1363_v49 = vmul.f32 1.442695, %v1262_v61  ;;  %1626 = vmatmul.mubr.bf16.gmra.mxu1 %v1525_v36  ;;  %v10942_v57 = vld [vmem:[#allocation27_spill] sm:$0xff]  ;;  %v1806_v61 = vld [vmem:[#allocation2 + $0x118] sm:$0xff] }
 0x28a   : > { %v1188_v25 = vpop.xlane.xlu0 %1187  ;;  %v7618_v39 = vadd.f32 %v6057_v15, %v6055_v63 }
 0x28b   : > { %6070 = vpow2.f32 %v1361_v31  ;;  %v1263_v1 = vsub.f32 %v10937_v32, %v1188_v25  ;;  %v1264_v56 = vsub.f32 %v10938_v35, %v1188_v25  ;;  %4117 = vrot.lane.b32.xlu1 %v10939_v23, %s6810_s17 }
 0x28c   : > { %10936 = vst [vmem:[#allocation37_spill] sm:$0xff] %v7618_v39  ;;  %v6059_v5 = vpop.eup %6058  ;;  %6072 = vpow2.f32 %v1363_v49  ;;  %v1842_v49 = vunpack.c.h.bf16 %v1806_v61 }
 0x28d   : > { %v6061_v43 = vpop.eup %6060  ;;  %v1365_v55 = vmul.f32 1.442695, %v1263_v1  ;;  %v1367_v28 = vmul.f32 1.442695, %v1264_v56  ;;  %v1527_v30 = vpack.c.bf16 %v6059_v5, %v6055_v63  ;;  %v1841_v1 = vunpack.c.l.bf16 %v1806_v61  ;;  %v10945_v56 = vld [vmem:[#allocation44_spill] sm:$0xff] }
 0x28e   : > { %v1191_v50 = vpop.xlane.xlu1 %1190  ;;  %v1528_v54 = vpack.c.bf16 %v6061_v43, %v6057_v15  ;;  %v7624_v36 = vadd.f32 %v6061_v43, %v6059_v5  ;;  %v10946_v5 = vld [vmem:[#allocation28_spill] sm:$0xff] }
 0x28f   : > { %6074 = vpow2.f32 %v1365_v55  ;;  %v1265_v44 = vsub.f32 %v7380_v20, %v1191_v50  ;;  %v1266_v22 = vsub.f32 %v10941_v24, %v1191_v50  ;;  %2644 = vrot.lane.b32.xlu1 %v10942_v57, %s6808_s15  ;;  %v10944_v20 = vld [vmem:[#allocation43_spill] sm:$0xff]  ;;  %v7642_v61 = vadd.f32 %v7490_v53, %v1841_v1 }
 0x290   : > { %10940 = vst [vmem:[#allocation38_spill] sm:$0xff] %v7624_v36  ;;  %v6063_v14 = vpop.eup %6062  ;;  %6076 = vpow2.f32 %v1367_v28  ;;  %1633 = vmatprep.mubr.bf16.mxu1 %v1528_v54  ;;  %v7637_v28 = vadd.f32 %v7494_v46, %v1842_v49  ;;  %v10951_v53 = vld [vmem:[#allocation47_spill] sm:$0xff]  ;;  %v1811_v36 = vld [vmem:[#allocation2 + $0x140] sm:$0xff] }
 0x291   : > { %v6065_v31 = vpop.eup %6064  ;;  %v1369_v25 = vmul.f32 1.442695, %v1265_v44  ;;  %v1371_v63 = vmul.f32 1.442695, %v1266_v22  ;;  %1634 = vmatmul.mubr.bf16.gmra.mxu1 %v1527_v30 }
 0x292   : > { %v1194_v15 = vpop.xlane.xlu0 %1193  ;;  %v7630_v32 = vadd.f32 %v6065_v31, %v6063_v14 }
 0x293   : > { %6078 = vpow2.f32 %v1369_v25  ;;  %v1267_v35 = vsub.f32 %v10944_v20, %v1194_v15  ;;  %v1268_v23 = vsub.f32 %v10945_v56, %v1194_v15  ;;  %2628 = vrot.lane.b32.xlu1 %v10946_v5, %s6808_s15  ;;  %v10948_v25 = vld [vmem:[#allocation45_spill] sm:$0xff]  ;;  %v10949_v20 = vld [vmem:[#allocation46_spill] sm:$0xff] }
 0x294   : > { %10943 = vst [vmem:[#allocation39_spill] sm:$0xff] %v7630_v32  ;;  %v6067_v43 = vpop.eup %6066  ;;  %6080 = vpow2.f32 %v1371_v63 }
 0x295   : > { %v6069_v55 = vpop.eup %6068  ;;  %v1373_v50 = vmul.f32 1.442695, %v1267_v35  ;;  %v1375_v30 = vmul.f32 1.442695, %v1268_v23  ;;  %v1529_v54 = vpack.c.bf16 %v6067_v43, %v6063_v14  ;;  %v2197_v14 = vmax.f32 %v7642_v61, %v7637_v28 }
 0x296   : > { %v1197_v44 = vpop.xlane.xlu1 %1196  ;;  %v1530_v24 = vpack.c.bf16 %v6069_v55, %v6065_v31  ;;  %v7639_v22 = vadd.f32 %v6069_v55, %v6067_v43  ;;  %v10952_v43 = vld [vmem:[#allocation48_spill] sm:$0xff] }
 0x297   : > { %6082 = vpow2.f32 %v1373_v50  ;;  %v1269_v15 = vsub.f32 %v10948_v25, %v1197_v44  ;;  %v1270_v56 = vsub.f32 %v10949_v20, %v1197_v44 }
 0x298   : > { %10947 = vst [vmem:[#allocation40_spill] sm:$0xff] %v7639_v22  ;;  %v6071_v63 = vpop.eup %6070  ;;  %6084 = vpow2.f32 %v1375_v30  ;;  %1641 = vmatprep.mubr.bf16.mxu1 %v1530_v24 }
 0x299   : > { %v6073_v46 = vpop.eup %6072  ;;  %v1377_v49 = vmul.f32 1.442695, %v1269_v15  ;;  %v1379_v35 = vmul.f32 1.442695, %v1270_v56  ;;  %1642 = vmatmul.mubr.bf16.gmra.mxu1 %v1529_v54 }
 0x29a   : > { %v1200_v31 = vpop.xlane.xlu0 %1199  ;;  %v7648_v23 = vadd.f32 %v6073_v46, %v6071_v63 }
 0x29b   : > { %6086 = vpow2.f32 %v1377_v49  ;;  %v1271_v1 = vsub.f32 %v10951_v53, %v1200_v31  ;;  %v1272_v55 = vsub.f32 %v10952_v43, %v1200_v31  ;;  %2198 = vmax.xlane.f32.xlu0 %v2197_v14  ;;  %v10957_v43 = vld [vmem:[#allocation51_spill] sm:$0xff] }
 0x29c   : > { %10950 = vst [vmem:[#allocation41_spill] sm:$0xff] %v7648_v23  ;;  %v6075_v50 = vpop.eup %6074  ;;  %6088 = vpow2.f32 %v1379_v35  ;;  %v10954_v23 = vld [vmem:[#allocation49_spill] sm:$0xff] }
 0x29d   : > { %v6077_v30 = vpop.eup %6076  ;;  %v1381_v44 = vmul.f32 1.442695, %v1271_v1  ;;  %v1383_v24 = vmul.f32 1.442695, %v1272_v55  ;;  %v1531_v25 = vpack.c.bf16 %v6075_v50, %v6071_v63  ;;  %v10956_v63 = vld [vmem:[#allocation50_spill] sm:$0xff] }
 0x29e   : > { %v1203_v15 = vpop.xlane.xlu1 %1202  ;;  %v1532_v54 = vpack.c.bf16 %v6077_v30, %v6073_v46  ;;  %v7652_v20 = vadd.f32 %v6077_v30, %v6075_v50 }
 0x29f   : > { %6090 = vpow2.f32 %v1381_v44  ;;  %v1273_v56 = vsub.f32 %v7409_v8, %v1203_v15  ;;  %v1274_v49 = vsub.f32 %v10954_v23, %v1203_v15 }
 0x2a0   : > { %10953 = vst [vmem:[#allocation6_spill] sm:$0xff] %v7652_v20  ;;  %v6079_v32 = vpop.eup %6078  ;;  %6092 = vpow2.f32 %v1383_v24  ;;  %1649 = vmatprep.mubr.bf16.mxu1 %v1532_v54 }
 0x2a1   : > { %v6081_v31 = vpop.eup %6080  ;;  %v1385_v14 = vmul.f32 1.442695, %v1273_v56  ;;  %v1387_v53 = vmul.f32 1.442695, %v1274_v49  ;;  %1650 = vmatmul.mubr.bf16.gmra.mxu1 %v1531_v25  ;;  %v10959_v25 = vld [vmem:[#allocation52_spill] sm:$0xff]  ;;  %v10960_v49 = vld [vmem:[#allocation53_spill] sm:$0xff] }
 0x2a2   : > { %v1206_v35 = vpop.xlane.xlu0 %1205  ;;  %v7656_v1 = vadd.f32 %v6081_v31, %v6079_v32 }
 0x2a3   : > { %6094 = vpow2.f32 %v1385_v14  ;;  %v1275_v46 = vsub.f32 %v10956_v63, %v1206_v35  ;;  %v1276_v55 = vsub.f32 %v10957_v43, %v1206_v35 }
 0x2a4   : > { %10955 = vst [vmem:[#allocation42_spill] sm:$0xff] %v7656_v1  ;;  %v6083_v50 = vpop.eup %6082  ;;  %6096 = vpow2.f32 %v1387_v53 }
 0x2a5   : > { %v6085_v8 = vpop.eup %6084  ;;  %v1389_v30 = vmul.f32 1.442695, %v1275_v46  ;;  %v1391_v23 = vmul.f32 1.442695, %v1276_v55  ;;  %v1533_v44 = vpack.c.bf16 %v6083_v50, %v6079_v32  ;;  %v10962_v32 = vld [vmem:[#allocation54_spill] sm:$0xff]  ;;  %v10963_v55 = vld [vmem:[#allocation55_spill] sm:$0xff] }
 0x2a6   : > { %v1209_v24 = vpop.xlane.xlu1 %1208  ;;  %v1534_v15 = vpack.c.bf16 %v6085_v8, %v6081_v31  ;;  %v7660_v54 = vadd.f32 %v6085_v8, %v6083_v50 }
 0x2a7   : > { %6098 = vpow2.f32 %v1389_v30  ;;  %v1277_v56 = vsub.f32 %v10959_v25, %v1209_v24  ;;  %v1278_v1 = vsub.f32 %v10960_v49, %v1209_v24  ;;  %v1807_v30 = vld [vmem:[#allocation2 + $0x120] sm:$0xff] }
 0x2a8   : > { %10958 = vst [vmem:[#allocation43_spill] sm:$0xff] %v7660_v54  ;;  %v6087_v14 = vpop.eup %6086  ;;  %6100 = vpow2.f32 %v1391_v23  ;;  %1657 = vmatprep.mubr.bf16.mxu1 %v1534_v15  ;;  %v1844_v24 = vunpack.c.h.bf16 %v1807_v30 }
 0x2a9   : > { %v6089_v63 = vpop.eup %6088  ;;  %v1393_v35 = vmul.f32 1.442695, %v1277_v56  ;;  %v1395_v43 = vmul.f32 1.442695, %v1278_v1  ;;  %1658 = vmatmul.mubr.bf16.gmra.mxu1 %v1533_v44  ;;  %v1843_v44 = vunpack.c.l.bf16 %v1807_v30 }
 0x2aa   : > { %v1212_v53 = vpop.xlane.xlu0 %1211  ;;  %v7664_v46 = vadd.f32 %v6089_v63, %v6087_v14 }
 0x2ab   : > { %6102 = vpow2.f32 %v1393_v35  ;;  %v1279_v31 = vsub.f32 %v10962_v32, %v1212_v53  ;;  %v1280_v50 = vsub.f32 %v10963_v55, %v1212_v53  ;;  %v7671_v32 = vpop.f32.mrf.mxu0  ;;  %v10965_v53 = vld [vmem:[#allocation56_spill] sm:$0xff] }
 0x2ac   : > { %10961 = vst [vmem:[#allocation44_spill] sm:$0xff] %v7664_v46  ;;  %v6091_v8 = vpop.eup %6090  ;;  %6104 = vpow2.f32 %v1395_v43 }
 0x2ad   : > { %v6093_v25 = vpop.eup %6092  ;;  %v1397_v49 = vmul.f32 1.442695, %v1279_v31  ;;  %v1399_v23 = vmul.f32 1.442695, %v1280_v50  ;;  %v1535_v15 = vpack.c.bf16 %v6091_v8, %v6087_v14  ;;  %v7675_v31 = vadd.f32 %v7511_v26, %v1844_v24  ;;  %v10969_v26 = vld [vmem:[#allocation58_spill] sm:$0xff] }
 0x2ae   : > { %v1215_v39 = vpop.xlane.xlu1 %1214  ;;  %v1536_v56 = vpack.c.bf16 %v6093_v25, %v6089_v63  ;;  %v7668_v1 = vadd.f32 %v6093_v25, %v6091_v8  ;;  %v10966_v63 = vld [vmem:[#allocation26_spill] sm:$0xff]  ;;  %v10968_v25 = vld [vmem:[#allocation57_spill] sm:$0xff] }
 0x2af   : > { %6106 = vpow2.f32 %v1397_v49  ;;  %v1281_v35 = vsub.f32 %v7438_v52, %v1215_v39  ;;  %v1282_v55 = vsub.f32 %v10965_v53, %v1215_v39  ;;  %v7682_v52 = vadd.f32 %v7505_v19, %v1843_v44 }
 0x2b0   : > { %10964 = vst [vmem:[#allocation45_spill] sm:$0xff] %v7668_v1  ;;  %v6095_v46 = vpop.eup %6094  ;;  %6108 = vpow2.f32 %v1399_v23  ;;  %1665 = vmatprep.mubr.bf16.mxu1 %v1536_v56  ;;  %v7685_v23 = vpop.f32.mrf.mxu0 }
 0x2b1   : > { %v6097_v43 = vpop.eup %6096  ;;  %v1401_v14 = vmul.f32 1.442695, %v1281_v35  ;;  %1666 = vmatmul.mubr.bf16.gmra.mxu1 %v1535_v15  ;;  %2630 = vrot.lane.b32.xlu0 %v10966_v63, %s6808_s15  ;;  %v1403_v50 = vmul.f32 1.442695, %v1282_v55  ;;  %v2200_v56 = vmax.f32 %v7682_v52, %v7675_v31 }
 0x2b2   : > { %v1218_v8 = vpop.xlane.xlu0 %1217  ;;  %v7679_v30 = vadd.f32 %v6097_v43, %v6095_v46 }
 0x2b3   : > { %6110 = vpow2.f32 %v1401_v14  ;;  %v1283_v39 = vsub.f32 %v10968_v25, %v1218_v8  ;;  %v1284_v24 = vsub.f32 %v10969_v26, %v1218_v8  ;;  %v7693_v25 = vpop.f32.mrf.mxu0 }
 0x2b4   : > { %10967 = vst [vmem:[#allocation46_spill] sm:$0xff] %v7679_v30  ;;  %v6099_v49 = vpop.eup %6098  ;;  %6112 = vpow2.f32 %v1403_v50 }
 0x2b5   : > { %v6101_v15 = vpop.eup %6100  ;;  %v1405_v35 = vmul.f32 1.442695, %v1283_v39  ;;  %v1537_v53 = vpack.c.bf16 %v6099_v49, %v6095_v46  ;;  %v1407_v55 = vmul.f32 1.442695, %v1284_v24 }
 0x2b6   : > { %v1221_v30 = vpop.xlane.xlu1 %1220  ;;  %v1538_v1 = vpack.c.bf16 %v6101_v15, %v6097_v43  ;;  %v7690_v19 = vadd.f32 %v6101_v15, %v6099_v49  ;;  %v10972_v43 = vld [vmem:[#allocation59_spill] sm:$0xff] }
 0x2b7   : > { %6114 = vpow2.f32 %v1405_v35  ;;  %v1285_v44 = vsub.f32 %v7453_v0, %v1221_v30  ;;  %2201 = vmax.xlane.f32.xlu1 %v2200_v56  ;;  %v1286_v50 = vsub.f32 %v7455_v9, %v1221_v30  ;;  %v7699_v0 = vpop.f32.mrf.mxu0  ;;  %v10973_v56 = vld [vmem:[#allocation60_spill] sm:$0xff] }
 0x2b8   : > { %10970 = vst [vmem:[#allocation47_spill] sm:$0xff] %v7690_v19  ;;  %v6103_v14 = vpop.eup %6102  ;;  %6116 = vpow2.f32 %v1407_v55  ;;  %1673 = vmatprep.mubr.bf16.mxu1 %v1538_v1 }
 0x2b9   : > { %v6105_v8 = vpop.eup %6104  ;;  %v1409_v26 = vmul.f32 1.442695, %v1285_v44  ;;  %1674 = vmatmul.mubr.bf16.gmra.mxu1 %v1537_v53  ;;  %v1411_v46 = vmul.f32 1.442695, %v1286_v50 }
 0x2ba   : > { %v1224_v39 = vpop.xlane.xlu0 %1223  ;;  %v7696_v24 = vadd.f32 %v6105_v8, %v6103_v14 }
 0x2bb   : > { %6118 = vpow2.f32 %v1409_v26  ;;  %v1287_v49 = vsub.f32 %v10972_v43, %v1224_v39  ;;  %v1288_v35 = vsub.f32 %v10973_v56, %v1224_v39  ;;  %v7705_v43 = vpop.f32.mrf.mxu0 }
 0x2bc   : > { %10971 = vst [vmem:[#allocation48_spill] sm:$0xff] %v7696_v24  ;;  %v6107_v15 = vpop.eup %6106  ;;  %6120 = vpow2.f32 %v1411_v46  ;;  %v10975_v24 = vld [vmem:[#allocation61_spill] sm:$0xff] }
 0x2bd   : > { %v6109_v55 = vpop.eup %6108  ;;  %v1413_v19 = vmul.f32 1.442695, %v1287_v49  ;;  %v1539_v9 = vpack.c.bf16 %v6107_v15, %v6103_v14  ;;  %v1415_v1 = vmul.f32 1.442695, %v1288_v35  ;;  %v7712_v35 = vpop.f32.mrf.mxu0 }
 0x2be   : > { %v4114_v30 = vpop.permute.xlu0 %4113  ;;  %v1540_v44 = vpack.c.bf16 %v6109_v55, %v6105_v8  ;;  %v7702_v53 = vadd.f32 %v6109_v55, %v6107_v15  ;;  %v2190_v50 = vpop.xlane.xlu1 %2189 }
 0x2bf   : > { %6122 = vpow2.f32 %v1413_v19  ;;  %5340 = vmatmul.mubr.msk.bf16.vlgmr.msra.gmra.mxu0 %vm373_vm0, %v4114_v30  ;;  %v2284_v46 = vsub.f32 %v10975_v24, %v2190_v50  ;;  %v2285_v39 = vsub.f32 %v10976_v16, %v2190_v50 }
 0x2c0   : > { %10974 = vst [vmem:[#allocation49_spill] sm:$0xff] %v7702_v53  ;;  %v6111_v26 = vpop.eup %6110  ;;  %6124 = vpow2.f32 %v1415_v1  ;;  %1681 = vmatprep.mubr.bf16.mxu1 %v1540_v44  ;;  %4235 = vmatprep.mubr.bf16.mxu0 %v10886_v10  ;;  %v1808_v1 = vld [vmem:[#allocation2 + $0x128] sm:$0xff]  ;;  %v10979_v53 = vld [vmem:[#allocation29_spill] sm:$0xff] }
 0x2c1   : > { %v6113_v14 = vpop.eup %6112  ;;  %1682 = vmatmul.mubr.bf16.gmra.mxu1 %v1539_v9  ;;  %v2348_v8 = vmul.f32 1.442695, %v2284_v46  ;;  %v2350_v49 = vmul.f32 1.442695, %v2285_v39  ;;  %v1846_v44 = vunpack.c.h.bf16 %v1808_v1  ;;  %v7716_v46 = vpop.f32.mrf.mxu0 }
 0x2c2   : > { %v7710_v15 = vadd.f32 %v6113_v14, %v6111_v26  ;;  %v2651_v19 = vpop.permute.xlu1 %2650 }
 0x2c3   : > { %6126 = vpow2.f32 %v2348_v8  ;;  %5509 = vmatprep.subr.bf16.mxu1 %v2651_v19  ;;  %v7725_v19 = vpop.f32.mrf.mxu0 }
 0x2c4   : > { %10977 = vst [vmem:[#allocation50_spill] sm:$0xff] %v7710_v15  ;;  %v6115_v56 = vpop.eup %6114  ;;  %6128 = vpow2.f32 %v2350_v49  ;;  %v1845_v15 = vunpack.c.l.bf16 %v1808_v1  ;;  %v10981_v1 = vld [vmem:[#allocation5_spill] sm:$0xff] }
 0x2c5   : > { %v6117_v55 = vpop.eup %6116  ;;  %v1541_v24 = vpack.c.bf16 %v6115_v56, %v6111_v26  ;;  %v7723_v26 = vadd.f32 %v7527_v38, %v1846_v44 }
 0x2c6   : > { %v1542_v16 = vpack.c.bf16 %v6117_v55, %v6113_v14  ;;  %v7714_v30 = vadd.f32 %v6117_v55, %v6115_v56  ;;  %v2635_v50 = vpop.permute.xlu1 %2634  ;;  %v7729_v55 = vadd.f32 %v7519_v47, %v1845_v15  ;;  %v10983_v47 = vld [vmem:[#allocation30_spill] sm:$0xff] }
 0x2c7   : > { %5510 = vmatpush3.bf16.msra.mxu1 %v2635_v50 }
 0x2c8   : > { %10978 = vst [vmem:[#allocation51_spill] sm:$0xff] %v7714_v30  ;;  %v6119_v9 = vpop.eup %6118  ;;  %1689 = vmatprep.mubr.bf16.mxu1 %v1542_v16  ;;  %2642 = vrot.lane.b32.xlu1 %v10979_v53, %s6808_s15  ;;  %v2203_v44 = vmax.f32 %v7729_v55, %v7723_v26 }
 0x2c9   : > { %v6121_v39 = vpop.eup %6120  ;;  %1690 = vmatmul.mubr.bf16.gmra.mxu1 %v1541_v24 }
 0x2ca   : > { %v7720_v8 = vadd.f32 %v6121_v39, %v6119_v9  ;;  %v4116_v14 = vpop.permute.xlu1 %4115 }
 0x2cb   : > { %5341 = vmatmul.mubr.msk.bf16.gmra.mxu0 %vm373_vm0, %v4116_v14 }
 0x2cc   : > { %10980 = vst [vmem:[#allocation52_spill] sm:$0xff] %v7720_v8  ;;  %v6123_v49 = vpop.eup %6122  ;;  %4119 = vrot.lane.b32.xlu1 %v10981_v1, %s6810_s17  ;;  %4245 = vmatprep.mubr.bf16.mxu0 %v10886_v10 }
 0x2cd   : > { %v6125_v56 = vpop.eup %6124  ;;  %v1543_v16 = vpack.c.bf16 %v6123_v49, %v6119_v9  ;;  %v10985_v9 = vld [vmem:[#allocation31_spill] sm:$0xff] }
 0x2ce   : > { %v1544_v24 = vpack.c.bf16 %v6125_v56, %v6121_v39  ;;  %v7734_v50 = vadd.f32 %v6125_v56, %v6123_v49  ;;  %v2649_v38 = vpop.permute.xlu1 %2648  ;;  %v10986_v39 = vld [vmem:[#allocation20_spill] sm:$0xff] }
 0x2cf   : > { %5511 = vmatprep.subr.bf16.mxu1 %v2649_v38  ;;  %v1810_v49 = vld [vmem:[#allocation2 + $0x138] sm:$0xff] }
 0x2d0   : > { %10982 = vst [vmem:[#allocation53_spill] sm:$0xff] %v7734_v50  ;;  %1697 = vmatprep.mubr.bf16.mxu1 %v1544_v24  ;;  %v7738_v14 = vpop.eup %6126  ;;  %2204 = vmax.xlane.f32.xlu0 %v2203_v44  ;;  %v1850_v56 = vunpack.c.h.bf16 %v1810_v49  ;;  %v1849_v8 = vunpack.c.l.bf16 %v1810_v49 }
 0x2d1   : > { %2640 = vrot.lane.b32.xlu1 %v10983_v47, %s6808_s15  ;;  %v6129_v15 = vpop.eup %6128  ;;  %1698 = vmatmul.mubr.bf16.gmra.mxu1 %v1543_v16 }
 0x2d2   : > { %v7743_v1 = vadd.f32 %v6129_v15, %v7738_v14  ;;  %v7752_v16 = vadd.f32 %v7565_v42, %v1850_v56  ;;  %v7755_v54 = vadd.f32 %v7557_v11, %v1849_v8 }
 0x2d4   : > { %10984 = vst [vmem:[#allocation54_spill] sm:$0xff] %v7743_v1  ;;  %v2209_v13 = vmax.f32 %v7755_v54, %v7752_v16 }
 0x2d5   : > { %2624 = vrot.lane.b32.xlu1 %v10985_v9, %s6808_s15 }
 0x2e6   : > { %2626 = vrot.lane.b32.xlu0 %v10986_v39, %s6808_s15 }
 0x2ef   : > { %v2193_v24 = vpop.xlane.xlu0 %2192 }
 0x2f0   : > { %v2286_v38 = vsub.f32 %v7555_v27, %v2193_v24  ;;  %v2287_v44 = vsub.f32 %v7552_v34, %v2193_v24  ;;  %v1809_v27 = vld [vmem:[#allocation2 + $0x130] sm:$0xff]  ;;  %v7759_v34 = vpop.f32.mrf.mxu0 }
 0x2f1   : > { %v1848_v20 = vunpack.c.h.bf16 %v1809_v27  ;;  %v1847_v49 = vunpack.c.l.bf16 %v1809_v27 }
 0x2f2   : > { %v2352_v50 = vmul.f32 1.442695, %v2286_v38  ;;  %v2354_v30 = vmul.f32 1.442695, %v2287_v44  ;;  %v7764_v56 = vpop.f32.mrf.mxu0 }
 0x2f3   : > { %v2633_v1 = vpop.permute.xlu0 %2632  ;;  %v7762_v42 = vadd.f32 %v7542_v7, %v1848_v20  ;;  %v10988_v20 = vld [vmem:[#allocation19_spill] sm:$0xff] }
 0x2f4   : > { %6130 = vpow2.f32 %v2352_v50  ;;  %5512 = vmatpush3.bf16.msra.mxu1 %v2633_v1  ;;  %v7776_v7 = vpop.f32.mrf.mxu0 }
 0x2f5   : > { %6132 = vpow2.f32 %v2354_v30 }
 0x2f9   : > { %2210 = vmax.xlane.f32.xlu1 %v2209_v13  ;;  %v7771_v13 = vadd.f32 %v7536_v29, %v1847_v49  ;;  %v7780_v29 = vpop.f32.mrf.mxu0 }
 0x2ff   : > { %v2196_v24 = vpop.xlane.xlu1 %2195 }
 0x300   : > { %v2288_v50 = vsub.f32 %v7586_v41, %v2196_v24  ;;  %v2289_v11 = vsub.f32 %v7583_v21, %v2196_v24  ;;  %v2206_v21 = vmax.f32 %v7771_v13, %v7762_v42 }
 0x301   : > { %v7768_v30 = vpop.eup %6130 }
 0x302   : > { %v6133_v8 = vpop.eup %6132  ;;  %v2356_v1 = vmul.f32 1.442695, %v2288_v50  ;;  %v2358_v38 = vmul.f32 1.442695, %v2289_v11 }
 0x303   : > { %v2647_v44 = vpop.permute.xlu1 %2646  ;;  %v2573_v27 = vpack.c.bf16 %v6133_v8, %v6129_v15  ;;  %v7774_v48 = vadd.f32 %v6133_v8, %v7768_v30  ;;  %v10989_v15 = vld [vmem:[#allocation33_spill] sm:$0xff] }
 0x304   : > { %6134 = vpow2.f32 %v2356_v1  ;;  %5513 = vmatprep.subr.bf16.mxu1 %v2647_v44 }
 0x305   : > { %10987 = vst [vmem:[#allocation55_spill] sm:$0xff] %v7774_v48  ;;  %6136 = vpow2.f32 %v2358_v38  ;;  %2700 = vmatprep.mubr.bf16.mxu1 %v2573_v27  ;;  %2207 = vmax.xlane.f32.xlu0 %v2206_v21  ;;  %v10992_v38 = vld [vmem:[#allocation32_spill] sm:$0xff]  ;;  %v10995_v21 = vld [vmem:[#allocation7_spill] sm:$0xff] }
 0x307   : > { %v4118_v41 = vpop.permute.xlu1 %4117 }
 0x308   : > { %5342 = vmatmul.mubr.msk.bf16.gmra.mxu0 %vm373_vm0, %v4118_v41 }
 0x309   : > { %4255 = vmatprep.mubr.bf16.mxu0 %v10886_v10 }
 0x30a   : > { %2622 = vrot.lane.b32.xlu1 %v10988_v20, %s6808_s15 }
 0x30e   : > { %2636 = vrot.lane.b32.xlu1 %v10989_v15, %s6808_s15 }
 0x311   : > { %v7788_v49 = vpop.eup %6134 }
 0x312   : > { %v7790_v24 = vpop.eup %6136 }
 0x313   : > { %v7794_v50 = vadd.f32 %v7790_v24, %v7788_v49 }
 0x315   : > { %10990 = vst [vmem:[#allocation56_spill] sm:$0xff] %v7794_v50  ;;  %v10997_v50 = vld [vmem:[#allocation34_spill] sm:$0xff] }
 0x319   : > { %v5413_v11 = vpop.f32.mrf.mxu1 }
 0x31b   : > { %v5414_v8 = vpop.f32.mrf.mxu1  ;;  %2638 = vrot.lane.b32.xlu0 %v10992_v38, %s6808_s15 }
 0x31c   : > { %v7796_v1 = vadd.f32 %v5414_v8, %v5413_v11 }
 0x31d   : > { %v7800_v44 = vpop.f32.mrf.mxu1 }
 0x31e   : > { %10991 = vst [vmem:[#allocation57_spill] sm:$0xff] %v7796_v1  ;;  %10993 = vst [vmem:[#allocation58_spill] sm:$0xff] %v7800_v44  ;;  %v2645_v44 = vpop.permute.xlu1 %2644 }
 0x31f   : > { %v7802_v27 = vpop.f32.mrf.mxu1  ;;  %4121 = vrot.lane.b32.xlu0 %v10995_v21, %s6810_s17  ;;  %v1852_v21 = vunpack.c.h.bf16 %v1811_v36 }
 0x320   : > { %10994 = vst [vmem:[#allocation59_spill] sm:$0xff] %v7802_v27 }
 0x321   : > { %v5419_v41 = vpop.f32.mrf.mxu1 }
 0x323   : > { %v5420_v48 = vpop.f32.mrf.mxu1  ;;  %2620 = vrot.lane.b32.xlu0 %v10997_v50, %s6808_s15 }
 0x324   : > { %v7806_v22 = vadd.f32 %v5420_v48, %v5419_v41  ;;  %v2199_v2 = vpop.xlane.xlu0 %2198  ;;  %v1851_v41 = vunpack.c.l.bf16 %v1811_v36 }
 0x325   : > { %v7810_v11 = vpop.f32.mrf.mxu1  ;;  %v2290_v8 = vsub.f32 %v7642_v61, %v2199_v2  ;;  %v2291_v1 = vsub.f32 %v7637_v28, %v2199_v2  ;;  %v7817_v61 = vadd.f32 %v7685_v23, %v1852_v21  ;;  %v2629_v28 = vpop.permute.xlu1 %2628 }
 0x326   : > { %10996 = vst [vmem:[#allocation60_spill] sm:$0xff] %v7806_v22  ;;  %10998 = vst [vmem:[#allocation61_spill] sm:$0xff] %v7810_v11  ;;  %v1813_v22 = vld [vmem:[#allocation2 + $0x150] sm:$0xff] }
 0x327   : > { %v2360_v27 = vmul.f32 1.442695, %v2290_v8  ;;  %v2362_v18 = vmul.f32 1.442695, %v2291_v1  ;;  %v7814_v45 = vpop.f32.mrf.mxu1  ;;  %v1856_v2 = vunpack.c.h.bf16 %v1813_v22  ;;  %v7824_v8 = vadd.f32 %v7671_v32, %v1851_v41 }
 0x328   : > { %10999 = vst [vmem:[#allocation62_spill] sm:$0xff] %v7814_v45  ;;  %v2631_v58 = vpop.permute.xlu0 %2630 }
 0x329   : > { %6138 = vpow2.f32 %v2360_v27  ;;  %v5425_v48 = vpop.f32.mrf.mxu1  ;;  %5514 = vmatpush3.bf16.msra.mxu1 %v2631_v58  ;;  %v1855_v27 = vunpack.c.l.bf16 %v1813_v22  ;;  %v1814_v58 = vld [vmem:[#allocation2 + $0x158] sm:$0xff]  ;;  %v7831_v23 = vadd.f32 %v7712_v35, %v1856_v2 }
 0x32a   : > { %6140 = vpow2.f32 %v2362_v18  ;;  %5515 = vmatprep.subr.bf16.mxu1 %v2645_v44  ;;  %v2212_v18 = vmax.f32 %v7824_v8, %v7817_v61  ;;  %v1858_v44 = vunpack.c.h.bf16 %v1814_v58 }
 0x32b   : > { %v5426_v11 = vpop.f32.mrf.mxu1 }
 0x32c   : > { %v7819_v17 = vadd.f32 %v5426_v11, %v5425_v48  ;;  %v7834_v11 = vadd.f32 %v7705_v43, %v1855_v27  ;;  %v1857_v48 = vunpack.c.l.bf16 %v1814_v58  ;;  %v7839_v32 = vadd.f32 %v7725_v19, %v1858_v44  ;;  %v1812_v58 = vld [vmem:[#allocation2 + $0x148] sm:$0xff] }
 0x32d   : > { %v7821_v1 = vpop.f32.mrf.mxu1  ;;  %5516 = vmatpush3.bf16.msra.mxu1 %v2629_v28  ;;  %v1854_v44 = vunpack.c.h.bf16 %v1812_v58 }
 0x32e   : > { %11000 = vst [vmem:[#allocation5_spill] sm:$0xff] %v7819_v17  ;;  %11001 = vst [vmem:[#allocation7_spill] sm:$0xff] %v7821_v1  ;;  %v2218_v22 = vmax.f32 %v7834_v11, %v7831_v23  ;;  %v7848_v2 = vadd.f32 %v7716_v46, %v1857_v48 }
 0x32f   : > { %v7826_v36 = vpop.f32.mrf.mxu1  ;;  %v7863_v48 = vadd.f32 %v7699_v0, %v1854_v44 }
 0x330   : > { %11002 = vst [vmem:[#allocation75_spill] sm:$0xff] %v7826_v36 }
 0x331   : > { %v5431_v21 = vpop.f32.mrf.mxu1 }
 0x332   : > { %2213 = vmax.xlane.f32.xlu1 %v2212_v18  ;;  %v2221_v18 = vmax.f32 %v7848_v2, %v7839_v32 }
 0x333   : > { %v5432_v28 = vpop.f32.mrf.mxu1 }
 0x334   : > { %v7841_v41 = vadd.f32 %v5432_v28, %v5431_v21  ;;  %v1853_v28 = vunpack.c.l.bf16 %v1812_v58 }
 0x335   : > { %v7843_v17 = vpop.f32.mrf.mxu1 }
 0x336   : > { %11003 = vst [vmem:[#allocation76_spill] sm:$0xff] %v7841_v41  ;;  %11004 = vst [vmem:[#allocation77_spill] sm:$0xff] %v7843_v17  ;;  %v7845_v35 = vpop.eup %6138  ;;  %2219 = vmax.xlane.f32.xlu1 %v2218_v22  ;;  %v7865_v22 = vpop.f32.mrf.mxu0  ;;  %v7870_v17 = vadd.f32 %v7693_v25, %v1853_v28 }
 0x337   : > { %v7850_v43 = vpop.eup %6140  ;;  %v7852_v27 = vpop.f32.mrf.mxu1 }
 0x338   : > { %11005 = vst [vmem:[#allocation78_spill] sm:$0xff] %v7852_v27  ;;  %v7858_v19 = vadd.f32 %v7850_v43, %v7845_v35  ;;  %v7874_v45 = vpop.f32.mrf.mxu0  ;;  %v2215_v0 = vmax.f32 %v7870_v17, %v7863_v48 }
 0x339   : > { %v5437_v21 = vpop.f32.mrf.mxu1 }
 0x33a   : > { %11006 = vst [vmem:[#allocation79_spill] sm:$0xff] %v7858_v19  ;;  %2222 = vmax.xlane.f32.xlu1 %v2221_v18  ;;  %v7882_v28 = vpop.f32.mrf.mxu0 }
 0x33b   : > { %v5438_v41 = vpop.f32.mrf.mxu1 }
 0x33c   : > { %v7860_v46 = vadd.f32 %v5438_v41, %v5437_v21 }
 0x33d   : > { %v7867_v27 = vpop.f32.mrf.mxu1 }
 0x33e   : > { %11007 = vst [vmem:[#allocation80_spill] sm:$0xff] %v7860_v46  ;;  %11008 = vst [vmem:[#allocation81_spill] sm:$0xff] %v7867_v27 }
 0x33f   : > { %v7872_v36 = vpop.f32.mrf.mxu1 }
 0x340   : > { %11009 = vst [vmem:[#allocation82_spill] sm:$0xff] %v7872_v36  ;;  %v2202_v1 = vpop.xlane.xlu1 %2201 }
 0x341   : > { %v5443_v18 = vpop.f32.mrf.mxu1  ;;  %v2292_v58 = vsub.f32 %v7682_v52, %v2202_v1  ;;  %v2293_v41 = vsub.f32 %v7675_v31, %v2202_v1  ;;  %v7888_v1 = vpop.f32.mrf.mxu0 }
 0x342   : > { %2216 = vmax.xlane.f32.xlu0 %v2215_v0 }
 0x343   : > { %v2364_v44 = vmul.f32 1.442695, %v2292_v58  ;;  %v2366_v21 = vmul.f32 1.442695, %v2293_v41  ;;  %v5444_v46 = vpop.f32.mrf.mxu1 }
 0x344   : > { %v7880_v27 = vadd.f32 %v5444_v46, %v5443_v18  ;;  %v2643_v25 = vpop.permute.xlu1 %2642  ;;  %v11013_v18 = vld [vmem:[#allocation9_spill] sm:$0xff] }
 0x345   : > { %6142 = vpow2.f32 %v2364_v44  ;;  %v7884_v36 = vpop.f32.mrf.mxu1  ;;  %5517 = vmatprep.subr.bf16.mxu1 %v2643_v25 }
 0x346   : > { %11010 = vst [vmem:[#allocation83_spill] sm:$0xff] %v7880_v27  ;;  %11011 = vst [vmem:[#allocation84_spill] sm:$0xff] %v7884_v36  ;;  %6144 = vpow2.f32 %v2366_v21 }
 0x347   : > { %v7886_v52 = vpop.f32.mrf.mxu1 }
 0x348   : > { %11012 = vst [vmem:[#allocation85_spill] sm:$0xff] %v7886_v52  ;;  %v4120_v31 = vpop.permute.xlu1 %4119 }
 0x349   : > { %v5449_v19 = vpop.f32.mrf.mxu1  ;;  %5343 = vmatmul.mubr.msk.bf16.gmra.mxu0 %vm373_vm0, %v4120_v31 }
 0x34a   : > { %4265 = vmatprep.mubr.bf16.mxu0 %v10886_v10 }
 0x34b   : > { %v5450_v46 = vpop.f32.mrf.mxu1  ;;  %4125 = vrot.lane.b32.xlu1 %v11013_v18, %s6810_s17  ;;  %v11021_v18 = vld [vmem:[#allocation8_spill] sm:$0xff] }
 0x34c   : > { %v7894_v58 = vadd.f32 %v5450_v46, %v5449_v19 }
 0x34d   : > { %v7896_v41 = vpop.f32.mrf.mxu1 }
 0x34e   : > { %11014 = vst [vmem:[#allocation9_spill] sm:$0xff] %v7894_v58  ;;  %11015 = vst [vmem:[#allocation86_spill] sm:$0xff] %v7896_v41 }
 0x34f   : > { %v7898_v0 = vpop.f32.mrf.mxu1 }
 0x350   : > { %11016 = vst [vmem:[#allocation87_spill] sm:$0xff] %v7898_v0 }
 0x351   : > { %v5455_v44 = vpop.f32.mrf.mxu1 }
 0x352   : > { %v7900_v21 = vpop.eup %6142 }
 0x353   : > { %v7902_v25 = vpop.eup %6144  ;;  %v5456_v27 = vpop.f32.mrf.mxu1 }
 0x354   : > { %v7904_v52 = vadd.f32 %v5456_v27, %v5455_v44  ;;  %v7908_v31 = vadd.f32 %v7902_v25, %v7900_v21  ;;  %v2641_v27 = vpop.permute.xlu1 %2640 }
 0x355   : > { %v7910_v36 = vpop.f32.mrf.mxu1 }
 0x356   : > { %11017 = vst [vmem:[#allocation88_spill] sm:$0xff] %v7904_v52  ;;  %11018 = vst [vmem:[#allocation89_spill] sm:$0xff] %v7908_v31 }
 0x357   : > { %11019 = vst [vmem:[#allocation90_spill] sm:$0xff] %v7910_v36  ;;  %v7912_v19 = vpop.f32.mrf.mxu1 }
 0x358   : > { %11020 = vst [vmem:[#allocation91_spill] sm:$0xff] %v7912_v19  ;;  %4123 = vrot.lane.b32.xlu0 %v11021_v18, %s6810_s17  ;;  %v2625_v4 = vpop.permute.xlu1 %2624 }
 0x359   : > { %v5461_v46 = vpop.f32.mrf.mxu1  ;;  %v2205_v58 = vpop.xlane.xlu0 %2204 }
 0x35a   : > { %v2294_v0 = vsub.f32 %v7729_v55, %v2205_v58  ;;  %v2295_v41 = vsub.f32 %v7723_v26, %v2205_v58  ;;  %v1816_v26 = vld [vmem:[#allocation2 + $0x168] sm:$0xff] }
 0x35b   : > { %v5462_v51 = vpop.f32.mrf.mxu1 }
 0x35c   : > { %v7918_v44 = vadd.f32 %v5462_v51, %v5461_v46  ;;  %v2368_v52 = vmul.f32 1.442695, %v2294_v0  ;;  %v2370_v33 = vmul.f32 1.442695, %v2295_v41  ;;  %v1862_v51 = vunpack.c.h.bf16 %v1816_v26 }
 0x35d   : > { %v7920_v31 = vpop.f32.mrf.mxu1  ;;  %v2627_v36 = vpop.permute.xlu0 %2626  ;;  %v1861_v41 = vunpack.c.l.bf16 %v1816_v26  ;;  %v1815_v26 = vld [vmem:[#allocation2 + $0x160] sm:$0xff] }
 0x35e   : > { %11022 = vst [vmem:[#allocation8_spill] sm:$0xff] %v7918_v44  ;;  %11023 = vst [vmem:[#allocation92_spill] sm:$0xff] %v7920_v31  ;;  %6146 = vpow2.f32 %v2368_v52  ;;  %5518 = vmatpush3.bf16.msra.mxu1 %v2627_v36  ;;  %v1817_v44 = vld [vmem:[#allocation2 + $0x170] sm:$0xff]  ;;  %v7931_v52 = vadd.f32 %v7780_v29, %v1862_v51 }
 0x35f   : > { %v7922_v19 = vpop.f32.mrf.mxu1  ;;  %6148 = vpow2.f32 %v2370_v33  ;;  %5519 = vmatprep.subr.bf16.mxu1 %v2641_v27  ;;  %v1864_v36 = vunpack.c.h.bf16 %v1817_v44  ;;  %v7934_v27 = vadd.f32 %v7776_v7, %v1861_v41  ;;  %v1860_v7 = vunpack.c.h.bf16 %v1815_v26 }
 0x360   : > { %11024 = vst [vmem:[#allocation93_spill] sm:$0xff] %v7922_v19  ;;  %v1863_v19 = vunpack.c.l.bf16 %v1817_v44 }
 0x361   : > { %v5467_v18 = vpop.f32.mrf.mxu1  ;;  %v7945_v29 = vadd.f32 %v7874_v45, %v1864_v36  ;;  %v7964_v12 = vadd.f32 %v7764_v56, %v1860_v7 }
 0x362   : > { %5520 = vmatpush3.bf16.msra.mxu1 %v2625_v4  ;;  %v7954_v41 = vadd.f32 %v7865_v22, %v1863_v19 }
 0x363   : > { %v5468_v55 = vpop.f32.mrf.mxu1 }
 0x364   : > { %v7924_v58 = vadd.f32 %v5468_v55, %v5467_v18  ;;  %v1818_v18 = vld [vmem:[#allocation2 + $0x178] sm:$0xff]  ;;  %v2230_v45 = vmax.f32 %v7954_v41, %v7945_v29 }
 0x365   : > { %v7926_v46 = vpop.f32.mrf.mxu1  ;;  %v1866_v51 = vunpack.c.h.bf16 %v1818_v18 }
 0x366   : > { %11025 = vst [vmem:[#allocation94_spill] sm:$0xff] %v7924_v58  ;;  %11026 = vst [vmem:[#allocation95_spill] sm:$0xff] %v7926_v46 }
 0x367   : > { %v7928_v0 = vpop.f32.mrf.mxu1  ;;  %v7961_v36 = vadd.f32 %v7888_v1, %v1866_v51 }
 0x368   : > { %11027 = vst [vmem:[#allocation96_spill] sm:$0xff] %v7928_v0  ;;  %v2227_v0 = vmax.f32 %v7934_v27, %v7931_v52 }
 0x369   : > { %v5473_v33 = vpop.f32.mrf.mxu1 }
 0x36b   : > { %v5474_v4 = vpop.f32.mrf.mxu1  ;;  %v7936_v31 = vpop.eup %6146 }
 0x36c   : > { %v7938_v55 = vadd.f32 %v5474_v4, %v5473_v33  ;;  %v7940_v58 = vpop.eup %6148  ;;  %v1865_v33 = vunpack.c.l.bf16 %v1818_v18 }
 0x36d   : > { %v7947_v46 = vpop.f32.mrf.mxu1  ;;  %v7951_v44 = vadd.f32 %v7940_v58, %v7936_v31 }
 0x36e   : > { %11028 = vst [vmem:[#allocation97_spill] sm:$0xff] %v7938_v55  ;;  %11029 = vst [vmem:[#allocation98_spill] sm:$0xff] %v7947_v46  ;;  %v1859_v55 = vunpack.c.l.bf16 %v1815_v26 }
 0x36f   : > { %11030 = vst [vmem:[#allocation99_spill] sm:$0xff] %v7951_v44  ;;  %v7956_v4 = vpop.f32.mrf.mxu1  ;;  %2228 = vmax.xlane.f32.xlu1 %v2227_v0  ;;  %v7967_v44 = vadd.f32 %v7882_v28, %v1865_v33 }
 0x370   : > { %11031 = vst [vmem:[#allocation100_spill] sm:$0xff] %v7956_v4  ;;  %v7970_v19 = vadd.f32 %v7759_v34, %v1859_v55 }
 0x371   : > { %v5479_v46 = vpop.f32.mrf.mxu1  ;;  %v2233_v18 = vmax.f32 %v7967_v44, %v7961_v36 }
 0x372   : > { %v2224_v1 = vmax.f32 %v7970_v19, %v7964_v12 }
 0x373   : > { %v5480_v22 = vpop.f32.mrf.mxu1  ;;  %2231 = vmax.xlane.f32.xlu1 %v2230_v45 }
 0x374   : > { %v7972_v0 = vadd.f32 %v5480_v22, %v5479_v46 }
 0x375   : > { %v7976_v26 = vpop.f32.mrf.mxu1 }
 0x376   : > { %11032 = vst [vmem:[#allocation101_spill] sm:$0xff] %v7972_v0  ;;  %11033 = vst [vmem:[#allocation102_spill] sm:$0xff] %v7976_v26 }
 0x377   : > { %v7980_v56 = vpop.f32.mrf.mxu1  ;;  %2234 = vmax.xlane.f32.xlu1 %v2233_v18  ;;  %2225 = vmax.xlane.f32.xlu0 %v2224_v1 }
 0x378   : > { %11034 = vst [vmem:[#allocation103_spill] sm:$0xff] %v7980_v56 }
 0x379   : > { %v5485_v28 = vpop.f32.mrf.mxu1 }
 0x37b   : > { %v5486_v51 = vpop.f32.mrf.mxu1 }
 0x37c   : > { %v7982_v7 = vadd.f32 %v5486_v51, %v5485_v28  ;;  %v11041_v51 = vld [vmem:[#allocation11_spill] sm:$0xff] }
 0x37d   : > { %v7984_v34 = vpop.f32.mrf.mxu1 }
 0x37e   : > { %11035 = vst [vmem:[#allocation104_spill] sm:$0xff] %v7982_v7  ;;  %11036 = vst [vmem:[#allocation105_spill] sm:$0xff] %v7984_v34  ;;  %v2109_v34 = vpop.f32.mrf.mxu0 }
 0x37f   : > { %v7986_v46 = vpop.f32.mrf.mxu1 }
 0x380   : > { %11037 = vst [vmem:[#allocation106_spill] sm:$0xff] %v7986_v46 }
 0x381   : > { %v5491_v55 = vpop.f32.mrf.mxu1 }
 0x382   : > { %v2211_v33 = vpop.xlane.xlu1 %2210 }
 0x383   : > { %v2298_v45 = vsub.f32 %v7755_v54, %v2211_v33  ;;  %v2299_v22 = vsub.f32 %v7752_v16, %v2211_v33  ;;  %v5492_v0 = vpop.f32.mrf.mxu1 }
 0x384   : > { %v7990_v26 = vadd.f32 %v5492_v0, %v5491_v55  ;;  %v11044_v55 = vld [vmem:[#allocation10_spill] sm:$0xff] }
 0x385   : > { %v2376_v56 = vmul.f32 1.442695, %v2298_v45  ;;  %v2378_v18 = vmul.f32 1.442695, %v2299_v22  ;;  %v7992_v1 = vpop.f32.mrf.mxu1 }
 0x386   : > { %11038 = vst [vmem:[#allocation107_spill] sm:$0xff] %v7990_v26  ;;  %11039 = vst [vmem:[#allocation108_spill] sm:$0xff] %v7992_v1  ;;  %v2623_v0 = vpop.permute.xlu1 %2622 }
 0x387   : > { %6150 = vpow2.f32 %v2376_v56  ;;  %v7994_v28 = vpop.f32.mrf.mxu1  ;;  %v2111_v56 = vpop.f32.mrf.mxu0 }
 0x388   : > { %11040 = vst [vmem:[#allocation109_spill] sm:$0xff] %v7994_v28  ;;  %6152 = vpow2.f32 %v2378_v18  ;;  %4129 = vrot.lane.b32.xlu1 %v11041_v51, %s6810_s17 }
 0x389   : > { %v5497_v7 = vpop.f32.mrf.mxu1 }
 0x38a   : > { %v2637_v4 = vpop.permute.xlu1 %2636 }
 0x38b   : > { %v5498_v46 = vpop.f32.mrf.mxu1 }
 0x38c   : > { %v7998_v54 = vadd.f32 %v5498_v46, %v5497_v7  ;;  %v2113_v46 = vpop.f32.mrf.mxu0 }
 0x38d   : > { %v8000_v16 = vpop.f32.mrf.mxu1  ;;  %4127 = vrot.lane.b32.xlu0 %v11044_v55, %s6810_s17 }
 0x38e   : > { %11042 = vst [vmem:[#allocation11_spill] sm:$0xff] %v7998_v54  ;;  %11043 = vst [vmem:[#allocation110_spill] sm:$0xff] %v8000_v16  ;;  %v2208_v33 = vpop.xlane.xlu0 %2207 }
 0x38f   : > { %v8004_v45 = vpop.f32.mrf.mxu1  ;;  %v2296_v22 = vsub.f32 %v7771_v13, %v2208_v33  ;;  %v2297_v18 = vsub.f32 %v7762_v42, %v2208_v33  ;;  %v2115_v42 = vpop.f32.mrf.mxu0 }
 0x390   : > { %11045 = vst [vmem:[#allocation10_spill] sm:$0xff] %v8004_v45 }
 0x391   : > { %v2372_v51 = vmul.f32 1.442695, %v2296_v22  ;;  %v2374_v26 = vmul.f32 1.442695, %v2297_v18  ;;  %v5503_v28 = vpop.f32.mrf.mxu1 }
 0x392   : > { %v2639_v1 = vpop.permute.xlu0 %2638 }
 0x393   : > { %6154 = vpow2.f32 %v2372_v51  ;;  %v5504_v54 = vpop.f32.mrf.mxu1  ;;  %5521 = vmatprep.subr.bf16.mxu1 %v2639_v1  ;;  %v2572_v1 = vpack.c.bf16 %v7768_v30, %v7738_v14  ;;  %v2119_v51 = vpop.f32.mrf.mxu0  ;;  %v2574_v14 = vpack.c.bf16 %v7845_v35, %v7788_v49 }
 0x394   : > { %v6151_v7 = vpop.eup %6150  ;;  %6156 = vpow2.f32 %v2374_v26  ;;  %v8008_v55 = vadd.f32 %v5504_v54, %v5503_v28  ;;  %5522 = vmatpush3.bf16.msra.mxu1 %v2623_v0  ;;  %v2575_v26 = vpack.c.bf16 %v7850_v43, %v7790_v24  ;;  %v1819_v0 = vld [vmem:[#allocation2 + $0x180] sm:$0xff]  ;;  %v2577_v43 = vpack.c.bf16 %v7940_v58, %v7902_v25 }
 0x395   : > { %v6153_v16 = vpop.eup %6152  ;;  %5523 = vmatprep.subr.bf16.mxu1 %v2637_v4  ;;  %v1820_v4 = vld [vmem:[#allocation2 + $0x188] sm:$0xff]  ;;  %v1868_v18 = vunpack.c.h.bf16 %v1819_v0  ;;  %v2576_v25 = vpack.c.bf16 %v7936_v31, %v7900_v21 }
 0x396   : > { %11046 = vst [vmem:[#allocation111_spill] sm:$0xff] %v8008_v55  ;;  %v8010_v45 = vadd.f32 %v6153_v16, %v6151_v7  ;;  %v4122_v13 = vpop.permute.xlu0 %4121  ;;  %v1870_v22 = vunpack.c.h.bf16 %v1820_v4  ;;  %v1869_v55 = vunpack.c.l.bf16 %v1820_v4 }
 0x397   : > { %5344 = vmatmul.mubr.msk.bf16.gmra.mxu0 %vm373_vm0, %v4122_v13 }
 0x398   : > { %11047 = vst [vmem:[#allocation112_spill] sm:$0xff] %v8010_v45  ;;  %4275 = vmatprep.mubr.bf16.mxu0 %v10886_v10  ;;  %v1867_v45 = vunpack.c.l.bf16 %v1819_v0  ;;  %v8022_v30 = vadd.f32 %v2115_v42, %v1870_v22  ;;  %v8028_v3 = vadd.f32 %v2113_v46, %v1869_v55 }
 0x39a   : > { %v2621_v33 = vpop.permute.xlu0 %2620  ;;  %v8030_v4 = vadd.f32 %v2109_v34, %v1867_v45  ;;  %v2239_v0 = vmax.f32 %v8028_v3, %v8022_v30 }
 0x39b   : > { %5524 = vmatpush3.bf16.msra.mxu1 %v2621_v33  ;;  %v1821_v33 = vld [vmem:[#allocation2 + $0x190] sm:$0xff] }
 0x39c   : > { %v1872_v24 = vunpack.c.h.bf16 %v1821_v33  ;;  %v1871_v40 = vunpack.c.l.bf16 %v1821_v33 }
 0x39e   : > { %2701 = vmatmul.mubr.bf16.vlgmr.msra.gmra.mxu1 %v2572_v1  ;;  %v8026_v1 = vadd.f32 %v2111_v56, %v1868_v18  ;;  %v8038_v42 = vadd.f32 %v2119_v51, %v1871_v40 }
 0x39f   : > { %2708 = vmatprep.mubr.bf16.mxu1 %v2575_v26  ;;  %v2121_v26 = vpop.f32.mrf.mxu0 }
 0x3a0   : > { %v6155_v28 = vpop.eup %6154  ;;  %v8034_v49 = vadd.f32 %v2121_v26, %v1872_v24  ;;  %v2236_v35 = vmax.f32 %v8030_v4, %v8026_v1 }
 0x3a1   : > { %v6157_v54 = vpop.eup %6156  ;;  %v2578_v45 = vpack.c.bf16 %v6151_v7, %v6155_v28  ;;  %v2123_v51 = vpop.f32.mrf.mxu0 }
 0x3a2   : > { %v8018_v13 = vadd.f32 %v6157_v54, %v6155_v28  ;;  %v2242_v58 = vmax.f32 %v8038_v42, %v8034_v49  ;;  %v2579_v34 = vpack.c.bf16 %v6153_v16, %v6157_v54  ;;  %v11049_v16 = vld [vmem:[#allocation12_spill] sm:$0xff]  ;;  %v11050_v28 = vld [vmem:[#allocation13_spill] sm:$0xff] }
 0x3a4   : > { %11048 = vst [vmem:[#allocation113_spill] sm:$0xff] %v8018_v13 }
 0x3a6   : > { %2709 = vmatmul.mubr.bf16.gmra.mxu1 %v2574_v14 }
 0x3a7   : > { %2716 = vmatprep.mubr.bf16.mxu1 %v2577_v43 }
 0x3ac   : > { %2240 = vmax.xlane.f32.xlu1 %v2239_v0  ;;  %2237 = vmax.xlane.f32.xlu0 %v2236_v35 }
 0x3ae   : > { %2717 = vmatmul.mubr.bf16.gmra.mxu1 %v2576_v25 }
 0x3af   : > { %2724 = vmatprep.mubr.bf16.mxu1 %v2579_v34 }
 0x3b0   : > { %2243 = vmax.xlane.f32.xlu1 %v2242_v58 }
 0x3b6   : > { %2725 = vmatmul.mubr.bf16.gmra.mxu1 %v2578_v45 }
 0x3bb   : > { %v2214_v56 = vpop.xlane.xlu1 %2213 }
 0x3bc   : > { %v2300_v46 = vsub.f32 %v7824_v8, %v2214_v56  ;;  %v2301_v40 = vsub.f32 %v7817_v61, %v2214_v56 }
 0x3be   : > { %v2380_v55 = vmul.f32 1.442695, %v2300_v46  ;;  %v2382_v22 = vmul.f32 1.442695, %v2301_v40 }
 0x3bf   : > { %v2220_v18 = vpop.xlane.xlu1 %2219 }
 0x3c0   : > { %6158 = vpow2.f32 %v2380_v55  ;;  %v2304_v21 = vsub.f32 %v7834_v11, %v2220_v18  ;;  %v2305_v31 = vsub.f32 %v7831_v23, %v2220_v18  ;;  %v2125_v23 = vpop.f32.mrf.mxu0 }
 0x3c1   : > { %6160 = vpow2.f32 %v2382_v22  ;;  %4133 = vrot.lane.b32.xlu1 %v11049_v16, %s6810_s17  ;;  %v1822_v22 = vld [vmem:[#allocation2 + $0x198] sm:$0xff] }
 0x3c2   : > { %v2388_v54 = vmul.f32 1.442695, %v2304_v21  ;;  %v2390_v7 = vmul.f32 1.442695, %v2305_v31  ;;  %4131 = vrot.lane.b32.xlu0 %v11050_v28, %s6810_s17  ;;  %v2129_v24 = vpop.f32.mrf.mxu0  ;;  %v1874_v21 = vunpack.c.h.bf16 %v1822_v22 }
 0x3c3   : > { %v2223_v8 = vpop.xlane.xlu1 %2222 }
 0x3c4   : > { %6162 = vpow2.f32 %v2388_v54  ;;  %v2306_v61 = vsub.f32 %v7848_v2, %v2223_v8  ;;  %v2307_v33 = vsub.f32 %v7839_v32, %v2223_v8  ;;  %v2131_v2 = vpop.f32.mrf.mxu0  ;;  %v1873_v54 = vunpack.c.l.bf16 %v1822_v22  ;;  %v1824_v8 = vld [vmem:[#allocation2 + $0x1a8] sm:$0xff] }
 0x3c5   : > { %6164 = vpow2.f32 %v2390_v7  ;;  %v1823_v7 = vld [vmem:[#allocation2 + $0x1a0] sm:$0xff] }
 0x3c6   : > { %v2392_v11 = vmul.f32 1.442695, %v2306_v61  ;;  %v2394_v14 = vmul.f32 1.442695, %v2307_v33  ;;  %v1876_v28 = vunpack.c.h.bf16 %v1823_v7  ;;  %v8066_v61 = vadd.f32 %v2125_v23, %v1874_v21 }
 0x3c7   : > { %v4126_v16 = vpop.permute.xlu1 %4125  ;;  %v1878_v33 = vunpack.c.h.bf16 %v1824_v8 }
 0x3c8   : > { %6166 = vpow2.f32 %v2392_v11 }
 0x3c9   : > { %6168 = vpow2.f32 %v2394_v14  ;;  %v1875_v14 = vunpack.c.l.bf16 %v1823_v7 }
 0x3cb   : > { %v2217_v43 = vpop.xlane.xlu0 %2216  ;;  %v8078_v7 = vadd.f32 %v2129_v24, %v1875_v14  ;;  %v11056_v14 = vld [vmem:[#allocation15_spill] sm:$0xff] }
 0x3cc   : > { %v2302_v0 = vsub.f32 %v7870_v17, %v2217_v43  ;;  %v2303_v35 = vsub.f32 %v7863_v48, %v2217_v43  ;;  %v2133_v17 = vpop.f32.mrf.mxu0 }
 0x3cd   : > { %v6159_v26 = vpop.eup %6158 }
 0x3ce   : > { %v6161_v25 = vpop.eup %6160  ;;  %v2384_v58 = vmul.f32 1.442695, %v2302_v0  ;;  %v2386_v34 = vmul.f32 1.442695, %v2303_v35  ;;  %v2135_v31 = vpop.f32.mrf.mxu0  ;;  %v8068_v0 = vadd.f32 %v2123_v51, %v1873_v54  ;;  %v1877_v35 = vunpack.c.l.bf16 %v1824_v8  ;;  %v11055_v8 = vld [vmem:[#allocation14_spill] sm:$0xff] }
 0x3cf   : > { %v8056_v45 = vadd.f32 %v6161_v25, %v6159_v26  ;;  %v4124_v32 = vpop.permute.xlu0 %4123 }
 0x3d0   : > { %6170 = vpow2.f32 %v2384_v58  ;;  %5345 = vmatmul.mubr.msk.bf16.gmra.mxu0 %vm373_vm0, %v4124_v32  ;;  %v2139_v11 = vpop.f32.mrf.mxu0  ;;  %v1825_v58 = vld [vmem:[#allocation2 + $0x1b0] sm:$0xff]  ;;  %v8070_v32 = vadd.f32 %v2131_v2, %v1876_v28  ;;  %v2245_v23 = vmax.f32 %v8068_v0, %v8066_v61  ;;  %v8080_v54 = vadd.f32 %v2133_v17, %v1877_v35 }
 0x3d1   : > { %11051 = vst [vmem:[#allocation12_spill] sm:$0xff] %v8056_v45  ;;  %v6163_v56 = vpop.eup %6162  ;;  %6172 = vpow2.f32 %v2386_v34  ;;  %4285 = vmatprep.mubr.bf16.mxu0 %v10886_v10  ;;  %v1879_v51 = vunpack.c.l.bf16 %v1825_v58 }
 0x3d2   : > { %v6165_v46 = vpop.eup %6164  ;;  %v2141_v45 = vpop.f32.mrf.mxu0 }
 0x3d3   : > { %v8060_v40 = vadd.f32 %v6165_v46, %v6163_v56  ;;  %v8088_v28 = vadd.f32 %v2139_v11, %v1879_v51 }
 0x3d5   : > { %11052 = vst [vmem:[#allocation13_spill] sm:$0xff] %v8060_v40  ;;  %v6167_v55 = vpop.eup %6166  ;;  %v8072_v40 = vadd.f32 %v2135_v31, %v1878_v33 }
 0x3d6   : > { %v6169_v48 = vpop.eup %6168 }
 0x3d7   : > { %v8062_v18 = vadd.f32 %v6169_v48, %v6167_v55  ;;  %v2583_v2 = vpack.c.bf16 %v6169_v48, %v6165_v46  ;;  %v8094_v48 = vpop.f32.mrf.mxu0 }
 0x3d8   : > { %5346 = vmatmul.mubr.msk.bf16.gmra.mxu0 %vm373_vm0, %v4126_v16  ;;  %v1880_v16 = vunpack.c.h.bf16 %v1825_v58 }
 0x3d9   : > { %11053 = vst [vmem:[#allocation114_spill] sm:$0xff] %v8062_v18  ;;  %4295 = vmatprep.mubr.bf16.mxu0 %v10886_v10  ;;  %v2145_v35 = vpop.f32.mrf.mxu0 }
 0x3da   : > { %v8084_v31 = vadd.f32 %v2141_v45, %v1880_v16 }
 0x3dc   : > { %v2254_v24 = vmax.f32 %v8088_v28, %v8084_v31 }
 0x3dd   : > { %v6171_v43 = vpop.eup %6170 }
 0x3de   : > { %v6173_v34 = vpop.eup %6172  ;;  %v2580_v22 = vpack.c.bf16 %v6171_v43, %v6159_v26  ;;  %v2248_v26 = vmax.f32 %v8078_v7, %v8070_v32 }
 0x3df   : > { %v2581_v13 = vpack.c.bf16 %v6173_v34, %v6161_v25  ;;  %v8076_v21 = vadd.f32 %v6173_v34, %v6171_v43  ;;  %v2251_v25 = vmax.f32 %v8080_v54, %v8072_v40 }
 0x3e1   : > { %11054 = vst [vmem:[#allocation115_spill] sm:$0xff] %v8076_v21  ;;  %2732 = vmatprep.mubr.bf16.mxu1 %v2581_v13  ;;  %2246 = vmax.xlane.f32.xlu0 %v2245_v23  ;;  %v2582_v13 = vpack.c.bf16 %v6167_v55, %v6163_v56  ;;  %v2149_v23 = vpop.f32.mrf.mxu0 }
 0x3e2   : > { %2733 = vmatmul.mubr.bf16.gmra.mxu1 %v2580_v22 }
 0x3e3   : > { %2740 = vmatprep.mubr.bf16.mxu1 %v2583_v2 }
 0x3e5   : > { %2249 = vmax.xlane.f32.xlu1 %v2248_v26  ;;  %2252 = vmax.xlane.f32.xlu0 %v2251_v25 }
 0x3e9   : > { %2255 = vmax.xlane.f32.xlu1 %v2254_v24 }
 0x3ea   : > { %2741 = vmatmul.mubr.bf16.gmra.mxu1 %v2582_v13  ;;  %v2151_v13 = vpop.f32.mrf.mxu0 }
 0x3f8   : > { %v2229_v46 = vpop.xlane.xlu1 %2228 }
 0x3f9   : > { %v2310_v17 = vsub.f32 %v7934_v27, %v2229_v46  ;;  %v2311_v45 = vsub.f32 %v7931_v52, %v2229_v46 }
 0x3fa   : > { %4137 = vrot.lane.b32.xlu1 %v11055_v8, %s6810_s17 }
 0x3fb   : > { %v2400_v33 = vmul.f32 1.442695, %v2310_v17  ;;  %v2402_v11 = vmul.f32 1.442695, %v2311_v45  ;;  %4135 = vrot.lane.b32.xlu0 %v11056_v14, %s6810_s17 }
 0x3fc   : > { %v2232_v43 = vpop.xlane.xlu1 %2231 }
 0x3fd   : > { %6174 = vpow2.f32 %v2400_v33  ;;  %v2312_v56 = vsub.f32 %v7954_v41, %v2232_v43  ;;  %v2313_v55 = vsub.f32 %v7945_v29, %v2232_v43  ;;  %v1826_v33 = vld [vmem:[#allocation2 + $0x1b8] sm:$0xff] }
 0x3fe   : > { %6176 = vpow2.f32 %v2402_v11  ;;  %v1882_v14 = vunpack.c.h.bf16 %v1826_v33 }
 0x3ff   : > { %v2404_v27 = vmul.f32 1.442695, %v2312_v56  ;;  %v2406_v52 = vmul.f32 1.442695, %v2313_v55  ;;  %v1881_v55 = vunpack.c.l.bf16 %v1826_v33 }
 0x400   : > { %v2235_v58 = vpop.xlane.xlu1 %2234  ;;  %v2226_v22 = vpop.xlane.xlu0 %2225 }
 0x401   : > { %6178 = vpow2.f32 %v2404_v27  ;;  %v2314_v34 = vsub.f32 %v7967_v44, %v2235_v58  ;;  %v2315_v16 = vsub.f32 %v7961_v36, %v2235_v58  ;;  %v2308_v51 = vsub.f32 %v7970_v19, %v2226_v22  ;;  %v2153_v36 = vpop.f32.mrf.mxu0  ;;  %v1827_v27 = vld [vmem:[#allocation2 + $0x1c0] sm:$0xff] }
 0x402   : > { %6180 = vpow2.f32 %v2406_v52  ;;  %v2309_v2 = vsub.f32 %v7964_v12, %v2226_v22  ;;  %v1884_v58 = vunpack.c.h.bf16 %v1827_v27 }
 0x403   : > { %v2408_v41 = vmul.f32 1.442695, %v2314_v34  ;;  %v2410_v26 = vmul.f32 1.442695, %v2315_v16  ;;  %v2396_v29 = vmul.f32 1.442695, %v2308_v51  ;;  %v2155_v45 = vpop.f32.mrf.mxu0  ;;  %v8116_v51 = vadd.f32 %v2145_v35, %v1882_v14 }
 0x404   : > { %v2398_v25 = vmul.f32 1.442695, %v2309_v2  ;;  %v4128_v24 = vpop.permute.xlu0 %4127  ;;  %v4130_v12 = vpop.permute.xlu1 %4129  ;;  %v1828_v34 = vld [vmem:[#allocation2 + $0x1c8] sm:$0xff] }
 0x405   : > { %6182 = vpow2.f32 %v2408_v41  ;;  %5347 = vmatmul.mubr.msk.bf16.gmra.mxu0 %vm373_vm0, %v4128_v24  ;;  %v1886_v2 = vunpack.c.h.bf16 %v1828_v34  ;;  %v2159_v41 = vpop.f32.mrf.mxu0  ;;  %v1885_v33 = vunpack.c.l.bf16 %v1828_v34 }
 0x406   : > { %6184 = vpow2.f32 %v2410_v26  ;;  %4305 = vmatprep.mubr.bf16.mxu0 %v10886_v10 }
 0x407   : > { %6186 = vpow2.f32 %v2396_v29  ;;  %v1883_v29 = vunpack.c.l.bf16 %v1827_v27  ;;  %v8125_v21 = vadd.f32 %v2155_v45, %v1886_v2  ;;  %v2161_v35 = vpop.f32.mrf.mxu0 }
 0x408   : > { %6188 = vpow2.f32 %v2398_v25 }
 0x40a   : > { %v6175_v44 = vpop.eup %6174 }
 0x40b   : > { %v6177_v46 = vpop.eup %6176 }
 0x40c   : > { %v8108_v19 = vadd.f32 %v6177_v46, %v6175_v44 }
 0x40d   : > { %5348 = vmatmul.mubr.msk.bf16.gmra.mxu0 %vm373_vm0, %v4130_v12  ;;  %v8121_v12 = vadd.f32 %v8094_v48, %v1881_v55  ;;  %v8131_v48 = vadd.f32 %v2153_v36, %v1885_v33  ;;  %v2163_v36 = vpop.f32.mrf.mxu0 }
 0x40e   : > { %11057 = vst [vmem:[#allocation14_spill] sm:$0xff] %v8108_v19  ;;  %v6179_v17 = vpop.eup %6178  ;;  %4315 = vmatprep.mubr.bf16.mxu0 %v10886_v10  ;;  %v8123_v19 = vadd.f32 %v2151_v13, %v1884_v58  ;;  %v11062_v58 = vld [vmem:[#allocation17_spill] sm:$0xff] }
 0x40f   : > { %v6181_v8 = vpop.eup %6180  ;;  %v2263_v45 = vmax.f32 %v8131_v48, %v8125_v21 }
 0x410   : > { %v8112_v11 = vadd.f32 %v6181_v8, %v6179_v17 }
 0x412   : > { %11058 = vst [vmem:[#allocation15_spill] sm:$0xff] %v8112_v11  ;;  %v6183_v43 = vpop.eup %6182  ;;  %v1829_v11 = vld [vmem:[#allocation2 + $0x1d0] sm:$0xff] }
 0x413   : > { %v6185_v56 = vpop.eup %6184  ;;  %v1888_v18 = vunpack.c.h.bf16 %v1829_v11  ;;  %v1887_v14 = vunpack.c.l.bf16 %v1829_v11  ;;  %v2165_v11 = vpop.f32.mrf.mxu0 }
 0x414   : > { %v6187_v52 = vpop.eup %6186  ;;  %v8114_v16 = vadd.f32 %v6185_v56, %v6183_v43 }
 0x415   : > { %v6189_v22 = vpop.eup %6188  ;;  %v2584_v26 = vpack.c.bf16 %v6175_v44, %v6187_v52  ;;  %v2257_v44 = vmax.f32 %v8121_v12, %v8116_v51  ;;  %v8135_v55 = vadd.f32 %v2161_v35, %v1888_v18  ;;  %v8143_v27 = vpop.f32.mrf.mxu0  ;;  %v11061_v18 = vld [vmem:[#allocation16_spill] sm:$0xff] }
 0x416   : > { %11059 = vst [vmem:[#allocation116_spill] sm:$0xff] %v8114_v16  ;;  %v2585_v25 = vpack.c.bf16 %v6177_v46, %v6189_v22  ;;  %v8118_v24 = vadd.f32 %v6189_v22, %v6187_v52  ;;  %v2587_v16 = vpack.c.bf16 %v6185_v56, %v6181_v8  ;;  %v8129_v46 = vadd.f32 %v2149_v23, %v1883_v29 }
 0x417   : > { %v8139_v8 = vadd.f32 %v2159_v41, %v1887_v14  ;;  %v2586_v56 = vpack.c.bf16 %v6183_v43, %v6179_v17  ;;  %v2171_v52 = vpop.f32.mrf.mxu0 }
 0x418   : > { %11060 = vst [vmem:[#allocation117_spill] sm:$0xff] %v8118_v24  ;;  %2748 = vmatprep.mubr.bf16.mxu1 %v2585_v25  ;;  %v2260_v13 = vmax.f32 %v8129_v46, %v8123_v19 }
 0x419   : > { %2749 = vmatmul.mubr.bf16.gmra.mxu1 %v2584_v26  ;;  %v2266_v23 = vmax.f32 %v8139_v8, %v8135_v55 }
 0x41a   : > { %2756 = vmatprep.mubr.bf16.mxu1 %v2587_v16  ;;  %2258 = vmax.xlane.f32.xlu0 %v2257_v44  ;;  %v8149_v16 = vpop.f32.mrf.mxu0 }
 0x41c   : > { %v2175_v44 = vpop.f32.mrf.mxu0 }
 0x41e   : > { %2261 = vmax.xlane.f32.xlu1 %v2260_v13  ;;  %2264 = vmax.xlane.f32.xlu0 %v2263_v45 }
 0x421   : > { %2757 = vmatmul.mubr.bf16.gmra.mxu1 %v2586_v56 }
 0x422   : > { %2267 = vmax.xlane.f32.xlu1 %v2266_v23 }
 0x433   : > { %4141 = vrot.lane.b32.xlu1 %v11061_v18, %s6810_s17 }
 0x434   : > { %4139 = vrot.lane.b32.xlu0 %v11062_v58, %s6810_s17  ;;  %v1830_v58 = vld [vmem:[#allocation2 + $0x1d8] sm:$0xff] }
 0x435   : > { %v2241_v34 = vpop.xlane.xlu1 %2240  ;;  %v2238_v22 = vpop.xlane.xlu0 %2237 }
 0x436   : > { %v2318_v17 = vsub.f32 %v8028_v3, %v2241_v34  ;;  %v2319_v43 = vsub.f32 %v8022_v30, %v2241_v34  ;;  %v2316_v2 = vsub.f32 %v8030_v4, %v2238_v22  ;;  %v2317_v41 = vsub.f32 %v8026_v1, %v2238_v22  ;;  %v2179_v1 = vpop.f32.mrf.mxu0 }
 0x438   : > { %v2416_v26 = vmul.f32 1.442695, %v2318_v17  ;;  %v2418_v29 = vmul.f32 1.442695, %v2319_v43  ;;  %v2412_v25 = vmul.f32 1.442695, %v2316_v2  ;;  %v2181_v4 = vpop.f32.mrf.mxu0  ;;  %v1890_v43 = vunpack.c.h.bf16 %v1830_v58 }
 0x439   : > { %v2414_v33 = vmul.f32 1.442695, %v2317_v41  ;;  %v2244_v35 = vpop.xlane.xlu1 %2243  ;;  %v4132_v45 = vpop.permute.xlu0 %4131 }
 0x43a   : > { %6190 = vpow2.f32 %v2416_v26  ;;  %v2320_v14 = vsub.f32 %v8038_v42, %v2244_v35  ;;  %v2321_v13 = vsub.f32 %v8034_v49, %v2244_v35  ;;  %5349 = vmatmul.mubr.msk.bf16.gmra.mxu0 %vm373_vm0, %v4132_v45  ;;  %v8161_v49 = vpop.f32.mrf.mxu0  ;;  %v1831_v35 = vld [vmem:[#allocation2 + $0x1e0] sm:$0xff] }
 0x43b   : > { %6192 = vpow2.f32 %v2418_v29  ;;  %4325 = vmatprep.mubr.bf16.mxu0 %v10886_v10 }
 0x43c   : > { %6194 = vpow2.f32 %v2412_v25  ;;  %v2420_v3 = vmul.f32 1.442695, %v2320_v14  ;;  %v2422_v30 = vmul.f32 1.442695, %v2321_v13  ;;  %v8165_v22 = vpop.f32.mrf.mxu0  ;;  %v1892_v14 = vunpack.c.h.bf16 %v1831_v35  ;;  %v1832_v13 = vld [vmem:[#allocation2 + $0x1e8] sm:$0xff] }
 0x43d   : > { %6196 = vpow2.f32 %v2414_v33  ;;  %v4134_v56 = vpop.permute.xlu1 %4133  ;;  %v1889_v33 = vunpack.c.l.bf16 %v1830_v58 }
 0x43e   : > { %6198 = vpow2.f32 %v2420_v3  ;;  %v8177_v3 = vadd.f32 %v2165_v11, %v1890_v43 }
 0x43f   : > { %6200 = vpow2.f32 %v2422_v30  ;;  %v1894_v30 = vunpack.c.h.bf16 %v1832_v13 }
 0x441   : > { %v8185_v24 = vadd.f32 %v2175_v44, %v1894_v30  ;;  %v2927_v30 = vld [vmem:[#allocation2 + $0x208] sm:$0xff] }
 0x442   : > { %5350 = vmatmul.mubr.msk.bf16.gmra.mxu0 %vm373_vm0, %v4134_v56  ;;  %v3136_v56 = vpop.f32.mrf.mxu0 }
 0x443   : > { %4335 = vmatprep.mubr.bf16.mxu0 %v10886_v10 }
 0x447   : > { %v6191_v42 = vpop.eup %6190 }
 0x448   : > { %v6193_v23 = vpop.eup %6192 }
 0x449   : > { %v6195_v18 = vpop.eup %6194  ;;  %v8163_v34 = vadd.f32 %v6193_v23, %v6191_v42 }
 0x44a   : > { %v6197_v17 = vpop.eup %6196  ;;  %v2588_v2 = vpack.c.bf16 %v6191_v42, %v6195_v18  ;;  %v1891_v42 = vunpack.c.l.bf16 %v1831_v35 }
 0x44b   : > { %11063 = vst [vmem:[#allocation16_spill] sm:$0xff] %v8163_v34  ;;  %v8167_v41 = vpop.eup %6198  ;;  %v2589_v26 = vpack.c.bf16 %v6193_v23, %v6197_v17  ;;  %v8169_v29 = vadd.f32 %v6197_v17, %v6195_v18  ;;  %v8179_v23 = vadd.f32 %v2163_v36, %v1889_v33  ;;  %v1893_v18 = vunpack.c.l.bf16 %v1832_v13  ;;  %v1833_v17 = vld [vmem:[#allocation2 + $0x1f0] sm:$0xff]  ;;  %v3138_v34 = vpop.f32.mrf.mxu0  ;;  %v2926_v36 = vld [vmem:[#allocation2 + $0x200] sm:$0xff] }
 0x44c   : > { %v8171_v25 = vpop.eup %6200  ;;  %v1896_v58 = vunpack.c.h.bf16 %v1833_v17  ;;  %v8188_v11 = vadd.f32 %v8143_v27, %v1891_v42  ;;  %v1895_v43 = vunpack.c.l.bf16 %v1833_v17  ;;  %v2959_v35 = vunpack.c.h.bf16 %v2926_v36  ;;  %v8205_v17 = vpop.f32.mrf.mxu1 }
 0x44d   : > { %11064 = vst [vmem:[#allocation17_spill] sm:$0xff] %v8169_v29  ;;  %2764 = vmatprep.mubr.bf16.mxu1 %v2589_v26  ;;  %v8175_v45 = vadd.f32 %v8171_v25, %v8167_v41  ;;  %v8181_v29 = vadd.f32 %v2171_v52, %v1892_v14  ;;  %v2269_v26 = vmax.f32 %v8179_v23, %v8177_v3  ;;  %v3140_v14 = vpop.f32.mrf.mxu0  ;;  %v2958_v27 = vunpack.c.l.bf16 %v2926_v36 }
 0x44e   : > { %2765 = vmatmul.mubr.bf16.gmra.mxu1 %v2588_v2  ;;  %v8191_v2 = vadd.f32 %v8149_v16, %v1893_v18  ;;  %v8195_v33 = vadd.f32 %v2181_v4, %v1896_v58  ;;  %v8199_v13 = vadd.f32 %v2179_v1, %v1895_v43  ;;  %v8203_v42 = vadd.f32 %v3138_v34, %v2959_v35  ;;  %v8213_v36 = vpop.f32.mrf.mxu1 }
 0x44f   : > { %11065 = vst [vmem:[#allocation118_spill] sm:$0xff] %v8175_v45  ;;  %v2272_v52 = vmax.f32 %v8188_v11, %v8181_v29  ;;  %v2961_v18 = vunpack.c.h.bf16 %v2927_v30  ;;  %11066 = vst [vmem:[#allocation119_spill] sm:$0xff] %v8205_v17  ;;  %v3142_v4 = vpop.f32.mrf.mxu0  ;;  %v8207_v58 = vadd.f32 %v3136_v56, %v2958_v27 }
 0x450   : > { %v2275_v44 = vmax.f32 %v8191_v2, %v8185_v24  ;;  %v2278_v16 = vmax.f32 %v8199_v13, %v8195_v33  ;;  %11067 = vst [vmem:[#allocation120_spill] sm:$0xff] %v8213_v36 }
 0x451   : > { %v3295_v1 = vmax.f32 %v8207_v58, %v8203_v42  ;;  %v8211_v43 = vadd.f32 %v3142_v4, %v2961_v18 }
 0x453   : > { %2270 = vmax.xlane.f32.xlu0 %v2269_v26  ;;  %v2960_v26 = vunpack.c.l.bf16 %v2927_v30 }
 0x457   : > { %2273 = vmax.xlane.f32.xlu1 %v2272_v52  ;;  %2276 = vmax.xlane.f32.xlu0 %v2275_v44  ;;  %v8215_v52 = vadd.f32 %v3140_v14, %v2960_v26 }
 0x459   : > { %v3298_v35 = vmax.f32 %v8215_v52, %v8211_v43 }
 0x45b   : > { %2279 = vmax.xlane.f32.xlu1 %v2278_v16 }
 0x45e   : > { %v5525_v34 = vpop.f32.mrf.mxu1 }
 0x45f   : > { %3296 = vmax.xlane.f32.xlu1 %v3295_v1 }
 0x460   : > { %v5526_v44 = vpop.f32.mrf.mxu1 }
 0x461   : > { %v8219_v17 = vadd.f32 %v5526_v44, %v5525_v34 }
 0x462   : > { %v8221_v56 = vpop.f32.mrf.mxu1 }
 0x463   : > { %11068 = vst [vmem:[#allocation121_spill] sm:$0xff] %v8219_v17  ;;  %3299 = vmax.xlane.f32.xlu1 %v3298_v35  ;;  %11069 = vst [vmem:[#allocation122_spill] sm:$0xff] %v8221_v56  ;;  %v11074_v35 = vld [vmem:[#allocation18_spill] sm:$0xff] }
 0x464   : > { %v8223_v27 = vpop.f32.mrf.mxu1 }
 0x465   : > { %11070 = vst [vmem:[#allocation123_spill] sm:$0xff] %v8223_v27 }
 0x466   : > { %v5531_v30 = vpop.f32.mrf.mxu1 }
 0x468   : > { %v5532_v16 = vpop.f32.mrf.mxu1 }
 0x469   : > { %v8225_v18 = vadd.f32 %v5532_v16, %v5531_v30 }
 0x46a   : > { %v2247_v4 = vpop.xlane.xlu0 %2246  ;;  %v8227_v14 = vpop.f32.mrf.mxu1 }
 0x46b   : > { %11071 = vst [vmem:[#allocation124_spill] sm:$0xff] %v8225_v18  ;;  %11072 = vst [vmem:[#allocation125_spill] sm:$0xff] %v8227_v14  ;;  %v2322_v26 = vsub.f32 %v8068_v0, %v2247_v4  ;;  %v2323_v1 = vsub.f32 %v8066_v61, %v2247_v4 }
 0x46c   : > { %v8231_v36 = vpop.f32.mrf.mxu1 }
 0x46d   : > { %11073 = vst [vmem:[#allocation126_spill] sm:$0xff] %v8231_v36  ;;  %v2424_v34 = vmul.f32 1.442695, %v2322_v26  ;;  %v2426_v44 = vmul.f32 1.442695, %v2323_v1  ;;  %4143 = vrot.lane.b32.xlu0 %v11074_v35, %s6810_s17 }
 0x46e   : > { %v2250_v17 = vpop.xlane.xlu1 %2249  ;;  %v2253_v16 = vpop.xlane.xlu0 %2252 }
 0x46f   : > { %v2324_v27 = vsub.f32 %v8078_v7, %v2250_v17  ;;  %v2325_v30 = vsub.f32 %v8070_v32, %v2250_v17  ;;  %v5537_v18 = vpop.f32.mrf.mxu1  ;;  %6202 = vpow2.f32 %v2424_v34  ;;  %v2326_v14 = vsub.f32 %v8080_v54, %v2253_v16 }
 0x470   : > { %v2327_v0 = vsub.f32 %v8072_v40, %v2253_v16  ;;  %6204 = vpow2.f32 %v2426_v44 }
 0x471   : > { %v2428_v61 = vmul.f32 1.442695, %v2324_v27  ;;  %v2430_v4 = vmul.f32 1.442695, %v2325_v30  ;;  %v5538_v26 = vpop.f32.mrf.mxu1  ;;  %v2432_v1 = vmul.f32 1.442695, %v2326_v14 }
 0x472   : > { %v2434_v36 = vmul.f32 1.442695, %v2327_v0  ;;  %v8239_v56 = vadd.f32 %v5538_v26, %v5537_v18  ;;  %v2256_v35 = vpop.xlane.xlu1 %2255  ;;  %v4136_v17 = vpop.permute.xlu0 %4135 }
 0x473   : > { %6206 = vpow2.f32 %v2428_v61  ;;  %v2328_v7 = vsub.f32 %v8088_v28, %v2256_v35  ;;  %v2329_v32 = vsub.f32 %v8084_v31, %v2256_v35  ;;  %v8243_v34 = vpop.f32.mrf.mxu1  ;;  %5351 = vmatmul.mubr.msk.bf16.gmra.mxu0 %vm373_vm0, %v4136_v17  ;;  %v1834_v35 = vld [vmem:[#allocation2 + $0x1f8] sm:$0xff] }
 0x474   : > { %11075 = vst [vmem:[#allocation18_spill] sm:$0xff] %v8239_v56  ;;  %11076 = vst [vmem:[#allocation127_spill] sm:$0xff] %v8243_v34  ;;  %6208 = vpow2.f32 %v2430_v4  ;;  %3741 = vrot.lane.b32.xlu1 %v7163_v62, %s6809_s16  ;;  %4345 = vmatprep.mubr.bf16.mxu0 %v10886_v10  ;;  %v3146_v4 = vpop.f32.mrf.mxu0  ;;  %v1898_v17 = vunpack.c.h.bf16 %v1834_v35 }
 0x475   : > { %6210 = vpow2.f32 %v2432_v1  ;;  %v2436_v40 = vmul.f32 1.442695, %v2328_v7  ;;  %v2438_v54 = vmul.f32 1.442695, %v2329_v32  ;;  %v8248_v27 = vpop.f32.mrf.mxu1 }
 0x476   : > { %11077 = vst [vmem:[#allocation128_spill] sm:$0xff] %v8248_v27  ;;  %6212 = vpow2.f32 %v2434_v36  ;;  %v4138_v14 = vpop.permute.xlu1 %4137 }
 0x477   : > { %6214 = vpow2.f32 %v2436_v40  ;;  %v5543_v28 = vpop.f32.mrf.mxu1 }
 0x478   : > { %6216 = vpow2.f32 %v2438_v54  ;;  %3725 = vrot.lane.b32.xlu1 %v7161_v59, %s6809_s16  ;;  %v3148_v54 = vpop.f32.mrf.mxu0 }
 0x479   : > { %v5544_v31 = vpop.f32.mrf.mxu1 }
 0x47a   : > { %v8253_v18 = vadd.f32 %v5544_v31, %v5543_v28  ;;  %v1897_v31 = vunpack.c.l.bf16 %v1834_v35 }
 0x47b   : > { %5352 = vmatmul.mubr.msk.bf16.gmra.mxu0 %vm373_vm0, %v4138_v14 }
 0x47c   : > { %11078 = vst [vmem:[#allocation129_spill] sm:$0xff] %v8253_v18  ;;  %3723 = vrot.lane.b32.xlu1 %v10926_v60, %s6809_s16  ;;  %v6203_v44 = vpop.eup %6202  ;;  %4355 = vmatprep.mubr.bf16.mxu0 %v10886_v10  ;;  %v2928_v18 = vld [vmem:[#allocation2 + $0x210] sm:$0xff] }
 0x47d   : > { %v6205_v30 = vpop.eup %6204  ;;  %v2590_v36 = vpack.c.bf16 %v6203_v44, %v8167_v41 }
 0x47e   : > { %v2591_v16 = vpack.c.bf16 %v6205_v30, %v8171_v25  ;;  %v8261_v0 = vadd.f32 %v6205_v30, %v6203_v44  ;;  %v8276_v44 = vadd.f32 %v8165_v22, %v1898_v17  ;;  %v8278_v30 = vpop.f32.mrf.mxu0  ;;  %v2963_v22 = vunpack.c.h.bf16 %v2928_v18 }
 0x47f   : > { %v2962_v17 = vunpack.c.l.bf16 %v2928_v18 }
 0x480   : > { %11079 = vst [vmem:[#allocation130_spill] sm:$0xff] %v8261_v0  ;;  %v6207_v61 = vpop.eup %6206  ;;  %2772 = vmatprep.mubr.bf16.mxu1 %v2591_v16  ;;  %v8281_v16 = vadd.f32 %v8161_v49, %v1897_v31  ;;  %v8299_v31 = vpop.f32.mrf.mxu1 }
 0x481   : > { %v6209_v26 = vpop.eup %6208  ;;  %2773 = vmatmul.mubr.bf16.gmra.mxu1 %v2590_v36  ;;  %v8295_v49 = vadd.f32 %v3146_v4, %v2962_v17  ;;  %11083 = vst [vmem:[#allocation134_spill] sm:$0xff] %v8299_v31 }
 0x482   : > { %v6211_v1 = vpop.eup %6210  ;;  %v8263_v7 = vadd.f32 %v6209_v26, %v6207_v61  ;;  %v8305_v27 = vpop.f32.mrf.mxu1 }
 0x483   : > { %v6213_v32 = vpop.eup %6212  ;;  %v2592_v36 = vpack.c.bf16 %v6211_v1, %v6207_v61  ;;  %v8293_v61 = vadd.f32 %v3148_v54, %v2963_v22  ;;  %11084 = vst [vmem:[#allocation135_spill] sm:$0xff] %v8305_v27 }
 0x484   : > { %11080 = vst [vmem:[#allocation131_spill] sm:$0xff] %v8263_v7  ;;  %v8265_v40 = vpop.eup %6214  ;;  %v2593_v28 = vpack.c.bf16 %v6213_v32, %v6209_v26  ;;  %v8267_v41 = vadd.f32 %v6213_v32, %v6211_v1  ;;  %v2281_v26 = vmax.f32 %v8281_v16, %v8276_v44  ;;  %v8285_v32 = vpop.f32.mrf.mxu0 }
 0x485   : > { %v8269_v25 = vpop.eup %6216 }
 0x486   : > { %11081 = vst [vmem:[#allocation132_spill] sm:$0xff] %v8267_v41  ;;  %2780 = vmatprep.mubr.bf16.mxu1 %v2593_v28  ;;  %v8273_v14 = vadd.f32 %v8269_v25, %v8265_v40  ;;  %v8287_v35 = vpop.f32.mrf.mxu0 }
 0x488   : > { %11082 = vst [vmem:[#allocation133_spill] sm:$0xff] %v8273_v14  ;;  %v8289_v28 = vpop.f32.mrf.mxu0 }
 0x489   : > { %2781 = vmatmul.mubr.bf16.gmra.mxu1 %v2592_v36  ;;  %v3301_v36 = vmax.f32 %v8295_v49, %v8293_v61 }
 0x48a   : > { %v8291_v56 = vpop.f32.mrf.mxu0 }
 0x48c   : > { %2282 = vmax.xlane.f32.xlu0 %v2281_v26  ;;  %v8297_v1 = vpop.f32.mrf.mxu0 }
 0x48e   : > { %v8303_v26 = vpop.f32.mrf.mxu0 }
 0x490   : > { %v8309_v18 = vpop.f32.mrf.mxu0 }
 0x492   : > { %v8317_v27 = vpop.f32.mrf.mxu0 }
 0x494   : > { %v8325_v62 = vpop.f32.mrf.mxu0 }
 0x4a0   : > { %3302 = vmax.xlane.f32.xlu1 %v3301_v36 }
 0x4a2   : > { %v5549_v34 = vpop.f32.mrf.mxu1  ;;  %3739 = vrot.lane.b32.xlu0 %v7170_v6, %s6809_s16 }
 0x4a3   : > { %v2259_v4 = vpop.xlane.xlu0 %2258 }
 0x4a4   : > { %v2330_v54 = vsub.f32 %v8121_v12, %v2259_v4  ;;  %v2331_v22 = vsub.f32 %v8116_v51, %v2259_v4  ;;  %v5550_v17 = vpop.f32.mrf.mxu1 }
 0x4a5   : > { %v8313_v31 = vadd.f32 %v5550_v17, %v5549_v34 }
 0x4a6   : > { %v2440_v14 = vmul.f32 1.442695, %v2330_v54  ;;  %v2442_v7 = vmul.f32 1.442695, %v2331_v22  ;;  %v8315_v45 = vpop.f32.mrf.mxu1 }
 0x4a7   : > { %11085 = vst [vmem:[#allocation136_spill] sm:$0xff] %v8313_v31  ;;  %11086 = vst [vmem:[#allocation137_spill] sm:$0xff] %v8315_v45  ;;  %v2262_v36 = vpop.xlane.xlu1 %2261  ;;  %v2265_v60 = vpop.xlane.xlu0 %2264 }
 0x4a8   : > { %v2332_v41 = vsub.f32 %v8129_v46, %v2262_v36  ;;  %v2333_v0 = vsub.f32 %v8123_v19, %v2262_v36  ;;  %6218 = vpow2.f32 %v2440_v14  ;;  %v2334_v12 = vsub.f32 %v8131_v48, %v2265_v60  ;;  %v8323_v4 = vpop.f32.mrf.mxu1 }
 0x4a9   : > { %v2335_v51 = vsub.f32 %v8125_v21, %v2265_v60  ;;  %11087 = vst [vmem:[#allocation138_spill] sm:$0xff] %v8323_v4  ;;  %6220 = vpow2.f32 %v2442_v7  ;;  %v8333_v7 = vpop.f32.mrf.mxu0 }
 0x4aa   : > { %v2444_v34 = vmul.f32 1.442695, %v2332_v41  ;;  %v2446_v54 = vmul.f32 1.442695, %v2333_v0  ;;  %v2448_v22 = vmul.f32 1.442695, %v2334_v12  ;;  %v5555_v31 = vpop.f32.mrf.mxu1 }
 0x4ab   : > { %v2450_v17 = vmul.f32 1.442695, %v2335_v51  ;;  %v2268_v45 = vpop.xlane.xlu1 %2267  ;;  %v4140_v14 = vpop.permute.xlu0 %4139 }
 0x4ac   : > { %6222 = vpow2.f32 %v2444_v34  ;;  %v2336_v19 = vsub.f32 %v8139_v8, %v2268_v45  ;;  %v2337_v46 = vsub.f32 %v8135_v55, %v2268_v45  ;;  %v5556_v48 = vpop.f32.mrf.mxu1  ;;  %5353 = vmatmul.mubr.msk.bf16.gmra.mxu0 %vm373_vm0, %v4140_v14  ;;  %v8337_v55 = vpop.f32.mrf.mxu0 }
 0x4ad   : > { %6224 = vpow2.f32 %v2446_v54  ;;  %v8330_v0 = vadd.f32 %v5556_v48, %v5555_v31  ;;  %4365 = vmatprep.mubr.bf16.mxu0 %v10886_v10  ;;  %v2929_v31 = vld [vmem:[#allocation2 + $0x218] sm:$0xff] }
 0x4ae   : > { %6226 = vpow2.f32 %v2448_v22  ;;  %v2452_v60 = vmul.f32 1.442695, %v2336_v19  ;;  %v2454_v21 = vmul.f32 1.442695, %v2337_v46  ;;  %v2965_v12 = vunpack.c.h.bf16 %v2929_v31  ;;  %v8344_v51 = vpop.f32.mrf.mxu0 }
 0x4af   : > { %11088 = vst [vmem:[#allocation139_spill] sm:$0xff] %v8330_v0  ;;  %6228 = vpow2.f32 %v2450_v17  ;;  %v4142_v8 = vpop.permute.xlu1 %4141  ;;  %v2964_v19 = vunpack.c.l.bf16 %v2929_v31 }
 0x4b0   : > { %6230 = vpow2.f32 %v2452_v60  ;;  %v8356_v48 = vpop.f32.mrf.mxu0 }
 0x4b1   : > { %6232 = vpow2.f32 %v2454_v21  ;;  %3737 = vrot.lane.b32.xlu1 %v10935_v37, %s6809_s16 }
 0x4b2   : > { %v8373_v31 = vpop.f32.mrf.mxu0 }
 0x4b4   : > { %5354 = vmatmul.mubr.msk.bf16.gmra.mxu0 %vm373_vm0, %v4142_v8 }
 0x4b5   : > { %3735 = vrot.lane.b32.xlu1 %v10942_v57, %s6809_s16  ;;  %v6219_v45 = vpop.eup %6218  ;;  %4375 = vmatprep.mubr.bf16.mxu0 %v10886_v10 }
 0x4b6   : > { %v6221_v41 = vpop.eup %6220  ;;  %v2594_v36 = vpack.c.bf16 %v6219_v45, %v8265_v40  ;;  %v8354_v40 = vadd.f32 %v8285_v32, %v2965_v12  ;;  %v8375_v12 = vpop.f32.mrf.mxu0 }
 0x4b7   : > { %v2595_v34 = vpack.c.bf16 %v6221_v41, %v8269_v25  ;;  %v8347_v54 = vadd.f32 %v6221_v41, %v6219_v45  ;;  %v8365_v45 = vadd.f32 %v8278_v30, %v2964_v19  ;;  %v2930_v19 = vld [vmem:[#allocation2 + $0x220] sm:$0xff] }
 0x4b8   : > { %v2966_v4 = vunpack.c.l.bf16 %v2930_v19 }
 0x4b9   : > { %11089 = vst [vmem:[#allocation140_spill] sm:$0xff] %v8347_v54  ;;  %v6223_v22 = vpop.eup %6222  ;;  %3719 = vrot.lane.b32.xlu1 %v10946_v5, %s6809_s16  ;;  %2788 = vmatprep.mubr.bf16.mxu1 %v2595_v34  ;;  %v3304_v32 = vmax.f32 %v8365_v45, %v8354_v40  ;;  %v8377_v34 = vpop.f32.mrf.mxu0 }
 0x4ba   : > { %v6225_v17 = vpop.eup %6224  ;;  %2789 = vmatmul.mubr.bf16.gmra.mxu1 %v2594_v36 }
 0x4bb   : > { %v6227_v46 = vpop.eup %6226  ;;  %v8351_v10 = vadd.f32 %v6225_v17, %v6223_v22 }
 0x4bc   : > { %v6229_v14 = vpop.eup %6228  ;;  %v2596_v36 = vpack.c.bf16 %v6227_v46, %v6223_v22 }
 0x4bd   : > { %11090 = vst [vmem:[#allocation141_spill] sm:$0xff] %v8351_v10  ;;  %v8358_v25 = vpop.eup %6230  ;;  %v2597_v60 = vpack.c.bf16 %v6229_v14, %v6225_v17  ;;  %v8360_v21 = vadd.f32 %v6229_v14, %v6227_v46  ;;  %v8379_v17 = vpop.f32.mrf.mxu0  ;;  %v2967_v14 = vunpack.c.h.bf16 %v2930_v19 }
 0x4be   : > { %v8362_v8 = vpop.eup %6232 }
 0x4bf   : > { %11091 = vst [vmem:[#allocation142_spill] sm:$0xff] %v8360_v21  ;;  %2796 = vmatprep.mubr.bf16.mxu1 %v2597_v60  ;;  %v8369_v41 = vadd.f32 %v8362_v8, %v8358_v25  ;;  %v8381_v30 = vpop.f32.mrf.mxu0  ;;  %v8383_v60 = vpop.f32.mrf.mxu1 }
 0x4c0   : > { %11093 = vst [vmem:[#allocation144_spill] sm:$0xff] %v8383_v60 }
 0x4c1   : > { %11092 = vst [vmem:[#allocation143_spill] sm:$0xff] %v8369_v41  ;;  %3305 = vmax.xlane.f32.xlu0 %v3304_v32  ;;  %v8385_v0 = vpop.f32.mrf.mxu0  ;;  %v8388_v41 = vadd.f32 %v8289_v28, %v2967_v14  ;;  %v8390_v22 = vpop.f32.mrf.mxu1  ;;  %v8397_v32 = vadd.f32 %v8287_v35, %v2966_v4 }
 0x4c2   : > { %2797 = vmatmul.mubr.bf16.gmra.mxu1 %v2596_v36  ;;  %11094 = vst [vmem:[#allocation145_spill] sm:$0xff] %v8390_v22 }
 0x4c3   : > { %v8392_v46 = vpop.f32.mrf.mxu0  ;;  %v3307_v60 = vmax.f32 %v8397_v32, %v8388_v41 }
 0x4c5   : > { %v8401_v21 = vpop.f32.mrf.mxu0 }
 0x4c7   : > { %v8411_v35 = vpop.f32.mrf.mxu0 }
 0x4d7   : > { %3721 = vrot.lane.b32.xlu0 %v10966_v63, %s6809_s16 }
 0x4d9   : > { %v5561_v36 = vpop.f32.mrf.mxu1 }
 0x4db   : > { %v5562_v10 = vpop.f32.mrf.mxu1 }
 0x4dc   : > { %v8403_v19 = vadd.f32 %v5562_v10, %v5561_v36  ;;  %v2271_v14 = vpop.xlane.xlu0 %2270 }
 0x4dd   : > { %v8405_v28 = vpop.f32.mrf.mxu1  ;;  %3308 = vmax.xlane.f32.xlu1 %v3307_v60  ;;  %v2338_v22 = vsub.f32 %v8179_v23, %v2271_v14  ;;  %v2339_v54 = vsub.f32 %v8177_v3, %v2271_v14 }
 0x4de   : > { %11095 = vst [vmem:[#allocation146_spill] sm:$0xff] %v8403_v19  ;;  %11096 = vst [vmem:[#allocation147_spill] sm:$0xff] %v8405_v28 }
 0x4df   : > { %v8409_v5 = vpop.f32.mrf.mxu1  ;;  %v2456_v4 = vmul.f32 1.442695, %v2338_v22  ;;  %v2458_v37 = vmul.f32 1.442695, %v2339_v54 }
 0x4e0   : > { %11097 = vst [vmem:[#allocation148_spill] sm:$0xff] %v8409_v5  ;;  %v2274_v57 = vpop.xlane.xlu1 %2273  ;;  %v2277_v36 = vpop.xlane.xlu0 %2276 }
 0x4e1   : > { %v5567_v63 = vpop.f32.mrf.mxu1  ;;  %v2340_v6 = vsub.f32 %v8188_v11, %v2274_v57  ;;  %v2341_v10 = vsub.f32 %v8181_v29, %v2274_v57  ;;  %6234 = vpow2.f32 %v2456_v4  ;;  %v2342_v60 = vsub.f32 %v8191_v2, %v2277_v36  ;;  %v8417_v5 = vpop.f32.mrf.mxu0 }
 0x4e2   : > { %v2343_v23 = vsub.f32 %v8185_v24, %v2277_v36  ;;  %6236 = vpow2.f32 %v2458_v37 }
 0x4e3   : > { %v2460_v3 = vmul.f32 1.442695, %v2340_v6  ;;  %v2462_v14 = vmul.f32 1.442695, %v2341_v10  ;;  %v5568_v19 = vpop.f32.mrf.mxu1  ;;  %v2464_v22 = vmul.f32 1.442695, %v2342_v60  ;;  %v8424_v24 = vpop.f32.mrf.mxu0 }
 0x4e4   : > { %v2466_v54 = vmul.f32 1.442695, %v2343_v23  ;;  %v8419_v28 = vadd.f32 %v5568_v19, %v5567_v63  ;;  %v2280_v59 = vpop.xlane.xlu1 %2279  ;;  %v4144_v11 = vpop.permute.xlu0 %4143 }
 0x4e5   : > { %6238 = vpow2.f32 %v2460_v3  ;;  %v2344_v57 = vsub.f32 %v8199_v13, %v2280_v59  ;;  %v2345_v29 = vsub.f32 %v8195_v33, %v2280_v59  ;;  %5355 = vmatmul.mubr.msk.bf16.gmra.mxu0 %vm373_vm0, %v4144_v11  ;;  %v2931_v59 = vld [vmem:[#allocation2 + $0x228] sm:$0xff]  ;;  %v8428_v33 = vpop.f32.mrf.mxu0 }
 0x4e6   : > { %11098 = vst [vmem:[#allocation149_spill] sm:$0xff] %v8419_v28  ;;  %6240 = vpow2.f32 %v2462_v14  ;;  %v2969_v36 = vunpack.c.h.bf16 %v2931_v59  ;;  %v2968_v3 = vunpack.c.l.bf16 %v2931_v59 }
 0x4e7   : > { %6242 = vpow2.f32 %v2464_v22  ;;  %v2468_v6 = vmul.f32 1.442695, %v2344_v57  ;;  %v2470_v37 = vmul.f32 1.442695, %v2345_v29 }
 0x4e8   : > { %6244 = vpow2.f32 %v2466_v54  ;;  %v3297_v2 = vpop.xlane.xlu1 %3296  ;;  %v8434_v54 = vpop.f32.mrf.mxu0  ;;  %v8438_v11 = vadd.f32 %v8297_v1, %v2969_v36 }
 0x4e9   : > { %6246 = vpow2.f32 %v2468_v6  ;;  %v3391_v63 = vsub.f32 %v8207_v58, %v3297_v2  ;;  %v3392_v19 = vsub.f32 %v8203_v42, %v3297_v2  ;;  %v8446_v2 = vadd.f32 %v8291_v56, %v2968_v3 }
 0x4ea   : > { %6248 = vpow2.f32 %v2470_v37 }
 0x4eb   : > { %v3455_v13 = vmul.f32 1.442695, %v3391_v63  ;;  %v3457_v4 = vmul.f32 1.442695, %v3392_v19  ;;  %v8448_v63 = vpop.f32.mrf.mxu0 }
 0x4ec   : > { %v3300_v10 = vpop.xlane.xlu1 %3299 }
 0x4ed   : > { %6250 = vpow2.f32 %v3455_v13  ;;  %v3393_v60 = vsub.f32 %v8215_v52, %v3300_v10  ;;  %v3394_v23 = vsub.f32 %v8211_v43, %v3300_v10  ;;  %v3310_v13 = vmax.f32 %v8446_v2, %v8438_v11  ;;  %v8462_v36 = vpop.f32.mrf.mxu0 }
 0x4ee   : > { %6252 = vpow2.f32 %v3457_v4  ;;  %3733 = vrot.lane.b32.xlu1 %v10979_v53, %s6809_s16  ;;  %v6235_v58 = vpop.eup %6234 }
 0x4ef   : > { %v3459_v42 = vmul.f32 1.442695, %v3393_v60  ;;  %v3461_v14 = vmul.f32 1.442695, %v3394_v23  ;;  %v6237_v22 = vpop.eup %6236  ;;  %v2598_v29 = vpack.c.bf16 %v6235_v58, %v8358_v25 }
 0x4f0   : > { %v3742_v57 = vpop.permute.xlu1 %3741  ;;  %v2599_v43 = vpack.c.bf16 %v6237_v22, %v8362_v8  ;;  %v8441_v52 = vadd.f32 %v6237_v22, %v6235_v58 }
 0x4f1   : > { %6254 = vpow2.f32 %v3459_v42  ;;  %5621 = vmatprep.subr.bf16.mxu1 %v3742_v57  ;;  %v8472_v42 = vpop.f32.mrf.mxu0 }
 0x4f2   : > { %11099 = vst [vmem:[#allocation150_spill] sm:$0xff] %v8441_v52  ;;  %v6239_v6 = vpop.eup %6238  ;;  %6256 = vpow2.f32 %v3461_v14  ;;  %3731 = vrot.lane.b32.xlu1 %v10983_v47, %s6809_s16  ;;  %2804 = vmatprep.mubr.bf16.mxu1 %v2599_v43 }
 0x4f3   : > { %v6241_v37 = vpop.eup %6240  ;;  %2805 = vmatmul.mubr.bf16.gmra.mxu1 %v2598_v29  ;;  %v8480_v29 = vpop.f32.mrf.mxu0 }
 0x4f4   : > { %v6243_v25 = vpop.eup %6242  ;;  %v3726_v1 = vpop.permute.xlu1 %3725  ;;  %v8450_v19 = vadd.f32 %v6241_v37, %v6239_v6 }
 0x4f5   : > { %v6245_v8 = vpop.eup %6244  ;;  %5622 = vmatpush3.bf16.msra.mxu1 %v3726_v1  ;;  %v2600_v58 = vpack.c.bf16 %v6243_v25, %v6239_v6 }
 0x4f6   : > { %11100 = vst [vmem:[#allocation151_spill] sm:$0xff] %v8450_v19  ;;  %v8454_v4 = vpop.eup %6246  ;;  %3715 = vrot.lane.b32.xlu1 %v10985_v9, %s6809_s16  ;;  %v2601_v56 = vpack.c.bf16 %v6245_v8, %v6241_v37  ;;  %v8458_v59 = vadd.f32 %v6245_v8, %v6243_v25  ;;  %3311 = vmax.xlane.f32.xlu0 %v3310_v13  ;;  %v8485_v37 = vpop.f32.mrf.mxu0 }
 0x4f7   : > { %v8460_v10 = vpop.eup %6248  ;;  %v8489_v25 = vpop.f32.mrf.mxu1 }
 0x4f8   : > { %11101 = vst [vmem:[#allocation152_spill] sm:$0xff] %v8458_v59  ;;  %2812 = vmatprep.mubr.bf16.mxu1 %v2601_v56  ;;  %v8466_v60 = vadd.f32 %v8460_v10, %v8454_v4  ;;  %v8487_v6 = vpop.f32.mrf.mxu0  ;;  %11107 = vst [vmem:[#allocation158_spill] sm:$0xff] %v8489_v25  ;;  %v2932_v56 = vld [vmem:[#allocation2 + $0x230] sm:$0xff] }
 0x4f9   : > { %v8493_v8 = vpop.f32.mrf.mxu1  ;;  %v2970_v19 = vunpack.c.l.bf16 %v2932_v56 }
 0x4fa   : > { %11102 = vst [vmem:[#allocation153_spill] sm:$0xff] %v8466_v60  ;;  %v8468_v23 = vpop.eup %6250  ;;  %v8491_v1 = vpop.f32.mrf.mxu0  ;;  %11108 = vst [vmem:[#allocation159_spill] sm:$0xff] %v8493_v8 }
 0x4fb   : > { %11103 = vst [vmem:[#allocation154_spill] sm:$0xff] %v8468_v23  ;;  %v8470_v3 = vpop.eup %6252  ;;  %2813 = vmatmul.mubr.bf16.gmra.mxu1 %v2600_v58  ;;  %v2971_v58 = vunpack.c.h.bf16 %v2932_v56  ;;  %v8507_v59 = vadd.f32 %v8303_v26, %v2970_v19  ;;  %v2933_v26 = vld [vmem:[#allocation2 + $0x238] sm:$0xff] }
 0x4fc   : > { %v8476_v14 = vadd.f32 %v8470_v3, %v8468_v23  ;;  %v8497_v28 = vpop.f32.mrf.mxu0  ;;  %v2972_v19 = vunpack.c.l.bf16 %v2933_v26 }
 0x4fd   : > { %11111 = vst [vmem:[#allocation162_spill] sm:$0xff] %v8507_v59 }
 0x4fe   : > { %11104 = vst [vmem:[#allocation155_spill] sm:$0xff] %v8476_v14  ;;  %v8478_v22 = vpop.eup %6254  ;;  %v8504_v25 = vpop.f32.mrf.mxu0 }
 0x4ff   : > { %11105 = vst [vmem:[#allocation156_spill] sm:$0xff] %v8478_v22  ;;  %v6257_v57 = vpop.eup %6256 }
 0x500   : > { %v8483_v43 = vadd.f32 %v6257_v57, %v8478_v22  ;;  %v8513_v47 = vpop.f32.mrf.mxu0  ;;  %v3680_v23 = vpack.c.bf16 %v6257_v57, %v8470_v3 }
 0x502   : > { %11106 = vst [vmem:[#allocation157_spill] sm:$0xff] %v8483_v43  ;;  %v8502_v43 = vadd.f32 %v8309_v18, %v2971_v58  ;;  %v3724_v18 = vpop.permute.xlu1 %3723  ;;  %v8515_v58 = vpop.f32.mrf.mxu0 }
 0x504   : > { %11110 = vst [vmem:[#allocation161_spill] sm:$0xff] %v8502_v43  ;;  %v3313_v53 = vmax.f32 %v8507_v59, %v8502_v43  ;;  %v2939_v59 = vld [vmem:[#allocation2 + $0x268] sm:$0xff] }
 0x50c   : > { %3717 = vrot.lane.b32.xlu0 %v10986_v39, %s6809_s16 }
 0x50e   : > { %v5573_v13 = vpop.f32.mrf.mxu1 }
 0x510   : > { %v5574_v14 = vpop.f32.mrf.mxu1 }
 0x511   : > { %v8499_v60 = vadd.f32 %v5574_v14, %v5573_v13 }
 0x512   : > { %v8556_v57 = vpop.f32.mrf.mxu1 }
 0x513   : > { %11109 = vst [vmem:[#allocation160_spill] sm:$0xff] %v8499_v60  ;;  %11117 = vst [vmem:[#allocation168_spill] sm:$0xff] %v8556_v57 }
 0x515   : > { %v2283_v8 = vpop.xlane.xlu0 %2282 }
 0x516   : > { %v2346_v52 = vsub.f32 %v8281_v16, %v2283_v8  ;;  %v2347_v9 = vsub.f32 %v8276_v44, %v2283_v8  ;;  %v8517_v16 = vpop.f32.mrf.mxu0  ;;  %v2973_v44 = vunpack.c.h.bf16 %v2933_v26 }
 0x518   : > { %v2472_v14 = vmul.f32 1.442695, %v2346_v52  ;;  %v2474_v13 = vmul.f32 1.442695, %v2347_v9  ;;  %v8519_v8 = vpop.f32.mrf.mxu0  ;;  %v8522_v60 = vadd.f32 %v8325_v62, %v2973_v44  ;;  %v8525_v9 = vadd.f32 %v8317_v27, %v2972_v19 }
 0x519   : > { %v3740_v56 = vpop.permute.xlu0 %3739 }
 0x51a   : > { %3314 = vmax.xlane.f32.xlu1 %v3313_v53  ;;  %6258 = vpow2.f32 %v2472_v14  ;;  %5623 = vmatprep.subr.bf16.mxu1 %v3740_v56  ;;  %11112 = vst [vmem:[#allocation163_spill] sm:$0xff] %v8522_v60  ;;  %11113 = vst [vmem:[#allocation164_spill] sm:$0xff] %v8525_v9  ;;  %v8527_v52 = vpop.f32.mrf.mxu0 }
 0x51b   : > { %6260 = vpow2.f32 %v2474_v13  ;;  %5624 = vmatpush3.bf16.msra.mxu1 %v3724_v18  ;;  %v3316_v13 = vmax.f32 %v8525_v9, %v8522_v60 }
 0x51c   : > { %v8539_v27 = vpop.f32.mrf.mxu0 }
 0x527   : > { %v6259_v53 = vpop.eup %6258 }
 0x528   : > { %v6261_v14 = vpop.eup %6260  ;;  %v2602_v18 = vpack.c.bf16 %v6259_v53, %v8454_v4 }
 0x529   : > { %v3303_v56 = vpop.xlane.xlu1 %3302  ;;  %v2603_v62 = vpack.c.bf16 %v6261_v14, %v8460_v10  ;;  %v8535_v44 = vadd.f32 %v6261_v14, %v6259_v53  ;;  %v8564_v14 = vpop.f32.mrf.mxu1 }
 0x52a   : > { %v3395_v26 = vsub.f32 %v8295_v49, %v3303_v56  ;;  %v3396_v39 = vsub.f32 %v8293_v61, %v3303_v56  ;;  %v8544_v61 = vpop.f32.mrf.mxu0  ;;  %11120 = vst [vmem:[#allocation171_spill] sm:$0xff] %v8564_v14 }
 0x52b   : > { %11114 = vst [vmem:[#allocation165_spill] sm:$0xff] %v8535_v44  ;;  %3713 = vrot.lane.b32.xlu1 %v10988_v20, %s6809_s16  ;;  %2820 = vmatprep.mubr.bf16.mxu1 %v2603_v62 }
 0x52c   : > { %v3463_v19 = vmul.f32 1.442695, %v3395_v26  ;;  %v3465_v22 = vmul.f32 1.442695, %v3396_v39  ;;  %3317 = vmax.xlane.f32.xlu0 %v3316_v13  ;;  %2821 = vmatmul.mubr.bf16.gmra.mxu1 %v2602_v18  ;;  %v8546_v49 = vpop.f32.mrf.mxu0 }
 0x52d   : > { %v3738_v4 = vpop.permute.xlu1 %3737  ;;  %3791 = vmatprep.mubr.bf16.mxu1 %v3680_v23 }
 0x52e   : > { %6262 = vpow2.f32 %v3463_v19  ;;  %5625 = vmatprep.subr.bf16.mxu1 %v3738_v4  ;;  %v8548_v10 = vpop.f32.mrf.mxu0  ;;  %v2934_v19 = vld [vmem:[#allocation2 + $0x240] sm:$0xff] }
 0x52f   : > { %6264 = vpow2.f32 %v3465_v22  ;;  %3727 = vrot.lane.b32.xlu1 %v10989_v15, %s6809_s16  ;;  %v2975_v14 = vunpack.c.h.bf16 %v2934_v19  ;;  %v2974_v44 = vunpack.c.l.bf16 %v2934_v19 }
 0x530   : > { %v8554_v3 = vpop.f32.mrf.mxu0 }
 0x531   : > { %v8590_v19 = vadd.f32 %v8333_v7, %v2974_v44  ;;  %v2984_v7 = vunpack.c.l.bf16 %v2939_v59  ;;  %v2941_v44 = vld [vmem:[#allocation2 + $0x278] sm:$0xff] }
 0x532   : > { %v8562_v22 = vpop.f32.mrf.mxu0 }
 0x533   : > { %11119 = vst [vmem:[#allocation170_spill] sm:$0xff] %v8562_v22 }
 0x534   : > { %v8568_v56 = vpop.f32.mrf.mxu0 }
 0x536   : > { %v8576_v4 = vpop.f32.mrf.mxu0 }
 0x538   : > { %v8580_v20 = vpop.f32.mrf.mxu0 }
 0x53a   : > { %v8592_v22 = vpop.f32.mrf.mxu0 }
 0x53b   : > { %v8550_v39 = vpop.eup %6262 }
 0x53c   : > { %11115 = vst [vmem:[#allocation166_spill] sm:$0xff] %v8550_v39  ;;  %v8552_v53 = vpop.eup %6264 }
 0x53d   : > { %11116 = vst [vmem:[#allocation167_spill] sm:$0xff] %v8552_v53  ;;  %v8560_v23 = vadd.f32 %v8552_v53, %v8550_v39  ;;  %v3736_v39 = vpop.permute.xlu1 %3735 }
 0x53f   : > { %11118 = vst [vmem:[#allocation169_spill] sm:$0xff] %v8560_v23 }
 0x541   : > { %v5579_v13 = vpop.f32.mrf.mxu1 }
 0x542   : > { %3729 = vrot.lane.b32.xlu0 %v10992_v38, %s6809_s16  ;;  %v2937_v38 = vld [vmem:[#allocation2 + $0x258] sm:$0xff] }
 0x543   : > { %v5580_v18 = vpop.f32.mrf.mxu1  ;;  %v2980_v9 = vunpack.c.l.bf16 %v2937_v38 }
 0x544   : > { %v8570_v26 = vadd.f32 %v5580_v18, %v5579_v13 }
 0x545   : > { %v8572_v62 = vpop.f32.mrf.mxu1 }
 0x546   : > { %11121 = vst [vmem:[#allocation172_spill] sm:$0xff] %v8570_v26  ;;  %11122 = vst [vmem:[#allocation173_spill] sm:$0xff] %v8572_v62  ;;  %3711 = vrot.lane.b32.xlu0 %v10997_v50, %s6809_s16  ;;  %v8585_v62 = vadd.f32 %v8337_v55, %v2975_v14  ;;  %v2981_v50 = vunpack.c.h.bf16 %v2937_v38  ;;  %v3720_v38 = vpop.permute.xlu1 %3719 }
 0x547   : > { %v8578_v57 = vpop.f32.mrf.mxu1 }
 0x548   : > { %11123 = vst [vmem:[#allocation174_spill] sm:$0xff] %v8578_v57  ;;  %v8597_v55 = vadd.f32 %v8379_v17, %v2981_v50  ;;  %v2989_v50 = vunpack.c.h.bf16 %v2941_v44  ;;  %v8610_v17 = vadd.f32 %v8392_v46, %v2984_v7  ;;  %v2945_v46 = vld [vmem:[#allocation2 + $0x298] sm:$0xff] }
 0x549   : > { %v5585_v23 = vpop.f32.mrf.mxu1 }
 0x54a   : > { %v3306_v15 = vpop.xlane.xlu0 %3305 }
 0x54b   : > { %v3397_v13 = vsub.f32 %v8365_v45, %v3306_v15  ;;  %v3398_v18 = vsub.f32 %v8354_v40, %v3306_v15  ;;  %v5586_v26 = vpop.f32.mrf.mxu1  ;;  %v3319_v15 = vmax.f32 %v8590_v19, %v8585_v62  ;;  %v2985_v40 = vunpack.c.h.bf16 %v2939_v59 }
 0x54c   : > { %v8587_v53 = vadd.f32 %v5586_v26, %v5585_v23  ;;  %v8600_v45 = vadd.f32 %v8377_v34, %v2980_v9  ;;  %v8602_v23 = vpop.f32.mrf.mxu0  ;;  %v2943_v34 = vld [vmem:[#allocation2 + $0x288] sm:$0xff] }
 0x54d   : > { %v3467_v57 = vmul.f32 1.442695, %v3397_v13  ;;  %v3469_v60 = vmul.f32 1.442695, %v3398_v18  ;;  %v2993_v14 = vunpack.c.h.bf16 %v2943_v34  ;;  %v2935_v26 = vld [vmem:[#allocation2 + $0x248] sm:$0xff]  ;;  %v2992_v18 = vunpack.c.l.bf16 %v2943_v34 }
 0x54e   : > { %11124 = vst [vmem:[#allocation175_spill] sm:$0xff] %v8587_v53  ;;  %v3722_v43 = vpop.permute.xlu0 %3721  ;;  %v8612_v59 = vpop.f32.mrf.mxu0  ;;  %v2977_v13 = vunpack.c.h.bf16 %v2935_v26  ;;  %v2976_v7 = vunpack.c.l.bf16 %v2935_v26 }
 0x54f   : > { %6266 = vpow2.f32 %v3467_v57  ;;  %5626 = vmatpush3.bf16.msra.mxu1 %v3722_v43  ;;  %v3328_v43 = vmax.f32 %v8600_v45, %v8597_v55  ;;  %v8607_v57 = vadd.f32 %v8401_v21, %v2985_v40  ;;  %v8637_v34 = vadd.f32 %v8462_v36, %v2992_v18 }
 0x550   : > { %6268 = vpow2.f32 %v3469_v60  ;;  %5627 = vmatprep.subr.bf16.mxu1 %v3736_v39  ;;  %v2988_v60 = vunpack.c.l.bf16 %v2941_v44  ;;  %v8617_v39 = vadd.f32 %v8428_v33, %v2989_v50  ;;  %v8629_v33 = vadd.f32 %v8472_v42, %v2993_v14 }
 0x551   : > { %v3334_v9 = vmax.f32 %v8610_v17, %v8607_v57  ;;  %v8646_v14 = vadd.f32 %v8344_v51, %v2976_v7  ;;  %v2949_v7 = vld [vmem:[#allocation2 + $0x2b8] sm:$0xff] }
 0x552   : > { %11125 = vst [vmem:[#allocation176_spill] sm:$0xff] %v8617_v39  ;;  %v8620_v21 = vadd.f32 %v8424_v24, %v2988_v60  ;;  %11127 = vst [vmem:[#allocation178_spill] sm:$0xff] %v8629_v33  ;;  %v8634_v60 = vadd.f32 %v8356_v48, %v2977_v13  ;;  %v3346_v48 = vmax.f32 %v8637_v34, %v8629_v33 }
 0x553   : > { %3320 = vmax.xlane.f32.xlu1 %v3319_v15  ;;  %5628 = vmatpush3.bf16.msra.mxu1 %v3720_v38  ;;  %v8622_v15 = vpop.f32.mrf.mxu0  ;;  %v2936_v38 = vld [vmem:[#allocation2 + $0x250] sm:$0xff] }
 0x554   : > { %11126 = vst [vmem:[#allocation177_spill] sm:$0xff] %v8620_v21  ;;  %v3340_v44 = vmax.f32 %v8620_v21, %v8617_v39  ;;  %v2979_v24 = vunpack.c.h.bf16 %v2936_v38  ;;  %11128 = vst [vmem:[#allocation179_spill] sm:$0xff] %v8634_v60  ;;  %v2978_v53 = vunpack.c.l.bf16 %v2936_v38  ;;  %v2947_v39 = vld [vmem:[#allocation2 + $0x2a8] sm:$0xff]  ;;  %v2938_v21 = vld [vmem:[#allocation2 + $0x260] sm:$0xff] }
 0x555   : > { %v8643_v42 = vpop.f32.mrf.mxu0  ;;  %v3001_v13 = vunpack.c.h.bf16 %v2947_v39  ;;  %v2983_v38 = vunpack.c.h.bf16 %v2938_v21  ;;  %v3000_v51 = vunpack.c.l.bf16 %v2947_v39  ;;  %v2982_v33 = vunpack.c.l.bf16 %v2938_v21  ;;  %v2951_v21 = vld [vmem:[#allocation2 + $0x2c8] sm:$0xff] }
 0x556   : > { %v8654_v18 = vadd.f32 %v8375_v12, %v2979_v24 }
 0x557   : > { %3329 = vmax.xlane.f32.xlu1 %v3328_v43  ;;  %v2997_v43 = vunpack.c.h.bf16 %v2945_v46  ;;  %v8669_v24 = vadd.f32 %v8515_v58, %v3001_v13  ;;  %v8682_v13 = vadd.f32 %v8381_v30, %v2982_v33 }
 0x558   : > { %11131 = vst [vmem:[#allocation182_spill] sm:$0xff] %v8654_v18 }
 0x559   : > { %v8651_v36 = vadd.f32 %v8491_v1, %v2997_v43  ;;  %v8664_v1 = vpop.f32.mrf.mxu0  ;;  %v2940_v43 = vld [vmem:[#allocation2 + $0x270] sm:$0xff] }
 0x55a   : > { %v2987_v39 = vunpack.c.h.bf16 %v2940_v43 }
 0x55b   : > { %3335 = vmax.xlane.f32.xlu1 %v3334_v9  ;;  %v2996_v9 = vunpack.c.l.bf16 %v2945_v46  ;;  %11130 = vst [vmem:[#allocation181_spill] sm:$0xff] %v8651_v36  ;;  %v3322_v46 = vmax.f32 %v8646_v14, %v8634_v60  ;;  %v3005_v60 = vunpack.c.h.bf16 %v2949_v7 }
 0x55c   : > { %v8624_v40 = vpop.eup %6266  ;;  %v8694_v33 = vadd.f32 %v8417_v5, %v2987_v39 }
 0x55d   : > { %v8631_v50 = vpop.eup %6268 }
 0x55e   : > { %v8641_v26 = vadd.f32 %v8631_v50, %v8624_v40 }
 0x55f   : > { %3341 = vmax.xlane.f32.xlu1 %v3340_v44  ;;  %v8659_v44 = vadd.f32 %v8487_v6, %v2996_v9  ;;  %v3004_v9 = vunpack.c.l.bf16 %v2949_v7  ;;  %v2942_v7 = vld [vmem:[#allocation2 + $0x280] sm:$0xff] }
 0x560   : > { %11129 = vst [vmem:[#allocation180_spill] sm:$0xff] %v8641_v26  ;;  %v8662_v26 = vadd.f32 %v8373_v31, %v2978_v53  ;;  %v8674_v31 = vadd.f32 %v8385_v0, %v2983_v38  ;;  %v8677_v53 = vadd.f32 %v8513_v47, %v3000_v51  ;;  %v8689_v47 = vadd.f32 %v8539_v27, %v3005_v60  ;;  %v2953_v60 = vld [vmem:[#allocation2 + $0x2d8] sm:$0xff] }
 0x561   : > { %v3352_v12 = vmax.f32 %v8659_v44, %v8651_v36  ;;  %v2990_v27 = vunpack.c.l.bf16 %v2942_v7  ;;  %v3013_v39 = vunpack.c.h.bf16 %v2953_v60 }
 0x562   : > { %11132 = vst [vmem:[#allocation183_spill] sm:$0xff] %v8662_v26  ;;  %v3325_v6 = vmax.f32 %v8662_v26, %v8654_v18  ;;  %v3009_v18 = vunpack.c.h.bf16 %v2951_v21  ;;  %v8684_v26 = vpop.f32.mrf.mxu0  ;;  %v3358_v0 = vmax.f32 %v8677_v53, %v8669_v24  ;;  %v3331_v30 = vmax.f32 %v8682_v13, %v8674_v31 }
 0x563   : > { %3347 = vmax.xlane.f32.xlu1 %v3346_v48 }
 0x564   : > { %v8705_v5 = vadd.f32 %v8554_v3, %v3009_v18  ;;  %v8718_v3 = vadd.f32 %v8434_v54, %v2990_v27  ;;  %v2946_v18 = vld [vmem:[#allocation2 + $0x2a0] sm:$0xff] }
 0x565   : > { %3323 = vmax.xlane.f32.xlu0 %v3322_v46  ;;  %v2986_v46 = vunpack.c.l.bf16 %v2940_v43  ;;  %v8697_v43 = vadd.f32 %v8527_v52, %v3004_v9 }
 0x566   : > { %v3309_v48 = vpop.xlane.xlu1 %3308 }
 0x567   : > { %v3399_v36 = vsub.f32 %v8397_v32, %v3309_v48  ;;  %v3400_v58 = vsub.f32 %v8388_v41, %v3309_v48  ;;  %3353 = vmax.xlane.f32.xlu1 %v3352_v12  ;;  %v2991_v32 = vunpack.c.h.bf16 %v2942_v7  ;;  %v3008_v41 = vunpack.c.l.bf16 %v2951_v21  ;;  %v2944_v48 = vld [vmem:[#allocation2 + $0x290] sm:$0xff] }
 0x568   : > { %v3364_v21 = vmax.f32 %v8697_v43, %v8689_v47  ;;  %v2995_v52 = vunpack.c.h.bf16 %v2944_v48 }
 0x569   : > { %v3471_v38 = vmul.f32 1.442695, %v3399_v36  ;;  %v3473_v51 = vmul.f32 1.442695, %v3400_v58  ;;  %3326 = vmax.xlane.f32.xlu0 %v3325_v6  ;;  %v3292_v36 = vpop.f32.mrf.mxu0  ;;  %v8700_v6 = vadd.f32 %v8411_v35, %v2986_v46  ;;  %v8712_v7 = vadd.f32 %v8448_v63, %v2991_v32 }
 0x56a   : > { %v3734_v12 = vpop.permute.xlu1 %3733  ;;  %v8715_v35 = vadd.f32 %v8548_v10, %v3008_v41  ;;  %v3012_v46 = vunpack.c.l.bf16 %v2953_v60  ;;  %v2999_v63 = vunpack.c.h.bf16 %v2946_v18  ;;  %v8730_v41 = vadd.f32 %v8485_v37, %v2995_v52  ;;  %v8743_v37 = vpop.f32.mrf.mxu1 }
 0x56b   : > { %6270 = vpow2.f32 %v3471_v38  ;;  %3359 = vmax.xlane.f32.xlu1 %v3358_v0  ;;  %5629 = vmatprep.subr.bf16.mxu1 %v3734_v12  ;;  %v8707_v9 = vpop.f32.mrf.mxu0  ;;  %v3337_v58 = vmax.f32 %v8700_v6, %v8694_v33  ;;  %11133 = vst [vmem:[#allocation184_spill] sm:$0xff] %v8712_v7  ;;  %v2994_v0 = vunpack.c.l.bf16 %v2944_v48  ;;  %v2955_v38 = vld [vmem:[#allocation2 + $0x2e8] sm:$0xff]  ;;  %v8723_v12 = vadd.f32 %v8580_v20, %v3013_v39  ;;  %v2957_v48 = vld [vmem:[#allocation2 + $0x2f8] sm:$0xff] }
 0x56c   : > { %6272 = vpow2.f32 %v3473_v51  ;;  %v3370_v51 = vmax.f32 %v8715_v35, %v8705_v5  ;;  %v3343_v10 = vmax.f32 %v8718_v3, %v8712_v7  ;;  %11134 = vst [vmem:[#allocation185_spill] sm:$0xff] %v8730_v41  ;;  %v8733_v54 = vadd.f32 %v8576_v4, %v3012_v46  ;;  %11136 = vst [vmem:[#allocation187_spill] sm:$0xff] %v8743_v37  ;;  %v2950_v37 = vld [vmem:[#allocation2 + $0x2c0] sm:$0xff] }
 0x56d   : > { %3332 = vmax.xlane.f32.xlu0 %v3331_v30  ;;  %v3017_v30 = vunpack.c.h.bf16 %v2955_v38  ;;  %v8725_v32 = vpop.f32.mrf.mxu0  ;;  %v3016_v27 = vunpack.c.l.bf16 %v2955_v38  ;;  %v2998_v60 = vunpack.c.l.bf16 %v2946_v18  ;;  %v8736_v20 = vadd.f32 %v8480_v29, %v2994_v0 }
 0x56e   : > { %v3376_v39 = vmax.f32 %v8733_v54, %v8723_v12  ;;  %v3021_v7 = vunpack.c.h.bf16 %v2957_v48  ;;  %v8748_v38 = vadd.f32 %v8504_v25, %v2999_v63  ;;  %v3020_v0 = vunpack.c.l.bf16 %v2957_v48 }
 0x56f   : > { %3365 = vmax.xlane.f32.xlu1 %v3364_v21  ;;  %v2948_v21 = vld [vmem:[#allocation2 + $0x2b0] sm:$0xff]  ;;  %v4231_v52 = vpop.f32.mrf.mxu0  ;;  %v3349_v46 = vmax.f32 %v8736_v20, %v8730_v41  ;;  %v8751_v29 = vadd.f32 %v8612_v59, %v3016_v27  ;;  %v8764_v59 = vpop.f32.mrf.mxu1  ;;  %v3007_v27 = vunpack.c.h.bf16 %v2950_v37 }
 0x570   : > { %v3003_v4 = vunpack.c.h.bf16 %v2948_v21  ;;  %11137 = vst [vmem:[#allocation188_spill] sm:$0xff] %v8748_v38  ;;  %v8762_v25 = vadd.f32 %v3292_v36, %v3021_v7  ;;  %11139 = vst [vmem:[#allocation190_spill] sm:$0xff] %v8764_v59  ;;  %v3006_v59 = vunpack.c.l.bf16 %v2950_v37 }
 0x571   : > { %3338 = vmax.xlane.f32.xlu0 %v3337_v58  ;;  %v8741_v58 = vadd.f32 %v8622_v15, %v3017_v30  ;;  %11138 = vst [vmem:[#allocation189_spill] sm:$0xff] %v8751_v29  ;;  %v3002_v15 = vunpack.c.l.bf16 %v2948_v21  ;;  %v4233_v48 = vpop.f32.mrf.mxu0 }
 0x573   : > { %3371 = vmax.xlane.f32.xlu1 %v3370_v51  ;;  %11135 = vst [vmem:[#allocation186_spill] sm:$0xff] %v8741_v58  ;;  %v4018_v51 = vld [vmem:[#allocation2 + $0x308] sm:$0xff]  ;;  %v3382_v41 = vmax.f32 %v8751_v29, %v8741_v58  ;;  %v2952_v58 = vld [vmem:[#allocation2 + $0x2d0] sm:$0xff] }
 0x574   : > { %v4052_v63 = vunpack.c.h.bf16 %v4018_v51  ;;  %v4051_v36 = vunpack.c.l.bf16 %v4018_v51  ;;  %v8797_v51 = vadd.f32 %v8544_v61, %v3006_v59 }
 0x575   : > { %3344 = vmax.xlane.f32.xlu0 %v3343_v10  ;;  %v8758_v10 = vadd.f32 %v8497_v28, %v2998_v60  ;;  %v8773_v60 = vadd.f32 %v8519_v8, %v3003_v4  ;;  %v8790_v4 = vadd.f32 %v8546_v49, %v3007_v27 }
 0x576   : > { %v8783_v29 = vadd.f32 %v4233_v48, %v4052_v63  ;;  %v2954_v63 = vld [vmem:[#allocation2 + $0x2e0] sm:$0xff] }
 0x577   : > { %3377 = vmax.xlane.f32.xlu1 %v3376_v39  ;;  %v3355_v28 = vmax.f32 %v8758_v10, %v8748_v38  ;;  %v8776_v39 = vadd.f32 %v8684_v26, %v3020_v0  ;;  %v3010_v0 = vunpack.c.l.bf16 %v2952_v58 }
 0x578   : > { %v8753_v18 = vpop.eup %6270 }
 0x579   : > { %v8755_v30 = vpop.eup %6272  ;;  %3350 = vmax.xlane.f32.xlu0 %v3349_v46  ;;  %v8779_v46 = vadd.f32 %v8517_v16, %v3002_v15  ;;  %v8792_v16 = vadd.f32 %v4231_v52, %v4051_v36  ;;  %v3015_v52 = vunpack.c.h.bf16 %v2954_v63 }
 0x57a   : > { %v8768_v21 = vadd.f32 %v8755_v30, %v8753_v18  ;;  %v5591_v7 = vpop.f32.mrf.mxu1 }
 0x57b   : > { %3383 = vmax.xlane.f32.xlu1 %v3382_v41  ;;  %v3361_v26 = vmax.f32 %v8779_v46, %v8773_v60  ;;  %v3011_v41 = vunpack.c.h.bf16 %v2952_v58  ;;  %v3367_v58 = vmax.f32 %v8797_v51, %v8790_v4 }
 0x57c   : > { %11140 = vst [vmem:[#allocation191_spill] sm:$0xff] %v8768_v21  ;;  %v3388_v21 = vmax.f32 %v8776_v39, %v8762_v25  ;;  %v5592_v38 = vpop.f32.mrf.mxu1 }
 0x57d   : > { %3356 = vmax.xlane.f32.xlu0 %v3355_v28  ;;  %v8785_v8 = vadd.f32 %v5592_v38, %v5591_v7  ;;  %v4389_v38 = vmax.f32 %v8792_v16, %v8783_v29  ;;  %v3732_v28 = vpop.permute.xlu1 %3731 }
 0x57e   : > { %v8794_v37 = vpop.f32.mrf.mxu1 }
 0x57f   : > { %11141 = vst [vmem:[#allocation192_spill] sm:$0xff] %v8785_v8  ;;  %11142 = vst [vmem:[#allocation193_spill] sm:$0xff] %v8794_v37  ;;  %3389 = vmax.xlane.f32.xlu1 %v3388_v21  ;;  %v3312_v15 = vpop.xlane.xlu0 %3311  ;;  %v8808_v21 = vadd.f32 %v8568_v56, %v3011_v41  ;;  %v11144_v8 = vld [vmem:[#allocation170_spill] sm:$0xff]  ;;  %v8818_v41 = vadd.f32 %v8602_v23, %v3015_v52 }
 0x580   : > { %v3401_v48 = vsub.f32 %v8446_v2, %v3312_v15  ;;  %v3402_v49 = vsub.f32 %v8438_v11, %v3312_v15  ;;  %v8803_v27 = vpop.f32.mrf.mxu1  ;;  %v8811_v2 = vadd.f32 %v11144_v8, %v3010_v0  ;;  %v3014_v11 = vunpack.c.l.bf16 %v2954_v63  ;;  %v4017_v63 = vld [vmem:[#allocation2 + $0x300] sm:$0xff] }
 0x581   : > { %11143 = vst [vmem:[#allocation194_spill] sm:$0xff] %v8803_v27  ;;  %3362 = vmax.xlane.f32.xlu0 %v3361_v26  ;;  %v2956_v26 = vld [vmem:[#allocation2 + $0x2f0] sm:$0xff]  ;;  %11146 = vst [vmem:[#allocation195_spill] sm:$0xff] %v8818_v41  ;;  %v4049_v23 = vunpack.c.l.bf16 %v4017_v63 }
 0x582   : > { %v3475_v61 = vmul.f32 1.442695, %v3401_v48  ;;  %v3477_v59 = vmul.f32 1.442695, %v3402_v49  ;;  %v5597_v36 = vpop.f32.mrf.mxu1  ;;  %v3373_v56 = vmax.f32 %v8811_v2, %v8808_v21  ;;  %v3716_v48 = vpop.permute.xlu1 %3715  ;;  %v8821_v8 = vadd.f32 %v8592_v22, %v3014_v11 }
 0x583   : > { %4390 = vmax.xlane.f32.xlu1 %v4389_v38  ;;  %v3718_v7 = vpop.permute.xlu0 %3717  ;;  %v3019_v38 = vunpack.c.h.bf16 %v2956_v26  ;;  %v3018_v0 = vunpack.c.l.bf16 %v2956_v26 }
 0x584   : > { %6274 = vpow2.f32 %v3475_v61  ;;  %v5598_v15 = vpop.f32.mrf.mxu1  ;;  %5630 = vmatpush3.bf16.msra.mxu1 %v3718_v7  ;;  %v3379_v49 = vmax.f32 %v8821_v8, %v8818_v41  ;;  %v11151_v7 = vld [vmem:[#allocation21_spill] sm:$0xff] }
 0x585   : > { %3368 = vmax.xlane.f32.xlu0 %v3367_v58  ;;  %6276 = vpow2.f32 %v3477_v59  ;;  %v8813_v27 = vadd.f32 %v5598_v15, %v5597_v36  ;;  %5631 = vmatprep.subr.bf16.mxu1 %v3732_v28  ;;  %v8826_v28 = vadd.f32 %v8664_v1, %v3019_v38  ;;  %v4050_v58 = vunpack.c.h.bf16 %v4017_v63  ;;  %v11154_v15 = vld [vmem:[#allocation162_spill] sm:$0xff] }
 0x586   : > { %v8829_v61 = vadd.f32 %v8643_v42, %v3018_v0  ;;  %v8837_v59 = vadd.f32 %v8707_v9, %v4049_v23  ;;  %v11156_v63 = vld [vmem:[#allocation22_spill] sm:$0xff]  ;;  %v11158_v23 = vld [vmem:[#allocation23_spill] sm:$0xff] }
 0x587   : > { %11145 = vst [vmem:[#allocation170_spill] sm:$0xff] %v8813_v27  ;;  %11147 = vst [vmem:[#allocation196_spill] sm:$0xff] %v8826_v28  ;;  %v8834_v52 = vadd.f32 %v8725_v32, %v4050_v58  ;;  %v11153_v32 = vld [vmem:[#allocation24_spill] sm:$0xff]  ;;  %v4237_v58 = vpop.f32.mrf.mxu0 }
 0x588   : > { %5632 = vmatpush3.bf16.msra.mxu1 %v3716_v48  ;;  %11148 = vst [vmem:[#allocation197_spill] sm:$0xff] %v8829_v61  ;;  %v3385_v22 = vmax.f32 %v8829_v61, %v8826_v28  ;;  %11150 = vst [vmem:[#allocation199_spill] sm:$0xff] %v8837_v59 }
 0x589   : > { %3374 = vmax.xlane.f32.xlu0 %v3373_v56  ;;  %11149 = vst [vmem:[#allocation198_spill] sm:$0xff] %v8834_v52  ;;  %v4386_v42 = vmax.f32 %v8837_v59, %v8834_v52  ;;  %v11155_v56 = vld [vmem:[#allocation161_spill] sm:$0xff] }
 0x58d   : > { %3380 = vmax.xlane.f32.xlu0 %v3379_v49  ;;  %v8857_v49 = vpop.f32.mrf.mxu1 }
 0x58e   : > { %11157 = vst [vmem:[#allocation24_spill] sm:$0xff] %v8857_v49  ;;  %v11161_v49 = vld [vmem:[#allocation163_spill] sm:$0xff] }
 0x591   : > { %3386 = vmax.xlane.f32.xlu0 %v3385_v22  ;;  %v8839_v36 = vpop.eup %6274  ;;  %v4019_v22 = vld [vmem:[#allocation2 + $0x310] sm:$0xff] }
 0x592   : > { %v8841_v1 = vpop.eup %6276 }
 0x593   : > { %v8849_v11 = vadd.f32 %v8841_v1, %v8839_v36 }
 0x594   : > { %4816 = vrot.lane.b32.xlu1 %v11151_v7, %s6810_s17  ;;  %v8861_v7 = vpop.f32.mrf.mxu1 }
 0x595   : > { %11152 = vst [vmem:[#allocation21_spill] sm:$0xff] %v8849_v11  ;;  %4387 = vmax.xlane.f32.xlu0 %v4386_v42  ;;  %v4054_v42 = vunpack.c.h.bf16 %v4019_v22  ;;  %11159 = vst [vmem:[#allocation162_spill] sm:$0xff] %v8861_v7 }
 0x598   : > { %4830 = vrot.lane.b32.xlu1 %v11153_v32, %s6810_s17  ;;  %v4239_v32 = vpop.f32.mrf.mxu0 }
 0x5a3   : > { %v3315_v9 = vpop.xlane.xlu1 %3314 }
 0x5a4   : > { %v3403_v26 = vsub.f32 %v11154_v15, %v3315_v9  ;;  %v3404_v38 = vsub.f32 %v11155_v56, %v3315_v9  ;;  %v4053_v15 = vunpack.c.l.bf16 %v4019_v22 }
 0x5a6   : > { %v3479_v48 = vmul.f32 1.442695, %v3403_v26  ;;  %v3481_v0 = vmul.f32 1.442695, %v3404_v38  ;;  %v8874_v22 = vadd.f32 %v4237_v58, %v4053_v15 }
 0x5a7   : > { %v3714_v56 = vpop.permute.xlu1 %3713 }
 0x5a8   : > { %6278 = vpow2.f32 %v3479_v48 }
 0x5a9   : > { %6280 = vpow2.f32 %v3481_v0  ;;  %v8865_v0 = vadd.f32 %v4239_v32, %v4054_v42 }
 0x5ab   : > { %4832 = vrot.lane.b32.xlu0 %v11156_v63, %s6810_s17  ;;  %v11160_v63 = vld [vmem:[#allocation164_spill] sm:$0xff]  ;;  %v4392_v42 = vmax.f32 %v8874_v22, %v8865_v0 }
 0x5af   : > { %4814 = vrot.lane.b32.xlu0 %v11158_v23, %s6810_s17  ;;  %v4241_v23 = vpop.f32.mrf.mxu0 }
 0x5b3   : > { %v5603_v9 = vpop.f32.mrf.mxu1 }
 0x5b5   : > { %v8863_v26 = vpop.eup %6278  ;;  %v3318_v38 = vpop.xlane.xlu0 %3317 }
 0x5b6   : > { %v6281_v48 = vpop.eup %6280  ;;  %v3405_v27 = vsub.f32 %v11160_v63, %v3318_v38  ;;  %v3406_v37 = vsub.f32 %v11161_v49, %v3318_v38  ;;  %v5604_v11 = vpop.f32.mrf.mxu1  ;;  %v11167_v38 = vld [vmem:[#allocation154_spill] sm:$0xff]  ;;  %v11168_v63 = vld [vmem:[#allocation156_spill] sm:$0xff] }
 0x5b7   : > { %v8869_v52 = vadd.f32 %v5604_v11, %v5603_v9  ;;  %v8872_v7 = vadd.f32 %v6281_v48, %v8863_v26  ;;  %v4243_v49 = vpop.f32.mrf.mxu0  ;;  %v3728_v11 = vpop.permute.xlu1 %3727 }
 0x5b8   : > { %v3483_v59 = vmul.f32 1.442695, %v3405_v27  ;;  %v3485_v28 = vmul.f32 1.442695, %v3406_v37  ;;  %v8876_v61 = vpop.f32.mrf.mxu1 }
 0x5b9   : > { %11162 = vst [vmem:[#allocation161_spill] sm:$0xff] %v8869_v52  ;;  %11163 = vst [vmem:[#allocation22_spill] sm:$0xff] %v8872_v7  ;;  %v3730_v41 = vpop.permute.xlu0 %3729  ;;  %v8882_v58 = vpop.f32.mrf.mxu0 }
 0x5ba   : > { %11164 = vst [vmem:[#allocation23_spill] sm:$0xff] %v8876_v61  ;;  %6282 = vpow2.f32 %v3483_v59  ;;  %v8880_v32 = vpop.f32.mrf.mxu1  ;;  %5633 = vmatprep.subr.bf16.mxu1 %v3730_v41  ;;  %v3679_v59 = vpack.c.bf16 %v11168_v63, %v11167_v38  ;;  %v11169_v41 = vld [vmem:[#allocation167_spill] sm:$0xff]  ;;  %v3684_v63 = vpack.c.bf16 %v8841_v1, %v8755_v30  ;;  %v3683_v30 = vpack.c.bf16 %v8839_v36, %v8753_v18 }
 0x5bb   : > { %11165 = vst [vmem:[#allocation164_spill] sm:$0xff] %v8880_v32  ;;  %6284 = vpow2.f32 %v3485_v28  ;;  %5634 = vmatpush3.bf16.msra.mxu1 %v3714_v56  ;;  %v8888_v52 = vpop.f32.mrf.mxu0  ;;  %v3682_v32 = vpack.c.bf16 %v8631_v50, %v11169_v41  ;;  %v4020_v28 = vld [vmem:[#allocation2 + $0x318] sm:$0xff]  ;;  %v11172_v41 = vld [vmem:[#allocation26_spill] sm:$0xff]  ;;  %v11173_v1 = vld [vmem:[#allocation27_spill] sm:$0xff] }
 0x5bc   : > { %v5609_v9 = vpop.f32.mrf.mxu1  ;;  %4393 = vmax.xlane.f32.xlu1 %v4392_v42  ;;  %5635 = vmatprep.subr.bf16.mxu1 %v3728_v11  ;;  %v4056_v56 = vunpack.c.h.bf16 %v4020_v28  ;;  %v4055_v11 = vunpack.c.l.bf16 %v4020_v28 }
 0x5bd   : > { %v3712_v37 = vpop.permute.xlu0 %3711  ;;  %v8892_v42 = vpop.f32.mrf.mxu0 }
 0x5be   : > { %v5610_v27 = vpop.f32.mrf.mxu1 }
 0x5bf   : > { %v8884_v15 = vadd.f32 %v5610_v27, %v5609_v9  ;;  %5636 = vmatpush3.bf16.msra.mxu1 %v3712_v37  ;;  %v8894_v9 = vadd.f32 %v4243_v49, %v4056_v56  ;;  %v11170_v37 = vld [vmem:[#allocation166_spill] sm:$0xff]  ;;  %v8898_v38 = vpop.f32.mrf.mxu0 }
 0x5c0   : > { %v3681_v27 = vpack.c.bf16 %v8624_v40, %v11170_v37 }
 0x5c1   : > { %11166 = vst [vmem:[#allocation163_spill] sm:$0xff] %v8884_v15 }
 0x5c2   : > { %3792 = vmatmul.mubr.bf16.vlgmr.msra.gmra.mxu1 %v3679_v59  ;;  %v8904_v59 = vadd.f32 %v4241_v23, %v4055_v11 }
 0x5c3   : > { %3799 = vmatprep.mubr.bf16.mxu1 %v3682_v32  ;;  %v8906_v32 = vpop.f32.mrf.mxu0 }
 0x5c4   : > { %v4395_v49 = vmax.f32 %v8904_v59, %v8894_v9 }
 0x5c5   : > { %v8912_v40 = vpop.f32.mrf.mxu0 }
 0x5c7   : > { %v6283_v61 = vpop.eup %6282  ;;  %v8918_v28 = vpop.f32.mrf.mxu0 }
 0x5c8   : > { %v6285_v7 = vpop.eup %6284  ;;  %v3685_v11 = vpack.c.bf16 %v6283_v61, %v8863_v26 }
 0x5c9   : > { %v8902_v50 = vadd.f32 %v6285_v7, %v6283_v61  ;;  %v3686_v23 = vpack.c.bf16 %v6285_v7, %v6281_v48  ;;  %v8920_v56 = vpop.f32.mrf.mxu0 }
 0x5ca   : > { %3800 = vmatmul.mubr.bf16.gmra.mxu1 %v3681_v27 }
 0x5cb   : > { %11171 = vst [vmem:[#allocation154_spill] sm:$0xff] %v8902_v50  ;;  %3807 = vmatprep.mubr.bf16.mxu1 %v3684_v63  ;;  %v8923_v37 = vpop.f32.mrf.mxu0  ;;  %v11182_v50 = vld [vmem:[#allocation178_spill] sm:$0xff] }
 0x5cd   : > { %4812 = vrot.lane.b32.xlu1 %v11172_v41, %s6810_s17  ;;  %v8925_v63 = vpop.f32.mrf.mxu0 }
 0x5ce   : > { %4396 = vmax.xlane.f32.xlu0 %v4395_v49 }
 0x5cf   : > { %v8929_v41 = vpop.f32.mrf.mxu0 }
 0x5d1   : > { %4826 = vrot.lane.b32.xlu1 %v11173_v1, %s6810_s17 }
 0x5d2   : > { %3808 = vmatmul.mubr.bf16.gmra.mxu1 %v3683_v30 }
 0x5d3   : > { %3815 = vmatprep.mubr.bf16.mxu1 %v3686_v23  ;;  %v11174_v23 = vld [vmem:[#allocation25_spill] sm:$0xff] }
 0x5da   : > { %3816 = vmatmul.mubr.bf16.gmra.mxu1 %v3685_v11 }
 0x5dc   : > { %v3321_v27 = vpop.xlane.xlu1 %3320 }
 0x5dd   : > { %v3407_v18 = vsub.f32 %v8590_v19, %v3321_v27  ;;  %v3408_v36 = vsub.f32 %v8585_v62, %v3321_v27  ;;  %v8935_v19 = vpop.f32.mrf.mxu0 }
 0x5df   : > { %v3487_v49 = vmul.f32 1.442695, %v3407_v18  ;;  %v3489_v7 = vmul.f32 1.442695, %v3408_v36  ;;  %v8939_v18 = vpop.f32.mrf.mxu0 }
 0x5e0   : > { %v3330_v48 = vpop.xlane.xlu1 %3329  ;;  %11175 = vst [vmem:[#allocation156_spill] sm:$0xff] %v8939_v18 }
 0x5e1   : > { %6286 = vpow2.f32 %v3487_v49  ;;  %v3413_v30 = vsub.f32 %v8600_v45, %v3330_v48  ;;  %v3414_v61 = vsub.f32 %v8597_v55, %v3330_v48  ;;  %v8941_v45 = vpop.f32.mrf.mxu1  ;;  %v11177_v49 = vld [vmem:[#allocation28_spill] sm:$0xff]  ;;  %v4021_v48 = vld [vmem:[#allocation2 + $0x320] sm:$0xff] }
 0x5e2   : > { %6288 = vpow2.f32 %v3489_v7  ;;  %11176 = vst [vmem:[#allocation167_spill] sm:$0xff] %v8941_v45 }
 0x5e3   : > { %v3499_v26 = vmul.f32 1.442695, %v3413_v30  ;;  %v3501_v1 = vmul.f32 1.442695, %v3414_v61  ;;  %v11178_v30 = vld [vmem:[#allocation177_spill] sm:$0xff] }
 0x5e4   : > { %4828 = vrot.lane.b32.xlu0 %v11174_v23, %s6810_s17  ;;  %v3336_v11 = vpop.xlane.xlu1 %3335 }
 0x5e5   : > { %6290 = vpow2.f32 %v3499_v26  ;;  %v3417_v62 = vsub.f32 %v8610_v17, %v3336_v11  ;;  %v3418_v27 = vsub.f32 %v8607_v57, %v3336_v11  ;;  %v11179_v26 = vld [vmem:[#allocation176_spill] sm:$0xff]  ;;  %v4058_v17 = vunpack.c.h.bf16 %v4021_v48  ;;  %v8947_v57 = vpop.f32.mrf.mxu0 }
 0x5e6   : > { %6292 = vpow2.f32 %v3501_v1  ;;  %11180 = vst [vmem:[#allocation166_spill] sm:$0xff] %v8947_v57  ;;  %v8949_v1 = vpop.f32.mrf.mxu1 }
 0x5e7   : > { %v3507_v55 = vmul.f32 1.442695, %v3417_v62  ;;  %v3509_v36 = vmul.f32 1.442695, %v3418_v27  ;;  %11181 = vst [vmem:[#allocation26_spill] sm:$0xff] %v8949_v1  ;;  %v4057_v62 = vunpack.c.l.bf16 %v4021_v48 }
 0x5e8   : > { %4810 = vrot.lane.b32.xlu0 %v11177_v49, %s6810_s17  ;;  %v3342_v7 = vpop.xlane.xlu1 %3341 }
 0x5e9   : > { %6294 = vpow2.f32 %v3507_v55  ;;  %v3421_v61 = vsub.f32 %v11178_v30, %v3342_v7  ;;  %v3422_v23 = vsub.f32 %v11179_v26, %v3342_v7  ;;  %v8956_v7 = vadd.f32 %v8888_v52, %v4058_v17  ;;  %v8960_v26 = vpop.f32.mrf.mxu0 }
 0x5ea   : > { %6296 = vpow2.f32 %v3509_v36 }
 0x5eb   : > { %v3515_v11 = vmul.f32 1.442695, %v3421_v61  ;;  %v3517_v15 = vmul.f32 1.442695, %v3422_v23  ;;  %11183 = vst [vmem:[#allocation27_spill] sm:$0xff] %v8956_v7 }
 0x5ec   : > { %v3348_v27 = vpop.xlane.xlu1 %3347  ;;  %v5615_v45 = vpop.f32.mrf.mxu1 }
 0x5ed   : > { %6298 = vpow2.f32 %v3515_v11  ;;  %v3425_v49 = vsub.f32 %v8637_v34, %v3348_v27  ;;  %v3426_v55 = vsub.f32 %v11182_v50, %v3348_v27  ;;  %v11184_v11 = vld [vmem:[#allocation179_spill] sm:$0xff]  ;;  %v8965_v50 = vadd.f32 %v8882_v58, %v4057_v62  ;;  %v11188_v58 = vld [vmem:[#allocation181_spill] sm:$0xff] }
 0x5ee   : > { %v8953_v18 = vpop.eup %6286  ;;  %6300 = vpow2.f32 %v3517_v15  ;;  %v3324_v36 = vpop.xlane.xlu0 %3323 }
 0x5ef   : > { %v8958_v30 = vpop.eup %6288  ;;  %v3523_v61 = vmul.f32 1.442695, %v3425_v49  ;;  %v3525_v48 = vmul.f32 1.442695, %v3426_v55  ;;  %v3409_v23 = vsub.f32 %v8646_v14, %v3324_v36  ;;  %v3410_v1 = vsub.f32 %v11184_v11, %v3324_v36  ;;  %v5616_v34 = vpop.f32.mrf.mxu1  ;;  %11185 = vst [vmem:[#allocation25_spill] sm:$0xff] %v8965_v50 }
 0x5f0   : > { %v8967_v27 = vadd.f32 %v5616_v34, %v5615_v45  ;;  %v3354_v52 = vpop.xlane.xlu1 %3353  ;;  %v8971_v15 = vadd.f32 %v8958_v30, %v8953_v18  ;;  %v4398_v14 = vmax.f32 %v8965_v50, %v8956_v7  ;;  %v8981_v11 = vpop.f32.mrf.mxu0 }
 0x5f1   : > { %6302 = vpow2.f32 %v3523_v61  ;;  %v3491_v17 = vmul.f32 1.442695, %v3409_v23  ;;  %v3493_v57 = vmul.f32 1.442695, %v3410_v1  ;;  %v3429_v49 = vsub.f32 %v8659_v44, %v3354_v52  ;;  %v11189_v61 = vld [vmem:[#allocation183_spill] sm:$0xff]  ;;  %v11190_v1 = vld [vmem:[#allocation182_spill] sm:$0xff] }
 0x5f2   : > { %11186 = vst [vmem:[#allocation28_spill] sm:$0xff] %v8967_v27  ;;  %11187 = vst [vmem:[#allocation177_spill] sm:$0xff] %v8971_v15  ;;  %v8974_v55 = vpop.eup %6290  ;;  %6304 = vpow2.f32 %v3525_v48  ;;  %v3430_v62 = vsub.f32 %v11188_v58, %v3354_v52  ;;  %v3327_v45 = vpop.xlane.xlu0 %3326 }
 0x5f3   : > { %v8979_v36 = vpop.eup %6292  ;;  %6306 = vpow2.f32 %v3491_v17  ;;  %v3531_v34 = vmul.f32 1.442695, %v3429_v49  ;;  %v3411_v23 = vsub.f32 %v11189_v61, %v3327_v45  ;;  %v3412_v27 = vsub.f32 %v11190_v1, %v3327_v45 }
 0x5f4   : > { %6308 = vpow2.f32 %v3493_v57  ;;  %v3533_v44 = vmul.f32 1.442695, %v3430_v62  ;;  %v3360_v15 = vpop.xlane.xlu1 %3359  ;;  %v8987_v7 = vadd.f32 %v8979_v36, %v8974_v55  ;;  %v4022_v57 = vld [vmem:[#allocation2 + $0x328] sm:$0xff]  ;;  %v8995_v62 = vpop.f32.mrf.mxu0 }
 0x5f5   : > { %6310 = vpow2.f32 %v3531_v34  ;;  %v3495_v48 = vmul.f32 1.442695, %v3411_v23  ;;  %v3497_v52 = vmul.f32 1.442695, %v3412_v27  ;;  %v3433_v58 = vsub.f32 %v8677_v53, %v3360_v15  ;;  %4399 = vmax.xlane.f32.xlu1 %v4398_v14 }
 0x5f6   : > { %11191 = vst [vmem:[#allocation176_spill] sm:$0xff] %v8987_v7  ;;  %v8990_v50 = vpop.eup %6294  ;;  %6312 = vpow2.f32 %v3533_v44  ;;  %v3434_v17 = vsub.f32 %v8669_v24, %v3360_v15  ;;  %v3333_v49 = vpop.xlane.xlu0 %3332  ;;  %v4060_v23 = vunpack.c.h.bf16 %v4022_v57 }
 0x5f7   : > { %v8993_v45 = vpop.eup %6296  ;;  %6314 = vpow2.f32 %v3495_v48  ;;  %v3539_v61 = vmul.f32 1.442695, %v3433_v58  ;;  %v3415_v34 = vsub.f32 %v8682_v13, %v3333_v49  ;;  %v3416_v27 = vsub.f32 %v8674_v31, %v3333_v49 }
 0x5f8   : > { %6316 = vpow2.f32 %v3497_v52  ;;  %v3541_v53 = vmul.f32 1.442695, %v3434_v17  ;;  %v3366_v14 = vpop.xlane.xlu1 %3365  ;;  %v9001_v1 = vadd.f32 %v8993_v45, %v8990_v50  ;;  %v4059_v48 = vunpack.c.l.bf16 %v4022_v57  ;;  %v9009_v52 = vpop.f32.mrf.mxu0 }
 0x5f9   : > { %6318 = vpow2.f32 %v3539_v61  ;;  %v3503_v24 = vmul.f32 1.442695, %v3415_v34  ;;  %v3505_v15 = vmul.f32 1.442695, %v3416_v27  ;;  %v3437_v44 = vsub.f32 %v8697_v43, %v3366_v14 }
 0x5fa   : > { %11192 = vst [vmem:[#allocation178_spill] sm:$0xff] %v9001_v1  ;;  %v9004_v7 = vpop.eup %6298  ;;  %6320 = vpow2.f32 %v3541_v53  ;;  %v3438_v13 = vsub.f32 %v8689_v47, %v3366_v14  ;;  %v3339_v31 = vpop.xlane.xlu0 %3338  ;;  %v9014_v34 = vadd.f32 %v8898_v38, %v4060_v23 }
 0x5fb   : > { %v9007_v58 = vpop.eup %6300  ;;  %6322 = vpow2.f32 %v3503_v24  ;;  %v3547_v17 = vmul.f32 1.442695, %v3437_v44  ;;  %v3419_v49 = vsub.f32 %v8700_v6, %v3339_v31  ;;  %v3420_v61 = vsub.f32 %v8694_v33, %v3339_v31  ;;  %v11196_v31 = vld [vmem:[#allocation184_spill] sm:$0xff] }
 0x5fc   : > { %11193 = vst [vmem:[#allocation179_spill] sm:$0xff] %v9014_v34  ;;  %6324 = vpow2.f32 %v3505_v15  ;;  %v3549_v43 = vmul.f32 1.442695, %v3438_v13  ;;  %v3372_v57 = vpop.xlane.xlu1 %3371  ;;  %v9018_v47 = vadd.f32 %v9007_v58, %v9004_v7  ;;  %v9024_v6 = vadd.f32 %v8892_v42, %v4059_v48  ;;  %v9029_v15 = vpop.f32.mrf.mxu0 }
 0x5fd   : > { %6326 = vpow2.f32 %v3547_v17  ;;  %v3511_v27 = vmul.f32 1.442695, %v3419_v49  ;;  %v3513_v53 = vmul.f32 1.442695, %v3420_v61  ;;  %v3441_v14 = vsub.f32 %v8715_v35, %v3372_v57 }
 0x5fe   : > { %11194 = vst [vmem:[#allocation181_spill] sm:$0xff] %v9018_v47  ;;  %v9021_v24 = vpop.eup %6302  ;;  %11195 = vst [vmem:[#allocation183_spill] sm:$0xff] %v9024_v6  ;;  %6328 = vpow2.f32 %v3549_v43  ;;  %v3442_v33 = vsub.f32 %v8705_v5, %v3372_v57  ;;  %v3345_v38 = vpop.xlane.xlu0 %3344  ;;  %v4401_v49 = vmax.f32 %v9024_v6, %v9014_v34  ;;  %v11227_v6 = vld [vmem:[#allocation31_spill] sm:$0xff] }
 0x5ff   : > { %v9027_v23 = vpop.eup %6304  ;;  %6330 = vpow2.f32 %v3511_v27  ;;  %v3555_v44 = vmul.f32 1.442695, %v3441_v14  ;;  %v3423_v13 = vsub.f32 %v8718_v3, %v3345_v38  ;;  %v3424_v17 = vsub.f32 %v11196_v31, %v3345_v38  ;;  %v9047_v47 = vpop.f32.mrf.mxu0 }
 0x600   : > { %v6307_v35 = vpop.eup %6306  ;;  %6332 = vpow2.f32 %v3513_v53  ;;  %v3557_v42 = vmul.f32 1.442695, %v3442_v33  ;;  %v3378_v48 = vpop.xlane.xlu1 %3377  ;;  %v9037_v5 = vadd.f32 %v9027_v23, %v9021_v24 }
 0x601   : > { %v6309_v61 = vpop.eup %6308  ;;  %6334 = vpow2.f32 %v3555_v44  ;;  %v3519_v43 = vmul.f32 1.442695, %v3423_v13  ;;  %v3521_v57 = vmul.f32 1.442695, %v3424_v17  ;;  %v3445_v27 = vsub.f32 %v8733_v54, %v3378_v48  ;;  %v11198_v17 = vld [vmem:[#allocation185_spill] sm:$0xff]  ;;  %v9057_v1 = vpop.f32.mrf.mxu0 }
 0x602   : > { %11197 = vst [vmem:[#allocation182_spill] sm:$0xff] %v9037_v5  ;;  %v9040_v3 = vpop.eup %6310  ;;  %6336 = vpow2.f32 %v3557_v42  ;;  %v3446_v14 = vsub.f32 %v8723_v12, %v3378_v48  ;;  %v3351_v38 = vpop.xlane.xlu0 %3350  ;;  %v3688_v53 = vpack.c.bf16 %v6309_v61, %v8958_v30  ;;  %v3687_v33 = vpack.c.bf16 %v6307_v35, %v8953_v18 }
 0x603   : > { %v9045_v31 = vpop.eup %6312  ;;  %6338 = vpow2.f32 %v3519_v43  ;;  %v3563_v44 = vmul.f32 1.442695, %v3445_v27  ;;  %v3427_v13 = vsub.f32 %v8736_v20, %v3351_v38  ;;  %v3428_v54 = vsub.f32 %v11198_v17, %v3351_v38  ;;  %v11201_v20 = vld [vmem:[#allocation189_spill] sm:$0xff] }
 0x604   : > { %v6315_v5 = vpop.eup %6314  ;;  %6340 = vpow2.f32 %v3521_v57  ;;  %v3565_v42 = vmul.f32 1.442695, %v3446_v14  ;;  %3823 = vmatprep.mubr.bf16.mxu1 %v3688_v53  ;;  %v3384_v12 = vpop.xlane.xlu1 %3383  ;;  %v9051_v48 = vadd.f32 %v6309_v61, %v6307_v35  ;;  %v9055_v18 = vadd.f32 %v9045_v31, %v9040_v3  ;;  %v11202_v57 = vld [vmem:[#allocation186_spill] sm:$0xff]  ;;  %v11203_v61 = vld [vmem:[#allocation20_spill] sm:$0xff] }
 0x605   : > { %v6317_v30 = vpop.eup %6316  ;;  %6342 = vpow2.f32 %v3563_v44  ;;  %v3527_v43 = vmul.f32 1.442695, %v3427_v13  ;;  %v3529_v27 = vmul.f32 1.442695, %v3428_v54  ;;  %3824 = vmatmul.mubr.bf16.gmra.mxu1 %v3687_v33  ;;  %v3449_v38 = vsub.f32 %v11201_v20, %v3384_v12  ;;  %v11204_v33 = vld [vmem:[#allocation188_spill] sm:$0xff] }
 0x606   : > { %11199 = vst [vmem:[#allocation184_spill] sm:$0xff] %v9051_v48  ;;  %11200 = vst [vmem:[#allocation185_spill] sm:$0xff] %v9055_v18  ;;  %v9060_v17 = vpop.eup %6318  ;;  %6344 = vpow2.f32 %v3565_v42  ;;  %v3450_v14 = vsub.f32 %v11202_v57, %v3384_v12  ;;  %v3357_v35 = vpop.xlane.xlu0 %3356  ;;  %4808 = vrot.lane.b32.xlu1 %v11203_v61, %s6810_s17  ;;  %v3690_v53 = vpack.c.bf16 %v8979_v36, %v6317_v30 }
 0x607   : > { %v9066_v18 = vpop.eup %6320  ;;  %6346 = vpow2.f32 %v3527_v43  ;;  %v3571_v44 = vmul.f32 1.442695, %v3449_v38  ;;  %v3431_v13 = vsub.f32 %v8758_v10, %v3357_v35  ;;  %v3432_v54 = vsub.f32 %v11204_v33, %v3357_v35  ;;  %4402 = vmax.xlane.f32.xlu0 %v4401_v49  ;;  %v9078_v43 = vpop.f32.mrf.mxu0 }
 0x608   : > { %v9070_v20 = vpop.eup %6322  ;;  %6348 = vpow2.f32 %v3529_v27  ;;  %v3573_v42 = vmul.f32 1.442695, %v3450_v14  ;;  %3831 = vmatprep.mubr.bf16.mxu1 %v3690_v53  ;;  %v3390_v12 = vpop.xlane.xlu1 %3389  ;;  %v9072_v57 = vadd.f32 %v6317_v30, %v6315_v5  ;;  %v9076_v36 = vadd.f32 %v9066_v18, %v9060_v17  ;;  %v11207_v30 = vld [vmem:[#allocation30_spill] sm:$0xff] }
 0x609   : > { %v6325_v61 = vpop.eup %6324  ;;  %6350 = vpow2.f32 %v3571_v44  ;;  %v3535_v10 = vmul.f32 1.442695, %v3431_v13  ;;  %v3537_v38 = vmul.f32 1.442695, %v3432_v54  ;;  %v3453_v49 = vsub.f32 %v8776_v39, %v3390_v12 }
 0x60a   : > { %11205 = vst [vmem:[#allocation189_spill] sm:$0xff] %v9072_v57  ;;  %11206 = vst [vmem:[#allocation186_spill] sm:$0xff] %v9076_v36  ;;  %v9081_v35 = vpop.eup %6326  ;;  %6352 = vpow2.f32 %v3573_v42  ;;  %v3454_v27 = vsub.f32 %v8762_v25, %v3390_v12  ;;  %v3363_v14 = vpop.xlane.xlu0 %3362  ;;  %4822 = vrot.lane.b32.xlu1 %v11207_v30, %s6810_s17  ;;  %v3689_v53 = vpack.c.bf16 %v8974_v55, %v6315_v5 }
 0x60b   : > { %v3692_v33 = vpack.c.bf16 %v8993_v45, %v6325_v61  ;;  %v9088_v36 = vpop.eup %6328  ;;  %6354 = vpow2.f32 %v3535_v10  ;;  %v3579_v44 = vmul.f32 1.442695, %v3453_v49  ;;  %v3435_v13 = vsub.f32 %v8779_v46, %v3363_v14  ;;  %v9101_v5 = vpop.f32.mrf.mxu0 }
 0x60c   : > { %v3436_v39 = vsub.f32 %v8773_v60, %v3363_v14  ;;  %v9092_v54 = vpop.eup %6330  ;;  %6356 = vpow2.f32 %v3537_v38  ;;  %v3581_v25 = vmul.f32 1.442695, %v3454_v27  ;;  %v4391_v42 = vpop.xlane.xlu1 %4390  ;;  %v9095_v12 = vadd.f32 %v6325_v61, %v9070_v20 }
 0x60d   : > { %v9099_v55 = vadd.f32 %v9088_v36, %v9081_v35  ;;  %v6333_v45 = vpop.eup %6332  ;;  %6358 = vpow2.f32 %v3579_v44  ;;  %v3543_v10 = vmul.f32 1.442695, %v3435_v13  ;;  %3832 = vmatmul.mubr.bf16.gmra.mxu1 %v3689_v53  ;;  %v4484_v60 = vsub.f32 %v8792_v16, %v4391_v42 }
 0x60e   : > { %11208 = vst [vmem:[#allocation20_spill] sm:$0xff] %v9095_v12  ;;  %v3545_v46 = vmul.f32 1.442695, %v3436_v39  ;;  %v9104_v49 = vpop.eup %6334  ;;  %6360 = vpow2.f32 %v3581_v25  ;;  %v4485_v38 = vsub.f32 %v8783_v29, %v4391_v42  ;;  %3839 = vmatprep.mubr.bf16.mxu1 %v3692_v33  ;;  %v3369_v61 = vpop.xlane.xlu0 %3368  ;;  %v9114_v16 = vadd.f32 %v6333_v45, %v9092_v54 }
 0x60f   : > { %11209 = vst [vmem:[#allocation188_spill] sm:$0xff] %v9099_v55  ;;  %v9107_v27 = vpop.eup %6336  ;;  %6362 = vpow2.f32 %v3543_v10  ;;  %v4550_v14 = vmul.f32 1.442695, %v4484_v60  ;;  %v3439_v30 = vsub.f32 %v8797_v51, %v3369_v61  ;;  %v3440_v44 = vsub.f32 %v8790_v4, %v3369_v61  ;;  %v9120_v39 = vpop.f32.mrf.mxu0 }
 0x610   : > { %v9111_v13 = vpop.eup %6338  ;;  %6364 = vpow2.f32 %v3545_v46  ;;  %v4552_v53 = vmul.f32 1.442695, %v4485_v38  ;;  %11210 = vst [vmem:[#allocation30_spill] sm:$0xff] %v9114_v16  ;;  %v9118_v29 = vadd.f32 %v9107_v27, %v9104_v49  ;;  %v3691_v61 = vpack.c.bf16 %v8990_v50, %v9070_v20  ;;  %v11219_v16 = vld [vmem:[#allocation196_spill] sm:$0xff] }
 0x611   : > { %v6341_v33 = vpop.eup %6340  ;;  %6366 = vpow2.f32 %v4550_v14  ;;  %v3551_v25 = vmul.f32 1.442695, %v3439_v30  ;;  %v3553_v42 = vmul.f32 1.442695, %v3440_v44  ;;  %v3694_v30 = vpack.c.bf16 %v9007_v58, %v6333_v45 }
 0x612   : > { %11211 = vst [vmem:[#allocation200_spill] sm:$0xff] %v9118_v29  ;;  %v9122_v51 = vpop.eup %6342  ;;  %6368 = vpow2.f32 %v4552_v53  ;;  %v3375_v4 = vpop.xlane.xlu0 %3374  ;;  %v9125_v10 = vadd.f32 %v6341_v33, %v9111_v13  ;;  %v3693_v55 = vpack.c.bf16 %v9004_v7, %v9092_v54 }
 0x613   : > { %v9127_v46 = vpop.eup %6344  ;;  %6370 = vpow2.f32 %v3551_v25  ;;  %v3443_v60 = vsub.f32 %v8811_v2, %v3375_v4  ;;  %v3444_v38 = vsub.f32 %v8808_v21, %v3375_v4  ;;  %v4817_v54 = vpop.permute.xlu1 %4816 }
 0x614   : > { %11212 = vst [vmem:[#allocation201_spill] sm:$0xff] %v9125_v10  ;;  %v9133_v14 = vpop.eup %6346  ;;  %6372 = vpow2.f32 %v3553_v42  ;;  %v9138_v44 = vadd.f32 %v9127_v46, %v9122_v51  ;;  %v9142_v10 = vpop.f32.mrf.mxu0  ;;  %v11215_v42 = vld [vmem:[#allocation195_spill] sm:$0xff] }
 0x615   : > { %v9140_v53 = vpop.eup %6348  ;;  %v3559_v25 = vmul.f32 1.442695, %v3443_v60  ;;  %v3561_v2 = vmul.f32 1.442695, %v3444_v38  ;;  %3840 = vmatmul.mubr.bf16.gmra.mxu1 %v3691_v61 }
 0x616   : > { %11213 = vst [vmem:[#allocation202_spill] sm:$0xff] %v9138_v44  ;;  %v9144_v21 = vpop.eup %6350  ;;  %3847 = vmatprep.mubr.bf16.mxu1 %v3694_v30  ;;  %v3381_v50 = vpop.xlane.xlu0 %3380  ;;  %v9148_v20 = vadd.f32 %v9140_v53, %v9133_v14 }
 0x617   : > { %v9150_v58 = vpop.eup %6352  ;;  %6374 = vpow2.f32 %v3559_v25  ;;  %v3447_v45 = vsub.f32 %v8821_v8, %v3381_v50  ;;  %v3448_v4 = vsub.f32 %v11215_v42, %v3381_v50  ;;  %v9162_v61 = vpop.f32.mrf.mxu0 }
 0x618   : > { %11214 = vst [vmem:[#allocation203_spill] sm:$0xff] %v9148_v20  ;;  %v9154_v44 = vpop.eup %6354  ;;  %6376 = vpow2.f32 %v3561_v2  ;;  %v9158_v60 = vadd.f32 %v9150_v58, %v9144_v21  ;;  %v11218_v2 = vld [vmem:[#allocation197_spill] sm:$0xff] }
 0x619   : > { %v9160_v38 = vpop.eup %6356  ;;  %v3567_v30 = vmul.f32 1.442695, %v3447_v45  ;;  %v3569_v20 = vmul.f32 1.442695, %v3448_v4  ;;  %v3696_v45 = vpack.c.bf16 %v9027_v23, %v6341_v33  ;;  %v9185_v57 = vpop.f32.mrf.mxu0 }
 0x61a   : > { %11216 = vst [vmem:[#allocation195_spill] sm:$0xff] %v9158_v60  ;;  %v9164_v29 = vpop.eup %6358  ;;  %v3387_v25 = vpop.xlane.xlu0 %3386  ;;  %v9168_v8 = vadd.f32 %v9160_v38, %v9154_v44 }
 0x61b   : > { %v9170_v50 = vpop.eup %6360  ;;  %6378 = vpow2.f32 %v3567_v30  ;;  %v3451_v42 = vsub.f32 %v11218_v2, %v3387_v25  ;;  %v3452_v60 = vsub.f32 %v11219_v16, %v3387_v25  ;;  %v11221_v16 = vld [vmem:[#allocation29_spill] sm:$0xff]  ;;  %v11224_v25 = vld [vmem:[#allocation199_spill] sm:$0xff] }
 0x61c   : > { %11217 = vst [vmem:[#allocation204_spill] sm:$0xff] %v9168_v8  ;;  %v9176_v12 = vpop.eup %6362  ;;  %6380 = vpow2.f32 %v3569_v20  ;;  %v9181_v4 = vadd.f32 %v9170_v50, %v9164_v29 }
 0x61d   : > { %v9183_v8 = vpop.eup %6364  ;;  %v3575_v30 = vmul.f32 1.442695, %v3451_v42  ;;  %v3577_v2 = vmul.f32 1.442695, %v3452_v60  ;;  %3848 = vmatmul.mubr.bf16.gmra.mxu1 %v3693_v55  ;;  %4824 = vrot.lane.b32.xlu0 %v11221_v16, %s6810_s17  ;;  %v11225_v42 = vld [vmem:[#allocation198_spill] sm:$0xff] }
 0x61e   : > { %11220 = vst [vmem:[#allocation197_spill] sm:$0xff] %v9181_v4  ;;  %v9189_v7 = vpop.eup %6366  ;;  %3855 = vmatprep.mubr.bf16.mxu1 %v3696_v45  ;;  %v4388_v20 = vpop.xlane.xlu0 %4387  ;;  %v9193_v23 = vadd.f32 %v9183_v8, %v9176_v12 }
 0x61f   : > { %11222 = vst [vmem:[#allocation196_spill] sm:$0xff] %v9189_v7  ;;  %v9195_v33 = vpop.eup %6368  ;;  %6382 = vpow2.f32 %v3575_v30  ;;  %v4482_v4 = vsub.f32 %v11224_v25, %v4388_v20  ;;  %v4483_v60 = vsub.f32 %v11225_v42, %v4388_v20  ;;  %v4023_v20 = vld [vmem:[#allocation2 + $0x330] sm:$0xff] }
 0x620   : > { %11223 = vst [vmem:[#allocation29_spill] sm:$0xff] %v9193_v23  ;;  %v9199_v55 = vpop.eup %6370  ;;  %6384 = vpow2.f32 %v3577_v2  ;;  %v9203_v16 = vadd.f32 %v9195_v33, %v9189_v7  ;;  %v9207_v23 = vpop.f32.mrf.mxu0  ;;  %v3695_v2 = vpack.c.bf16 %v9021_v24, %v9111_v13 }
 0x621   : > { %v6373_v45 = vpop.eup %6372  ;;  %v4546_v48 = vmul.f32 1.442695, %v4482_v4  ;;  %v4548_v34 = vmul.f32 1.442695, %v4483_v60  ;;  %4806 = vrot.lane.b32.xlu0 %v11227_v6, %s6810_s17  ;;  %v4831_v60 = vpop.permute.xlu1 %4830  ;;  %v3698_v6 = vpack.c.bf16 %v9045_v31, %v9140_v53 }
 0x622   : > { %11226 = vst [vmem:[#allocation199_spill] sm:$0xff] %v9203_v16  ;;  %v4833_v30 = vpop.permute.xlu0 %4832  ;;  %v9210_v25 = vadd.f32 %v6373_v45, %v9199_v55  ;;  %v4062_v16 = vunpack.c.h.bf16 %v4023_v20  ;;  %v9216_v4 = vpop.f32.mrf.mxu0 }
 0x623   : > { %6386 = vpow2.f32 %v4546_v48  ;;  %5733 = vmatprep.subr.bf16.mxu1 %v4833_v30  ;;  %11229 = vst [vmem:[#allocation31_spill] sm:$0xff] %v9216_v4 }
 0x624   : > { %11228 = vst [vmem:[#allocation198_spill] sm:$0xff] %v9210_v25  ;;  %v9214_v42 = vpop.eup %6374  ;;  %6388 = vpow2.f32 %v4548_v34  ;;  %5734 = vmatpush3.bf16.msra.mxu1 %v4817_v54  ;;  %v4061_v25 = vunpack.c.l.bf16 %v4023_v20  ;;  %v9226_v13 = vadd.f32 %v8912_v40, %v4062_v16  ;;  %v9228_v4 = vpop.f32.mrf.mxu0  ;;  %v3697_v54 = vpack.c.bf16 %v9040_v3, %v9133_v14 }
 0x625   : > { %v6377_v7 = vpop.eup %6376  ;;  %3856 = vmatmul.mubr.bf16.gmra.mxu1 %v3695_v2  ;;  %5735 = vmatprep.subr.bf16.mxu1 %v4831_v60  ;;  %v3700_v16 = vpack.c.bf16 %v9066_v18, %v9160_v38  ;;  %v3699_v18 = vpack.c.bf16 %v9060_v17, %v9154_v44 }
 0x626   : > { %3863 = vmatprep.mubr.bf16.mxu1 %v3698_v6  ;;  %v4815_v48 = vpop.permute.xlu0 %4814  ;;  %v9221_v30 = vadd.f32 %v6377_v7, %v9214_v42  ;;  %v9231_v31 = vadd.f32 %v8906_v32, %v4061_v25  ;;  %v9242_v40 = vpop.f32.mrf.mxu0 }
 0x628   : > { %11230 = vst [vmem:[#allocation205_spill] sm:$0xff] %v9221_v30  ;;  %v9223_v24 = vpop.eup %6378  ;;  %5736 = vmatpush3.bf16.msra.mxu1 %v4815_v48  ;;  %v4404_v2 = vmax.f32 %v9231_v31, %v9226_v13  ;;  %v9251_v3 = vpop.f32.mrf.mxu0  ;;  %v3702_v48 = vpack.c.bf16 %v9088_v36, %v9183_v8  ;;  %v3704_v36 = vpack.c.bf16 %v9107_v27, %v6373_v45 }
 0x629   : > { %v6381_v34 = vpop.eup %6380 }
 0x62a   : > { %v9234_v53 = vadd.f32 %v6381_v34, %v9223_v24  ;;  %v9261_v38 = vpop.f32.mrf.mxu0 }
 0x62c   : > { %11231 = vst [vmem:[#allocation206_spill] sm:$0xff] %v9234_v53  ;;  %v9238_v20 = vpop.eup %6382 }
 0x62d   : > { %v6385_v60 = vpop.eup %6384  ;;  %3864 = vmatmul.mubr.bf16.gmra.mxu1 %v3697_v54  ;;  %v4024_v54 = vld [vmem:[#allocation2 + $0x338] sm:$0xff] }
 0x62e   : > { %3871 = vmatprep.mubr.bf16.mxu1 %v3700_v16  ;;  %4405 = vmax.xlane.f32.xlu1 %v4404_v2  ;;  %v9247_v32 = vadd.f32 %v6385_v60, %v9238_v20  ;;  %v4064_v2 = vunpack.c.h.bf16 %v4024_v54  ;;  %v4063_v16 = vunpack.c.l.bf16 %v4024_v54 }
 0x630   : > { %11232 = vst [vmem:[#allocation207_spill] sm:$0xff] %v9247_v32  ;;  %v9249_v25 = vpop.eup %6386  ;;  %v9265_v32 = vpop.f32.mrf.mxu0  ;;  %v9268_v53 = vadd.f32 %v8920_v56, %v4064_v2  ;;  %v9273_v17 = vadd.f32 %v8918_v28, %v4063_v16  ;;  %v11235_v28 = vld [vmem:[#allocation33_spill] sm:$0xff] }
 0x631   : > { %v9253_v14 = vpop.eup %6388 }
 0x632   : > { %v9257_v6 = vadd.f32 %v9253_v14, %v9249_v25  ;;  %v9275_v44 = vpop.f32.mrf.mxu0  ;;  %v4407_v8 = vmax.f32 %v9273_v17, %v9268_v53 }
 0x634   : > { %11233 = vst [vmem:[#allocation208_spill] sm:$0xff] %v9257_v6  ;;  %v3701_v6 = vpack.c.bf16 %v9081_v35, %v9176_v12  ;;  %v9282_v56 = vpop.f32.mrf.mxu0  ;;  %v3703_v35 = vpack.c.bf16 %v9104_v49, %v9199_v55  ;;  %v3706_v12 = vpack.c.bf16 %v9127_v46, %v6377_v7  ;;  %v3705_v49 = vpack.c.bf16 %v9122_v51, %v9214_v42 }
 0x635   : > { %3872 = vmatmul.mubr.bf16.gmra.mxu1 %v3699_v18  ;;  %v11234_v18 = vld [vmem:[#allocation19_spill] sm:$0xff]  ;;  %v3708_v46 = vpack.c.bf16 %v9150_v58, %v6381_v34 }
 0x636   : > { %3879 = vmatprep.mubr.bf16.mxu1 %v3702_v48  ;;  %v9284_v48 = vpop.f32.mrf.mxu0 }
 0x638   : > { %v9291_v45 = vpop.f32.mrf.mxu0 }
 0x63d   : > { %3880 = vmatmul.mubr.bf16.gmra.mxu1 %v3701_v6 }
 0x63e   : > { %3887 = vmatprep.mubr.bf16.mxu1 %v3704_v36  ;;  %v9295_v36 = vpop.f32.mrf.mxu0 }
 0x63f   : > { %4804 = vrot.lane.b32.xlu1 %v11234_v18, %s6810_s17  ;;  %v11236_v18 = vld [vmem:[#allocation32_spill] sm:$0xff] }
 0x640   : > { %4408 = vmax.xlane.f32.xlu0 %v4407_v8  ;;  %v9300_v7 = vpop.f32.mrf.mxu0 }
 0x642   : > { %v9302_v55 = vpop.f32.mrf.mxu0 }
 0x643   : > { %4818 = vrot.lane.b32.xlu1 %v11235_v28, %s6810_s17 }
 0x644   : > { %v9307_v8 = vpop.f32.mrf.mxu0 }
 0x645   : > { %3888 = vmatmul.mubr.bf16.gmra.mxu1 %v3703_v35  ;;  %v4394_v27 = vpop.xlane.xlu1 %4393 }
 0x646   : > { %3895 = vmatprep.mubr.bf16.mxu1 %v3706_v12  ;;  %v4486_v6 = vsub.f32 %v8874_v22, %v4394_v27  ;;  %v4487_v54 = vsub.f32 %v8865_v0, %v4394_v27  ;;  %v3707_v0 = vpack.c.bf16 %v9144_v21, %v9223_v24  ;;  %v3710_v22 = vpack.c.bf16 %v9170_v50, %v6385_v60  ;;  %v9321_v50 = vpop.f32.mrf.mxu0  ;;  %v11238_v12 = vld [vmem:[#allocation34_spill] sm:$0xff] }
 0x648   : > { %v4554_v2 = vmul.f32 1.442695, %v4486_v6  ;;  %v4556_v16 = vmul.f32 1.442695, %v4487_v54  ;;  %v3709_v6 = vpack.c.bf16 %v9164_v29, %v9238_v20  ;;  %v4025_v54 = vld [vmem:[#allocation2 + $0x340] sm:$0xff] }
 0x649   : > { %v4813_v34 = vpop.permute.xlu1 %4812 }
 0x64a   : > { %6390 = vpow2.f32 %v4554_v2  ;;  %v9329_v2 = vpop.f32.mrf.mxu0 }
 0x64b   : > { %6392 = vpow2.f32 %v4556_v16 }
 0x64d   : > { %3896 = vmatmul.mubr.bf16.gmra.mxu1 %v3705_v49  ;;  %v4827_v16 = vpop.permute.xlu1 %4826  ;;  %v4065_v49 = vunpack.c.l.bf16 %v4025_v54 }
 0x64e   : > { %3903 = vmatprep.mubr.bf16.mxu1 %v3708_v46 }
 0x655   : > { %3904 = vmatmul.mubr.bf16.gmra.mxu1 %v3707_v0  ;;  %v4028_v0 = vld [vmem:[#allocation2 + $0x358] sm:$0xff] }
 0x656   : > { %3911 = vmatprep.mubr.bf16.mxu1 %v3710_v22  ;;  %4820 = vrot.lane.b32.xlu0 %v11236_v18, %s6810_s17  ;;  %v9331_v22 = vpop.f32.mrf.mxu0  ;;  %v4072_v20 = vunpack.c.h.bf16 %v4028_v0  ;;  %v4030_v18 = vld [vmem:[#allocation2 + $0x368] sm:$0xff] }
 0x657   : > { %v9311_v51 = vpop.eup %6390  ;;  %v4397_v58 = vpop.xlane.xlu0 %4396 }
 0x658   : > { %v9313_v42 = vpop.eup %6392  ;;  %v4488_v28 = vsub.f32 %v8904_v59, %v4397_v58  ;;  %v4489_v35 = vsub.f32 %v8894_v9, %v4397_v58  ;;  %v4771_v9 = vpack.c.bf16 %v9195_v33, %v9253_v14  ;;  %v4066_v59 = vunpack.c.h.bf16 %v4025_v54  ;;  %v9339_v58 = vpop.f32.mrf.mxu0 }
 0x659   : > { %v9319_v21 = vadd.f32 %v9313_v42, %v9311_v51  ;;  %v9337_v33 = vadd.f32 %v8923_v37, %v4065_v49  ;;  %v4071_v14 = vunpack.c.l.bf16 %v4028_v0 }
 0x65a   : > { %v4558_v24 = vmul.f32 1.442695, %v4488_v28  ;;  %v4560_v60 = vmul.f32 1.442695, %v4489_v35  ;;  %4802 = vrot.lane.b32.xlu0 %v11238_v12, %s6810_s17  ;;  %v9334_v29 = vadd.f32 %v8925_v63, %v4066_v59  ;;  %v9344_v28 = vadd.f32 %v8981_v11, %v4072_v20  ;;  %v9349_v12 = vpop.f32.mrf.mxu0  ;;  %v4026_v20 = vld [vmem:[#allocation2 + $0x348] sm:$0xff] }
 0x65b   : > { %11237 = vst [vmem:[#allocation19_spill] sm:$0xff] %v9319_v21  ;;  %v4829_v27 = vpop.permute.xlu0 %4828  ;;  %v4076_v35 = vunpack.c.h.bf16 %v4030_v18  ;;  %v4075_v63 = vunpack.c.l.bf16 %v4030_v18 }
 0x65c   : > { %6394 = vpow2.f32 %v4558_v24  ;;  %5737 = vmatprep.subr.bf16.mxu1 %v4829_v27  ;;  %v9347_v24 = vadd.f32 %v8960_v26, %v4071_v14  ;;  %v9367_v49 = vpop.f32.mrf.mxu0  ;;  %v4068_v14 = vunpack.c.h.bf16 %v4026_v20 }
 0x65d   : > { %6396 = vpow2.f32 %v4560_v60  ;;  %3912 = vmatmul.mubr.bf16.gmra.mxu1 %v3709_v6  ;;  %v4032_v60 = vld [vmem:[#allocation2 + $0x378] sm:$0xff]  ;;  %v9356_v6 = vadd.f32 %v9047_v47, %v4076_v35 }
 0x65e   : > { %5738 = vmatpush3.bf16.msra.mxu1 %v4813_v34  ;;  %4882 = vmatprep.mubr.bf16.mxu1 %v4771_v9  ;;  %v4410_v34 = vmax.f32 %v9337_v33, %v9334_v29  ;;  %v4419_v27 = vmax.f32 %v9347_v24, %v9344_v28  ;;  %v4080_v54 = vunpack.c.h.bf16 %v4032_v60  ;;  %v9361_v9 = vadd.f32 %v9029_v15, %v4075_v63  ;;  %v9377_v35 = vpop.f32.mrf.mxu0 }
 0x65f   : > { %5739 = vmatprep.subr.bf16.mxu1 %v4827_v16  ;;  %v4811_v46 = vpop.permute.xlu0 %4810  ;;  %v4079_v26 = vunpack.c.l.bf16 %v4032_v60  ;;  %v4034_v16 = vld [vmem:[#allocation2 + $0x388] sm:$0xff]  ;;  %v4067_v63 = vunpack.c.l.bf16 %v4026_v20  ;;  %v4027_v60 = vld [vmem:[#allocation2 + $0x350] sm:$0xff] }
 0x660   : > { %v9372_v47 = vadd.f32 %v9120_v39, %v4080_v54  ;;  %v4084_v0 = vunpack.c.h.bf16 %v4034_v16  ;;  %v4083_v18 = vunpack.c.l.bf16 %v4034_v16  ;;  %v9385_v54 = vadd.f32 %v8935_v19, %v4068_v14  ;;  %v9390_v20 = vpop.f32.mrf.mxu0 }
 0x661   : > { %v9375_v15 = vadd.f32 %v9101_v5, %v4079_v26  ;;  %v4070_v30 = vunpack.c.h.bf16 %v4027_v60  ;;  %v4069_v16 = vunpack.c.l.bf16 %v4027_v60 }
 0x662   : > { %5740 = vmatpush3.bf16.msra.mxu1 %v4811_v46  ;;  %v4425_v46 = vmax.f32 %v9361_v9, %v9356_v6  ;;  %11240 = vst [vmem:[#allocation32_spill] sm:$0xff] %v9372_v47  ;;  %v9382_v21 = vadd.f32 %v9207_v23, %v4084_v0  ;;  %11243 = vst [vmem:[#allocation210_spill] sm:$0xff] %v9385_v54  ;;  %v9388_v5 = vadd.f32 %v9185_v57, %v4083_v18  ;;  %v11245_v18 = vld [vmem:[#allocation166_spill] sm:$0xff] }
 0x663   : > { %11241 = vst [vmem:[#allocation34_spill] sm:$0xff] %v9375_v15 }
 0x664   : > { %11242 = vst [vmem:[#allocation209_spill] sm:$0xff] %v9382_v21  ;;  %11244 = vst [vmem:[#allocation211_spill] sm:$0xff] %v9388_v5  ;;  %v4437_v23 = vmax.f32 %v9388_v5, %v9382_v21  ;;  %v11247_v21 = vld [vmem:[#allocation156_spill] sm:$0xff] }
 0x667   : > { %4411 = vmax.xlane.f32.xlu1 %v4410_v34  ;;  %v4036_v34 = vld [vmem:[#allocation2 + $0x398] sm:$0xff] }
 0x668   : > { %v4088_v39 = vunpack.c.h.bf16 %v4036_v34  ;;  %v4087_v26 = vunpack.c.l.bf16 %v4036_v34  ;;  %v9403_v34 = vadd.f32 %v11245_v18, %v4070_v30  ;;  %v9429_v18 = vpop.f32.mrf.mxu1 }
 0x669   : > { %v9351_v37 = vpop.eup %6394  ;;  %11253 = vst [vmem:[#allocation216_spill] sm:$0xff] %v9429_v18  ;;  %v4044_v18 = vld [vmem:[#allocation2 + $0x3d8] sm:$0xff] }
 0x66a   : > { %v9358_v11 = vpop.eup %6396  ;;  %v9398_v19 = vadd.f32 %v9251_v3, %v4088_v39  ;;  %11246 = vst [vmem:[#allocation166_spill] sm:$0xff] %v9403_v34  ;;  %v9406_v60 = vadd.f32 %v9242_v40, %v4087_v26  ;;  %v9411_v3 = vadd.f32 %v11247_v21, %v4069_v16  ;;  %v4031_v39 = vld [vmem:[#allocation2 + $0x370] sm:$0xff] }
 0x66b   : > { %4420 = vmax.xlane.f32.xlu1 %v4419_v27  ;;  %v9365_v59 = vadd.f32 %v9358_v11, %v9351_v37  ;;  %v4431_v27 = vmax.f32 %v9375_v15, %v9372_v47  ;;  %v4029_v47 = vld [vmem:[#allocation2 + $0x360] sm:$0xff]  ;;  %v9408_v15 = vpop.f32.mrf.mxu0  ;;  %v4078_v26 = vunpack.c.h.bf16 %v4031_v39 }
 0x66c   : > { %v4074_v14 = vunpack.c.h.bf16 %v4029_v47  ;;  %11248 = vst [vmem:[#allocation156_spill] sm:$0xff] %v9411_v3  ;;  %v4443_v5 = vmax.f32 %v9406_v60, %v9398_v19 }
 0x66d   : > { %11239 = vst [vmem:[#allocation33_spill] sm:$0xff] %v9365_v59  ;;  %v9393_v59 = vadd.f32 %v8929_v41, %v4067_v63  ;;  %v4073_v63 = vunpack.c.l.bf16 %v4029_v47  ;;  %v4416_v47 = vmax.f32 %v9411_v3, %v9403_v34 }
 0x66e   : > { %v9419_v40 = vadd.f32 %v9009_v52, %v4074_v14 }
 0x66f   : > { %4426 = vmax.xlane.f32.xlu1 %v4425_v46  ;;  %v4038_v46 = vld [vmem:[#allocation2 + $0x3a8] sm:$0xff]  ;;  %v4413_v57 = vmax.f32 %v9393_v59, %v9385_v54  ;;  %v9427_v16 = vadd.f32 %v8995_v62, %v4073_v63  ;;  %v9439_v62 = vadd.f32 %v9078_v43, %v4078_v26  ;;  %v4104_v43 = vunpack.c.h.bf16 %v4044_v18  ;;  %v9451_v26 = vpop.f32.mrf.mxu1 }
 0x670   : > { %v4092_v0 = vunpack.c.h.bf16 %v4038_v46  ;;  %v4091_v41 = vunpack.c.l.bf16 %v4038_v46  ;;  %11250 = vst [vmem:[#allocation213_spill] sm:$0xff] %v9419_v40 }
 0x671   : > { %11252 = vst [vmem:[#allocation215_spill] sm:$0xff] %v9427_v16 }
 0x672   : > { %v9416_v54 = vadd.f32 %v9282_v56, %v4092_v0  ;;  %v9424_v46 = vadd.f32 %v9275_v44, %v4091_v41  ;;  %v4042_v56 = vld [vmem:[#allocation2 + $0x3c8] sm:$0xff]  ;;  %v4373_v0 = vpop.f32.mrf.mxu0  ;;  %v4422_v44 = vmax.f32 %v9427_v16, %v9419_v40  ;;  %v4035_v16 = vld [vmem:[#allocation2 + $0x390] sm:$0xff] }
 0x673   : > { %4432 = vmax.xlane.f32.xlu1 %v4431_v27  ;;  %v4040_v27 = vld [vmem:[#allocation2 + $0x3b8] sm:$0xff]  ;;  %v4100_v34 = vunpack.c.h.bf16 %v4042_v56 }
 0x674   : > { %11249 = vst [vmem:[#allocation212_spill] sm:$0xff] %v9416_v54  ;;  %v4096_v30 = vunpack.c.h.bf16 %v4040_v27  ;;  %11251 = vst [vmem:[#allocation214_spill] sm:$0xff] %v9424_v46  ;;  %v4095_v21 = vunpack.c.l.bf16 %v4040_v27  ;;  %v4449_v52 = vmax.f32 %v9424_v46, %v9416_v54  ;;  %v9441_v41 = vpop.f32.mrf.mxu0  ;;  %v11254_v54 = vld [vmem:[#allocation25_spill] sm:$0xff] }
 0x675   : > { %11256 = vst [vmem:[#allocation25_spill] sm:$0xff] %v9451_v26 }
 0x676   : > { %v9434_v14 = vadd.f32 %v9300_v7, %v4096_v30  ;;  %v9444_v27 = vadd.f32 %v9295_v36, %v4095_v21  ;;  %v11255_v30 = vld [vmem:[#allocation27_spill] sm:$0xff]  ;;  %v9456_v36 = vadd.f32 %v9329_v2, %v4100_v34  ;;  %v4085_v34 = vunpack.c.l.bf16 %v4035_v16 }
 0x677   : > { %4438 = vmax.xlane.f32.xlu1 %v4437_v23  ;;  %v4077_v23 = vunpack.c.l.bf16 %v4031_v39  ;;  %v4099_v39 = vunpack.c.l.bf16 %v4042_v56 }
 0x678   : > { %v4455_v3 = vmax.f32 %v9444_v27, %v9434_v14 }
 0x679   : > { %4414 = vmax.xlane.f32.xlu0 %v4413_v57  ;;  %v4033_v57 = vld [vmem:[#allocation2 + $0x380] sm:$0xff] }
 0x67a   : > { %v4081_v40 = vunpack.c.l.bf16 %v4033_v57 }
 0x67b   : > { %4444 = vmax.xlane.f32.xlu1 %v4443_v5  ;;  %v4082_v5 = vunpack.c.h.bf16 %v4033_v57 }
 0x67c   : > { %v9469_v2 = vadd.f32 %v9142_v10, %v4081_v40 }
 0x67d   : > { %4417 = vmax.xlane.f32.xlu0 %v4416_v47  ;;  %v9449_v47 = vadd.f32 %v9057_v1, %v4077_v23  ;;  %v9460_v1 = vpop.f32.mrf.mxu0  ;;  %v9463_v57 = vadd.f32 %v9162_v61, %v4082_v5  ;;  %v9474_v61 = vadd.f32 %v9367_v49, %v4104_v43  ;;  %v4048_v43 = vld [vmem:[#allocation2 + $0x3f8] sm:$0xff] }
 0x67e   : > { %v4400_v63 = vpop.xlane.xlu1 %4399 }
 0x67f   : > { %v4490_v7 = vsub.f32 %v11254_v54, %v4400_v63  ;;  %v4491_v46 = vsub.f32 %v11255_v30, %v4400_v63  ;;  %4450 = vmax.xlane.f32.xlu1 %v4449_v52  ;;  %v4428_v54 = vmax.f32 %v9449_v47, %v9439_v62  ;;  %v4086_v52 = vunpack.c.h.bf16 %v4035_v16  ;;  %11257 = vst [vmem:[#allocation27_spill] sm:$0xff] %v9474_v61 }
 0x680   : > { %v9466_v63 = vadd.f32 %v9321_v50, %v4099_v39  ;;  %v4103_v30 = vunpack.c.l.bf16 %v4044_v18  ;;  %v4434_v10 = vmax.f32 %v9469_v2, %v9463_v57 }
 0x681   : > { %v4562_v21 = vmul.f32 1.442695, %v4490_v7  ;;  %v4564_v56 = vmul.f32 1.442695, %v4491_v46  ;;  %4423 = vmax.xlane.f32.xlu0 %v4422_v44  ;;  %v4046_v46 = vld [vmem:[#allocation2 + $0x3e8] sm:$0xff]  ;;  %v4037_v7 = vld [vmem:[#allocation2 + $0x3a0] sm:$0xff]  ;;  %v9483_v40 = vadd.f32 %v9228_v4, %v4086_v52  ;;  %v4112_v4 = vunpack.c.h.bf16 %v4048_v43 }
 0x682   : > { %v5637_v23 = vpop.f32.mrf.mxu1  ;;  %v4461_v26 = vmax.f32 %v9466_v63, %v9456_v36  ;;  %v4108_v5 = vunpack.c.h.bf16 %v4046_v46  ;;  %v4090_v18 = vunpack.c.h.bf16 %v4037_v7  ;;  %v9486_v16 = vadd.f32 %v9349_v12, %v4103_v30 }
 0x683   : > { %6398 = vpow2.f32 %v4562_v21  ;;  %4456 = vmax.xlane.f32.xlu1 %v4455_v3  ;;  %v4381_v3 = vpop.f32.mrf.mxu0  ;;  %v4107_v21 = vunpack.c.l.bf16 %v4046_v46  ;;  %v4089_v49 = vunpack.c.l.bf16 %v4037_v7  ;;  %v4111_v7 = vunpack.c.l.bf16 %v4048_v43 }
 0x684   : > { %6400 = vpow2.f32 %v4564_v56  ;;  %v5638_v44 = vpop.f32.mrf.mxu1  ;;  %11260 = vst [vmem:[#allocation219_spill] sm:$0xff] %v9486_v16  ;;  %v9500_v46 = vadd.f32 %v9265_v32, %v4090_v18 }
 0x685   : > { %v9476_v50 = vadd.f32 %v5638_v44, %v5637_v23  ;;  %4429 = vmax.xlane.f32.xlu0 %v4428_v54  ;;  %v11262_v54 = vld [vmem:[#allocation31_spill] sm:$0xff]  ;;  %v4383_v12 = vpop.f32.mrf.mxu0 }
 0x686   : > { %v9478_v39 = vpop.f32.mrf.mxu1  ;;  %v9491_v23 = vadd.f32 %v11262_v54, %v4085_v34  ;;  %v4039_v44 = vld [vmem:[#allocation2 + $0x3b0] sm:$0xff]  ;;  %v9503_v34 = vadd.f32 %v9408_v15, %v4107_v21  ;;  %v4809_v21 = vpop.permute.xlu1 %4808 }
 0x687   : > { %11258 = vst [vmem:[#allocation217_spill] sm:$0xff] %v9476_v50  ;;  %11259 = vst [vmem:[#allocation218_spill] sm:$0xff] %v9478_v39  ;;  %4462 = vmax.xlane.f32.xlu1 %v4461_v26  ;;  %v4467_v50 = vmax.f32 %v9486_v16, %v9474_v61  ;;  %v9495_v39 = vadd.f32 %v4373_v0, %v4108_v5  ;;  %v4094_v52 = vunpack.c.h.bf16 %v4039_v44  ;;  %v4093_v54 = vunpack.c.l.bf16 %v4039_v44  ;;  %v4041_v5 = vld [vmem:[#allocation2 + $0x3c0] sm:$0xff] }
 0x688   : > { %v9488_v56 = vpop.f32.mrf.mxu1  ;;  %v4440_v26 = vmax.f32 %v9491_v23, %v9483_v40  ;;  %11263 = vst [vmem:[#allocation31_spill] sm:$0xff] %v9503_v34  ;;  %v9506_v0 = vadd.f32 %v9261_v38, %v4089_v49  ;;  %v9510_v16 = vadd.f32 %v4383_v12, %v4112_v4  ;;  %v4098_v18 = vunpack.c.h.bf16 %v4041_v5 }
 0x689   : > { %11261 = vst [vmem:[#allocation220_spill] sm:$0xff] %v9488_v56  ;;  %4435 = vmax.xlane.f32.xlu0 %v4434_v10  ;;  %v4473_v10 = vmax.f32 %v9503_v34, %v9495_v39  ;;  %v9521_v38 = vadd.f32 %v4381_v3, %v4111_v7  ;;  %v4097_v43 = vunpack.c.l.bf16 %v4041_v5  ;;  %v9530_v12 = vadd.f32 %v9284_v48, %v4093_v54 }
 0x68a   : > { %v5643_v30 = vpop.f32.mrf.mxu1  ;;  %11264 = vst [vmem:[#allocation221_spill] sm:$0xff] %v9510_v16  ;;  %v4446_v15 = vmax.f32 %v9506_v0, %v9500_v46  ;;  %v9543_v48 = vadd.f32 %v9307_v8, %v4098_v18 }
 0x68b   : > { %4468 = vmax.xlane.f32.xlu1 %v4467_v50  ;;  %v9519_v50 = vadd.f32 %v9291_v45, %v4094_v52  ;;  %11267 = vst [vmem:[#allocation224_spill] sm:$0xff] %v9521_v38  ;;  %v4479_v45 = vmax.f32 %v9521_v38, %v9510_v16  ;;  %v11269_v52 = vld [vmem:[#allocation183_spill] sm:$0xff]  ;;  %v4823_v16 = vpop.permute.xlu1 %4822 }
 0x68c   : > { %v5644_v56 = vpop.f32.mrf.mxu1 }
 0x68d   : > { %v9512_v61 = vadd.f32 %v5644_v56, %v5643_v30  ;;  %4441 = vmax.xlane.f32.xlu0 %v4440_v26  ;;  %v4043_v30 = vld [vmem:[#allocation2 + $0x3d0] sm:$0xff] }
 0x68e   : > { %v9514_v32 = vpop.f32.mrf.mxu1  ;;  %v11270_v26 = vld [vmem:[#allocation179_spill] sm:$0xff] }
 0x68f   : > { %11265 = vst [vmem:[#allocation222_spill] sm:$0xff] %v9512_v61  ;;  %11266 = vst [vmem:[#allocation223_spill] sm:$0xff] %v9514_v32  ;;  %4474 = vmax.xlane.f32.xlu1 %v4473_v10  ;;  %v4102_v10 = vunpack.c.h.bf16 %v4043_v30 }
 0x690   : > { %v9523_v49 = vpop.eup %6398  ;;  %v4403_v44 = vpop.xlane.xlu0 %4402 }
 0x691   : > { %v9525_v56 = vpop.f32.mrf.mxu1  ;;  %v9527_v4 = vpop.eup %6400  ;;  %v4492_v3 = vsub.f32 %v11269_v52, %v4403_v44  ;;  %v4493_v7 = vsub.f32 %v11270_v26, %v4403_v44  ;;  %4447 = vmax.xlane.f32.xlu0 %v4446_v15  ;;  %v9546_v44 = vadd.f32 %v9302_v55, %v4097_v43  ;;  %v4101_v15 = vunpack.c.l.bf16 %v4043_v30  ;;  %v11274_v43 = vld [vmem:[#allocation64_spill] sm:$0xff] }
 0x692   : > { %11268 = vst [vmem:[#allocation225_spill] sm:$0xff] %v9525_v56  ;;  %v9538_v5 = vadd.f32 %v9527_v4, %v9523_v49  ;;  %v4452_v56 = vmax.f32 %v9530_v12, %v9519_v50  ;;  %v9555_v18 = vadd.f32 %v9339_v58, %v4102_v10 }
 0x693   : > { %v5649_v61 = vpop.f32.mrf.mxu1  ;;  %v4566_v54 = vmul.f32 1.442695, %v4492_v3  ;;  %v4568_v32 = vmul.f32 1.442695, %v4493_v7  ;;  %4480 = vmax.xlane.f32.xlu1 %v4479_v45  ;;  %v4458_v8 = vmax.f32 %v9546_v44, %v9543_v48  ;;  %v11276_v7 = vld [vmem:[#allocation66_spill] sm:$0xff] }
 0x694   : > { %11271 = vst [vmem:[#allocation183_spill] sm:$0xff] %v9538_v5  ;;  %v4825_v38 = vpop.permute.xlu0 %4824  ;;  %v4045_v5 = vld [vmem:[#allocation2 + $0x3e0] sm:$0xff] }
 0x695   : > { %v5650_v52 = vpop.f32.mrf.mxu1  ;;  %6402 = vpow2.f32 %v4566_v54  ;;  %4453 = vmax.xlane.f32.xlu0 %v4452_v56  ;;  %5741 = vmatprep.subr.bf16.mxu1 %v4825_v38  ;;  %v4106_v55 = vunpack.c.h.bf16 %v4045_v5  ;;  %v9561_v38 = vadd.f32 %v9331_v22, %v4101_v15  ;;  %v4047_v56 = vld [vmem:[#allocation2 + $0x3f0] sm:$0xff]  ;;  %v11278_v15 = vld [vmem:[#allocation68_spill] sm:$0xff] }
 0x696   : > { %v9548_v26 = vadd.f32 %v5650_v52, %v5649_v61  ;;  %6404 = vpow2.f32 %v4568_v32  ;;  %5742 = vmatpush3.bf16.msra.mxu1 %v4809_v21  ;;  %v4105_v32 = vunpack.c.l.bf16 %v4045_v5  ;;  %v4110_v3 = vunpack.c.h.bf16 %v4047_v56 }
 0x697   : > { %v9550_v34 = vpop.f32.mrf.mxu1  ;;  %1421 = vadd.xlane.f32.xlu1 %v11274_v43  ;;  %5743 = vmatprep.subr.bf16.mxu1 %v4823_v16  ;;  %v4464_v45 = vmax.f32 %v9561_v38, %v9555_v18  ;;  %v9566_v58 = vadd.f32 %v9390_v20, %v4106_v55  ;;  %v4109_v22 = vunpack.c.l.bf16 %v4047_v56  ;;  %v11279_v43 = vld [vmem:[#allocation70_spill] sm:$0xff]  ;;  %v11283_v56 = vld [vmem:[#allocation65_spill] sm:$0xff] }
 0x698   : > { %11272 = vst [vmem:[#allocation179_spill] sm:$0xff] %v9548_v26  ;;  %11273 = vst [vmem:[#allocation226_spill] sm:$0xff] %v9550_v34  ;;  %v4807_v61 = vpop.permute.xlu0 %4806  ;;  %v9570_v10 = vadd.f32 %v9377_v35, %v4105_v32  ;;  %v9577_v52 = vadd.f32 %v9460_v1, %v4110_v3  ;;  %v11280_v1 = vld [vmem:[#allocation72_spill] sm:$0xff]  ;;  %v11281_v32 = vld [vmem:[#allocation63_spill] sm:$0xff] }
 0x699   : > { %v9558_v30 = vpop.f32.mrf.mxu1  ;;  %4459 = vmax.xlane.f32.xlu0 %v4458_v8  ;;  %v9581_v20 = vadd.f32 %v9441_v41, %v4109_v22  ;;  %v11282_v41 = vld [vmem:[#allocation74_spill] sm:$0xff] }
 0x69a   : > { %11275 = vst [vmem:[#allocation64_spill] sm:$0xff] %v9558_v30  ;;  %5744 = vmatpush3.bf16.msra.mxu1 %v4807_v61  ;;  %v4470_v5 = vmax.f32 %v9570_v10, %v9566_v58  ;;  %v11286_v3 = vld [vmem:[#allocation38_spill] sm:$0xff] }
 0x69b   : > { %v5655_v21 = vpop.f32.mrf.mxu1  ;;  %1427 = vadd.xlane.f32.xlu1 %v11276_v7  ;;  %v4476_v55 = vmax.f32 %v9581_v20, %v9577_v52  ;;  %v11287_v7 = vld [vmem:[#allocation69_spill] sm:$0xff] }
 0x69d   : > { %v5656_v16 = vpop.f32.mrf.mxu1  ;;  %4465 = vmax.xlane.f32.xlu0 %v4464_v45  ;;  %v11285_v45 = vld [vmem:[#allocation67_spill] sm:$0xff] }
 0x69e   : > { %v9572_v54 = vadd.f32 %v5656_v16, %v5655_v21  ;;  %v11284_v21 = vld [vmem:[#allocation36_spill] sm:$0xff] }
 0x69f   : > { %1433 = vadd.xlane.f32.xlu1 %v11278_v15  ;;  %v11288_v16 = vld [vmem:[#allocation40_spill] sm:$0xff] }
 0x6a0   : > { %11277 = vst [vmem:[#allocation66_spill] sm:$0xff] %v9572_v54 }
 0x6a1   : > { %4471 = vmax.xlane.f32.xlu0 %v4470_v5 }
 0x6a2   : > { %v9583_v8 = vpop.eup %6402 }
 0x6a3   : > { %v9585_v35 = vpop.eup %6404  ;;  %1439 = vadd.xlane.f32.xlu1 %v11279_v43 }
 0x6a4   : > { %v9592_v61 = vadd.f32 %v9585_v35, %v9583_v8 }
 0x6a5   : > { %4477 = vmax.xlane.f32.xlu0 %v4476_v55  ;;  %v11289_v55 = vld [vmem:[#allocation71_spill] sm:$0xff] }
 0x6a7   : > { %1445 = vadd.xlane.f32.xlu1 %v11280_v1 }
 0x6a9   : > { %1418 = vadd.xlane.f32.xlu0 %v11281_v32  ;;  %v11290_v32 = vld [vmem:[#allocation6_spill] sm:$0xff] }
 0x6ab   : > { %1451 = vadd.xlane.f32.xlu1 %v11282_v41  ;;  %v11291_v41 = vld [vmem:[#allocation73_spill] sm:$0xff] }
 0x6ad   : > { %1424 = vadd.xlane.f32.xlu0 %v11283_v56  ;;  %v9608_v56 = vpop.f32.mrf.mxu1 }
 0x6ae   : > { %11292 = vst [vmem:[#allocation68_spill] sm:$0xff] %v9608_v56  ;;  %v11417_v56 = vld [vmem:[#allocation30_spill] sm:$0xff] }
 0x6af   : > { %1457 = vadd.xlane.f32.xlu1 %v11284_v21  ;;  %v11293_v21 = vld [vmem:[#allocation43_spill] sm:$0xff] }
 0x6b1   : > { %1430 = vadd.xlane.f32.xlu0 %v11285_v45  ;;  %v11294_v45 = vld [vmem:[#allocation35_spill] sm:$0xff] }
 0x6b3   : > { %1463 = vadd.xlane.f32.xlu1 %v11286_v3  ;;  %v9612_v3 = vpop.f32.mrf.mxu1 }
 0x6b4   : > { %11295 = vst [vmem:[#allocation70_spill] sm:$0xff] %v9612_v3 }
 0x6b5   : > { %1436 = vadd.xlane.f32.xlu0 %v11287_v7  ;;  %v11297_v7 = vld [vmem:[#allocation37_spill] sm:$0xff] }
 0x6b7   : > { %1469 = vadd.xlane.f32.xlu1 %v11288_v16  ;;  %v4406_v22 = vpop.xlane.xlu1 %4405 }
 0x6b8   : > { %v4494_v5 = vsub.f32 %v9231_v31, %v4406_v22  ;;  %v4495_v15 = vsub.f32 %v9226_v13, %v4406_v22  ;;  %v11296_v31 = vld [vmem:[#allocation45_spill] sm:$0xff]  ;;  %v11298_v22 = vld [vmem:[#allocation47_spill] sm:$0xff] }
 0x6b9   : > { %1442 = vadd.xlane.f32.xlu0 %v11289_v55 }
 0x6ba   : > { %v4570_v43 = vmul.f32 1.442695, %v4494_v5  ;;  %v4572_v1 = vmul.f32 1.442695, %v4495_v15 }
 0x6bb   : > { %1475 = vadd.xlane.f32.xlu1 %v11290_v32  ;;  %v4805_v5 = vpop.permute.xlu1 %4804  ;;  %v11300_v32 = vld [vmem:[#allocation39_spill] sm:$0xff] }
 0x6bc   : > { %6406 = vpow2.f32 %v4570_v43 }
 0x6bd   : > { %6408 = vpow2.f32 %v4572_v1  ;;  %1448 = vadd.xlane.f32.xlu0 %v11291_v41 }
 0x6bf   : > { %1481 = vadd.xlane.f32.xlu1 %v11293_v21 }
 0x6c1   : > { %1454 = vadd.xlane.f32.xlu0 %v11294_v45 }
 0x6c3   : > { %1487 = vadd.xlane.f32.xlu1 %v11296_v31 }
 0x6c5   : > { %v5661_v13 = vpop.f32.mrf.mxu1  ;;  %1460 = vadd.xlane.f32.xlu0 %v11297_v7  ;;  %v11301_v7 = vld [vmem:[#allocation49_spill] sm:$0xff] }
 0x6c7   : > { %v5662_v16 = vpop.f32.mrf.mxu1  ;;  %1493 = vadd.xlane.f32.xlu1 %v11298_v22 }
 0x6c8   : > { %v9617_v15 = vadd.f32 %v5662_v16, %v5661_v13 }
 0x6c9   : > { %v9619_v55 = vpop.eup %6406  ;;  %v5664_v43 = vpop.f32.mrf.mxu1  ;;  %1466 = vadd.xlane.f32.xlu0 %v11300_v32  ;;  %v11303_v32 = vld [vmem:[#allocation41_spill] sm:$0xff] }
 0x6ca   : > { %11299 = vst [vmem:[#allocation72_spill] sm:$0xff] %v9617_v15  ;;  %v4409_v1 = vpop.xlane.xlu0 %4408  ;;  %v9622_v41 = vpop.eup %6408 }
 0x6cb   : > { %v4496_v21 = vsub.f32 %v9273_v17, %v4409_v1  ;;  %v4497_v45 = vsub.f32 %v9268_v53, %v4409_v1  ;;  %v5665_v31 = vpop.f32.mrf.mxu1  ;;  %1499 = vadd.xlane.f32.xlu1 %v11301_v7  ;;  %v9629_v22 = vadd.f32 %v9622_v41, %v9619_v55  ;;  %v4819_v17 = vpop.permute.xlu1 %4818  ;;  %v11304_v1 = vld [vmem:[#allocation51_spill] sm:$0xff] }
 0x6cc   : > { %v9631_v15 = vadd.f32 %v5665_v31, %v5664_v43  ;;  %v11307_v31 = vld [vmem:[#allocation53_spill] sm:$0xff] }
 0x6cd   : > { %v4574_v13 = vmul.f32 1.442695, %v4496_v21  ;;  %v4576_v16 = vmul.f32 1.442695, %v4497_v45  ;;  %v5667_v54 = vpop.f32.mrf.mxu1  ;;  %1472 = vadd.xlane.f32.xlu0 %v11303_v32  ;;  %v11306_v45 = vld [vmem:[#allocation42_spill] sm:$0xff] }
 0x6ce   : > { %11302 = vst [vmem:[#allocation63_spill] sm:$0xff] %v9631_v15  ;;  %v4821_v26 = vpop.permute.xlu0 %4820  ;;  %v11310_v15 = vld [vmem:[#allocation44_spill] sm:$0xff] }
 0x6cf   : > { %6410 = vpow2.f32 %v4574_v13  ;;  %5745 = vmatprep.subr.bf16.mxu1 %v4821_v26  ;;  %v5668_v53 = vpop.f32.mrf.mxu1  ;;  %1505 = vadd.xlane.f32.xlu1 %v11304_v1  ;;  %v11309_v26 = vld [vmem:[#allocation196_spill] sm:$0xff] }
 0x6d0   : > { %6412 = vpow2.f32 %v4576_v16  ;;  %5746 = vmatpush3.bf16.msra.mxu1 %v4805_v5  ;;  %v9635_v7 = vadd.f32 %v5668_v53, %v5667_v54  ;;  %v4770_v13 = vpack.c.bf16 %v11309_v26, %v9249_v25  ;;  %v4773_v54 = vpack.c.bf16 %v9358_v11, %v9313_v42 }
 0x6d1   : > { %5747 = vmatprep.subr.bf16.mxu1 %v4819_v17  ;;  %v5670_v3 = vpop.f32.mrf.mxu1  ;;  %1478 = vadd.xlane.f32.xlu0 %v11306_v45  ;;  %v11311_v17 = vld [vmem:[#allocation55_spill] sm:$0xff]  ;;  %v4772_v42 = vpack.c.bf16 %v9351_v37, %v9311_v51  ;;  %v4775_v26 = vpack.c.bf16 %v9585_v35, %v9527_v4  ;;  %v11320_v51 = vld [vmem:[#allocation112_spill] sm:$0xff]  ;;  %v4774_v4 = vpack.c.bf16 %v9583_v8, %v9523_v49 }
 0x6d2   : > { %11305 = vst [vmem:[#allocation74_spill] sm:$0xff] %v9635_v7  ;;  %v4803_v21 = vpop.permute.xlu0 %4802  ;;  %v11370_v7 = vld [vmem:[#allocation157_spill] sm:$0xff] }
 0x6d3   : > { %v5671_v43 = vpop.f32.mrf.mxu1  ;;  %1511 = vadd.xlane.f32.xlu1 %v11307_v31 }
 0x6d4   : > { %5748 = vmatpush3.bf16.msra.mxu1 %v4803_v21  ;;  %v9639_v32 = vadd.f32 %v5671_v43, %v5670_v3  ;;  %v11313_v21 = vld [vmem:[#allocation46_spill] sm:$0xff]  ;;  %v11314_v43 = vld [vmem:[#allocation79_spill] sm:$0xff] }
 0x6d5   : > { %v5673_v16 = vpop.f32.mrf.mxu1  ;;  %1484 = vadd.xlane.f32.xlu0 %v11310_v15  ;;  %v11316_v15 = vld [vmem:[#allocation48_spill] sm:$0xff] }
 0x6d6   : > { %11308 = vst [vmem:[#allocation65_spill] sm:$0xff] %v9639_v32 }
 0x6d7   : > { %4883 = vmatmul.mubr.bf16.vlgmr.msra.gmra.mxu1 %v4770_v13  ;;  %v5674_v5 = vpop.f32.mrf.mxu1  ;;  %2480 = vadd.xlane.f32.xlu1 %v11311_v17 }
 0x6d8   : > { %4890 = vmatprep.mubr.bf16.mxu1 %v4773_v54  ;;  %v9647_v53 = vadd.f32 %v5674_v5, %v5673_v16  ;;  %v11317_v54 = vld [vmem:[#allocation99_spill] sm:$0xff] }
 0x6d9   : > { %v5676_v1 = vpop.f32.mrf.mxu1  ;;  %1490 = vadd.xlane.f32.xlu0 %v11313_v21 }
 0x6da   : > { %11312 = vst [vmem:[#allocation36_spill] sm:$0xff] %v9647_v53  ;;  %v11361_v53 = vld [vmem:[#allocation150_spill] sm:$0xff] }
 0x6db   : > { %v5677_v45 = vpop.f32.mrf.mxu1  ;;  %2486 = vadd.xlane.f32.xlu1 %v11314_v43 }
 0x6dc   : > { %v6411_v3 = vpop.eup %6410  ;;  %v9651_v31 = vadd.f32 %v5677_v45, %v5676_v1  ;;  %v11319_v1 = vld [vmem:[#allocation50_spill] sm:$0xff]  ;;  %v11322_v45 = vld [vmem:[#allocation52_spill] sm:$0xff] }
 0x6dd   : > { %v6413_v25 = vpop.eup %6412  ;;  %v5679_v11 = vpop.f32.mrf.mxu1  ;;  %1496 = vadd.xlane.f32.xlu0 %v11316_v15  ;;  %v4776_v49 = vpack.c.bf16 %v6411_v3, %v9619_v55 }
 0x6de   : > { %11315 = vst [vmem:[#allocation67_spill] sm:$0xff] %v9651_v31  ;;  %v9658_v13 = vadd.f32 %v6413_v25, %v6411_v3  ;;  %v4777_v43 = vpack.c.bf16 %v6413_v25, %v9622_v41  ;;  %v11329_v25 = vld [vmem:[#allocation14_spill] sm:$0xff]  ;;  %v11332_v3 = vld [vmem:[#allocation116_spill] sm:$0xff] }
 0x6df   : > { %4891 = vmatmul.mubr.bf16.gmra.mxu1 %v4772_v42  ;;  %v5680_v16 = vpop.f32.mrf.mxu1  ;;  %2492 = vadd.xlane.f32.xlu1 %v11317_v54 }
 0x6e0   : > { %4898 = vmatprep.mubr.bf16.mxu1 %v4775_v26  ;;  %v9661_v5 = vadd.f32 %v5680_v16, %v5679_v11  ;;  %v11323_v11 = vld [vmem:[#allocation115_spill] sm:$0xff]  ;;  %v11325_v16 = vld [vmem:[#allocation54_spill] sm:$0xff] }
 0x6e1   : > { %v5682_v17 = vpop.f32.mrf.mxu1  ;;  %1502 = vadd.xlane.f32.xlu0 %v11319_v1 }
 0x6e2   : > { %11318 = vst [vmem:[#allocation38_spill] sm:$0xff] %v9661_v5  ;;  %v11360_v5 = vld [vmem:[#allocation213_spill] sm:$0xff] }
 0x6e3   : > { %v5683_v21 = vpop.f32.mrf.mxu1  ;;  %2498 = vadd.xlane.f32.xlu1 %v11320_v51 }
 0x6e4   : > { %v9665_v37 = vadd.f32 %v5683_v21, %v5682_v17  ;;  %v11326_v17 = vld [vmem:[#allocation114_spill] sm:$0xff]  ;;  %v11328_v21 = vld [vmem:[#allocation56_spill] sm:$0xff] }
 0x6e5   : > { %v5685_v35 = vpop.f32.mrf.mxu1  ;;  %1508 = vadd.xlane.f32.xlu0 %v11322_v45 }
 0x6e6   : > { %11321 = vst [vmem:[#allocation69_spill] sm:$0xff] %v9665_v37 }
 0x6e7   : > { %4899 = vmatmul.mubr.bf16.gmra.mxu1 %v4774_v4  ;;  %v5686_v42 = vpop.f32.mrf.mxu1  ;;  %2504 = vadd.xlane.f32.xlu1 %v11323_v11 }
 0x6e8   : > { %4906 = vmatprep.mubr.bf16.mxu1 %v4777_v43  ;;  %v9672_v15 = vadd.f32 %v5686_v42, %v5685_v35  ;;  %v11331_v42 = vld [vmem:[#allocation89_spill] sm:$0xff] }
 0x6e9   : > { %v5688_v26 = vpop.f32.mrf.mxu1  ;;  %2477 = vadd.xlane.f32.xlu0 %v11325_v16 }
 0x6ea   : > { %11324 = vst [vmem:[#allocation40_spill] sm:$0xff] %v9672_v15  ;;  %v11357_v15 = vld [vmem:[#allocation17_spill] sm:$0xff] }
 0x6eb   : > { %v5689_v54 = vpop.f32.mrf.mxu1  ;;  %2510 = vadd.xlane.f32.xlu1 %v11326_v17 }
 0x6ec   : > { %v9676_v1 = vadd.f32 %v5689_v54, %v5688_v26 }
 0x6ed   : > { %v5691_v8 = vpop.f32.mrf.mxu1  ;;  %2483 = vadd.xlane.f32.xlu0 %v11328_v21  ;;  %v11334_v21 = vld [vmem:[#allocation113_spill] sm:$0xff] }
 0x6ee   : > { %11327 = vst [vmem:[#allocation71_spill] sm:$0xff] %v9676_v1 }
 0x6ef   : > { %4907 = vmatmul.mubr.bf16.gmra.mxu1 %v4776_v49  ;;  %v5692_v41 = vpop.f32.mrf.mxu1  ;;  %2516 = vadd.xlane.f32.xlu1 %v11329_v25  ;;  %v11335_v25 = vld [vmem:[#allocation16_spill] sm:$0xff] }
 0x6f0   : > { %v9681_v51 = vadd.f32 %v5692_v41, %v5691_v8  ;;  %v4412_v4 = vpop.xlane.xlu1 %4411 }
 0x6f1   : > { %v5694_v35 = vpop.f32.mrf.mxu1  ;;  %v4498_v45 = vsub.f32 %v9337_v33, %v4412_v4  ;;  %v4499_v43 = vsub.f32 %v9334_v29, %v4412_v4  ;;  %2489 = vadd.xlane.f32.xlu0 %v11331_v42 }
 0x6f2   : > { %11330 = vst [vmem:[#allocation6_spill] sm:$0xff] %v9681_v51 }
 0x6f3   : > { %v4578_v11 = vmul.f32 1.442695, %v4498_v45  ;;  %v4580_v26 = vmul.f32 1.442695, %v4499_v43  ;;  %v5695_v55 = vpop.f32.mrf.mxu1  ;;  %2522 = vadd.xlane.f32.xlu1 %v11332_v3 }
 0x6f4   : > { %v9687_v16 = vadd.f32 %v5695_v55, %v5694_v35  ;;  %v4421_v54 = vpop.xlane.xlu1 %4420  ;;  %v11338_v55 = vld [vmem:[#allocation130_spill] sm:$0xff] }
 0x6f5   : > { %6414 = vpow2.f32 %v4578_v11  ;;  %v5697_v17 = vpop.f32.mrf.mxu1  ;;  %v4504_v49 = vsub.f32 %v9347_v24, %v4421_v54  ;;  %v4505_v8 = vsub.f32 %v9344_v28, %v4421_v54  ;;  %2495 = vadd.xlane.f32.xlu0 %v11334_v21  ;;  %v11337_v24 = vld [vmem:[#allocation12_spill] sm:$0xff] }
 0x6f6   : > { %11333 = vst [vmem:[#allocation73_spill] sm:$0xff] %v9687_v16  ;;  %6416 = vpow2.f32 %v4580_v26  ;;  %v11341_v21 = vld [vmem:[#allocation32_spill] sm:$0xff] }
 0x6f7   : > { %v4590_v29 = vmul.f32 1.442695, %v4504_v49  ;;  %v4592_v33 = vmul.f32 1.442695, %v4505_v8  ;;  %v5698_v41 = vpop.f32.mrf.mxu1  ;;  %2528 = vadd.xlane.f32.xlu1 %v11335_v25  ;;  %v11340_v49 = vld [vmem:[#allocation34_spill] sm:$0xff]  ;;  %v11343_v25 = vld [vmem:[#allocation132_spill] sm:$0xff] }
 0x6f8   : > { %v9693_v4 = vadd.f32 %v5698_v41, %v5697_v17  ;;  %v4427_v45 = vpop.xlane.xlu1 %4426 }
 0x6f9   : > { %6418 = vpow2.f32 %v4590_v29  ;;  %v5700_v35 = vpop.f32.mrf.mxu1  ;;  %v4508_v43 = vsub.f32 %v9361_v9, %v4427_v45  ;;  %v4509_v42 = vsub.f32 %v9356_v6, %v4427_v45  ;;  %2501 = vadd.xlane.f32.xlu0 %v11337_v24  ;;  %v11342_v9 = vld [vmem:[#allocation13_spill] sm:$0xff] }
 0x6fa   : > { %11336 = vst [vmem:[#allocation43_spill] sm:$0xff] %v9693_v4  ;;  %6420 = vpow2.f32 %v4592_v33  ;;  %v11354_v4 = vld [vmem:[#allocation142_spill] sm:$0xff] }
 0x6fb   : > { %v4598_v28 = vmul.f32 1.442695, %v4508_v43  ;;  %v4600_v11 = vmul.f32 1.442695, %v4509_v42  ;;  %v5701_v26 = vpop.f32.mrf.mxu1  ;;  %2534 = vadd.xlane.f32.xlu1 %v11338_v55  ;;  %v11345_v42 = vld [vmem:[#allocation211_spill] sm:$0xff]  ;;  %v11347_v55 = vld [vmem:[#allocation117_spill] sm:$0xff] }
 0x6fc   : > { %v9699_v3 = vadd.f32 %v5701_v26, %v5700_v35  ;;  %v4433_v54 = vpop.xlane.xlu1 %4432 }
 0x6fd   : > { %6422 = vpow2.f32 %v4598_v28  ;;  %v5703_v17 = vpop.f32.mrf.mxu1  ;;  %v4512_v8 = vsub.f32 %v11340_v49, %v4433_v54  ;;  %v4513_v29 = vsub.f32 %v11341_v21, %v4433_v54  ;;  %2507 = vadd.xlane.f32.xlu0 %v11342_v9  ;;  %v11346_v28 = vld [vmem:[#allocation209_spill] sm:$0xff] }
 0x6fe   : > { %11339 = vst [vmem:[#allocation35_spill] sm:$0xff] %v9699_v3  ;;  %6424 = vpow2.f32 %v4600_v11 }
 0x6ff   : > { %v4606_v6 = vmul.f32 1.442695, %v4512_v8  ;;  %v4608_v41 = vmul.f32 1.442695, %v4513_v29  ;;  %v5704_v33 = vpop.f32.mrf.mxu1  ;;  %2540 = vadd.xlane.f32.xlu1 %v11343_v25  ;;  %v11348_v29 = vld [vmem:[#allocation210_spill] sm:$0xff] }
 0x700   : > { %v9705_v45 = vadd.f32 %v5704_v33, %v5703_v17  ;;  %v4439_v43 = vpop.xlane.xlu1 %4438  ;;  %v11349_v33 = vld [vmem:[#allocation140_spill] sm:$0xff] }
 0x701   : > { %6426 = vpow2.f32 %v4606_v6  ;;  %v5706_v35 = vpop.f32.mrf.mxu1  ;;  %v4516_v24 = vsub.f32 %v11345_v42, %v4439_v43  ;;  %v4517_v26 = vsub.f32 %v11346_v28, %v4439_v43  ;;  %2513 = vadd.xlane.f32.xlu0 %v11347_v55 }
 0x702   : > { %11344 = vst [vmem:[#allocation45_spill] sm:$0xff] %v9705_v45  ;;  %v9710_v54 = vpop.eup %6414  ;;  %6428 = vpow2.f32 %v4608_v41  ;;  %v4415_v11 = vpop.xlane.xlu0 %4414 }
 0x703   : > { %v9712_v49 = vpop.eup %6416  ;;  %v4614_v8 = vmul.f32 1.442695, %v4516_v24  ;;  %v4616_v21 = vmul.f32 1.442695, %v4517_v26  ;;  %v4500_v17 = vsub.f32 %v9393_v59, %v4415_v11  ;;  %v4501_v9 = vsub.f32 %v11348_v29, %v4415_v11  ;;  %v5707_v6 = vpop.f32.mrf.mxu1  ;;  %2546 = vadd.xlane.f32.xlu1 %v11349_v33  ;;  %v11351_v26 = vld [vmem:[#allocation15_spill] sm:$0xff]  ;;  %v11352_v33 = vld [vmem:[#allocation156_spill] sm:$0xff] }
 0x704   : > { %v9717_v25 = vadd.f32 %v5707_v6, %v5706_v35  ;;  %v4445_v43 = vpop.xlane.xlu1 %4444  ;;  %v9721_v42 = vadd.f32 %v9712_v49, %v9710_v54 }
 0x705   : > { %6430 = vpow2.f32 %v4614_v8  ;;  %v4582_v41 = vmul.f32 1.442695, %v4500_v17  ;;  %v4584_v28 = vmul.f32 1.442695, %v4501_v9  ;;  %v5709_v55 = vpop.f32.mrf.mxu1  ;;  %v4520_v24 = vsub.f32 %v9406_v60, %v4445_v43  ;;  %2519 = vadd.xlane.f32.xlu0 %v11351_v26  ;;  %v11353_v8 = vld [vmem:[#allocation166_spill] sm:$0xff] }
 0x706   : > { %11350 = vst [vmem:[#allocation37_spill] sm:$0xff] %v9717_v25  ;;  %v9725_v59 = vpop.eup %6418  ;;  %6432 = vpow2.f32 %v4616_v21  ;;  %v4521_v11 = vsub.f32 %v9398_v19, %v4445_v43  ;;  %v4418_v35 = vpop.xlane.xlu0 %4417 }
 0x707   : > { %v9728_v29 = vpop.eup %6420  ;;  %6434 = vpow2.f32 %v4582_v41  ;;  %v4622_v6 = vmul.f32 1.442695, %v4520_v24  ;;  %v4502_v45 = vsub.f32 %v11352_v33, %v4418_v35  ;;  %v4503_v17 = vsub.f32 %v11353_v8, %v4418_v35  ;;  %v5710_v9 = vpop.f32.mrf.mxu1  ;;  %2552 = vadd.xlane.f32.xlu1 %v11354_v4  ;;  %v11356_v41 = vld [vmem:[#allocation214_spill] sm:$0xff]  ;;  %v11358_v4 = vld [vmem:[#allocation212_spill] sm:$0xff] }
 0x708   : > { %6436 = vpow2.f32 %v4584_v28  ;;  %v4624_v60 = vmul.f32 1.442695, %v4521_v11  ;;  %v9733_v26 = vadd.f32 %v5710_v9, %v5709_v55  ;;  %v4451_v51 = vpop.xlane.xlu1 %4450  ;;  %v9737_v19 = vadd.f32 %v9728_v29, %v9725_v59  ;;  %v11359_v9 = vld [vmem:[#allocation215_spill] sm:$0xff] }
 0x709   : > { %v4588_v21 = vmul.f32 1.442695, %v4503_v17  ;;  %v5712_v43 = vpop.f32.mrf.mxu1  ;;  %v4524_v24 = vsub.f32 %v11356_v41, %v4451_v51  ;;  %2525 = vadd.xlane.f32.xlu0 %v11357_v15  ;;  %6438 = vpow2.f32 %v4622_v6  ;;  %v4586_v35 = vmul.f32 1.442695, %v4502_v45 }
 0x70a   : > { %11355 = vst [vmem:[#allocation47_spill] sm:$0xff] %v9733_v26  ;;  %v9741_v33 = vpop.eup %6422  ;;  %v4525_v28 = vsub.f32 %v11358_v4, %v4451_v51  ;;  %v4424_v11 = vpop.xlane.xlu0 %4423  ;;  %6440 = vpow2.f32 %v4624_v60 }
 0x70b   : > { %v9744_v55 = vpop.eup %6424  ;;  %v4630_v8 = vmul.f32 1.442695, %v4524_v24  ;;  %v4506_v26 = vsub.f32 %v11359_v9, %v4424_v11  ;;  %v4507_v17 = vsub.f32 %v11360_v5, %v4424_v11  ;;  %v5713_v25 = vpop.f32.mrf.mxu1  ;;  %2558 = vadd.xlane.f32.xlu1 %v11361_v53  ;;  %6442 = vpow2.f32 %v4588_v21  ;;  %v11363_v24 = vld [vmem:[#allocation118_spill] sm:$0xff]  ;;  %v11364_v9 = vld [vmem:[#allocation152_spill] sm:$0xff] }
 0x70c   : > { %v9749_v15 = vadd.f32 %v5713_v25, %v5712_v43  ;;  %v9751_v41 = vpop.xlane.xlu1 %4456  ;;  %v9755_v51 = vadd.f32 %v9744_v55, %v9741_v33  ;;  %v4632_v45 = vmul.f32 1.442695, %v4525_v28  ;;  %6444 = vpow2.f32 %v4586_v35 }
 0x70d   : > { %v4596_v6 = vmul.f32 1.442695, %v4507_v17  ;;  %v5715_v60 = vpop.f32.mrf.mxu1  ;;  %2531 = vadd.xlane.f32.xlu0 %v11363_v24  ;;  %v4594_v5 = vmul.f32 1.442695, %v4506_v26  ;;  %6446 = vpow2.f32 %v4630_v8 }
 0x70e   : > { %11362 = vst [vmem:[#allocation39_spill] sm:$0xff] %v9749_v15  ;;  %v9758_v4 = vpop.eup %6426  ;;  %v4430_v11 = vpop.xlane.xlu0 %4429  ;;  %v11366_v15 = vld [vmem:[#allocation131_spill] sm:$0xff] }
 0x70f   : > { %v9760_v53 = vpop.eup %6428  ;;  %v4510_v25 = vsub.f32 %v9449_v47, %v4430_v11  ;;  %v4511_v21 = vsub.f32 %v9439_v62, %v4430_v11  ;;  %v5716_v43 = vpop.f32.mrf.mxu1  ;;  %2564 = vadd.xlane.f32.xlu1 %v11364_v9  ;;  %6448 = vpow2.f32 %v4596_v6  ;;  %v11367_v9 = vld [vmem:[#allocation165_spill] sm:$0xff] }
 0x710   : > { %v9765_v28 = vadd.f32 %v5716_v43, %v5715_v60  ;;  %v9767_v17 = vpop.xlane.xlu1 %4462  ;;  %v9771_v35 = vadd.f32 %v9760_v53, %v9758_v4  ;;  %6450 = vpow2.f32 %v4632_v45 }
 0x711   : > { %v4602_v26 = vmul.f32 1.442695, %v4510_v25  ;;  %v4604_v24 = vmul.f32 1.442695, %v4511_v21  ;;  %v5718_v8 = vpop.f32.mrf.mxu1  ;;  %2537 = vadd.xlane.f32.xlu0 %v11366_v15  ;;  %6452 = vpow2.f32 %v4594_v5 }
 0x712   : > { %11365 = vst [vmem:[#allocation49_spill] sm:$0xff] %v9765_v28  ;;  %v9774_v47 = vpop.eup %6430  ;;  %v4436_v62 = vpop.xlane.xlu0 %4435 }
 0x713   : > { %v9776_v11 = vpop.eup %6432  ;;  %6454 = vpow2.f32 %v4602_v26  ;;  %v4514_v6 = vsub.f32 %v9469_v2, %v4436_v62  ;;  %v4515_v60 = vsub.f32 %v9463_v57, %v4436_v62  ;;  %v5719_v43 = vpop.f32.mrf.mxu1  ;;  %2570 = vadd.xlane.f32.xlu1 %v11367_v9  ;;  %v11369_v2 = vld [vmem:[#allocation133_spill] sm:$0xff] }
 0x714   : > { %v6435_v45 = vpop.eup %6434  ;;  %6456 = vpow2.f32 %v4604_v24  ;;  %v9781_v25 = vadd.f32 %v5719_v43, %v5718_v8  ;;  %v9783_v21 = vpop.xlane.xlu1 %4468  ;;  %v9787_v15 = vadd.f32 %v9776_v11, %v9774_v47 }
 0x715   : > { %v6437_v5 = vpop.eup %6436  ;;  %v4610_v28 = vmul.f32 1.442695, %v4514_v6  ;;  %v4612_v26 = vmul.f32 1.442695, %v4515_v60  ;;  %v5721_v3 = vpop.f32.mrf.mxu1  ;;  %2543 = vadd.xlane.f32.xlu0 %v11369_v2  ;;  %v4778_v9 = vpack.c.bf16 %v6435_v45, %v9710_v54 }
 0x716   : > { %11368 = vst [vmem:[#allocation41_spill] sm:$0xff] %v9781_v25  ;;  %v4442_v57 = vpop.xlane.xlu0 %4441  ;;  %v4779_v62 = vpack.c.bf16 %v6437_v5, %v9712_v49  ;;  %v9792_v24 = vpop.eup %6438  ;;  %v9803_v49 = vadd.f32 %v6437_v5, %v6435_v45 }
 0x717   : > { %6458 = vpow2.f32 %v4610_v28  ;;  %v4518_v8 = vsub.f32 %v9491_v23, %v4442_v57  ;;  %v4519_v43 = vsub.f32 %v9483_v40, %v4442_v57  ;;  %v5722_v25 = vpop.f32.mrf.mxu1  ;;  %3587 = vadd.xlane.f32.xlu1 %v11370_v7  ;;  %v9797_v6 = vpop.eup %6440  ;;  %v11372_v23 = vld [vmem:[#allocation141_spill] sm:$0xff] }
 0x718   : > { %6460 = vpow2.f32 %v4612_v26  ;;  %v9799_v60 = vadd.f32 %v5722_v25, %v5721_v3  ;;  %4914 = vmatprep.mubr.bf16.mxu1 %v4779_v62  ;;  %v9801_v2 = vpop.xlane.xlu1 %4474  ;;  %v6443_v54 = vpop.eup %6442  ;;  %v11373_v62 = vld [vmem:[#allocation180_spill] sm:$0xff] }
 0x719   : > { %v4618_v16 = vmul.f32 1.442695, %v4518_v8  ;;  %v4620_v28 = vmul.f32 1.442695, %v4519_v43  ;;  %v5724_v1 = vpop.f32.mrf.mxu1  ;;  %4915 = vmatmul.mubr.bf16.gmra.mxu1 %v4778_v9  ;;  %2549 = vadd.xlane.f32.xlu0 %v11372_v23  ;;  %v4781_v7 = vpack.c.bf16 %v9728_v29, %v6443_v54  ;;  %v6445_v57 = vpop.eup %6444  ;;  %v9818_v29 = vadd.f32 %v9797_v6, %v9792_v24 }
 0x71a   : > { %11371 = vst [vmem:[#allocation51_spill] sm:$0xff] %v9799_v60  ;;  %v4448_v40 = vpop.xlane.xlu0 %4447  ;;  %v9810_v45 = vpop.eup %6446  ;;  %v4780_v60 = vpack.c.bf16 %v9725_v59, %v6445_v57  ;;  %v9832_v37 = vadd.f32 %v6445_v57, %v6443_v54  ;;  %v11379_v54 = vld [vmem:[#allocation154_spill] sm:$0xff] }
 0x71b   : > { %6462 = vpow2.f32 %v4618_v16  ;;  %v4522_v3 = vsub.f32 %v9506_v0, %v4448_v40  ;;  %v4523_v25 = vsub.f32 %v9500_v46, %v4448_v40  ;;  %v5725_v26 = vpop.f32.mrf.mxu1  ;;  %3593 = vadd.xlane.f32.xlu1 %v11373_v62  ;;  %4922 = vmatprep.mubr.bf16.mxu1 %v4781_v7  ;;  %v11375_v46 = vld [vmem:[#allocation143_spill] sm:$0xff] }
 0x71c   : > { %6464 = vpow2.f32 %v4620_v28  ;;  %v9812_v5 = vadd.f32 %v5725_v26, %v5724_v1  ;;  %v9814_v9 = vpop.xlane.xlu1 %4480  ;;  %v6449_v16 = vpop.eup %6448  ;;  %v11376_v26 = vld [vmem:[#allocation21_spill] sm:$0xff] }
 0x71d   : > { %v4626_v8 = vmul.f32 1.442695, %v4522_v3  ;;  %v4628_v0 = vmul.f32 1.442695, %v4523_v25  ;;  %v5727_v43 = vpop.f32.mrf.mxu1  ;;  %2555 = vadd.xlane.f32.xlu0 %v11375_v46  ;;  %v9821_v23 = vpop.eup %6450  ;;  %v4783_v46 = vpack.c.bf16 %v9744_v55, %v6449_v16 }
 0x71e   : > { %11374 = vst [vmem:[#allocation42_spill] sm:$0xff] %v9812_v5  ;;  %v4454_v40 = vpop.xlane.xlu0 %4453  ;;  %v6453_v62 = vpop.eup %6452  ;;  %v9837_v59 = vadd.f32 %v9821_v23, %v9810_v45 }
 0x71f   : > { %6466 = vpow2.f32 %v4626_v8  ;;  %v4526_v1 = vsub.f32 %v9530_v12, %v4454_v40  ;;  %v4527_v28 = vsub.f32 %v9519_v50, %v4454_v40  ;;  %v5728_v7 = vpop.f32.mrf.mxu1  ;;  %3599 = vadd.xlane.f32.xlu1 %v11376_v26  ;;  %v11378_v50 = vld [vmem:[#allocation151_spill] sm:$0xff] }
 0x720   : > { %v9827_v5 = vpop.eup %6454  ;;  %6468 = vpow2.f32 %v4628_v0  ;;  %v9829_v3 = vadd.f32 %v5728_v7, %v5727_v43  ;;  %v1422_v25 = vpop.xlane.xlu1 %1421  ;;  %v9839_v0 = vadd.f32 %v6453_v62, %v6449_v16  ;;  %v11380_v16 = vld [vmem:[#allocation153_spill] sm:$0xff] }
 0x721   : > { %v6457_v8 = vpop.eup %6456  ;;  %v4634_v31 = vmul.f32 1.442695, %v4526_v1  ;;  %v4636_v12 = vmul.f32 1.442695, %v4527_v28  ;;  %4923 = vmatmul.mubr.bf16.gmra.mxu1 %v4780_v60  ;;  %2561 = vadd.xlane.f32.xlu0 %v11378_v50  ;;  %v4782_v50 = vpack.c.bf16 %v9741_v33, %v6453_v62 }
 0x722   : > { %11377 = vst [vmem:[#allocation53_spill] sm:$0xff] %v9829_v3  ;;  %4930 = vmatprep.mubr.bf16.mxu1 %v4783_v46  ;;  %v4460_v40 = vpop.xlane.xlu0 %4459  ;;  %v9847_v1 = vadd.f32 %v6457_v8, %v9827_v5  ;;  %v11416_v3 = vld [vmem:[#allocation60_spill] sm:$0xff] }
 0x723   : > { %6470 = vpow2.f32 %v4634_v31  ;;  %v4530_v43 = vsub.f32 %v9546_v44, %v4460_v40  ;;  %v4531_v55 = vsub.f32 %v9543_v48, %v4460_v40  ;;  %3605 = vadd.xlane.f32.xlu1 %v11379_v54 }
 0x724   : > { %v9844_v57 = vpop.eup %6458  ;;  %6472 = vpow2.f32 %v4636_v12  ;;  %v1428_v60 = vpop.xlane.xlu1 %1427  ;;  %v11381_v12 = vld [vmem:[#allocation184_spill] sm:$0xff] }
 0x725   : > { %v6461_v28 = vpop.eup %6460  ;;  %6474 = vrcp.f32 %v1422_v25  ;;  %v4642_v7 = vmul.f32 1.442695, %v4530_v43  ;;  %v4644_v26 = vmul.f32 1.442695, %v4531_v55  ;;  %2567 = vadd.xlane.f32.xlu0 %v11380_v16  ;;  %v4785_v43 = vpack.c.bf16 %v9760_v53, %v6457_v8  ;;  %v11383_v53 = vld [vmem:[#allocation176_spill] sm:$0xff] }
 0x726   : > { %6476 = vrcp.f32 %v1428_v60  ;;  %v4466_v31 = vpop.xlane.xlu0 %4465  ;;  %v9851_v44 = vadd.f32 %v6461_v28, %v9844_v57 }
 0x727   : > { %6478 = vpow2.f32 %v4642_v7  ;;  %v4534_v48 = vsub.f32 %v9561_v38, %v4466_v31  ;;  %v4535_v46 = vsub.f32 %v9555_v18, %v4466_v31  ;;  %3611 = vadd.xlane.f32.xlu1 %v11381_v12  ;;  %v11382_v7 = vld [vmem:[#allocation155_spill] sm:$0xff] }
 0x728   : > { %v9857_v40 = vpop.eup %6462  ;;  %6480 = vpow2.f32 %v4644_v26  ;;  %v1434_v25 = vpop.xlane.xlu1 %1433 }
 0x729   : > { %v9860_v55 = vpop.eup %6464  ;;  %v4650_v54 = vmul.f32 1.442695, %v4534_v48  ;;  %v4652_v60 = vmul.f32 1.442695, %v4535_v46  ;;  %4931 = vmatmul.mubr.bf16.gmra.mxu1 %v4782_v50  ;;  %6482 = vrcp.f32 %v1434_v25  ;;  %3584 = vadd.xlane.f32.xlu0 %v11382_v7  ;;  %v11384_v46 = vld [vmem:[#allocation169_spill] sm:$0xff]  ;;  %v11385_v25 = vld [vmem:[#allocation178_spill] sm:$0xff]  ;;  %v4787_v7 = vpack.c.bf16 %v9776_v11, %v6461_v28 }
 0x72a   : > { %4938 = vmatprep.mubr.bf16.mxu1 %v4785_v43  ;;  %v4472_v18 = vpop.xlane.xlu0 %4471  ;;  %v9865_v38 = vadd.f32 %v9860_v55, %v9857_v40  ;;  %v4784_v43 = vpack.c.bf16 %v9758_v4, %v9827_v5  ;;  %v11390_v4 = vld [vmem:[#allocation62_spill] sm:$0xff] }
 0x72b   : > { %6484 = vpow2.f32 %v4650_v54  ;;  %v4538_v33 = vsub.f32 %v9570_v10, %v4472_v18  ;;  %v4539_v62 = vsub.f32 %v9566_v58, %v4472_v18  ;;  %3617 = vadd.xlane.f32.xlu1 %v11383_v53 }
 0x72c   : > { %v9870_v8 = vpop.eup %6466  ;;  %6486 = vpow2.f32 %v4652_v60  ;;  %v1440_v26 = vpop.xlane.xlu1 %1439 }
 0x72d   : > { %v9872_v16 = vpop.eup %6468  ;;  %v4658_v31 = vmul.f32 1.442695, %v4538_v33  ;;  %v4660_v48 = vmul.f32 1.442695, %v4539_v62  ;;  %6488 = vrcp.f32 %v1440_v26  ;;  %3590 = vadd.xlane.f32.xlu0 %v11384_v46  ;;  %v11386_v33 = vld [vmem:[#allocation58_spill] sm:$0xff]  ;;  %v11387_v62 = vld [vmem:[#allocation59_spill] sm:$0xff] }
 0x72e   : > { %v4478_v12 = vpop.xlane.xlu0 %4477  ;;  %v9877_v50 = vadd.f32 %v9872_v16, %v9870_v8  ;;  %v5418_v53 = vadd.f32 %v11387_v62, %v11386_v33  ;;  %v11389_v46 = vld [vmem:[#allocation61_spill] sm:$0xff] }
 0x72f   : > { %6490 = vpow2.f32 %v4658_v31  ;;  %v4542_v58 = vsub.f32 %v9581_v20, %v4478_v12  ;;  %v4543_v10 = vsub.f32 %v9577_v52, %v4478_v12  ;;  %3623 = vadd.xlane.f32.xlu1 %v11385_v25  ;;  %v11388_v52 = vld [vmem:[#allocation191_spill] sm:$0xff]  ;;  %v5424_v5 = vadd.f32 %v11390_v4, %v11389_v46 }
 0x730   : > { %v9884_v54 = vpop.eup %6470  ;;  %6492 = vpow2.f32 %v4660_v48  ;;  %v1446_v60 = vpop.xlane.xlu1 %1445  ;;  %v4529_v48 = vsub.f32 %v9434_v14, %v9751_v41  ;;  %v11392_v14 = vld [vmem:[#allocation7_spill] sm:$0xff] }
 0x731   : > { %v9887_v18 = vpop.eup %6472  ;;  %v4666_v26 = vmul.f32 1.442695, %v4542_v58  ;;  %v4668_v20 = vmul.f32 1.442695, %v4543_v10  ;;  %4939 = vmatmul.mubr.bf16.gmra.mxu1 %v4784_v43  ;;  %6494 = vrcp.f32 %v1446_v60  ;;  %3596 = vadd.xlane.f32.xlu0 %v11388_v52  ;;  %v11391_v10 = vld [vmem:[#allocation181_spill] sm:$0xff]  ;;  %v11394_v52 = vld [vmem:[#allocation22_spill] sm:$0xff] }
 0x732   : > { %v6475_v31 = vpop.eup %6474  ;;  %4946 = vmatprep.mubr.bf16.mxu1 %v4787_v7  ;;  %v1419_v11 = vpop.xlane.xlu0 %1418  ;;  %v9898_v28 = vadd.f32 %v9887_v18, %v9884_v54  ;;  %v11393_v7 = vld [vmem:[#allocation75_spill] sm:$0xff] }
 0x733   : > { %v6477_v12 = vpop.eup %6476  ;;  %v9900_v58 = vmul.f32 %v6475_v31, %v5418_v53  ;;  %6496 = vpow2.f32 %v4666_v26  ;;  %3629 = vadd.xlane.f32.xlu1 %v11391_v10  ;;  %v5430_v62 = vadd.f32 %v11393_v7, %v11392_v14  ;;  %v4640_v53 = vmul.f32 1.442695, %v4529_v48  ;;  %v11397_v14 = vld [vmem:[#allocation77_spill] sm:$0xff]  ;;  %v11398_v7 = vld [vmem:[#allocation78_spill] sm:$0xff] }
 0x734   : > { %v9903_v25 = vpop.eup %6478  ;;  %v9905_v43 = vmul.f32 %v6477_v12, %v5424_v5  ;;  %6498 = vpow2.f32 %v4668_v20  ;;  %v1452_v60 = vpop.xlane.xlu1 %1451  ;;  %v11396_v20 = vld [vmem:[#allocation182_spill] sm:$0xff]  ;;  %v4786_v5 = vpack.c.bf16 %v9774_v47, %v9844_v57  ;;  %v4789_v10 = vpack.c.bf16 %v9797_v6, %v9860_v55  ;;  %v11401_v57 = vld [vmem:[#allocation185_spill] sm:$0xff] }
 0x735   : > { %v9907_v33 = vpop.eup %6480  ;;  %6500 = vrcp.f32 %v1419_v11  ;;  %3602 = vadd.xlane.f32.xlu0 %v11394_v52  ;;  %v4528_v11 = vsub.f32 %v9444_v27, %v9751_v41  ;;  %v11399_v52 = vld [vmem:[#allocation177_spill] sm:$0xff]  ;;  %v4533_v47 = vsub.f32 %v9456_v36, %v9767_v17 }
 0x736   : > { %v6483_v46 = vpop.eup %6482  ;;  %6502 = vrcp.f32 %v1452_v60  ;;  %v1425_v26 = vpop.xlane.xlu0 %1424  ;;  %v9914_v31 = vadd.f32 %v9907_v33, %v9903_v25 }
 0x737   : > { %v9916_v4 = vmul.f32 %v6483_v46, %v5430_v62  ;;  %6504 = vrcp.f32 %v1425_v26  ;;  %3635 = vadd.xlane.f32.xlu1 %v11396_v20  ;;  %v5436_v62 = vadd.f32 %v11398_v7, %v11397_v14  ;;  %v4638_v26 = vmul.f32 1.442695, %v4528_v11  ;;  %v11406_v11 = vld [vmem:[#allocation186_spill] sm:$0xff] }
 0x738   : > { %11395 = vst [vmem:[#allocation196_spill] sm:$0xff] %v9914_v31  ;;  %v9921_v12 = vpop.eup %6484  ;;  %v1458_v48 = vpop.xlane.xlu1 %1457  ;;  %v4648_v7 = vmul.f32 1.442695, %v4533_v47 }
 0x739   : > { %v9927_v60 = vpop.eup %6486  ;;  %4947 = vmatmul.mubr.bf16.gmra.mxu1 %v4786_v5  ;;  %6506 = vrcp.f32 %v1458_v48  ;;  %3608 = vadd.xlane.f32.xlu0 %v11399_v52  ;;  %v11403_v48 = vld [vmem:[#allocation82_spill] sm:$0xff] }
 0x73a   : > { %v6489_v46 = vpop.eup %6488  ;;  %6508 = vpow2.f32 %v4640_v53  ;;  %4954 = vmatprep.mubr.bf16.mxu1 %v4789_v10  ;;  %v1431_v27 = vpop.xlane.xlu0 %1430  ;;  %v9936_v41 = vadd.f32 %v9927_v60, %v9921_v12  ;;  %v11402_v53 = vld [vmem:[#allocation81_spill] sm:$0xff] }
 0x73b   : > { %v9938_v6 = vmul.f32 %v6489_v46, %v5436_v62  ;;  %6510 = vrcp.f32 %v1431_v27  ;;  %3641 = vadd.xlane.f32.xlu1 %v11401_v57  ;;  %v5442_v36 = vadd.f32 %v11403_v48, %v11402_v53  ;;  %v11404_v10 = vld [vmem:[#allocation189_spill] sm:$0xff]  ;;  %v4788_v27 = vpack.c.bf16 %v9792_v24, %v9857_v40  ;;  %v11410_v40 = vld [vmem:[#allocation27_spill] sm:$0xff] }
 0x73c   : > { %11400 = vst [vmem:[#allocation44_spill] sm:$0xff] %v9936_v41  ;;  %v9941_v55 = vpop.eup %6490  ;;  %v1464_v20 = vpop.xlane.xlu1 %1463  ;;  %v4791_v53 = vpack.c.bf16 %v9821_v23, %v9872_v16  ;;  %v11412_v16 = vld [vmem:[#allocation57_spill] sm:$0xff] }
 0x73d   : > { %v9943_v5 = vpop.eup %6492  ;;  %6512 = vrcp.f32 %v1464_v20  ;;  %3614 = vadd.xlane.f32.xlu0 %v11404_v10  ;;  %v4532_v20 = vsub.f32 %v9466_v63, %v9767_v17 }
 0x73e   : > { %v6495_v14 = vpop.eup %6494  ;;  %v1437_v52 = vpop.xlane.xlu0 %1436  ;;  %v9950_v62 = vadd.f32 %v9943_v5, %v9941_v55 }
 0x73f   : > { %v9952_v46 = vmul.f32 %v6495_v14, %v5442_v36  ;;  %6514 = vrcp.f32 %v1437_v52  ;;  %3647 = vadd.xlane.f32.xlu1 %v11406_v11  ;;  %v11407_v36 = vld [vmem:[#allocation20_spill] sm:$0xff]  ;;  %v11409_v52 = vld [vmem:[#allocation85_spill] sm:$0xff] }
 0x740   : > { %11405 = vst [vmem:[#allocation55_spill] sm:$0xff] %v9950_v62  ;;  %v9957_v57 = vpop.eup %6496  ;;  %6516 = vpow2.f32 %v4638_v26  ;;  %v1470_v47 = vpop.xlane.xlu1 %1469  ;;  %v11408_v14 = vld [vmem:[#allocation84_spill] sm:$0xff]  ;;  %v4537_v26 = vsub.f32 %v11410_v40, %v9783_v21  ;;  %v11415_v40 = vld [vmem:[#allocation87_spill] sm:$0xff] }
 0x741   : > { %v9963_v48 = vpop.eup %6498  ;;  %4955 = vmatmul.mubr.bf16.gmra.mxu1 %v4788_v27  ;;  %6518 = vrcp.f32 %v1470_v47  ;;  %3620 = vadd.xlane.f32.xlu0 %v11407_v36  ;;  %v5448_v24 = vadd.f32 %v11409_v52, %v11408_v14  ;;  %v11413_v27 = vld [vmem:[#allocation188_spill] sm:$0xff]  ;;  %v4646_v36 = vmul.f32 1.442695, %v4532_v20  ;;  %v11414_v52 = vld [vmem:[#allocation86_spill] sm:$0xff] }
 0x742   : > { %v6501_v10 = vpop.eup %6500  ;;  %6520 = vpow2.f32 %v4648_v7  ;;  %4962 = vmatprep.mubr.bf16.mxu1 %v4791_v53  ;;  %v1443_v63 = vpop.xlane.xlu0 %1442  ;;  %v9972_v17 = vadd.f32 %v9963_v48, %v9957_v57  ;;  %v5454_v53 = vadd.f32 %v11415_v40, %v11414_v52  ;;  %v11418_v20 = vld [vmem:[#allocation200_spill] sm:$0xff]  ;;  %v11421_v52 = vld [vmem:[#allocation91_spill] sm:$0xff] }
 0x743   : > { %v6503_v23 = vpop.eup %6502  ;;  %v9975_v11 = vmul.f32 %v6501_v10, %v11412_v16  ;;  %6522 = vrcp.f32 %v1443_v63  ;;  %3653 = vadd.xlane.f32.xlu1 %v11413_v27  ;;  %v4656_v10 = vmul.f32 1.442695, %v4537_v26  ;;  %v11420_v26 = vld [vmem:[#allocation90_spill] sm:$0xff] }
 0x744   : > { %11411 = vst [vmem:[#allocation46_spill] sm:$0xff] %v9972_v17  ;;  %v6505_v47 = vpop.eup %6504  ;;  %v9978_v14 = vmul.f32 %v6503_v23, %v5448_v24  ;;  %v1476_v7 = vpop.xlane.xlu1 %1475  ;;  %v4790_v24 = vpack.c.bf16 %v9810_v45, %v9870_v8  ;;  %v5460_v40 = vadd.f32 %v11421_v52, %v11420_v26  ;;  %v4541_v8 = vsub.f32 %v9495_v39, %v9801_v2  ;;  %v11428_v39 = vld [vmem:[#allocation203_spill] sm:$0xff] }
 0x745   : > { %v9983_v32 = vmul.f32 %v6505_v47, %v11416_v3  ;;  %6524 = vrcp.f32 %v1476_v7  ;;  %3626 = vadd.xlane.f32.xlu0 %v11417_v56  ;;  %v11419_v3 = vld [vmem:[#allocation219_spill] sm:$0xff] }
 0x746   : > { %v6507_v30 = vpop.eup %6506  ;;  %v1449_v16 = vpop.xlane.xlu0 %1448  ;;  %v4536_v47 = vsub.f32 %v11419_v3, %v9783_v21  ;;  %v11439_v17 = vld [vmem:[#allocation83_spill] sm:$0xff] }
 0x747   : > { %v9986_v63 = vpop.eup %6508  ;;  %v9988_v27 = vmul.f32 %v6507_v30, %v5454_v53  ;;  %6526 = vrcp.f32 %v1449_v16  ;;  %3659 = vadd.xlane.f32.xlu1 %v11418_v20  ;;  %v11422_v30 = vld [vmem:[#allocation5_spill] sm:$0xff] }
 0x748   : > { %v6511_v23 = vpop.eup %6510  ;;  %6528 = vpow2.f32 %v4646_v36  ;;  %v1482_v7 = vpop.xlane.xlu1 %1481  ;;  %v4793_v56 = vpack.c.bf16 %v9986_v63, %v9887_v18  ;;  %v11423_v16 = vld [vmem:[#allocation201_spill] sm:$0xff]  ;;  %v11424_v18 = vld [vmem:[#allocation202_spill] sm:$0xff]  ;;  %v4654_v3 = vmul.f32 1.442695, %v4536_v47  ;;  %v11429_v47 = vld [vmem:[#allocation195_spill] sm:$0xff] }
 0x749   : > { %v10000_v53 = vmul.f32 %v6511_v23, %v11422_v30  ;;  %4963 = vmatmul.mubr.bf16.gmra.mxu1 %v4790_v24  ;;  %6530 = vrcp.f32 %v1482_v7  ;;  %3632 = vadd.xlane.f32.xlu0 %v11423_v16  ;;  %v11425_v24 = vld [vmem:[#allocation92_spill] sm:$0xff]  ;;  %v11426_v7 = vld [vmem:[#allocation93_spill] sm:$0xff] }
 0x74a   : > { %v6513_v45 = vpop.eup %6512  ;;  %6532 = vpow2.f32 %v4656_v10  ;;  %4970 = vmatprep.mubr.bf16.mxu1 %v4793_v56  ;;  %v1455_v21 = vpop.xlane.xlu0 %1454  ;;  %v5466_v52 = vadd.f32 %v11426_v7, %v11425_v24  ;;  %v11427_v30 = vld [vmem:[#allocation76_spill] sm:$0xff] }
 0x74b   : > { %v10005_v36 = vmul.f32 %v6513_v45, %v5460_v40  ;;  %6534 = vrcp.f32 %v1455_v21  ;;  %3665 = vadd.xlane.f32.xlu1 %v11424_v18  ;;  %v4664_v40 = vmul.f32 1.442695, %v4541_v8 }
 0x74c   : > { %v6515_v20 = vpop.eup %6514  ;;  %v1488_v23 = vpop.xlane.xlu1 %1487 }
 0x74d   : > { %v10008_v26 = vpop.eup %6516  ;;  %v10013_v10 = vmul.f32 %v6515_v20, %v11427_v30  ;;  %6536 = vrcp.f32 %v1488_v23  ;;  %3638 = vadd.xlane.f32.xlu0 %v11428_v39  ;;  %v11430_v20 = vld [vmem:[#allocation31_spill] sm:$0xff]  ;;  %v11432_v39 = vld [vmem:[#allocation96_spill] sm:$0xff] }
 0x74e   : > { %v6519_v56 = vpop.eup %6518  ;;  %v1461_v16 = vpop.xlane.xlu0 %1460  ;;  %v4792_v18 = vpack.c.bf16 %v10008_v26, %v9884_v54  ;;  %v4540_v23 = vsub.f32 %v11430_v20, %v9801_v2  ;;  %v11431_v30 = vld [vmem:[#allocation95_spill] sm:$0xff]  ;;  %v11436_v20 = vld [vmem:[#allocation197_spill] sm:$0xff] }
 0x74f   : > { %v10016_v45 = vpop.eup %6520  ;;  %v10018_v21 = vmul.f32 %v6519_v56, %v5466_v52  ;;  %6538 = vrcp.f32 %v1461_v16  ;;  %3671 = vadd.xlane.f32.xlu1 %v11429_v47  ;;  %v5472_v34 = vadd.f32 %v11432_v39, %v11431_v30  ;;  %v11433_v52 = vld [vmem:[#allocation80_spill] sm:$0xff] }
 0x750   : > { %v6523_v24 = vpop.eup %6522  ;;  %6540 = vpow2.f32 %v4654_v3  ;;  %v1494_v7 = vpop.xlane.xlu1 %1493  ;;  %v4795_v8 = vpack.c.bf16 %v10016_v45, %v9907_v33  ;;  %v11434_v16 = vld [vmem:[#allocation204_spill] sm:$0xff]  ;;  %v11435_v3 = vld [vmem:[#allocation221_spill] sm:$0xff]  ;;  %v4662_v39 = vmul.f32 1.442695, %v4540_v23 }
 0x751   : > { %v10030_v56 = vmul.f32 %v6523_v24, %v11433_v52  ;;  %4971 = vmatmul.mubr.bf16.gmra.mxu1 %v4792_v18  ;;  %6542 = vrcp.f32 %v1494_v7  ;;  %3644 = vadd.xlane.f32.xlu0 %v11434_v16  ;;  %v4545_v47 = vsub.f32 %v11435_v3, %v9814_v9  ;;  %v11437_v18 = vld [vmem:[#allocation98_spill] sm:$0xff]  ;;  %v11438_v7 = vld [vmem:[#allocation100_spill] sm:$0xff]  ;;  %v11440_v3 = vld [vmem:[#allocation29_spill] sm:$0xff] }
 0x752   : > { %v6525_v54 = vpop.eup %6524  ;;  %6544 = vpow2.f32 %v4664_v40  ;;  %4978 = vmatprep.mubr.bf16.mxu1 %v4795_v8  ;;  %v1467_v2 = vpop.xlane.xlu0 %1466  ;;  %v5478_v16 = vadd.f32 %v11438_v7, %v11437_v18  ;;  %v11443_v7 = vld [vmem:[#allocation102_spill] sm:$0xff] }
 0x753   : > { %6546 = vrcp.f32 %v1467_v2  ;;  %3677 = vadd.xlane.f32.xlu1 %v11436_v20  ;;  %v10036_v33 = vmul.f32 %v6525_v54, %v5472_v34  ;;  %v4672_v2 = vmul.f32 1.442695, %v4545_v47  ;;  %v11441_v34 = vld [vmem:[#allocation199_spill] sm:$0xff] }
 0x754   : > { %v6527_v30 = vpop.eup %6526  ;;  %v1500_v24 = vpop.xlane.xlu1 %1499 }
 0x755   : > { %v10038_v52 = vpop.eup %6528  ;;  %v10043_v40 = vmul.f32 %v6527_v30, %v11439_v17  ;;  %6548 = vrcp.f32 %v1500_v24  ;;  %3650 = vadd.xlane.f32.xlu0 %v11440_v3  ;;  %v11442_v17 = vld [vmem:[#allocation224_spill] sm:$0xff]  ;;  %v11444_v3 = vld [vmem:[#allocation103_spill] sm:$0xff] }
 0x756   : > { %v6531_v8 = vpop.eup %6530  ;;  %v1473_v62 = vpop.xlane.xlu0 %1472  ;;  %v4794_v23 = vpack.c.bf16 %v10038_v52, %v9903_v25  ;;  %v4544_v30 = vsub.f32 %v11442_v17, %v9814_v9  ;;  %v5484_v41 = vadd.f32 %v11444_v3, %v11443_v7  ;;  %v11446_v25 = vld [vmem:[#allocation198_spill] sm:$0xff]  ;;  %v11447_v9 = vld [vmem:[#allocation33_spill] sm:$0xff] }
 0x757   : > { %v10046_v20 = vpop.eup %6532  ;;  %6550 = vrcp.f32 %v1473_v62  ;;  %4678 = vadd.xlane.f32.xlu1 %v11441_v34  ;;  %v10051_v54 = vmul.f32 %v6531_v8, %v5478_v16  ;;  %v11445_v62 = vld [vmem:[#allocation9_spill] sm:$0xff]  ;;  %v11449_v3 = vld [vmem:[#allocation106_spill] sm:$0xff] }
 0x758   : > { %v6535_v18 = vpop.eup %6534  ;;  %6552 = vpow2.f32 %v4662_v39  ;;  %v1506_v24 = vpop.xlane.xlu1 %1505  ;;  %v4797_v47 = vpack.c.bf16 %v10046_v20, %v9927_v60  ;;  %v4670_v34 = vmul.f32 1.442695, %v4544_v30 }
 0x759   : > { %v10060_v31 = vmul.f32 %v6535_v18, %v11445_v62  ;;  %4979 = vmatmul.mubr.bf16.gmra.mxu1 %v4794_v23  ;;  %6554 = vrcp.f32 %v1506_v24  ;;  %3656 = vadd.xlane.f32.xlu0 %v11446_v25  ;;  %v11448_v18 = vld [vmem:[#allocation105_spill] sm:$0xff]  ;;  %v11450_v24 = vld [vmem:[#allocation88_spill] sm:$0xff] }
 0x75a   : > { %v6537_v16 = vpop.eup %6536  ;;  %6556 = vpow2.f32 %v4672_v2  ;;  %4986 = vmatprep.mubr.bf16.mxu1 %v4797_v47  ;;  %v1479_v39 = vpop.xlane.xlu0 %1478  ;;  %v5490_v23 = vadd.f32 %v11449_v3, %v11448_v18  ;;  %v11451_v2 = vld [vmem:[#allocation205_spill] sm:$0xff] }
 0x75b   : > { %6558 = vrcp.f32 %v1479_v39  ;;  %4684 = vadd.xlane.f32.xlu1 %v11447_v9  ;;  %v10064_v8 = vmul.f32 %v6537_v16, %v5484_v41  ;;  %v11453_v18 = vld [vmem:[#allocation109_spill] sm:$0xff] }
 0x75c   : > { %v6539_v60 = vpop.eup %6538  ;;  %v1512_v17 = vpop.xlane.xlu1 %1511 }
 0x75d   : > { %v10066_v7 = vpop.eup %6540  ;;  %v10071_v62 = vmul.f32 %v6539_v60, %v11450_v24  ;;  %6560 = vrcp.f32 %v1512_v17  ;;  %3662 = vadd.xlane.f32.xlu0 %v11451_v2  ;;  %v11452_v17 = vld [vmem:[#allocation108_spill] sm:$0xff] }
 0x75e   : > { %v6543_v47 = vpop.eup %6542  ;;  %v1485_v25 = vpop.xlane.xlu0 %1484  ;;  %v4796_v41 = vpack.c.bf16 %v10066_v7, %v9921_v12  ;;  %v5496_v3 = vadd.f32 %v11453_v18, %v11452_v17  ;;  %v11454_v24 = vld [vmem:[#allocation8_spill] sm:$0xff]  ;;  %v11456_v17 = vld [vmem:[#allocation110_spill] sm:$0xff] }
 0x75f   : > { %v10074_v39 = vpop.eup %6544  ;;  %6562 = vrcp.f32 %v1485_v25  ;;  %4690 = vadd.xlane.f32.xlu1 %v9592_v61  ;;  %v10079_v30 = vmul.f32 %v6543_v47, %v5490_v23  ;;  %v11455_v61 = vld [vmem:[#allocation206_spill] sm:$0xff] }
 0x760   : > { %v6547_v16 = vpop.eup %6546  ;;  %6564 = vpow2.f32 %v4670_v34  ;;  %v2481_v9 = vpop.xlane.xlu1 %2480  ;;  %v4799_v60 = vpack.c.bf16 %v10074_v39, %v9943_v5  ;;  %v11457_v18 = vld [vmem:[#allocation10_spill] sm:$0xff] }
 0x761   : > { %v10086_v2 = vmul.f32 %v6547_v16, %v11454_v24  ;;  %4987 = vmatmul.mubr.bf16.gmra.mxu1 %v4796_v41  ;;  %6566 = vrcp.f32 %v2481_v9  ;;  %3668 = vadd.xlane.f32.xlu0 %v11455_v61  ;;  %v5502_v16 = vadd.f32 %v11457_v18, %v11456_v17  ;;  %v11458_v24 = vld [vmem:[#allocation94_spill] sm:$0xff]  ;;  %v11460_v9 = vld [vmem:[#allocation207_spill] sm:$0xff]  ;;  %v11463_v18 = vld [vmem:[#allocation120_spill] sm:$0xff] }
 0x762   : > { %v6549_v25 = vpop.eup %6548  ;;  %4994 = vmatprep.mubr.bf16.mxu1 %v4799_v60  ;;  %v1491_v12 = vpop.xlane.xlu0 %1490 }
 0x763   : > { %6568 = vrcp.f32 %v1491_v12  ;;  %4696 = vadd.xlane.f32.xlu1 %v9658_v13  ;;  %v10090_v34 = vmul.f32 %v6549_v25, %v5496_v3 }
 0x764   : > { %v6551_v23 = vpop.eup %6550  ;;  %v2487_v5 = vpop.xlane.xlu1 %2486 }
 0x765   : > { %v10092_v47 = vpop.eup %6552  ;;  %v10097_v41 = vmul.f32 %v6551_v23, %v11458_v24  ;;  %6570 = vrcp.f32 %v2487_v5  ;;  %3674 = vadd.xlane.f32.xlu0 %v11460_v9  ;;  %v11462_v5 = vld [vmem:[#allocation119_spill] sm:$0xff]  ;;  %v11464_v9 = vld [vmem:[#allocation97_spill] sm:$0xff] }
 0x766   : > { %v6555_v60 = vpop.eup %6554  ;;  %v1497_v61 = vpop.xlane.xlu0 %1496  ;;  %v4798_v13 = vpack.c.bf16 %v10092_v47, %v9941_v55  ;;  %v5508_v24 = vadd.f32 %v11463_v18, %v11462_v5  ;;  %v11468_v5 = vld [vmem:[#allocation122_spill] sm:$0xff]  ;;  %v11469_v18 = vld [vmem:[#allocation123_spill] sm:$0xff] }
 0x767   : > { %11459 = vst [vmem:[#allocation79_spill] sm:$0xff] %v10097_v41  ;;  %v10100_v12 = vpop.eup %6556  ;;  %6572 = vrcp.f32 %v1497_v61  ;;  %4702 = vadd.xlane.f32.xlu1 %v9803_v49  ;;  %v10105_v3 = vmul.f32 %v6555_v60, %v5502_v16  ;;  %v11466_v61 = vld [vmem:[#allocation208_spill] sm:$0xff] }
 0x768   : > { %v6559_v25 = vpop.eup %6558  ;;  %v2493_v17 = vpop.xlane.xlu1 %2492  ;;  %v4801_v23 = vpack.c.bf16 %v10100_v12, %v9963_v48 }
 0x769   : > { %11461 = vst [vmem:[#allocation48_spill] sm:$0xff] %v10105_v3  ;;  %v10112_v41 = vmul.f32 %v6559_v25, %v11464_v9  ;;  %4995 = vmatmul.mubr.bf16.gmra.mxu1 %v4798_v13  ;;  %6574 = vrcp.f32 %v2493_v17  ;;  %4675 = vadd.xlane.f32.xlu0 %v11466_v61  ;;  %v5530_v25 = vadd.f32 %v11469_v18, %v11468_v5  ;;  %v11470_v9 = vld [vmem:[#allocation101_spill] sm:$0xff]  ;;  %v11471_v17 = vld [vmem:[#allocation19_spill] sm:$0xff] }
 0x76a   : > { %v6561_v49 = vpop.eup %6560  ;;  %5002 = vmatprep.mubr.bf16.mxu1 %v4801_v23  ;;  %v1503_v55 = vpop.xlane.xlu0 %1502 }
 0x76b   : > { %11465 = vst [vmem:[#allocation99_spill] sm:$0xff] %v10112_v41  ;;  %6576 = vrcp.f32 %v1503_v55  ;;  %4708 = vadd.xlane.f32.xlu1 %v9737_v19  ;;  %v10116_v16 = vmul.f32 %v6561_v49, %v5508_v24  ;;  %v11473_v41 = vld [vmem:[#allocation126_spill] sm:$0xff] }
 0x76c   : > { %v6563_v60 = vpop.eup %6562  ;;  %v2499_v48 = vpop.xlane.xlu1 %2498 }
 0x76d   : > { %11467 = vst [vmem:[#allocation50_spill] sm:$0xff] %v10116_v16  ;;  %v10118_v3 = vpop.eup %6564  ;;  %v10123_v13 = vmul.f32 %v6563_v60, %v11470_v9  ;;  %6578 = vrcp.f32 %v2499_v48  ;;  %4681 = vadd.xlane.f32.xlu0 %v11471_v17  ;;  %v11472_v16 = vld [vmem:[#allocation125_spill] sm:$0xff]  ;;  %v11474_v48 = vld [vmem:[#allocation104_spill] sm:$0xff] }
 0x76e   : > { %v6567_v23 = vpop.eup %6566  ;;  %v1509_v61 = vpop.xlane.xlu0 %1508  ;;  %v4800_v19 = vpack.c.bf16 %v10118_v3, %v9957_v57  ;;  %v5536_v5 = vadd.f32 %v11473_v41, %v11472_v16  ;;  %v11477_v41 = vld [vmem:[#allocation128_spill] sm:$0xff] }
 0x76f   : > { %v2862_v55 = vmul.f32 %v6567_v23, %v5530_v25  ;;  %6580 = vrcp.f32 %v1509_v61  ;;  %4714 = vadd.xlane.f32.xlu1 %v9755_v51  ;;  %v11475_v25 = vld [vmem:[#allocation183_spill] sm:$0xff] }
 0x770   : > { %v6569_v24 = vpop.eup %6568  ;;  %v2505_v49 = vpop.xlane.xlu1 %2504  ;;  %v11476_v61 = vld [vmem:[#allocation127_spill] sm:$0xff] }
 0x771   : > { %v10132_v60 = vadd.f32 %v2862_v55, %v9900_v58  ;;  %v10135_v18 = vmul.f32 %v6569_v24, %v11474_v48  ;;  %5003 = vmatmul.mubr.bf16.gmra.mxu1 %v4800_v19  ;;  %6582 = vrcp.f32 %v2505_v49  ;;  %4687 = vadd.xlane.f32.xlu0 %v11475_v25  ;;  %v5542_v16 = vadd.f32 %v11477_v41, %v11476_v61  ;;  %v11478_v55 = vld [vmem:[#allocation107_spill] sm:$0xff]  ;;  %v11479_v25 = vld [vmem:[#allocation134_spill] sm:$0xff] }
 0x772   : > { %v6571_v9 = vpop.eup %6570  ;;  %v2478_v51 = vpop.xlane.xlu0 %2477 }
 0x773   : > { %v2864_v17 = vmul.f32 %v6571_v9, %v5536_v5  ;;  %6584 = vrcp.f32 %v2478_v51  ;;  %4720 = vadd.xlane.f32.xlu1 %v9771_v35  ;;  %v11480_v9 = vld [vmem:[#allocation135_spill] sm:$0xff] }
 0x774   : > { %v6573_v57 = vpop.eup %6572  ;;  %v2511_v23 = vpop.xlane.xlu1 %2510  ;;  %v5548_v51 = vadd.f32 %v11480_v9, %v11479_v25  ;;  %v11485_v25 = vld [vmem:[#allocation144_spill] sm:$0xff]  ;;  %v11486_v9 = vld [vmem:[#allocation145_spill] sm:$0xff] }
 0x775   : > { %v10142_v58 = vadd.f32 %v2864_v17, %v9905_v43  ;;  %v10145_v24 = vmul.f32 %v6573_v57, %v11478_v55  ;;  %6586 = vrcp.f32 %v2511_v23  ;;  %4693 = vadd.xlane.f32.xlu0 %v9629_v22  ;;  %v11481_v17 = vld [vmem:[#allocation11_spill] sm:$0xff]  ;;  %v11483_v55 = vld [vmem:[#allocation138_spill] sm:$0xff] }
 0x776   : > { %v6575_v19 = vpop.eup %6574  ;;  %v2484_v49 = vpop.xlane.xlu0 %2483 }
 0x777   : > { %v2866_v5 = vmul.f32 %v6575_v19, %v5542_v16  ;;  %6588 = vrcp.f32 %v2484_v49  ;;  %4726 = vadd.xlane.f32.xlu1 %v9787_v15  ;;  %v11482_v16 = vld [vmem:[#allocation137_spill] sm:$0xff] }
 0x778   : > { %v6577_v35 = vpop.eup %6576  ;;  %v2517_v48 = vpop.xlane.xlu1 %2516  ;;  %v5554_v19 = vadd.f32 %v11483_v55, %v11482_v16  ;;  %v11488_v55 = vld [vmem:[#allocation147_spill] sm:$0xff] }
 0x779   : > { %v10152_v43 = vadd.f32 %v2866_v5, %v9916_v4  ;;  %6590 = vrcp.f32 %v2517_v48  ;;  %4699 = vadd.xlane.f32.xlu0 %v9721_v42  ;;  %v10156_v57 = vmul.f32 %v6577_v35, %v11481_v17  ;;  %v11484_v42 = vld [vmem:[#allocation111_spill] sm:$0xff] }
 0x77a   : > { %v6579_v22 = vpop.eup %6578  ;;  %v2490_v23 = vpop.xlane.xlu0 %2489 }
 0x77b   : > { %v2868_v61 = vmul.f32 %v6579_v22, %v5548_v51  ;;  %6592 = vrcp.f32 %v2490_v23  ;;  %4732 = vadd.xlane.f32.xlu1 %v9818_v29  ;;  %v5560_v51 = vadd.f32 %v11486_v9, %v11485_v25  ;;  %v11487_v22 = vld [vmem:[#allocation121_spill] sm:$0xff]  ;;  %v11491_v9 = vld [vmem:[#allocation158_spill] sm:$0xff] }
 0x77c   : > { %v6581_v15 = vpop.eup %6580  ;;  %v2523_v41 = vpop.xlane.xlu1 %2522 }
 0x77d   : > { %v10162_v4 = vadd.f32 %v2868_v61, %v9938_v6  ;;  %6594 = vrcp.f32 %v2523_v41  ;;  %4705 = vadd.xlane.f32.xlu0 %v9832_v37  ;;  %v10166_v49 = vmul.f32 %v6581_v15, %v11484_v42  ;;  %v4743_v37 = vadd.f32 %v10008_v26, %v9986_v63 }
 0x77e   : > { %v6583_v5 = vpop.eup %6582  ;;  %v2496_v35 = vpop.xlane.xlu0 %2495 }
 0x77f   : > { %v2870_v48 = vmul.f32 %v6583_v5, %v5554_v19  ;;  %6596 = vrcp.f32 %v2496_v35  ;;  %4738 = vadd.xlane.f32.xlu1 %v9837_v59 }
 0x780   : > { %v6585_v29 = vpop.eup %6584  ;;  %v2529_v17 = vpop.xlane.xlu1 %2528 }
 0x781   : > { %v10172_v6 = vadd.f32 %v2870_v48, %v9952_v46  ;;  %v2861_v23 = vmul.f32 %v6585_v29, %v11487_v22  ;;  %6598 = vrcp.f32 %v2529_v17  ;;  %4711 = vadd.xlane.f32.xlu0 %v9839_v0  ;;  %v11489_v46 = vld [vmem:[#allocation148_spill] sm:$0xff] }
 0x782   : > { %v6587_v61 = vpop.eup %6586  ;;  %v2502_v15 = vpop.xlane.xlu0 %2501  ;;  %v5566_v19 = vadd.f32 %v11489_v46, %v11488_v55  ;;  %v11490_v0 = vld [vmem:[#allocation124_spill] sm:$0xff] }
 0x783   : > { %v10179_v59 = vadd.f32 %v2861_v23, %v9975_v11  ;;  %v2872_v41 = vmul.f32 %v6587_v61, %v5560_v51  ;;  %6600 = vrcp.f32 %v2502_v15  ;;  %4744 = vadd.xlane.f32.xlu1 %v4743_v37  ;;  %v4749_v11 = vadd.f32 %v10038_v52, %v10016_v45 }
 0x784   : > { %v6589_v16 = vpop.eup %6588  ;;  %v2535_v42 = vpop.xlane.xlu1 %2534 }
 0x785   : > { %v10184_v5 = vadd.f32 %v2872_v41, %v9978_v14  ;;  %v2863_v35 = vmul.f32 %v6589_v16, %v11490_v0  ;;  %6602 = vrcp.f32 %v2535_v42  ;;  %4717 = vadd.xlane.f32.xlu0 %v9847_v1  ;;  %v11492_v14 = vld [vmem:[#allocation159_spill] sm:$0xff]  ;;  %v11493_v1 = vld [vmem:[#allocation18_spill] sm:$0xff]  ;;  %v11494_v41 = vld [vmem:[#allocation168_spill] sm:$0xff] }
 0x786   : > { %v6591_v63 = vpop.eup %6590  ;;  %v2508_v26 = vpop.xlane.xlu0 %2507  ;;  %v5572_v51 = vadd.f32 %v11492_v14, %v11491_v9 }
 0x787   : > { %v10191_v48 = vadd.f32 %v2863_v35, %v9983_v32  ;;  %v2874_v29 = vmul.f32 %v6591_v63, %v5566_v19  ;;  %6604 = vrcp.f32 %v2508_v26  ;;  %4750 = vadd.xlane.f32.xlu1 %v4749_v11  ;;  %v4755_v32 = vadd.f32 %v10066_v7, %v10046_v20  ;;  %v11497_v11 = vld [vmem:[#allocation173_spill] sm:$0xff]  ;;  %v10219_v26 = vpop.f32.mrf.mxu1 }
 0x788   : > { %v6593_v25 = vpop.eup %6592  ;;  %v2541_v17 = vpop.xlane.xlu1 %2540 }
 0x789   : > { %v10196_v22 = vadd.f32 %v2874_v29, %v9988_v27  ;;  %v2865_v23 = vmul.f32 %v6593_v25, %v11493_v1  ;;  %6606 = vrcp.f32 %v2541_v17  ;;  %4723 = vadd.xlane.f32.xlu0 %v9851_v44  ;;  %v11495_v27 = vld [vmem:[#allocation171_spill] sm:$0xff]  ;;  %v11496_v44 = vld [vmem:[#allocation129_spill] sm:$0xff]  ;;  %v11499_v25 = vld [vmem:[#allocation136_spill] sm:$0xff]  ;;  %v10231_v1 = vpop.f32.mrf.mxu1 }
 0x78a   : > { %v6595_v45 = vpop.eup %6594  ;;  %v2514_v52 = vpop.xlane.xlu0 %2513  ;;  %v5578_v16 = vadd.f32 %v11495_v27, %v11494_v41 }
 0x78b   : > { %v10203_v37 = vadd.f32 %v2865_v23, %v10000_v53  ;;  %v2876_v61 = vmul.f32 %v6595_v45, %v5572_v51  ;;  %6608 = vrcp.f32 %v2514_v52  ;;  %4756 = vadd.xlane.f32.xlu1 %v4755_v32  ;;  %v4761_v53 = vadd.f32 %v10092_v47, %v10074_v39  ;;  %v11500_v23 = vld [vmem:[#allocation187_spill] sm:$0xff]  ;;  %v11501_v32 = vld [vmem:[#allocation190_spill] sm:$0xff] }
 0x78c   : > { %v6597_v15 = vpop.eup %6596  ;;  %v2547_v55 = vpop.xlane.xlu1 %2546  ;;  %v5590_v45 = vadd.f32 %v11501_v32, %v11500_v23  ;;  %v11502_v52 = vld [vmem:[#allocation139_spill] sm:$0xff] }
 0x78d   : > { %v10208_v46 = vadd.f32 %v2876_v61, %v10005_v36  ;;  %v2867_v19 = vmul.f32 %v6597_v15, %v11496_v44  ;;  %6610 = vrcp.f32 %v2547_v55  ;;  %4729 = vadd.xlane.f32.xlu0 %v9865_v38  ;;  %v11498_v36 = vld [vmem:[#allocation174_spill] sm:$0xff] }
 0x78e   : > { %v6599_v20 = vpop.eup %6598  ;;  %v2520_v7 = vpop.xlane.xlu0 %2519  ;;  %v5584_v63 = vadd.f32 %v11498_v36, %v11497_v11  ;;  %v11504_v55 = vld [vmem:[#allocation194_spill] sm:$0xff] }
 0x78f   : > { %v10215_v42 = vadd.f32 %v2867_v19, %v10013_v10  ;;  %v2878_v0 = vmul.f32 %v6599_v20, %v5578_v16  ;;  %6612 = vrcp.f32 %v2520_v7  ;;  %4762 = vadd.xlane.f32.xlu1 %v4761_v53  ;;  %v4767_v10 = vadd.f32 %v10118_v3, %v10100_v12  ;;  %v11503_v16 = vld [vmem:[#allocation193_spill] sm:$0xff]  ;;  %v11505_v20 = vld [vmem:[#allocation146_spill] sm:$0xff] }
 0x790   : > { %v6601_v35 = vpop.eup %6600  ;;  %v2553_v29 = vpop.xlane.xlu1 %2552  ;;  %v5596_v44 = vadd.f32 %v11504_v55, %v11503_v16 }
 0x791   : > { %v10222_v38 = vadd.f32 %v2878_v0, %v10018_v21  ;;  %v2869_v39 = vmul.f32 %v6601_v35, %v11499_v25  ;;  %6614 = vrcp.f32 %v2553_v29  ;;  %4735 = vadd.xlane.f32.xlu0 %v9877_v50  ;;  %v11507_v25 = vld [vmem:[#allocation24_spill] sm:$0xff] }
 0x792   : > { %v6603_v47 = vpop.eup %6602  ;;  %v2526_v9 = vpop.xlane.xlu0 %2525 }
 0x793   : > { %v10229_v14 = vadd.f32 %v2869_v39, %v10030_v56  ;;  %6616 = vrcp.f32 %v2526_v9  ;;  %4768 = vadd.xlane.f32.xlu1 %v4767_v10  ;;  %v2880_v51 = vmul.f32 %v6603_v47, %v5584_v63  ;;  %v11508_v39 = vld [vmem:[#allocation162_spill] sm:$0xff]  ;;  %v11509_v47 = vld [vmem:[#allocation149_spill] sm:$0xff] }
 0x794   : > { %v6605_v17 = vpop.eup %6604  ;;  %v2559_v21 = vpop.xlane.xlu1 %2558  ;;  %v5602_v10 = vadd.f32 %v11508_v39, %v11507_v25 }
 0x795   : > { %v2871_v50 = vmul.f32 %v6605_v17, %v11502_v52  ;;  %6618 = vrcp.f32 %v2559_v21  ;;  %4741 = vadd.xlane.f32.xlu0 %v9898_v28  ;;  %v10238_v12 = vadd.f32 %v2880_v51, %v10036_v33  ;;  %v11506_v33 = vld [vmem:[#allocation196_spill] sm:$0xff]  ;;  %v11511_v52 = vld [vmem:[#allocation23_spill] sm:$0xff] }
 0x796   : > { %v6607_v56 = vpop.eup %6606  ;;  %v2532_v3 = vpop.xlane.xlu0 %2531  ;;  %v11510_v51 = vld [vmem:[#allocation44_spill] sm:$0xff] }
 0x797   : > { %v5749_v61 = vpop.f32.mrf.mxu1  ;;  %v10241_v15 = vadd.f32 %v2871_v50, %v10043_v40  ;;  %6620 = vrcp.f32 %v2532_v3  ;;  %v2882_v41 = vmul.f32 %v6607_v56, %v5590_v45  ;;  %v11512_v50 = vld [vmem:[#allocation164_spill] sm:$0xff] }
 0x798   : > { %v6609_v27 = vpop.eup %6608  ;;  %v2565_v53 = vpop.xlane.xlu1 %2564  ;;  %v5608_v56 = vadd.f32 %v11512_v50, %v11511_v52  ;;  %v11513_v3 = vld [vmem:[#allocation160_spill] sm:$0xff] }
 0x799   : > { %v5750_v19 = vpop.f32.mrf.mxu1  ;;  %v2873_v7 = vmul.f32 %v6609_v27, %v11505_v20  ;;  %6622 = vrcp.f32 %v2565_v53  ;;  %4747 = vadd.xlane.f32.xlu0 %v11506_v33  ;;  %v10250_v0 = vadd.f32 %v2882_v41, %v10051_v54  ;;  %v11514_v41 = vld [vmem:[#allocation55_spill] sm:$0xff] }
 0x79a   : > { %v10246_v28 = vadd.f32 %v5750_v19, %v5749_v61  ;;  %v6611_v40 = vpop.eup %6610  ;;  %v2538_v35 = vpop.xlane.xlu0 %2537  ;;  %v11515_v20 = vld [vmem:[#allocation167_spill] sm:$0xff] }
 0x79b   : > { %v10253_v11 = vadd.f32 %v2873_v7, %v10060_v31  ;;  %6624 = vrcp.f32 %v2538_v35  ;;  %v2884_v36 = vmul.f32 %v6611_v40, %v5596_v44  ;;  %v10275_v55 = vpop.f32.mrf.mxu1  ;;  %v11516_v7 = vld [vmem:[#allocation26_spill] sm:$0xff]  ;;  %v11517_v40 = vld [vmem:[#allocation172_spill] sm:$0xff] }
 0x79c   : > { %v6613_v63 = vpop.eup %6612  ;;  %v2571_v29 = vpop.xlane.xlu1 %2570  ;;  %v5614_v33 = vadd.f32 %v11516_v7, %v11515_v20  ;;  %v11527_v20 = vld [vmem:[#allocation192_spill] sm:$0xff] }
 0x79d   : > { %v2875_v9 = vmul.f32 %v6613_v63, %v11509_v47  ;;  %6626 = vrcp.f32 %v2571_v29  ;;  %4753 = vadd.xlane.f32.xlu0 %v11510_v51  ;;  %v10260_v54 = vadd.f32 %v2884_v36, %v10064_v8  ;;  %v11518_v36 = vld [vmem:[#allocation46_spill] sm:$0xff]  ;;  %v11519_v29 = vld [vmem:[#allocation79_spill] sm:$0xff]  ;;  %v10287_v39 = vpop.f32.mrf.mxu1  ;;  %v11520_v51 = vld [vmem:[#allocation216_spill] sm:$0xff] }
 0x79e   : > { %v6615_v17 = vpop.eup %6614  ;;  %v2544_v21 = vpop.xlane.xlu0 %2543 }
 0x79f   : > { %v10263_v31 = vadd.f32 %v2875_v9, %v10071_v62  ;;  %6628 = vrcp.f32 %v2544_v21  ;;  %v2886_v23 = vmul.f32 %v6615_v17, %v5602_v10  ;;  %v11521_v17 = vld [vmem:[#allocation25_spill] sm:$0xff] }
 0x7a0   : > { %v6617_v32 = vpop.eup %6616  ;;  %v3588_v45 = vpop.xlane.xlu1 %3587  ;;  %v5620_v21 = vadd.f32 %v11521_v17, %v11520_v51  ;;  %v11530_v51 = vld [vmem:[#allocation225_spill] sm:$0xff] }
 0x7a1   : > { %v2877_v61 = vmul.f32 %v6617_v32, %v11513_v3  ;;  %6630 = vrcp.f32 %v3588_v45  ;;  %4759 = vadd.xlane.f32.xlu0 %v11514_v41  ;;  %v10270_v8 = vadd.f32 %v2886_v23, %v10079_v30  ;;  %v11522_v23 = vld [vmem:[#allocation175_spill] sm:$0xff]  ;;  %v11523_v45 = vld [vmem:[#allocation48_spill] sm:$0xff] }
 0x7a2   : > { %v6619_v27 = vpop.eup %6618  ;;  %v2550_v16 = vpop.xlane.xlu0 %2549 }
 0x7a3   : > { %v10273_v62 = vadd.f32 %v2877_v61, %v10086_v2  ;;  %6632 = vrcp.f32 %v2550_v16  ;;  %v2888_v44 = vmul.f32 %v6619_v27, %v5608_v56  ;;  %v11524_v56 = vld [vmem:[#allocation99_spill] sm:$0xff]  ;;  %v10298_v61 = vpop.f32.mrf.mxu1 }
 0x7a4   : > { %v6621_v19 = vpop.eup %6620  ;;  %v3594_v53 = vpop.xlane.xlu1 %3593 }
 0x7a5   : > { %v2879_v35 = vmul.f32 %v6621_v19, %v11517_v40  ;;  %6634 = vrcp.f32 %v3594_v53  ;;  %4765 = vadd.xlane.f32.xlu0 %v11518_v36  ;;  %v10282_v30 = vadd.f32 %v2888_v44, %v10090_v34  ;;  %v11525_v44 = vld [vmem:[#allocation218_spill] sm:$0xff]  ;;  %v11526_v19 = vld [vmem:[#allocation220_spill] sm:$0xff] }
 0x7a6   : > { %v6623_v63 = vpop.eup %6622  ;;  %v2556_v2 = vpop.xlane.xlu0 %2555  ;;  %v5642_v53 = vadd.f32 %v11526_v19, %v11525_v44  ;;  %v11533_v44 = vld [vmem:[#allocation64_spill] sm:$0xff] }
 0x7a7   : > { %v10285_v25 = vadd.f32 %v2879_v35, %v11519_v29  ;;  %6636 = vrcp.f32 %v2556_v2  ;;  %v2890_v10 = vmul.f32 %v6623_v63, %v5614_v33  ;;  %v11528_v33 = vld [vmem:[#allocation50_spill] sm:$0xff]  ;;  %v10309_v2 = vpop.f32.mrf.mxu1 }
 0x7a8   : > { %v6625_v47 = vpop.eup %6624  ;;  %v3600_v9 = vpop.xlane.xlu1 %3599 }
 0x7a9   : > { %v2881_v32 = vmul.f32 %v6625_v47, %v11522_v23  ;;  %6638 = vrcp.f32 %v3600_v9  ;;  %v10293_v34 = vadd.f32 %v2890_v10, %v11523_v45  ;;  %v11529_v9 = vld [vmem:[#allocation223_spill] sm:$0xff]  ;;  %v11531_v23 = vld [vmem:[#allocation170_spill] sm:$0xff] }
 0x7aa   : > { %v6627_v52 = vpop.eup %6626  ;;  %v2562_v50 = vpop.xlane.xlu0 %2561  ;;  %v5648_v17 = vadd.f32 %v11530_v51, %v11529_v9  ;;  %v11536_v9 = vld [vmem:[#allocation70_spill] sm:$0xff] }
 0x7ab   : > { %v10296_v3 = vadd.f32 %v2881_v32, %v11524_v56  ;;  %6640 = vrcp.f32 %v2562_v50  ;;  %v2892_v41 = vmul.f32 %v6627_v52, %v5620_v21  ;;  %v10320_v50 = vpop.f32.mrf.mxu1 }
 0x7ac   : > { %v6629_v27 = vpop.eup %6628  ;;  %v3606_v16 = vpop.xlane.xlu1 %3605 }
 0x7ad   : > { %v2883_v7 = vmul.f32 %v6629_v27, %v11527_v20  ;;  %6642 = vrcp.f32 %v3606_v16  ;;  %v10304_v40 = vadd.f32 %v2892_v41, %v11528_v33  ;;  %v11532_v16 = vld [vmem:[#allocation226_spill] sm:$0xff] }
 0x7ae   : > { %v6631_v35 = vpop.eup %6630  ;;  %v2568_v36 = vpop.xlane.xlu0 %2567  ;;  %v5654_v19 = vadd.f32 %v11533_v44, %v11532_v16 }
 0x7af   : > { %v10307_v63 = vadd.f32 %v2883_v7, %v10123_v13  ;;  %v3953_v29 = vmul.f32 %v6631_v35, %v5642_v53  ;;  %6644 = vrcp.f32 %v2568_v36  ;;  %v11534_v53 = vld [vmem:[#allocation161_spill] sm:$0xff]  ;;  %v10328_v35 = vpop.f32.mrf.mxu1 }
 0x7b0   : > { %v6633_v10 = vpop.eup %6632  ;;  %v3612_v47 = vpop.xlane.xlu1 %3611 }
 0x7b1   : > { %v10314_v21 = vadd.f32 %v3953_v29, %v10132_v60  ;;  %v2885_v32 = vmul.f32 %v6633_v10, %v11531_v23  ;;  %6646 = vrcp.f32 %v3612_v47  ;;  %v11535_v47 = vld [vmem:[#allocation68_spill] sm:$0xff] }
 0x7b2   : > { %v6635_v45 = vpop.eup %6634  ;;  %v3585_v52 = vpop.xlane.xlu0 %3584  ;;  %v5660_v51 = vadd.f32 %v11536_v9, %v11535_v47 }
 0x7b3   : > { %v10318_v13 = vadd.f32 %v2885_v32, %v10135_v18  ;;  %v3955_v56 = vmul.f32 %v6635_v45, %v5648_v17  ;;  %6648 = vrcp.f32 %v3585_v52  ;;  %v11537_v17 = vld [vmem:[#allocation163_spill] sm:$0xff]  ;;  %v10339_v52 = vpop.f32.mrf.mxu1 }
 0x7b4   : > { %v6637_v41 = vpop.eup %6636  ;;  %v3618_v27 = vpop.xlane.xlu1 %3617 }
 0x7b5   : > { %v10325_v60 = vadd.f32 %v3955_v56, %v10142_v58  ;;  %v2887_v20 = vmul.f32 %v6637_v41, %v11534_v53  ;;  %6650 = vrcp.f32 %v3618_v27 }
 0x7b6   : > { %v6639_v7 = vpop.eup %6638  ;;  %v3591_v33 = vpop.xlane.xlu0 %3590 }
 0x7b7   : > { %v10331_v18 = vadd.f32 %v2887_v20, %v10145_v24  ;;  %v3957_v36 = vmul.f32 %v6639_v7, %v5654_v19  ;;  %6652 = vrcp.f32 %v3591_v33  ;;  %v10348_v20 = vpop.f32.mrf.mxu1  ;;  %v11539_v7 = vld [vmem:[#allocation63_spill] sm:$0xff] }
 0x7b8   : > { %v6641_v29 = vpop.eup %6640  ;;  %v3624_v10 = vpop.xlane.xlu1 %3623 }
 0x7b9   : > { %v10336_v58 = vadd.f32 %v3957_v36, %v10152_v43  ;;  %6654 = vrcp.f32 %v3624_v10  ;;  %v2889_v23 = vmul.f32 %v6641_v29, %v11537_v17  ;;  %v11538_v43 = vld [vmem:[#allocation28_spill] sm:$0xff]  ;;  %v10358_v17 = vpop.f32.mrf.mxu1 }
 0x7ba   : > { %v6643_v32 = vpop.eup %6642  ;;  %v3597_v45 = vpop.xlane.xlu0 %3596 }
 0x7bb   : > { %v3959_v56 = vmul.f32 %v6643_v32, %v5660_v51  ;;  %6656 = vrcp.f32 %v3597_v45  ;;  %v10342_v24 = vadd.f32 %v2889_v23, %v10156_v57  ;;  %v11541_v32 = vld [vmem:[#allocation65_spill] sm:$0xff] }
 0x7bc   : > { %v6645_v41 = vpop.eup %6644  ;;  %v3630_v27 = vpop.xlane.xlu1 %3629 }
 0x7bd   : > { %v10345_v16 = vadd.f32 %v3959_v56, %v10162_v4  ;;  %6658 = vrcp.f32 %v3630_v27  ;;  %v2891_v44 = vmul.f32 %v6645_v41, %v11538_v43  ;;  %v11540_v4 = vld [vmem:[#allocation217_spill] sm:$0xff] }
 0x7be   : > { %v6647_v19 = vpop.eup %6646  ;;  %v3603_v53 = vpop.xlane.xlu0 %3602 }
 0x7bf   : > { %v3961_v33 = vmul.f32 %v6647_v19, %v11539_v7  ;;  %6660 = vrcp.f32 %v3603_v53  ;;  %v10352_v36 = vadd.f32 %v2891_v44, %v10166_v49  ;;  %v10368_v19 = vpop.f32.mrf.mxu1 }
 0x7c0   : > { %v6649_v57 = vpop.eup %6648  ;;  %v3636_v29 = vpop.xlane.xlu1 %3635 }
 0x7c1   : > { %v10355_v10 = vadd.f32 %v3961_v33, %v10172_v6  ;;  %v3952_v47 = vmul.f32 %v6649_v57, %v11540_v4  ;;  %6662 = vrcp.f32 %v3636_v29  ;;  %v11542_v6 = vld [vmem:[#allocation222_spill] sm:$0xff] }
 0x7c2   : > { %v6651_v9 = vpop.eup %6650  ;;  %v3609_v51 = vpop.xlane.xlu0 %3608 }
 0x7c3   : > { %v10361_v23 = vadd.f32 %v3952_v47, %v10179_v59  ;;  %v3963_v45 = vmul.f32 %v6651_v9, %v11541_v32  ;;  %6664 = vrcp.f32 %v3609_v51  ;;  %v11543_v59 = vld [vmem:[#allocation67_spill] sm:$0xff]  ;;  %v10378_v51 = vpop.f32.mrf.mxu1 }
 0x7c4   : > { %v6653_v49 = vpop.eup %6652  ;;  %v3642_v56 = vpop.xlane.xlu1 %3641 }
 0x7c5   : > { %v10365_v41 = vadd.f32 %v3963_v45, %v10184_v5  ;;  %v3954_v27 = vmul.f32 %v6653_v49, %v11542_v6  ;;  %6666 = vrcp.f32 %v3642_v56  ;;  %v11544_v5 = vld [vmem:[#allocation179_spill] sm:$0xff] }
 0x7c6   : > { %v6655_v43 = vpop.eup %6654  ;;  %v3615_v44 = vpop.xlane.xlu0 %3614 }
 0x7c7   : > { %v10371_v53 = vadd.f32 %v3954_v27, %v10191_v48  ;;  %v3965_v7 = vmul.f32 %v6655_v43, %v11543_v59  ;;  %6668 = vrcp.f32 %v3615_v44  ;;  %v11545_v48 = vld [vmem:[#allocation69_spill] sm:$0xff]  ;;  %v10388_v59 = vpop.f32.mrf.mxu1 }
 0x7c8   : > { %v6657_v33 = vpop.eup %6656  ;;  %v3648_v57 = vpop.xlane.xlu1 %3647 }
 0x7c9   : > { %v10375_v29 = vadd.f32 %v3965_v7, %v10196_v22  ;;  %v3956_v4 = vmul.f32 %v6657_v33, %v11544_v5  ;;  %6670 = vrcp.f32 %v3648_v57  ;;  %v11546_v22 = vld [vmem:[#allocation66_spill] sm:$0xff] }
 0x7ca   : > { %v6659_v47 = vpop.eup %6658  ;;  %v3621_v9 = vpop.xlane.xlu0 %3620 }
 0x7cb   : > { %v10381_v32 = vadd.f32 %v3956_v4, %v10203_v37  ;;  %v3967_v45 = vmul.f32 %v6659_v47, %v11545_v48  ;;  %6672 = vrcp.f32 %v3621_v9  ;;  %v11547_v37 = vld [vmem:[#allocation71_spill] sm:$0xff] }
 0x7cc   : > { %v6661_v49 = vpop.eup %6660  ;;  %v3654_v56 = vpop.xlane.xlu1 %3653 }
 0x7cd   : > { %v10385_v6 = vadd.f32 %v3967_v45, %v10208_v46  ;;  %v3958_v27 = vmul.f32 %v6661_v49, %v11546_v22  ;;  %6674 = vrcp.f32 %v3654_v56  ;;  %v11548_v46 = vld [vmem:[#allocation72_spill] sm:$0xff]  ;;  %v10398_v45 = vpop.f32.mrf.mxu1 }
 0x7ce   : > { %v6663_v43 = vpop.eup %6662  ;;  %v3627_v44 = vpop.xlane.xlu0 %3626 }
 0x7cf   : > { %v10391_v7 = vadd.f32 %v3958_v27, %v10215_v42  ;;  %v3969_v33 = vmul.f32 %v6663_v43, %v11547_v37  ;;  %6676 = vrcp.f32 %v3627_v44  ;;  %v11550_v42 = vld [vmem:[#allocation73_spill] sm:$0xff]  ;;  %v11551_v43 = vld [vmem:[#allocation74_spill] sm:$0xff] }
 0x7d0   : > { %v6665_v57 = vpop.eup %6664  ;;  %v3660_v5 = vpop.xlane.xlu1 %3659 }
 0x7d1   : > { %v10395_v4 = vadd.f32 %v3969_v33, %v10222_v38  ;;  %v3960_v47 = vmul.f32 %v6665_v57, %v11548_v46  ;;  %6678 = vrcp.f32 %v3660_v5  ;;  %v10408_v57 = vpop.f32.mrf.mxu1 }
 0x7d2   : > { %v6667_v9 = vpop.eup %6666  ;;  %v3633_v48 = vpop.xlane.xlu0 %3632 }
 0x7d3   : > { %v10401_v49 = vadd.f32 %v3960_v47, %v10229_v14  ;;  %6680 = vrcp.f32 %v3633_v48  ;;  %v3971_v56 = vmul.f32 %v6667_v9, %v11550_v42  ;;  %v11552_v14 = vld [vmem:[#allocation35_spill] sm:$0xff]  ;;  %v11553_v48 = vld [vmem:[#allocation36_spill] sm:$0xff] }
 0x7d4   : > { %v6669_v22 = vpop.eup %6668  ;;  %v3666_v27 = vpop.xlane.xlu1 %3665 }
 0x7d5   : > { %11549 = vst [vmem:[#allocation112_spill] sm:$0xff] %v10401_v49  ;;  %v3962_v44 = vmul.f32 %v6669_v22, %v11551_v43  ;;  %6682 = vrcp.f32 %v3666_v27  ;;  %v10406_v38 = vadd.f32 %v3971_v56, %v10238_v12  ;;  %v11556_v43 = vld [vmem:[#allocation37_spill] sm:$0xff] }
 0x7d6   : > { %v6671_v37 = vpop.eup %6670  ;;  %v3639_v33 = vpop.xlane.xlu0 %3638 }
 0x7d7   : > { %v10411_v5 = vadd.f32 %v3962_v44, %v10241_v15  ;;  %6684 = vrcp.f32 %v3639_v33  ;;  %v3973_v46 = vmul.f32 %v6671_v37, %v11552_v14  ;;  %v11557_v14 = vld [vmem:[#allocation38_spill] sm:$0xff] }
 0x7d8   : > { %v6673_v47 = vpop.eup %6672  ;;  %v3672_v9 = vpop.xlane.xlu1 %3671 }
 0x7d9   : > { %v3964_v42 = vmul.f32 %v6673_v47, %v11553_v48  ;;  %v10415_v49 = vpop.f32.mrf.mxu1  ;;  %6686 = vrcp.f32 %v3672_v9  ;;  %v10418_v12 = vadd.f32 %v3973_v46, %v10250_v0 }
 0x7da   : > { %v6675_v56 = vpop.eup %6674  ;;  %v3645_v22 = vpop.xlane.xlu0 %3644 }
 0x7db   : > { %11554 = vst [vmem:[#allocation52_spill] sm:$0xff] %v10418_v12  ;;  %v10421_v27 = vadd.f32 %v3964_v42, %v10253_v11  ;;  %6688 = vrcp.f32 %v3645_v22  ;;  %v10423_v15 = vpop.f32.mrf.mxu1  ;;  %v3975_v44 = vmul.f32 %v6675_v56, %v11556_v43  ;;  %v11560_v22 = vld [vmem:[#allocation39_spill] sm:$0xff]  ;;  %v11561_v12 = vld [vmem:[#allocation40_spill] sm:$0xff] }
 0x7dc   : > { %v6677_v37 = vpop.eup %6676  ;;  %v3678_v33 = vpop.xlane.xlu1 %3677 }
 0x7dd   : > { %11555 = vst [vmem:[#allocation115_spill] sm:$0xff] %v10421_v27  ;;  %v3966_v47 = vmul.f32 %v6677_v37, %v11557_v14  ;;  %v10427_v48 = vpop.f32.mrf.mxu1  ;;  %6690 = vrcp.f32 %v3678_v33  ;;  %v10430_v0 = vadd.f32 %v3975_v44, %v10260_v54 }
 0x7de   : > { %v6679_v46 = vpop.eup %6678  ;;  %v3651_v9 = vpop.xlane.xlu0 %3650 }
 0x7df   : > { %11558 = vst [vmem:[#allocation54_spill] sm:$0xff] %v10430_v0  ;;  %v10433_v11 = vadd.f32 %v3966_v47, %v10263_v31  ;;  %6692 = vrcp.f32 %v3651_v9  ;;  %v10435_v42 = vpop.f32.mrf.mxu1  ;;  %v3977_v56 = vmul.f32 %v6679_v46, %v11560_v22  ;;  %v11564_v9 = vld [vmem:[#allocation41_spill] sm:$0xff]  ;;  %v11565_v0 = vld [vmem:[#allocation6_spill] sm:$0xff] }
 0x7e0   : > { %v6681_v43 = vpop.eup %6680  ;;  %v4679_v27 = vpop.xlane.xlu1 %4678 }
 0x7e1   : > { %11559 = vst [vmem:[#allocation114_spill] sm:$0xff] %v10433_v11  ;;  %v3968_v37 = vmul.f32 %v6681_v43, %v11561_v12  ;;  %v10439_v14 = vpop.f32.mrf.mxu1  ;;  %6694 = vrcp.f32 %v4679_v27  ;;  %v10442_v54 = vadd.f32 %v3977_v56, %v10270_v8 }
 0x7e2   : > { %v6683_v44 = vpop.eup %6682  ;;  %v3657_v33 = vpop.xlane.xlu0 %3656 }
 0x7e3   : > { %11562 = vst [vmem:[#allocation56_spill] sm:$0xff] %v10442_v54  ;;  %v10445_v31 = vadd.f32 %v3968_v37, %v10273_v62  ;;  %6696 = vrcp.f32 %v3657_v33  ;;  %v10447_v47 = vpop.f32.mrf.mxu1  ;;  %v3979_v46 = vmul.f32 %v6683_v44, %v11564_v9  ;;  %v11567_v33 = vld [vmem:[#allocation42_spill] sm:$0xff] }
 0x7e4   : > { %v6685_v22 = vpop.eup %6684  ;;  %v4685_v11 = vpop.xlane.xlu1 %4684 }
 0x7e5   : > { %11563 = vst [vmem:[#allocation14_spill] sm:$0xff] %v10445_v31  ;;  %v3970_v12 = vmul.f32 %v6685_v22, %v11565_v0  ;;  %v10451_v43 = vpop.f32.mrf.mxu1  ;;  %6698 = vrcp.f32 %v4685_v11  ;;  %v10454_v8 = vadd.f32 %v3979_v46, %v10282_v30  ;;  %v5732_v0 = vadd.f32 %v10231_v1, %v10219_v26  ;;  %v11568_v22 = vld [vmem:[#allocation43_spill] sm:$0xff]  ;;  %v11569_v1 = vld [vmem:[#allocation45_spill] sm:$0xff] }
 0x7e6   : > { %v6687_v27 = vpop.eup %6686  ;;  %v3663_v56 = vpop.xlane.xlu0 %3662  ;;  %v5754_v26 = vadd.f32 %v10287_v39, %v10275_v55  ;;  %v10491_v55 = vld [vmem:[%s10720_s3] ss:$0 sm:$0xff] }
 0x7e7   : > { %11566 = vst [vmem:[#allocation89_spill] sm:$0xff] %v10454_v8  ;;  %v10457_v62 = vadd.f32 %v3970_v12, %v10285_v25  ;;  %6700 = vrcp.f32 %v3663_v56  ;;  %v10459_v37 = vpop.f32.mrf.mxu1  ;;  %v3981_v44 = vmul.f32 %v6687_v27, %v11567_v33 }
 0x7e8   : > { %v6689_v9 = vpop.eup %6688  ;;  %v4691_v54 = vpop.xlane.xlu1 %4690 }
 0x7e9   : > { %v3972_v11 = vmul.f32 %v6689_v9, %v11568_v22  ;;  %v10465_v31 = vpop.f32.mrf.mxu1  ;;  %6702 = vrcp.f32 %v4691_v54  ;;  %v10468_v30 = vadd.f32 %v3981_v44, %v10293_v34 }
 0x7ea   : > { %v6691_v25 = vpop.eup %6690  ;;  %v3669_v46 = vpop.xlane.xlu0 %3668 }
 0x7eb   : > { %v10471_v12 = vadd.f32 %v3972_v11, %v10296_v3  ;;  %6704 = vrcp.f32 %v3669_v46  ;;  %v10473_v27 = vpop.f32.mrf.mxu1  ;;  %v3983_v56 = vmul.f32 %v6691_v25, %v5732_v0  ;;  %v11570_v46 = vld [vmem:[#allocation47_spill] sm:$0xff] }
 0x7ec   : > { %v6693_v33 = vpop.eup %6692  ;;  %v4697_v8 = vpop.xlane.xlu1 %4696 }
 0x7ed   : > { %v3974_v9 = vmul.f32 %v6693_v33, %v11569_v1  ;;  %v10478_v54 = vpop.f32.mrf.mxu1  ;;  %6706 = vrcp.f32 %v4697_v8  ;;  %v10481_v34 = vadd.f32 %v3983_v56, %v10304_v40  ;;  %v5760_v40 = vadd.f32 %v10328_v35, %v10320_v50 }
 0x7ee   : > { %v6695_v3 = vpop.eup %6694  ;;  %v3675_v44 = vpop.xlane.xlu0 %3674 }
 0x7ef   : > { %v10484_v22 = vadd.f32 %v3974_v9, %v10307_v63  ;;  %v5044_v0 = vmul.f32 %v6695_v3, %v5754_v26  ;;  %6708 = vrcp.f32 %v3675_v44  ;;  %v10486_v11 = vpop.f32.mrf.mxu1  ;;  %v5766_v44 = vadd.f32 %v10368_v19, %v10358_v17 }
 0x7f0   : > { %v6697_v25 = vpop.eup %6696  ;;  %v4703_v39 = vpop.xlane.xlu1 %4702 }
 0x7f1   : > { %v5076_v8 = vadd.f32 %v5044_v0, %v10314_v21  ;;  %v3976_v56 = vmul.f32 %v6697_v25, %v11570_v46  ;;  %v10497_v63 = vpop.f32.mrf.mxu1  ;;  %6710 = vrcp.f32 %v4703_v39  ;;  %v11571_v25 = vld [vmem:[#allocation49_spill] sm:$0xff] }
 0x7f2   : > { %v6699_v33 = vpop.eup %6698  ;;  %v4676_v26 = vpop.xlane.xlu0 %4675 }
 0x7f3   : > { %v5115_v1 = vadd.f32 %v10491_v55, %v5076_v8  ;;  %v10508_v50 = vadd.f32 %v3976_v56, %v10318_v13  ;;  %v5046_v21 = vmul.f32 %v6699_v33, %v5760_v40  ;;  %6712 = vrcp.f32 %v4676_v26  ;;  %v10510_v35 = vpop.f32.mrf.mxu1 }
 0x7f4   : > { %v6701_v9 = vpop.eup %6700  ;;  %v4709_v3 = vpop.xlane.xlu1 %4708 }
 0x7f5   : > { %5147 = vst.msk [vmem:[%s10504_s24 + $0x8] sm:$0xff] %vm373_vm0, %v5115_v1  ;;  %v5078_v0 = vadd.f32 %v5046_v21, %v10325_v60  ;;  %v3978_v39 = vmul.f32 %v6701_v9, %v11571_v25  ;;  %v10518_v8 = vpop.f32.mrf.mxu1  ;;  %6714 = vrcp.f32 %v4709_v3  ;;  %v5772_v60 = vadd.f32 %v10408_v57, %v10398_v45  ;;  %v11572_v9 = vld [vmem:[#allocation51_spill] sm:$0xff] }
 0x7f6   : > { %v6703_v13 = vpop.eup %6702  ;;  %v4682_v40 = vpop.xlane.xlu0 %4681 }
 0x7f7   : > { %v5117_v46 = vadd.f32 %v10491_v55, %v5078_v0  ;;  %v10522_v56 = vadd.f32 %v3978_v39, %v10331_v18  ;;  %v5048_v33 = vmul.f32 %v6703_v13, %v5766_v44  ;;  %6716 = vrcp.f32 %v4682_v40  ;;  %v10524_v17 = vpop.f32.mrf.mxu1 }
 0x7f8   : > { %v6705_v19 = vpop.eup %6704  ;;  %v4715_v26 = vpop.xlane.xlu1 %4714 }
 0x7f9   : > { %5149 = vst.msk [vmem:[%s10504_s24 + $0x18] sm:$0xff] %vm373_vm0, %v5117_v46  ;;  %v5080_v1 = vadd.f32 %v5048_v33, %v10336_v58  ;;  %v10531_v21 = vpop.f32.mrf.mxu1  ;;  %6718 = vrcp.f32 %v4715_v26  ;;  %v3980_v18 = vmul.f32 %v6705_v19, %v11572_v9  ;;  %v5778_v58 = vadd.f32 %v10435_v42, %v10427_v48  ;;  %v11573_v33 = vld [vmem:[#allocation53_spill] sm:$0xff] }
 0x7fa   : > { %v6707_v3 = vpop.eup %6706  ;;  %v4688_v44 = vpop.xlane.xlu0 %4687 }
 0x7fb   : > { %v5119_v0 = vadd.f32 %v10491_v55, %v5080_v1  ;;  %v5050_v25 = vmul.f32 %v6707_v3, %v5772_v60  ;;  %6720 = vrcp.f32 %v4688_v44  ;;  %v10535_v39 = vpop.f32.mrf.mxu1  ;;  %v10538_v45 = vadd.f32 %v3980_v18, %v10342_v24 }
 0x7fc   : > { %v6709_v57 = vpop.eup %6708  ;;  %v4721_v13 = vpop.xlane.xlu1 %4720 }
 0x7fd   : > { %5151 = vst.msk [vmem:[%s10504_s24 + $0x28] sm:$0xff] %vm373_vm0, %v5119_v0  ;;  %v5082_v40 = vadd.f32 %v5050_v25, %v10345_v16  ;;  %v10545_v46 = vpop.f32.mrf.mxu1  ;;  %6722 = vrcp.f32 %v4721_v13  ;;  %v3982_v19 = vmul.f32 %v6709_v57, %v11573_v33  ;;  %v5784_v16 = vadd.f32 %v10459_v37, %v10451_v43 }
 0x7fe   : > { %v6711_v26 = vpop.eup %6710  ;;  %v4694_v60 = vpop.xlane.xlu0 %4693 }
 0x7ff   : > { %v5121_v24 = vadd.f32 %v10491_v55, %v5082_v40  ;;  %v5052_v1 = vmul.f32 %v6711_v26, %v5778_v58  ;;  %6724 = vrcp.f32 %v4694_v60  ;;  %v5801_v9 = vpop.f32.mrf.mxu1  ;;  %v10550_v18 = vadd.f32 %v3982_v19, %v10352_v36 }
 0x800   : > { %v6713_v48 = vpop.eup %6712  ;;  %v4727_v42 = vpop.xlane.xlu1 %4726  ;;  %v5757_v36 = vadd.f32 %v10309_v2, %v10298_v61  ;;  %v5763_v26 = vadd.f32 %v10348_v20, %v10339_v52 }
 0x801   : > { %5153 = vst.msk [vmem:[%s10504_s24 + $0x38] sm:$0xff] %vm373_vm0, %v5121_v24  ;;  %v5084_v3 = vadd.f32 %v5052_v1, %v10355_v10  ;;  %v5043_v44 = vmul.f32 %v6713_v48, %v10246_v28  ;;  %v10558_v0 = vpop.f32.mrf.mxu1  ;;  %6726 = vrcp.f32 %v4727_v42  ;;  %v5790_v28 = vadd.f32 %v10486_v11, %v10478_v54 }
 0x802   : > { %v6715_v25 = vpop.eup %6714  ;;  %v4700_v57 = vpop.xlane.xlu0 %4699  ;;  %v5796_v48 = vadd.f32 %v10524_v17, %v10518_v8 }
 0x803   : > { %v5123_v13 = vadd.f32 %v10491_v55, %v5084_v3  ;;  %v5075_v58 = vadd.f32 %v5043_v44, %v10361_v23  ;;  %v5054_v43 = vmul.f32 %v6715_v25, %v5784_v16  ;;  %6728 = vrcp.f32 %v4700_v57  ;;  %v10564_v37 = vpop.f32.mrf.mxu1 }
 0x804   : > { %v6717_v10 = vpop.eup %6716  ;;  %v4733_v40 = vpop.xlane.xlu1 %4732  ;;  %v5769_v44 = vadd.f32 %v10388_v59, %v10378_v51 }
 0x805   : > { %5155 = vst.msk [vmem:[%s10504_s24 + $0x48] sm:$0xff] %vm373_vm0, %v5123_v13  ;;  %v5114_v33 = vadd.f32 %v10491_v55, %v5075_v58  ;;  %v5086_v61 = vadd.f32 %v5054_v43, %v10365_v41  ;;  %v5045_v2 = vmul.f32 %v6717_v10, %v5757_v36  ;;  %v5806_v19 = vpop.f32.mrf.mxu1  ;;  %6730 = vrcp.f32 %v4733_v40 }
 0x806   : > { %v6719_v23 = vpop.eup %6718  ;;  %v4706_v60 = vpop.xlane.xlu0 %4705  ;;  %v5802_v13 = vadd.f32 %v5801_v9, %v10545_v46 }
 0x807   : > { %5146 = vst.msk [vmem:[%s10504_s24] sm:$0xff] %vm373_vm0, %v5114_v33  ;;  %v5125_v54 = vadd.f32 %v10491_v55, %v5086_v61  ;;  %v5077_v11 = vadd.f32 %v5045_v2, %v10371_v53  ;;  %v5056_v24 = vmul.f32 %v6719_v23, %v5790_v28  ;;  %6732 = vrcp.f32 %v4706_v60  ;;  %v5807_v1 = vpop.f32.mrf.mxu1 }
 0x808   : > { %v6721_v41 = vpop.eup %6720  ;;  %v4739_v42 = vpop.xlane.xlu1 %4738  ;;  %v5775_v28 = vadd.f32 %v10423_v15, %v10415_v49  ;;  %v5808_v15 = vadd.f32 %v5807_v1, %v5806_v19 }
 0x809   : > { %5157 = vst.msk [vmem:[%s10504_s24 + $0x58] sm:$0xff] %vm373_vm0, %v5125_v54  ;;  %v5116_v52 = vadd.f32 %v10491_v55, %v5077_v11  ;;  %v5088_v20 = vadd.f32 %v5056_v24, %v10375_v29  ;;  %v5047_v16 = vmul.f32 %v6721_v41, %v5763_v26  ;;  %v10584_v3 = vpop.f32.mrf.mxu1  ;;  %6734 = vrcp.f32 %v4739_v42  ;;  %v11574_v41 = vld [vmem:[#allocation112_spill] sm:$0xff] }
 0x80a   : > { %v6723_v53 = vpop.eup %6722  ;;  %v4712_v25 = vpop.xlane.xlu0 %4711 }
 0x80b   : > { %5148 = vst.msk [vmem:[%s10504_s24 + $0x10] sm:$0xff] %vm373_vm0, %v5116_v52  ;;  %v5127_v8 = vadd.f32 %v10491_v55, %v5088_v20  ;;  %v5079_v17 = vadd.f32 %v5047_v16, %v10381_v32  ;;  %v5058_v36 = vmul.f32 %v6723_v53, %v5796_v48  ;;  %6736 = vrcp.f32 %v4712_v25  ;;  %v10592_v29 = vpop.f32.mrf.mxu1 }
 0x80c   : > { %v6725_v57 = vpop.eup %6724  ;;  %v4745_v58 = vpop.xlane.xlu1 %4744  ;;  %v5787_v53 = vadd.f32 %v10473_v27, %v10465_v31 }
 0x80d   : > { %5159 = vst.msk [vmem:[%s10504_s24 + $0x68] sm:$0xff] %vm373_vm0, %v5127_v8  ;;  %v5118_v51 = vadd.f32 %v10491_v55, %v5079_v17  ;;  %v5090_v59 = vadd.f32 %v5058_v36, %v10385_v6  ;;  %v5049_v43 = vmul.f32 %v6725_v57, %v5769_v44  ;;  %v5812_v10 = vpop.f32.mrf.mxu1  ;;  %6738 = vrcp.f32 %v4745_v58  ;;  %v11575_v58 = vld [vmem:[#allocation52_spill] sm:$0xff] }
 0x80e   : > { %v6727_v32 = vpop.eup %6726  ;;  %v4718_v40 = vpop.xlane.xlu0 %4717 }
 0x80f   : > { %5150 = vst.msk [vmem:[%s10504_s24 + $0x20] sm:$0xff] %vm373_vm0, %v5118_v51  ;;  %v5129_v46 = vadd.f32 %v10491_v55, %v5090_v59  ;;  %v5081_v9 = vadd.f32 %v5049_v43, %v10391_v7  ;;  %v5060_v33 = vmul.f32 %v6727_v32, %v5802_v13  ;;  %6740 = vrcp.f32 %v4718_v40  ;;  %v5813_v61 = vpop.f32.mrf.mxu1  ;;  %v11576_v32 = vld [vmem:[#allocation115_spill] sm:$0xff] }
 0x810   : > { %v6729_v2 = vpop.eup %6728  ;;  %v4751_v60 = vpop.xlane.xlu1 %4750  ;;  %v5781_v7 = vadd.f32 %v10447_v47, %v10439_v14  ;;  %v5814_v52 = vadd.f32 %v5813_v61, %v5812_v10  ;;  %v5793_v43 = vadd.f32 %v10510_v35, %v10497_v63  ;;  %v11577_v63 = vld [vmem:[#allocation54_spill] sm:$0xff] }
 0x811   : > { %5161 = vst.msk [vmem:[%s10504_s24 + $0x78] sm:$0xff] %vm373_vm0, %v5129_v46  ;;  %v5120_v6 = vadd.f32 %v10491_v55, %v5081_v9  ;;  %v5092_v23 = vadd.f32 %v5060_v33, %v10395_v4  ;;  %v5051_v49 = vmul.f32 %v6729_v2, %v5775_v28  ;;  %v10609_v26 = vpop.f32.mrf.mxu1 }
 0x812   : > { %v6731_v54 = vpop.eup %6730  ;;  %v4724_v11 = vpop.xlane.xlu0 %4723 }
 0x813   : > { %5152 = vst.msk [vmem:[%s10504_s24 + $0x30] sm:$0xff] %vm373_vm0, %v5120_v6  ;;  %v5131_v24 = vadd.f32 %v10491_v55, %v5092_v23  ;;  %v5083_v48 = vadd.f32 %v5051_v49, %v11574_v41  ;;  %v5062_v42 = vmul.f32 %v6731_v54, %v5808_v15  ;;  %6742 = vrcp.f32 %v4724_v11  ;;  %v10617_v4 = vpop.f32.mrf.mxu1  ;;  %v11578_v15 = vld [vmem:[#allocation114_spill] sm:$0xff] }
 0x814   : > { %v6733_v19 = vpop.eup %6732  ;;  %6744 = vrcp.f32 %v4751_v60  ;;  %v4757_v31 = vpop.xlane.xlu1 %4756  ;;  %v5799_v49 = vadd.f32 %v10535_v39, %v10531_v21 }
 0x815   : > { %5163 = vst.msk [vmem:[%s10504_s24 + $0x88] sm:$0xff] %vm373_vm0, %v5131_v24  ;;  %v5122_v1 = vadd.f32 %v10491_v55, %v5083_v48  ;;  %v5053_v14 = vmul.f32 %v6733_v19, %v5781_v7  ;;  %v5094_v47 = vadd.f32 %v5062_v42, %v10406_v38  ;;  %v5818_v20 = vpop.f32.mrf.mxu1 }
 0x816   : > { %v6735_v16 = vpop.eup %6734  ;;  %v4730_v44 = vpop.xlane.xlu0 %4729 }
 0x817   : > { %5154 = vst.msk [vmem:[%s10504_s24 + $0x40] sm:$0xff] %vm373_vm0, %v5122_v1  ;;  %v5085_v25 = vadd.f32 %v5053_v14, %v10411_v5  ;;  %v5133_v8 = vadd.f32 %v10491_v55, %v5094_v47  ;;  %v5064_v17 = vmul.f32 %v6735_v16, %v5814_v52  ;;  %6746 = vrcp.f32 %v4730_v44  ;;  %v5819_v36 = vpop.f32.mrf.mxu1  ;;  %v11579_v47 = vld [vmem:[#allocation14_spill] sm:$0xff] }
 0x818   : > { %v6737_v57 = vpop.eup %6736  ;;  %v5820_v27 = vadd.f32 %v5819_v36, %v5818_v20  ;;  %v4763_v19 = vpop.xlane.xlu1 %4762  ;;  %v5805_v14 = vadd.f32 %v10564_v37, %v10558_v0  ;;  %v5811_v0 = vadd.f32 %v10592_v29, %v10584_v3  ;;  %v5817_v29 = vadd.f32 %v10617_v4, %v10609_v26 }
 0x819   : > { %v5124_v38 = vadd.f32 %v10491_v55, %v5085_v25  ;;  %5165 = vst.msk [vmem:[%s10504_s24 + $0x98] sm:$0xff] %vm373_vm0, %v5133_v8  ;;  %v5055_v13 = vmul.f32 %v6737_v57, %v5787_v53  ;;  %v5096_v51 = vadd.f32 %v5064_v17, %v11575_v58  ;;  %v10633_v59 = vpop.f32.mrf.mxu1  ;;  %v11580_v53 = vld [vmem:[#allocation56_spill] sm:$0xff] }
 0x81a   : > { %v6739_v5 = vpop.eup %6738  ;;  %v4736_v10 = vpop.xlane.xlu0 %4735 }
 0x81b   : > { %5156 = vst.msk [vmem:[%s10504_s24 + $0x50] sm:$0xff] %vm373_vm0, %v5124_v38  ;;  %v5087_v28 = vadd.f32 %v5055_v13, %v11576_v32  ;;  %v5135_v40 = vadd.f32 %v10491_v55, %v5096_v51  ;;  %v5066_v46 = vmul.f32 %v6739_v5, %v5820_v27  ;;  %6748 = vrcp.f32 %v4736_v10  ;;  %v10641_v9 = vpop.f32.mrf.mxu1 }
 0x81c   : > { %v6741_v33 = vpop.eup %6740  ;;  %6750 = vrcp.f32 %v4757_v31  ;;  %v4769_v5 = vpop.xlane.xlu1 %4768 }
 0x81d   : > { %v5126_v61 = vadd.f32 %v10491_v55, %v5087_v28  ;;  %v5057_v2 = vmul.f32 %v6741_v33, %v5793_v43  ;;  %5167 = vst.msk [vmem:[%s10504_s24 + $0xa8] sm:$0xff] %vm373_vm0, %v5135_v40  ;;  %v5098_v35 = vadd.f32 %v5066_v46, %v11577_v63  ;;  %v5824_v6 = vpop.f32.mrf.mxu1  ;;  %v11581_v40 = vld [vmem:[#allocation89_spill] sm:$0xff] }
 0x81e   : > { %v4742_v23 = vpop.xlane.xlu0 %4741 }
 0x81f   : > { %5158 = vst.msk [vmem:[%s10504_s24 + $0x60] sm:$0xff] %vm373_vm0, %v5126_v61  ;;  %v5089_v60 = vadd.f32 %v5057_v2, %v11578_v15  ;;  %v5137_v54 = vadd.f32 %v10491_v55, %v5098_v35  ;;  %6752 = vrcp.f32 %v4742_v23  ;;  %v5825_v7 = vpop.f32.mrf.mxu1 }
 0x820   : > { %v6743_v11 = vpop.eup %6742  ;;  %v5826_v24 = vadd.f32 %v5825_v7, %v5824_v6 }
 0x821   : > { %v6745_v41 = vpop.eup %6744  ;;  %v5128_v48 = vadd.f32 %v10491_v55, %v5089_v60  ;;  %v5059_v42 = vmul.f32 %v6743_v11, %v5799_v49  ;;  %5169 = vst.msk [vmem:[%s10504_s24 + $0xb8] sm:$0xff] %vm373_vm0, %v5137_v54  ;;  %v5827_v1 = vpop.f32.mrf.mxu1 }
 0x822   : > { %v5068_v21 = vmul.f32 %v6745_v41, %v5826_v24  ;;  %v4748_v39 = vpop.xlane.xlu0 %4747 }
 0x823   : > { %5160 = vst.msk [vmem:[%s10504_s24 + $0x70] sm:$0xff] %vm373_vm0, %v5128_v48  ;;  %v5091_v52 = vadd.f32 %v5059_v42, %v11579_v47  ;;  %6754 = vrcp.f32 %v4748_v39  ;;  %v5828_v20 = vpop.f32.mrf.mxu1 }
 0x824   : > { %v6747_v16 = vpop.eup %6746  ;;  %6756 = vrcp.f32 %v4763_v19  ;;  %v5100_v44 = vadd.f32 %v5068_v21, %v11580_v53 }
 0x825   : > { %v5130_v25 = vadd.f32 %v10491_v55, %v5091_v52  ;;  %v5061_v8 = vmul.f32 %v6747_v16, %v5805_v14  ;;  %v5830_v17 = vpop.f32.mrf.mxu1 }
 0x826   : > { %v5139_v36 = vadd.f32 %v10491_v55, %v5100_v44  ;;  %v4754_v57 = vpop.xlane.xlu0 %4753 }
 0x827   : > { %5162 = vst.msk [vmem:[%s10504_s24 + $0x80] sm:$0xff] %vm373_vm0, %v5130_v25  ;;  %v5093_v37 = vadd.f32 %v5061_v8, %v10457_v62  ;;  %6758 = vrcp.f32 %v4754_v57  ;;  %v5831_v38 = vpop.f32.mrf.mxu1 }
 0x828   : > { %v6749_v13 = vpop.eup %6748  ;;  %5171 = vst.msk [vmem:[%s10504_s24 + $0xc8] sm:$0xff] %vm373_vm0, %v5139_v36  ;;  %v5832_v58 = vadd.f32 %v5831_v38, %v5830_v17 }
 0x829   : > { %v6751_v51 = vpop.eup %6750  ;;  %v5132_v31 = vadd.f32 %v10491_v55, %v5093_v37  ;;  %v5063_v27 = vmul.f32 %v6749_v13, %v5811_v0  ;;  %v5833_v43 = vpop.f32.mrf.mxu1 }
 0x82a   : > { %v5070_v10 = vmul.f32 %v6751_v51, %v5832_v58  ;;  %v4760_v3 = vpop.xlane.xlu0 %4759 }
 0x82b   : > { %5164 = vst.msk [vmem:[%s10504_s24 + $0x90] sm:$0xff] %vm373_vm0, %v5132_v31  ;;  %v5095_v62 = vadd.f32 %v5063_v27, %v10471_v12  ;;  %6760 = vrcp.f32 %v4760_v3  ;;  %v5834_v32 = vpop.f32.mrf.mxu1  ;;  %v5823_v12 = vadd.f32 %v10641_v9, %v10633_v59  ;;  %v5829_v9 = vadd.f32 %v5828_v20, %v5827_v1 }
 0x82c   : > { %v6753_v28 = vpop.eup %6752  ;;  %6762 = vrcp.f32 %v4769_v5  ;;  %v5102_v46 = vadd.f32 %v5070_v10, %v11581_v40  ;;  %v5835_v39 = vadd.f32 %v5834_v32, %v5833_v43 }
 0x82d   : > { %v5134_v33 = vadd.f32 %v10491_v55, %v5095_v62  ;;  %v5065_v61 = vmul.f32 %v6753_v28, %v5817_v29  ;;  %v5836_v2 = vpop.f32.mrf.mxu1 }
 0x82e   : > { %v5141_v63 = vadd.f32 %v10491_v55, %v5102_v46  ;;  %v4766_v35 = vpop.xlane.xlu0 %4765 }
 0x82f   : > { %5166 = vst.msk [vmem:[%s10504_s24 + $0xa0] sm:$0xff] %vm373_vm0, %v5134_v33  ;;  %v5097_v26 = vadd.f32 %v5065_v61, %v10484_v22  ;;  %6764 = vrcp.f32 %v4766_v35  ;;  %v5837_v4 = vpop.f32.mrf.mxu1 }
 0x830   : > { %v6755_v6 = vpop.eup %6754  ;;  %5173 = vst.msk [vmem:[%s10504_s24 + $0xd8] sm:$0xff] %vm373_vm0, %v5141_v63  ;;  %v5838_v23 = vadd.f32 %v5837_v4, %v5836_v2 }
 0x831   : > { %v6757_v49 = vpop.eup %6756  ;;  %v5136_v15 = vadd.f32 %v10491_v55, %v5097_v26  ;;  %v5067_v60 = vmul.f32 %v6755_v6, %v5823_v12  ;;  %v5839_v54 = vpop.f32.mrf.mxu1 }
 0x832   : > { %v5072_v7 = vmul.f32 %v6757_v49, %v5838_v23 }
 0x833   : > { %5168 = vst.msk [vmem:[%s10504_s24 + $0xb0] sm:$0xff] %vm373_vm0, %v5136_v15  ;;  %v5099_v59 = vadd.f32 %v5067_v60, %v10508_v50  ;;  %v5840_v22 = vpop.f32.mrf.mxu1 }
 0x834   : > { %v6759_v11 = vpop.eup %6758  ;;  %v5104_v24 = vadd.f32 %v5072_v7, %v10468_v30  ;;  %v5841_v53 = vadd.f32 %v5840_v22, %v5839_v54 }
 0x835   : > { %v5138_v41 = vadd.f32 %v10491_v55, %v5099_v59  ;;  %v5069_v48 = vmul.f32 %v6759_v11, %v5829_v9  ;;  %v5842_v42 = vpop.f32.mrf.mxu1 }
 0x836   : > { %v5143_v19 = vadd.f32 %v10491_v55, %v5104_v24 }
 0x837   : > { %5170 = vst.msk [vmem:[%s10504_s24 + $0xc0] sm:$0xff] %vm373_vm0, %v5138_v41  ;;  %v5101_v21 = vadd.f32 %v5069_v48, %v10522_v56  ;;  %v5843_v14 = vpop.f32.mrf.mxu1 }
 0x838   : > { %v6761_v50 = vpop.eup %6760  ;;  %5175 = vst.msk [vmem:[%s10504_s24 + $0xe8] sm:$0xff] %vm373_vm0, %v5143_v19  ;;  %v5844_v1 = vadd.f32 %v5843_v14, %v5842_v42 }
 0x839   : > { %v6763_v30 = vpop.eup %6762  ;;  %v5140_v47 = vadd.f32 %v10491_v55, %v5101_v21  ;;  %v5071_v52 = vmul.f32 %v6761_v50, %v5835_v39 }
 0x83a   : > { %v5074_v20 = vmul.f32 %v6763_v30, %v5844_v1 }
 0x83b   : > { %5172 = vst.msk [vmem:[%s10504_s24 + $0xd0] sm:$0xff] %vm373_vm0, %v5140_v47  ;;  %v5103_v16 = vadd.f32 %v5071_v52, %v10538_v45 }
 0x83c   : > { %v6765_v56 = vpop.eup %6764  ;;  %v5106_v44 = vadd.f32 %v5074_v20, %v10481_v34 }
 0x83d   : > { %v5142_v25 = vadd.f32 %v10491_v55, %v5103_v16  ;;  %v5073_v8 = vmul.f32 %v6765_v56, %v5841_v53 }
 0x83e   : > { %v5145_v17 = vadd.f32 %v10491_v55, %v5106_v44 }
 0x83f   : > { %5174 = vst.msk [vmem:[%s10504_s24 + $0xe0] sm:$0xff] %vm373_vm0, %v5142_v25  ;;  %v5105_v36 = vadd.f32 %v5073_v8, %v10550_v18 }
 0x840   : > { %5177 = vst.msk [vmem:[%s10504_s24 + $0xf8] sm:$0xff] %vm373_vm0, %v5145_v17 }
 0x841   : > { %v5144_v57 = vadd.f32 %v10491_v55, %v5105_v36 }
 0x843   : > { %5176 = vst.msk [vmem:[%s10504_s24 + $0xf0] sm:$0xff] %vm373_vm0, %v5144_v57 }
 0x844 PF: > { %s16_s18 = sadd.s32 1, %s6802_s18  }
 0x845   : > { %p13_p1 = scmp.ge.s32.totalorder %s16_s18, 4  }
 0x847   :  { %15 = sbr.rel (!%p13_p1) target bundleno = 1 (0x1), region = 78 }
 0x84c   :  { %5199 = vsyncpa [#allocation3], 1 }
 0x84d   :  { %5201 = vsyncpa [#allocation3 + $0x1], 1 }

</bundles_post_ra>
